<compile_context>
chip_gen: v7x
topology: tpu7x:2x2x1
jax: 0.10.0
libtpu: 0.0.40
codegen_flags: <defaults>
</compile_context>

<pallas_src>
import functools

import jax
import jax.numpy as jnp
from jax import lax
from jax.experimental import pallas as pl
from jax.experimental.pallas import tpu as pltpu

_EPS = 1e-5


# ------------------------------ small helpers -------------------------------
def _apply_act(x, act):
    if act == 'relu':
        return jnp.maximum(x, 0.0)
    if act == 'leakyrelu':
        return jnp.where(x >= 0, x, 0.2 * x)
    if act == 'tanh':
        return jnp.tanh(x)
    raise ValueError(f'unknown act {act}')


# ---------------------------------------------------------------------------
# Layer 1: ConvTranspose2d(nz, C, 4, 1, 0) on a 1x1 input + InstanceNorm + act
# ---------------------------------------------------------------------------
def _stem_kernel(z_ref, w_ref, o_ref, *, act):
    # z_ref: (B, nz) bf16, w_ref: (16, nz, CO) bf16, o_ref: (B, 16, CO) bf16
    z = z_ref[...]
    ys = [jnp.dot(z, w_ref[s], preferred_element_type=jnp.float32)
          for s in range(16)]                         # 16 x (B, CO) f32
    s1 = ys[0]
    s2 = ys[0] * ys[0]
    for y in ys[1:]:
        s1 = s1 + y
        s2 = s2 + y * y
    mean = s1 / 16.0
    var = s2 / 16.0 - mean * mean                     # biased, as in PyTorch
    inv = lax.rsqrt(var + _EPS)
    for s in range(16):
        o_ref[:, s, :] = _apply_act((ys[s] - mean) * inv, act).astype(o_ref.dtype)


def stem_layer(z2, w1, act):
    """z: (B, nz) -> (B, 4, 4, CO) bf16 NHWC, conv+InstanceNorm+act fused."""
    B, nz = z2.shape
    CO = w1.shape[1]
    # (nz, CO, 4, 4) -> (16, nz, CO); spatial index s = 4*ky + kx
    wm = jnp.transpose(w1, (2, 3, 0, 1)).reshape(16, nz, CO).astype(jnp.bfloat16)
    y = pl.pallas_call(
        functools.partial(_stem_kernel, act=act),
        out_shape=jax.ShapeDtypeStruct((B, 16, CO), jnp.bfloat16),
    )(z2.astype(jnp.bfloat16), wm)
    return y.reshape(B, 4, 4, CO)


# ---------------------------------------------------------------------------
# ConvTranspose2d(CI, CO, 4, 2, 1) [+ InstanceNorm] + act, fused per sample
# ---------------------------------------------------------------------------
def _uplayer_kernel(x_ref, w_ref, o_ref, xpad_ref, *rest,
                    hi, wi, co, act, norm):
    # x_ref:    (1, H, W, CI) bf16              one NHWC sample
    # w_ref:    (4, 4, CI, CO) bf16             [phase=2a+b, tap=2tr+tc]
    # o_ref:    (1, H, 2, W, 2*CO)              phase-interleaved output
    # xpad_ref: VMEM (H+2, W+2, CI) bf16        zero-padded copy of the sample
    # rest = (tmp_ref,) when norm: VMEM (4, H, W, CO) f32 pre-norm stash
    tmp_ref = rest[0] if norm else None

    # Zero-pad the sample into VMEM (single HBM read, no XLA pad pass).
    xpad_ref[...] = jnp.zeros(xpad_ref.shape, xpad_ref.dtype)

    def fill(oy, c):
        xpad_ref[oy + 1, 1:wi + 1, :] = x_ref[0, oy]
        return c
    lax.fori_loop(0, hi, fill, 0)

    # Pass 1: 4-phase 2x2 convs, one output-row strip at a time.
    # out(2oy+a, 2ox+b, co) = sum_{tr,tc,ci} xpad[oy+a+tr, ox+b+tc, ci]
    #                                        * W[ci, co, 3-a-2tr, 3-b-2tc]
    def pass1(oy, carry):
        s1, s2 = carry
        for a in range(2):
            for b in range(2):
                p = 2 * a + b
                acc = None
                for tr in range(2):
                    for tc in range(2):
                        tap = xpad_ref[oy + a + tr, b + tc:b + tc + wi, :]
                        d = jnp.dot(tap, w_ref[p, 2 * tr + tc],
                                    preferred_element_type=jnp.float32)
                        acc = d if acc is None else acc + d          # (W, CO)
                if norm:
                    tmp_ref[p, oy] = acc
                    s1 = s1 + jnp.sum(acc, axis=0, keepdims=True)
                    s2 = s2 + jnp.sum(acc * acc, axis=0, keepdims=True)
                else:
                    o_ref[0, oy, a, :, b * co:(b + 1) * co] = (
                        _apply_act(acc, act).astype(o_ref.dtype))
        return s1, s2

    zero = jnp.zeros((1, co), jnp.float32)
    s1, s2 = lax.fori_loop(0, hi, pass1, (zero, zero))

    # Pass 2 (norm only): InstanceNorm + act, phase-interleaved store.
    if norm:
        cnt = 4.0 * hi * wi
        mean = s1 / cnt
        var = s2 / cnt - mean * mean
        inv = lax.rsqrt(var + _EPS)

        def pass2(oy, c):
            for a in range(2):
                for b in range(2):
                    y = (tmp_ref[2 * a + b, oy] - mean) * inv
                    o_ref[0, oy, a, :, b * co:(b + 1) * co] = (
                        _apply_act(y, act).astype(o_ref.dtype))
            return c
        lax.fori_loop(0, hi, pass2, 0)


def up_layer(x, w, *, act, norm, out_dtype):
    """ConvTranspose2d(CI, CO, 4, 2, 1, bias=False) [+ InstanceNorm2d] + act.
    x: (B, H, W, CI) NHWC -> (B, 2H, 2W, CO) NHWC."""
    B, H, W, CI = x.shape
    CO = w.shape[1]
    # Per-(phase, tap) weight slices: wph[2a+b, 2tr+tc] = W[:, :, 3-a-2tr, 3-b-2tc]
    wph = jnp.stack([
        jnp.stack([w[:, :, 3 - a - 2 * tr, 3 - b - 2 * tc]
                   for tr in range(2) for tc in range(2)], axis=0)
        for a in range(2) for b in range(2)], axis=0).astype(jnp.bfloat16)

    scratch = [pltpu.VMEM((H + 2, W + 2, CI), jnp.bfloat16)]
    if norm:
        scratch.append(pltpu.VMEM((4, H, W, CO), jnp.float32))

    out = pl.pallas_call(
        functools.partial(_uplayer_kernel, hi=H, wi=W, co=CO,
                          act=act, norm=norm),
        out_shape=jax.ShapeDtypeStruct((B, H, 2, W, 2 * CO), out_dtype),
        grid=(B,),
        in_specs=[pl.BlockSpec((1, H, W, CI), lambda n: (n, 0, 0, 0)),
                  pl.BlockSpec((4, 4, CI, CO), lambda n: (0, 0, 0, 0))],
        out_specs=pl.BlockSpec((1, H, 2, W, 2 * CO),
                               lambda n: (n, 0, 0, 0, 0)),
        scratch_shapes=scratch,
        compiler_params=pltpu.CompilerParams(
            # batch axis is independent -> megacore can shard it on v7x
            dimension_semantics=("parallel",),
            vmem_limit_bytes=32 * 1024 * 1024),
    )(x.astype(jnp.bfloat16), wph)
    # (B, H, 2, W, 2*CO) -> (B, 2H, 2W, CO): the interleave is a free reshape.
    return out.reshape(B, 2 * H, 2 * W, CO)


# ----------------------------------- model ----------------------------------
def dc_decoder_forward(z, weights, act='relu'):
    """z: (B, nz, 1, 1) -> (B, 1, 16*isize_factor, ...) NCHW output."""
    w1, w2, w3, w4, w5, w6 = weights
    B = z.shape[0]
    x = stem_layer(z.reshape(B, -1), w1, act)                     # (B,4,4,16ngf)
    for w in (w2, w3, w4, w5):
        x = up_layer(x, w, act=act, norm=True, out_dtype=jnp.bfloat16)
    y = up_layer(x, w6, act='tanh', norm=False, out_dtype=jnp.float32)
    Bo, HH, WW, _ = y.shape
    return y.reshape(Bo, 1, HH, WW)


# ------------------------- pure-JAX reference (check) -----------------------
def reference_forward(z, weights, act='relu'):
    def convtrans(x, w, stride, pad):
        K = w.shape[-1]
        wc = jnp.transpose(w[:, :, ::-1, ::-1], (1, 0, 2, 3))  # (CO, CI, K, K)
        return jax.lax.conv_general_dilated(
            x, wc, window_strides=(1, 1),
            padding=[(K - 1 - pad, K - 1 - pad)] * 2,
            lhs_dilation=(stride, stride),
            dimension_numbers=('NCHW', 'OIHW', 'NCHW'),
            precision=jax.lax.Precision.HIGHEST)

    def inorm(x):
        m = jnp.mean(x, axis=(2, 3), keepdims=True)
        v = jnp.mean((x - m) ** 2, axis=(2, 3), keepdims=True)
        return (x - m) * jax.lax.rsqrt(v + _EPS)

    w1, w2, w3, w4, w5, w6 = weights
    x = _apply_act(inorm(convtrans(z, w1, 1, 0)), act)
    for w in (w2, w3, w4, w5):
        x = _apply_act(inorm(convtrans(x, w, 2, 1)), act)
    return _apply_act(convtrans(x, w6, 2, 1), 'tanh')


# ----------------------------------- main ------------------------------------
if __name__ == "__main__":
    # Small config: nz=8, ngf=2, batch=2 -> output (2, 1, 128, 128).
    B, nz, ngf = 2, 8, 2
    act = 'relu'
    key = jax.random.PRNGKey(0)
    ks = jax.random.split(key, 7)
    wshapes = [
        (nz,       ngf * 16, 4, 4),
        (ngf * 16, ngf * 8,  4, 4),
        (ngf * 8,  ngf * 4,  4, 4),
        (ngf * 4,  ngf * 2,  4, 4),
        (ngf * 2,  ngf,      4, 4),
        (ngf,      1,        4, 4),
    ]
    weights = [0.1 * jax.random.normal(k, s, jnp.float32)
               for k, s in zip(ks[:6], wshapes)]
    z = jax.random.normal(ks[6], (B, nz, 1, 1), jnp.float32)

    fwd = jax.jit(functools.partial(dc_decoder_forward, act=act))
    out = jax.block_until_ready(fwd(z, weights))

    assert out.shape == (B, 1, 128, 128), out.shape
    assert bool(jnp.all(jnp.isfinite(out)))

    ref = jax.block_until_ready(reference_forward(z, weights, act=act))
    err = jnp.abs(out - ref)
    max_err = float(jnp.max(err))
    mean_err = float(jnp.mean(err))
    # bf16 weights / bf16 inter-layer activations vs an f32 HIGHEST reference:
    # bf16-level tolerance still catches structural (tap / border / norm) bugs,
    # which show up as O(1) errors on the tanh output.
    assert max_err < 1e-1 and mean_err < 2e-2, (max_err, mean_err)

    print("KERNEL_OK")
</pallas_src>

<mosaic_0001>
module attributes {stable_mosaic.version = 11 : i64} {
  func.func @_stem_kernel(%arg0: memref<2x8xbf16, #tpu.memory_space<vmem>>, %arg1: memref<16x8x32xbf16, #tpu.memory_space<vmem>>, %arg2: memref<2x16x32xbf16, #tpu.memory_space<vmem>>) attributes {dimension_semantics = [], scalar_prefetch = 0 : i64, scratch_operands = 0 : i64, tpu.core_type = #tpu.core_type<tc>} {
    %c0 = arith.constant 0 : index
    %c0_0 = arith.constant 0 : index
    %0 = vector.load %arg0[%c0, %c0_0] : memref<2x8xbf16, #tpu.memory_space<vmem>>, vector<2x8xbf16>
    %c0_1 = arith.constant 0 : index
    %c0_2 = arith.constant 0 : index
    %c0_3 = arith.constant 0 : index
    %1 = vector.load %arg1[%c0_1, %c0_2, %c0_3] : memref<16x8x32xbf16, #tpu.memory_space<vmem>>, vector<1x8x32xbf16>
    %2 = vector.shape_cast %1 : vector<1x8x32xbf16> to vector<8x32xbf16>
    %cst = arith.constant dense<0.000000e+00> : vector<2x32xf32>
    %3 = tpu.matmul %0, %2, %cst {dimension_numbers = #tpu.dot_dimension_numbers<[1], [0], [0], [1], [0, 0, 1, 1], [], []>} : vector<2x8xbf16>, vector<8x32xbf16>, vector<2x32xf32> -> vector<2x32xf32>
    %c1 = arith.constant 1 : index
    %c0_4 = arith.constant 0 : index
    %c0_5 = arith.constant 0 : index
    %4 = vector.load %arg1[%c1, %c0_4, %c0_5] : memref<16x8x32xbf16, #tpu.memory_space<vmem>>, vector<1x8x32xbf16>
    %5 = vector.shape_cast %4 : vector<1x8x32xbf16> to vector<8x32xbf16>
    %cst_6 = arith.constant dense<0.000000e+00> : vector<2x32xf32>
    %6 = tpu.matmul %0, %5, %cst_6 {dimension_numbers = #tpu.dot_dimension_numbers<[1], [0], [0], [1], [0, 0, 1, 1], [], []>} : vector<2x8xbf16>, vector<8x32xbf16>, vector<2x32xf32> -> vector<2x32xf32>
    %c2 = arith.constant 2 : index
    %c0_7 = arith.constant 0 : index
    %c0_8 = arith.constant 0 : index
    %7 = vector.load %arg1[%c2, %c0_7, %c0_8] : memref<16x8x32xbf16, #tpu.memory_space<vmem>>, vector<1x8x32xbf16>
    %8 = vector.shape_cast %7 : vector<1x8x32xbf16> to vector<8x32xbf16>
    %cst_9 = arith.constant dense<0.000000e+00> : vector<2x32xf32>
    %9 = tpu.matmul %0, %8, %cst_9 {dimension_numbers = #tpu.dot_dimension_numbers<[1], [0], [0], [1], [0, 0, 1, 1], [], []>} : vector<2x8xbf16>, vector<8x32xbf16>, vector<2x32xf32> -> vector<2x32xf32>
    %c3 = arith.constant 3 : index
    %c0_10 = arith.constant 0 : index
    %c0_11 = arith.constant 0 : index
    %10 = vector.load %arg1[%c3, %c0_10, %c0_11] : memref<16x8x32xbf16, #tpu.memory_space<vmem>>, vector<1x8x32xbf16>
    %11 = vector.shape_cast %10 : vector<1x8x32xbf16> to vector<8x32xbf16>
    %cst_12 = arith.constant dense<0.000000e+00> : vector<2x32xf32>
    %12 = tpu.matmul %0, %11, %cst_12 {dimension_numbers = #tpu.dot_dimension_numbers<[1], [0], [0], [1], [0, 0, 1, 1], [], []>} : vector<2x8xbf16>, vector<8x32xbf16>, vector<2x32xf32> -> vector<2x32xf32>
    %c4 = arith.constant 4 : index
    %c0_13 = arith.constant 0 : index
    %c0_14 = arith.constant 0 : index
    %13 = vector.load %arg1[%c4, %c0_13, %c0_14] : memref<16x8x32xbf16, #tpu.memory_space<vmem>>, vector<1x8x32xbf16>
    %14 = vector.shape_cast %13 : vector<1x8x32xbf16> to vector<8x32xbf16>
    %cst_15 = arith.constant dense<0.000000e+00> : vector<2x32xf32>
    %15 = tpu.matmul %0, %14, %cst_15 {dimension_numbers = #tpu.dot_dimension_numbers<[1], [0], [0], [1], [0, 0, 1, 1], [], []>} : vector<2x8xbf16>, vector<8x32xbf16>, vector<2x32xf32> -> vector<2x32xf32>
    %c5 = arith.constant 5 : index
    %c0_16 = arith.constant 0 : index
    %c0_17 = arith.constant 0 : index
    %16 = vector.load %arg1[%c5, %c0_16, %c0_17] : memref<16x8x32xbf16, #tpu.memory_space<vmem>>, vector<1x8x32xbf16>
    %17 = vector.shape_cast %16 : vector<1x8x32xbf16> to vector<8x32xbf16>
    %cst_18 = arith.constant dense<0.000000e+00> : vector<2x32xf32>
    %18 = tpu.matmul %0, %17, %cst_18 {dimension_numbers = #tpu.dot_dimension_numbers<[1], [0], [0], [1], [0, 0, 1, 1], [], []>} : vector<2x8xbf16>, vector<8x32xbf16>, vector<2x32xf32> -> vector<2x32xf32>
    %c6 = arith.constant 6 : index
    %c0_19 = arith.constant 0 : index
    %c0_20 = arith.constant 0 : index
    %19 = vector.load %arg1[%c6, %c0_19, %c0_20] : memref<16x8x32xbf16, #tpu.memory_space<vmem>>, vector<1x8x32xbf16>
    %20 = vector.shape_cast %19 : vector<1x8x32xbf16> to vector<8x32xbf16>
    %cst_21 = arith.constant dense<0.000000e+00> : vector<2x32xf32>
    %21 = tpu.matmul %0, %20, %cst_21 {dimension_numbers = #tpu.dot_dimension_numbers<[1], [0], [0], [1], [0, 0, 1, 1], [], []>} : vector<2x8xbf16>, vector<8x32xbf16>, vector<2x32xf32> -> vector<2x32xf32>
    %c7 = arith.constant 7 : index
    %c0_22 = arith.constant 0 : index
    %c0_23 = arith.constant 0 : index
    %22 = vector.load %arg1[%c7, %c0_22, %c0_23] : memref<16x8x32xbf16, #tpu.memory_space<vmem>>, vector<1x8x32xbf16>
    %23 = vector.shape_cast %22 : vector<1x8x32xbf16> to vector<8x32xbf16>
    %cst_24 = arith.constant dense<0.000000e+00> : vector<2x32xf32>
    %24 = tpu.matmul %0, %23, %cst_24 {dimension_numbers = #tpu.dot_dimension_numbers<[1], [0], [0], [1], [0, 0, 1, 1], [], []>} : vector<2x8xbf16>, vector<8x32xbf16>, vector<2x32xf32> -> vector<2x32xf32>
    %c8 = arith.constant 8 : index
    %c0_25 = arith.constant 0 : index
    %c0_26 = arith.constant 0 : index
    %25 = vector.load %arg1[%c8, %c0_25, %c0_26] : memref<16x8x32xbf16, #tpu.memory_space<vmem>>, vector<1x8x32xbf16>
    %26 = vector.shape_cast %25 : vector<1x8x32xbf16> to vector<8x32xbf16>
    %cst_27 = arith.constant dense<0.000000e+00> : vector<2x32xf32>
    %27 = tpu.matmul %0, %26, %cst_27 {dimension_numbers = #tpu.dot_dimension_numbers<[1], [0], [0], [1], [0, 0, 1, 1], [], []>} : vector<2x8xbf16>, vector<8x32xbf16>, vector<2x32xf32> -> vector<2x32xf32>
    %c9 = arith.constant 9 : index
    %c0_28 = arith.constant 0 : index
    %c0_29 = arith.constant 0 : index
    %28 = vector.load %arg1[%c9, %c0_28, %c0_29] : memref<16x8x32xbf16, #tpu.memory_space<vmem>>, vector<1x8x32xbf16>
    %29 = vector.shape_cast %28 : vector<1x8x32xbf16> to vector<8x32xbf16>
    %cst_30 = arith.constant dense<0.000000e+00> : vector<2x32xf32>
    %30 = tpu.matmul %0, %29, %cst_30 {dimension_numbers = #tpu.dot_dimension_numbers<[1], [0], [0], [1], [0, 0, 1, 1], [], []>} : vector<2x8xbf16>, vector<8x32xbf16>, vector<2x32xf32> -> vector<2x32xf32>
    %c10 = arith.constant 10 : index
    %c0_31 = arith.constant 0 : index
    %c0_32 = arith.constant 0 : index
    %31 = vector.load %arg1[%c10, %c0_31, %c0_32] : memref<16x8x32xbf16, #tpu.memory_space<vmem>>, vector<1x8x32xbf16>
    %32 = vector.shape_cast %31 : vector<1x8x32xbf16> to vector<8x32xbf16>
    %cst_33 = arith.constant dense<0.000000e+00> : vector<2x32xf32>
    %33 = tpu.matmul %0, %32, %cst_33 {dimension_numbers = #tpu.dot_dimension_numbers<[1], [0], [0], [1], [0, 0, 1, 1], [], []>} : vector<2x8xbf16>, vector<8x32xbf16>, vector<2x32xf32> -> vector<2x32xf32>
    %c11 = arith.constant 11 : index
    %c0_34 = arith.constant 0 : index
    %c0_35 = arith.constant 0 : index
    %34 = vector.load %arg1[%c11, %c0_34, %c0_35] : memref<16x8x32xbf16, #tpu.memory_space<vmem>>, vector<1x8x32xbf16>
    %35 = vector.shape_cast %34 : vector<1x8x32xbf16> to vector<8x32xbf16>
    %cst_36 = arith.constant dense<0.000000e+00> : vector<2x32xf32>
    %36 = tpu.matmul %0, %35, %cst_36 {dimension_numbers = #tpu.dot_dimension_numbers<[1], [0], [0], [1], [0, 0, 1, 1], [], []>} : vector<2x8xbf16>, vector<8x32xbf16>, vector<2x32xf32> -> vector<2x32xf32>
    %c12 = arith.constant 12 : index
    %c0_37 = arith.constant 0 : index
    %c0_38 = arith.constant 0 : index
    %37 = vector.load %arg1[%c12, %c0_37, %c0_38] : memref<16x8x32xbf16, #tpu.memory_space<vmem>>, vector<1x8x32xbf16>
    %38 = vector.shape_cast %37 : vector<1x8x32xbf16> to vector<8x32xbf16>
    %cst_39 = arith.constant dense<0.000000e+00> : vector<2x32xf32>
    %39 = tpu.matmul %0, %38, %cst_39 {dimension_numbers = #tpu.dot_dimension_numbers<[1], [0], [0], [1], [0, 0, 1, 1], [], []>} : vector<2x8xbf16>, vector<8x32xbf16>, vector<2x32xf32> -> vector<2x32xf32>
    %c13 = arith.constant 13 : index
    %c0_40 = arith.constant 0 : index
    %c0_41 = arith.constant 0 : index
    %40 = vector.load %arg1[%c13, %c0_40, %c0_41] : memref<16x8x32xbf16, #tpu.memory_space<vmem>>, vector<1x8x32xbf16>
    %41 = vector.shape_cast %40 : vector<1x8x32xbf16> to vector<8x32xbf16>
    %cst_42 = arith.constant dense<0.000000e+00> : vector<2x32xf32>
    %42 = tpu.matmul %0, %41, %cst_42 {dimension_numbers = #tpu.dot_dimension_numbers<[1], [0], [0], [1], [0, 0, 1, 1], [], []>} : vector<2x8xbf16>, vector<8x32xbf16>, vector<2x32xf32> -> vector<2x32xf32>
    %c14 = arith.constant 14 : index
    %c0_43 = arith.constant 0 : index
    %c0_44 = arith.constant 0 : index
    %43 = vector.load %arg1[%c14, %c0_43, %c0_44] : memref<16x8x32xbf16, #tpu.memory_space<vmem>>, vector<1x8x32xbf16>
    %44 = vector.shape_cast %43 : vector<1x8x32xbf16> to vector<8x32xbf16>
    %cst_45 = arith.constant dense<0.000000e+00> : vector<2x32xf32>
    %45 = tpu.matmul %0, %44, %cst_45 {dimension_numbers = #tpu.dot_dimension_numbers<[1], [0], [0], [1], [0, 0, 1, 1], [], []>} : vector<2x8xbf16>, vector<8x32xbf16>, vector<2x32xf32> -> vector<2x32xf32>
    %c15 = arith.constant 15 : index
    %c0_46 = arith.constant 0 : index
    %c0_47 = arith.constant 0 : index
    %46 = vector.load %arg1[%c15, %c0_46, %c0_47] : memref<16x8x32xbf16, #tpu.memory_space<vmem>>, vector<1x8x32xbf16>
    %47 = vector.shape_cast %46 : vector<1x8x32xbf16> to vector<8x32xbf16>
    %cst_48 = arith.constant dense<0.000000e+00> : vector<2x32xf32>
    %48 = tpu.matmul %0, %47, %cst_48 {dimension_numbers = #tpu.dot_dimension_numbers<[1], [0], [0], [1], [0, 0, 1, 1], [], []>} : vector<2x8xbf16>, vector<8x32xbf16>, vector<2x32xf32> -> vector<2x32xf32>
    %49 = arith.mulf %3, %3 : vector<2x32xf32>
    %50 = arith.addf %3, %6 : vector<2x32xf32>
    %51 = arith.mulf %6, %6 : vector<2x32xf32>
    %52 = arith.addf %49, %51 : vector<2x32xf32>
    %53 = arith.addf %50, %9 : vector<2x32xf32>
    %54 = arith.mulf %9, %9 : vector<2x32xf32>
    %55 = arith.addf %52, %54 : vector<2x32xf32>
    %56 = arith.addf %53, %12 : vector<2x32xf32>
    %57 = arith.mulf %12, %12 : vector<2x32xf32>
    %58 = arith.addf %55, %57 : vector<2x32xf32>
    %59 = arith.addf %56, %15 : vector<2x32xf32>
    %60 = arith.mulf %15, %15 : vector<2x32xf32>
    %61 = arith.addf %58, %60 : vector<2x32xf32>
    %62 = arith.addf %59, %18 : vector<2x32xf32>
    %63 = arith.mulf %18, %18 : vector<2x32xf32>
    %64 = arith.addf %61, %63 : vector<2x32xf32>
    %65 = arith.addf %62, %21 : vector<2x32xf32>
    %66 = arith.mulf %21, %21 : vector<2x32xf32>
    %67 = arith.addf %64, %66 : vector<2x32xf32>
    %68 = arith.addf %65, %24 : vector<2x32xf32>
    %69 = arith.mulf %24, %24 : vector<2x32xf32>
    %70 = arith.addf %67, %69 : vector<2x32xf32>
    %71 = arith.addf %68, %27 : vector<2x32xf32>
    %72 = arith.mulf %27, %27 : vector<2x32xf32>
    %73 = arith.addf %70, %72 : vector<2x32xf32>
    %74 = arith.addf %71, %30 : vector<2x32xf32>
    %75 = arith.mulf %30, %30 : vector<2x32xf32>
    %76 = arith.addf %73, %75 : vector<2x32xf32>
    %77 = arith.addf %74, %33 : vector<2x32xf32>
    %78 = arith.mulf %33, %33 : vector<2x32xf32>
    %79 = arith.addf %76, %78 : vector<2x32xf32>
    %80 = arith.addf %77, %36 : vector<2x32xf32>
    %81 = arith.mulf %36, %36 : vector<2x32xf32>
    %82 = arith.addf %79, %81 : vector<2x32xf32>
    %83 = arith.addf %80, %39 : vector<2x32xf32>
    %84 = arith.mulf %39, %39 : vector<2x32xf32>
    %85 = arith.addf %82, %84 : vector<2x32xf32>
    %86 = arith.addf %83, %42 : vector<2x32xf32>
    %87 = arith.mulf %42, %42 : vector<2x32xf32>
    %88 = arith.addf %85, %87 : vector<2x32xf32>
    %89 = arith.addf %86, %45 : vector<2x32xf32>
    %90 = arith.mulf %45, %45 : vector<2x32xf32>
    %91 = arith.addf %88, %90 : vector<2x32xf32>
    %92 = arith.addf %89, %48 : vector<2x32xf32>
    %93 = arith.mulf %48, %48 : vector<2x32xf32>
    %94 = arith.addf %91, %93 : vector<2x32xf32>
    %cst_49 = arith.constant 1.600000e+01 : f32
    %95 = vector.broadcast %cst_49 : f32 to vector<2x32xf32>
    %96 = arith.divf %92, %95 : vector<2x32xf32>
    %cst_50 = arith.constant 1.600000e+01 : f32
    %97 = vector.broadcast %cst_50 : f32 to vector<2x32xf32>
    %98 = arith.divf %94, %97 : vector<2x32xf32>
    %99 = arith.mulf %96, %96 : vector<2x32xf32>
    %100 = arith.subf %98, %99 : vector<2x32xf32>
    %cst_51 = arith.constant 9.99999974E-6 : f32
    %101 = vector.broadcast %cst_51 : f32 to vector<2x32xf32>
    %102 = arith.addf %100, %101 : vector<2x32xf32>
    %103 = math.rsqrt %102 : vector<2x32xf32>
    %104 = arith.subf %3, %96 : vector<2x32xf32>
    %105 = arith.mulf %104, %103 : vector<2x32xf32>
    %cst_52 = arith.constant 0.000000e+00 : f32
    %106 = vector.broadcast %cst_52 : f32 to vector<2x32xf32>
    %107 = arith.maximumf %105, %106 : vector<2x32xf32>
    %108 = arith.truncf %107 : vector<2x32xf32> to vector<2x32xbf16>
    %c0_53 = arith.constant 0 : index
    %c0_54 = arith.constant 0 : index
    %c0_55 = arith.constant 0 : index
    %109 = vector.load %arg2[%c0_53, %c0_54, %c0_55] : memref<2x16x32xbf16, #tpu.memory_space<vmem>>, vector<2x1x32xbf16>
    %110 = vector.shape_cast %109 : vector<2x1x32xbf16> to vector<2x32xbf16>
    %111 = vector.shape_cast %108 : vector<2x32xbf16> to vector<2x1x32xbf16>
    tpu.vector_store %arg2[%c0_53, %c0_54, %c0_55], %111 {strides = array<i32>} : memref<2x16x32xbf16, #tpu.memory_space<vmem>>, vector<2x1x32xbf16>,
    %112 = arith.subf %6, %96 : vector<2x32xf32>
    %113 = arith.mulf %112, %103 : vector<2x32xf32>
    %cst_56 = arith.constant 0.000000e+00 : f32
    %114 = vector.broadcast %cst_56 : f32 to vector<2x32xf32>
    %115 = arith.maximumf %113, %114 : vector<2x32xf32>
    %116 = arith.truncf %115 : vector<2x32xf32> to vector<2x32xbf16>
    %c0_57 = arith.constant 0 : index
    %c1_58 = arith.constant 1 : index
    %c0_59 = arith.constant 0 : index
    %117 = vector.load %arg2[%c0_57, %c1_58, %c0_59] : memref<2x16x32xbf16, #tpu.memory_space<vmem>>, vector<2x1x32xbf16>
    %118 = vector.shape_cast %117 : vector<2x1x32xbf16> to vector<2x32xbf16>
    %119 = vector.shape_cast %116 : vector<2x32xbf16> to vector<2x1x32xbf16>
    tpu.vector_store %arg2[%c0_57, %c1_58, %c0_59], %119 {strides = array<i32>} : memref<2x16x32xbf16, #tpu.memory_space<vmem>>, vector<2x1x32xbf16>,
    %120 = arith.subf %9, %96 : vector<2x32xf32>
    %121 = arith.mulf %120, %103 : vector<2x32xf32>
    %cst_60 = arith.constant 0.000000e+00 : f32
    %122 = vector.broadcast %cst_60 : f32 to vector<2x32xf32>
    %123 = arith.maximumf %121, %122 : vector<2x32xf32>
    %124 = arith.truncf %123 : vector<2x32xf32> to vector<2x32xbf16>
    %c0_61 = arith.constant 0 : index
    %c2_62 = arith.constant 2 : index
    %c0_63 = arith.constant 0 : index
    %125 = vector.load %arg2[%c0_61, %c2_62, %c0_63] : memref<2x16x32xbf16, #tpu.memory_space<vmem>>, vector<2x1x32xbf16>
    %126 = vector.shape_cast %125 : vector<2x1x32xbf16> to vector<2x32xbf16>
    %127 = vector.shape_cast %124 : vector<2x32xbf16> to vector<2x1x32xbf16>
    tpu.vector_store %arg2[%c0_61, %c2_62, %c0_63], %127 {strides = array<i32>} : memref<2x16x32xbf16, #tpu.memory_space<vmem>>, vector<2x1x32xbf16>,
    %128 = arith.subf %12, %96 : vector<2x32xf32>
    %129 = arith.mulf %128, %103 : vector<2x32xf32>
    %cst_64 = arith.constant 0.000000e+00 : f32
    %130 = vector.broadcast %cst_64 : f32 to vector<2x32xf32>
    %131 = arith.maximumf %129, %130 : vector<2x32xf32>
    %132 = arith.truncf %131 : vector<2x32xf32> to vector<2x32xbf16>
    %c0_65 = arith.constant 0 : index
    %c3_66 = arith.constant 3 : index
    %c0_67 = arith.constant 0 : index
    %133 = vector.load %arg2[%c0_65, %c3_66, %c0_67] : memref<2x16x32xbf16, #tpu.memory_space<vmem>>, vector<2x1x32xbf16>
    %134 = vector.shape_cast %133 : vector<2x1x32xbf16> to vector<2x32xbf16>
    %135 = vector.shape_cast %132 : vector<2x32xbf16> to vector<2x1x32xbf16>
    tpu.vector_store %arg2[%c0_65, %c3_66, %c0_67], %135 {strides = array<i32>} : memref<2x16x32xbf16, #tpu.memory_space<vmem>>, vector<2x1x32xbf16>,
    %136 = arith.subf %15, %96 : vector<2x32xf32>
    %137 = arith.mulf %136, %103 : vector<2x32xf32>
    %cst_68 = arith.constant 0.000000e+00 : f32
    %138 = vector.broadcast %cst_68 : f32 to vector<2x32xf32>
    %139 = arith.maximumf %137, %138 : vector<2x32xf32>
    %140 = arith.truncf %139 : vector<2x32xf32> to vector<2x32xbf16>
    %c0_69 = arith.constant 0 : index
    %c4_70 = arith.constant 4 : index
    %c0_71 = arith.constant 0 : index
    %141 = vector.load %arg2[%c0_69, %c4_70, %c0_71] : memref<2x16x32xbf16, #tpu.memory_space<vmem>>, vector<2x1x32xbf16>
    %142 = vector.shape_cast %141 : vector<2x1x32xbf16> to vector<2x32xbf16>
    %143 = vector.shape_cast %140 : vector<2x32xbf16> to vector<2x1x32xbf16>
    tpu.vector_store %arg2[%c0_69, %c4_70, %c0_71], %143 {strides = array<i32>} : memref<2x16x32xbf16, #tpu.memory_space<vmem>>, vector<2x1x32xbf16>,
    %144 = arith.subf %18, %96 : vector<2x32xf32>
    %145 = arith.mulf %144, %103 : vector<2x32xf32>
    %cst_72 = arith.constant 0.000000e+00 : f32
    %146 = vector.broadcast %cst_72 : f32 to vector<2x32xf32>
    %147 = arith.maximumf %145, %146 : vector<2x32xf32>
    %148 = arith.truncf %147 : vector<2x32xf32> to vector<2x32xbf16>
    %c0_73 = arith.constant 0 : index
    %c5_74 = arith.constant 5 : index
    %c0_75 = arith.constant 0 : index
    %149 = vector.load %arg2[%c0_73, %c5_74, %c0_75] : memref<2x16x32xbf16, #tpu.memory_space<vmem>>, vector<2x1x32xbf16>
    %150 = vector.shape_cast %149 : vector<2x1x32xbf16> to vector<2x32xbf16>
    %151 = vector.shape_cast %148 : vector<2x32xbf16> to vector<2x1x32xbf16>
    tpu.vector_store %arg2[%c0_73, %c5_74, %c0_75], %151 {strides = array<i32>} : memref<2x16x32xbf16, #tpu.memory_space<vmem>>, vector<2x1x32xbf16>,
    %152 = arith.subf %21, %96 : vector<2x32xf32>
    %153 = arith.mulf %152, %103 : vector<2x32xf32>
    %cst_76 = arith.constant 0.000000e+00 : f32
    %154 = vector.broadcast %cst_76 : f32 to vector<2x32xf32>
    %155 = arith.maximumf %153, %154 : vector<2x32xf32>
    %156 = arith.truncf %155 : vector<2x32xf32> to vector<2x32xbf16>
    %c0_77 = arith.constant 0 : index
    %c6_78 = arith.constant 6 : index
    %c0_79 = arith.constant 0 : index
    %157 = vector.load %arg2[%c0_77, %c6_78, %c0_79] : memref<2x16x32xbf16, #tpu.memory_space<vmem>>, vector<2x1x32xbf16>
    %158 = vector.shape_cast %157 : vector<2x1x32xbf16> to vector<2x32xbf16>
    %159 = vector.shape_cast %156 : vector<2x32xbf16> to vector<2x1x32xbf16>
    tpu.vector_store %arg2[%c0_77, %c6_78, %c0_79], %159 {strides = array<i32>} : memref<2x16x32xbf16, #tpu.memory_space<vmem>>, vector<2x1x32xbf16>,
    %160 = arith.subf %24, %96 : vector<2x32xf32>
    %161 = arith.mulf %160, %103 : vector<2x32xf32>
    %cst_80 = arith.constant 0.000000e+00 : f32
    %162 = vector.broadcast %cst_80 : f32 to vector<2x32xf32>
    %163 = arith.maximumf %161, %162 : vector<2x32xf32>
    %164 = arith.truncf %163 : vector<2x32xf32> to vector<2x32xbf16>
    %c0_81 = arith.constant 0 : index
    %c7_82 = arith.constant 7 : index
    %c0_83 = arith.constant 0 : index
    %165 = vector.load %arg2[%c0_81, %c7_82, %c0_83] : memref<2x16x32xbf16, #tpu.memory_space<vmem>>, vector<2x1x32xbf16>
    %166 = vector.shape_cast %165 : vector<2x1x32xbf16> to vector<2x32xbf16>
    %167 = vector.shape_cast %164 : vector<2x32xbf16> to vector<2x1x32xbf16>
    tpu.vector_store %arg2[%c0_81, %c7_82, %c0_83], %167 {strides = array<i32>} : memref<2x16x32xbf16, #tpu.memory_space<vmem>>, vector<2x1x32xbf16>,
    %168 = arith.subf %27, %96 : vector<2x32xf32>
    %169 = arith.mulf %168, %103 : vector<2x32xf32>
    %cst_84 = arith.constant 0.000000e+00 : f32
    %170 = vector.broadcast %cst_84 : f32 to vector<2x32xf32>
    %171 = arith.maximumf %169, %170 : vector<2x32xf32>
    %172 = arith.truncf %171 : vector<2x32xf32> to vector<2x32xbf16>
    %c0_85 = arith.constant 0 : index
    %c8_86 = arith.constant 8 : index
    %c0_87 = arith.constant 0 : index
    %173 = vector.load %arg2[%c0_85, %c8_86, %c0_87] : memref<2x16x32xbf16, #tpu.memory_space<vmem>>, vector<2x1x32xbf16>
    %174 = vector.shape_cast %173 : vector<2x1x32xbf16> to vector<2x32xbf16>
    %175 = vector.shape_cast %172 : vector<2x32xbf16> to vector<2x1x32xbf16>
    tpu.vector_store %arg2[%c0_85, %c8_86, %c0_87], %175 {strides = array<i32>} : memref<2x16x32xbf16, #tpu.memory_space<vmem>>, vector<2x1x32xbf16>,
    %176 = arith.subf %30, %96 : vector<2x32xf32>
    %177 = arith.mulf %176, %103 : vector<2x32xf32>
    %cst_88 = arith.constant 0.000000e+00 : f32
    %178 = vector.broadcast %cst_88 : f32 to vector<2x32xf32>
    %179 = arith.maximumf %177, %178 : vector<2x32xf32>
    %180 = arith.truncf %179 : vector<2x32xf32> to vector<2x32xbf16>
    %c0_89 = arith.constant 0 : index
    %c9_90 = arith.constant 9 : index
    %c0_91 = arith.constant 0 : index
    %181 = vector.load %arg2[%c0_89, %c9_90, %c0_91] : memref<2x16x32xbf16, #tpu.memory_space<vmem>>, vector<2x1x32xbf16>
    %182 = vector.shape_cast %181 : vector<2x1x32xbf16> to vector<2x32xbf16>
    %183 = vector.shape_cast %180 : vector<2x32xbf16> to vector<2x1x32xbf16>
    tpu.vector_store %arg2[%c0_89, %c9_90, %c0_91], %183 {strides = array<i32>} : memref<2x16x32xbf16, #tpu.memory_space<vmem>>, vector<2x1x32xbf16>,
    %184 = arith.subf %33, %96 : vector<2x32xf32>
    %185 = arith.mulf %184, %103 : vector<2x32xf32>
    %cst_92 = arith.constant 0.000000e+00 : f32
    %186 = vector.broadcast %cst_92 : f32 to vector<2x32xf32>
    %187 = arith.maximumf %185, %186 : vector<2x32xf32>
    %188 = arith.truncf %187 : vector<2x32xf32> to vector<2x32xbf16>
    %c0_93 = arith.constant 0 : index
    %c10_94 = arith.constant 10 : index
    %c0_95 = arith.constant 0 : index
    %189 = vector.load %arg2[%c0_93, %c10_94, %c0_95] : memref<2x16x32xbf16, #tpu.memory_space<vmem>>, vector<2x1x32xbf16>
    %190 = vector.shape_cast %189 : vector<2x1x32xbf16> to vector<2x32xbf16>
    %191 = vector.shape_cast %188 : vector<2x32xbf16> to vector<2x1x32xbf16>
    tpu.vector_store %arg2[%c0_93, %c10_94, %c0_95], %191 {strides = array<i32>} : memref<2x16x32xbf16, #tpu.memory_space<vmem>>, vector<2x1x32xbf16>,
    %192 = arith.subf %36, %96 : vector<2x32xf32>
    %193 = arith.mulf %192, %103 : vector<2x32xf32>
    %cst_96 = arith.constant 0.000000e+00 : f32
    %194 = vector.broadcast %cst_96 : f32 to vector<2x32xf32>
    %195 = arith.maximumf %193, %194 : vector<2x32xf32>
    %196 = arith.truncf %195 : vector<2x32xf32> to vector<2x32xbf16>
    %c0_97 = arith.constant 0 : index
    %c11_98 = arith.constant 11 : index
    %c0_99 = arith.constant 0 : index
    %197 = vector.load %arg2[%c0_97, %c11_98, %c0_99] : memref<2x16x32xbf16, #tpu.memory_space<vmem>>, vector<2x1x32xbf16>
    %198 = vector.shape_cast %197 : vector<2x1x32xbf16> to vector<2x32xbf16>
    %199 = vector.shape_cast %196 : vector<2x32xbf16> to vector<2x1x32xbf16>
    tpu.vector_store %arg2[%c0_97, %c11_98, %c0_99], %199 {strides = array<i32>} : memref<2x16x32xbf16, #tpu.memory_space<vmem>>, vector<2x1x32xbf16>,
    %200 = arith.subf %39, %96 : vector<2x32xf32>
    %201 = arith.mulf %200, %103 : vector<2x32xf32>
    %cst_100 = arith.constant 0.000000e+00 : f32
    %202 = vector.broadcast %cst_100 : f32 to vector<2x32xf32>
    %203 = arith.maximumf %201, %202 : vector<2x32xf32>
    %204 = arith.truncf %203 : vector<2x32xf32> to vector<2x32xbf16>
    %c0_101 = arith.constant 0 : index
    %c12_102 = arith.constant 12 : index
    %c0_103 = arith.constant 0 : index
    %205 = vector.load %arg2[%c0_101, %c12_102, %c0_103] : memref<2x16x32xbf16, #tpu.memory_space<vmem>>, vector<2x1x32xbf16>
    %206 = vector.shape_cast %205 : vector<2x1x32xbf16> to vector<2x32xbf16>
    %207 = vector.shape_cast %204 : vector<2x32xbf16> to vector<2x1x32xbf16>
    tpu.vector_store %arg2[%c0_101, %c12_102, %c0_103], %207 {strides = array<i32>} : memref<2x16x32xbf16, #tpu.memory_space<vmem>>, vector<2x1x32xbf16>,
    %208 = arith.subf %42, %96 : vector<2x32xf32>
    %209 = arith.mulf %208, %103 : vector<2x32xf32>
    %cst_104 = arith.constant 0.000000e+00 : f32
    %210 = vector.broadcast %cst_104 : f32 to vector<2x32xf32>
    %211 = arith.maximumf %209, %210 : vector<2x32xf32>
    %212 = arith.truncf %211 : vector<2x32xf32> to vector<2x32xbf16>
    %c0_105 = arith.constant 0 : index
    %c13_106 = arith.constant 13 : index
    %c0_107 = arith.constant 0 : index
    %213 = vector.load %arg2[%c0_105, %c13_106, %c0_107] : memref<2x16x32xbf16, #tpu.memory_space<vmem>>, vector<2x1x32xbf16>
    %214 = vector.shape_cast %213 : vector<2x1x32xbf16> to vector<2x32xbf16>
    %215 = vector.shape_cast %212 : vector<2x32xbf16> to vector<2x1x32xbf16>
    tpu.vector_store %arg2[%c0_105, %c13_106, %c0_107], %215 {strides = array<i32>} : memref<2x16x32xbf16, #tpu.memory_space<vmem>>, vector<2x1x32xbf16>,
    %216 = arith.subf %45, %96 : vector<2x32xf32>
    %217 = arith.mulf %216, %103 : vector<2x32xf32>
    %cst_108 = arith.constant 0.000000e+00 : f32
    %218 = vector.broadcast %cst_108 : f32 to vector<2x32xf32>
    %219 = arith.maximumf %217, %218 : vector<2x32xf32>
    %220 = arith.truncf %219 : vector<2x32xf32> to vector<2x32xbf16>
    %c0_109 = arith.constant 0 : index
    %c14_110 = arith.constant 14 : index
    %c0_111 = arith.constant 0 : index
    %221 = vector.load %arg2[%c0_109, %c14_110, %c0_111] : memref<2x16x32xbf16, #tpu.memory_space<vmem>>, vector<2x1x32xbf16>
    %222 = vector.shape_cast %221 : vector<2x1x32xbf16> to vector<2x32xbf16>
    %223 = vector.shape_cast %220 : vector<2x32xbf16> to vector<2x1x32xbf16>
    tpu.vector_store %arg2[%c0_109, %c14_110, %c0_111], %223 {strides = array<i32>} : memref<2x16x32xbf16, #tpu.memory_space<vmem>>, vector<2x1x32xbf16>,
    %224 = arith.subf %48, %96 : vector<2x32xf32>
    %225 = arith.mulf %224, %103 : vector<2x32xf32>
    %cst_112 = arith.constant 0.000000e+00 : f32
    %226 = vector.broadcast %cst_112 : f32 to vector<2x32xf32>
    %227 = arith.maximumf %225, %226 : vector<2x32xf32>
    %228 = arith.truncf %227 : vector<2x32xf32> to vector<2x32xbf16>
    %c0_113 = arith.constant 0 : index
    %c15_114 = arith.constant 15 : index
    %c0_115 = arith.constant 0 : index
    %229 = vector.load %arg2[%c0_113, %c15_114, %c0_115] : memref<2x16x32xbf16, #tpu.memory_space<vmem>>, vector<2x1x32xbf16>
    %230 = vector.shape_cast %229 : vector<2x1x32xbf16> to vector<2x32xbf16>
    %231 = vector.shape_cast %228 : vector<2x32xbf16> to vector<2x1x32xbf16>
    tpu.vector_store %arg2[%c0_113, %c15_114, %c0_115], %231 {strides = array<i32>} : memref<2x16x32xbf16, #tpu.memory_space<vmem>>, vector<2x1x32xbf16>,
    return
  }
}

module attributes {stable_mosaic.version = 11 : i64} {
  func.func @_uplayer_kernel(%arg0: i32, %arg1: memref<1x4x4x32xbf16, #tpu.memory_space<vmem>>, %arg2: memref<4x4x32x16xbf16, #tpu.memory_space<vmem>>, %arg3: memref<1x4x2x4x32xbf16, #tpu.memory_space<vmem>>, %arg4: memref<6x6x32xbf16, #tpu.memory_space<vmem>>, %arg5: memref<4x4x4x16xf32, #tpu.memory_space<vmem>>) attributes {dimension_semantics = [#tpu.dimension_semantics<parallel>], iteration_bounds = array<i64: 2>, scalar_prefetch = 0 : i64, scratch_operands = 2 : i64, tpu.core_type = #tpu.core_type<tc>, window_params = [{transform_indices = @transform_0, window_bounds = array<i64: 1, 4, 4, 32>}, {pipeline_mode = #tpu.pipeline_mode<synchronous>, transform_indices = @transform_1, window_bounds = array<i64: 4, 4, 32, 16>}, {transform_indices = @transform_2, window_bounds = array<i64: 1, 4, 2, 4, 32>}]} {
    %cst = arith.constant 0.000000e+00 : bf16
    %0 = vector.broadcast %cst : bf16 to vector<6x6x32xbf16>
    %c0 = arith.constant 0 : index
    %c0_0 = arith.constant 0 : index
    %c0_1 = arith.constant 0 : index
    %1 = vector.load %arg4[%c0, %c0_0, %c0_1] : memref<6x6x32xbf16, #tpu.memory_space<vmem>>, vector<6x6x32xbf16>
    tpu.vector_store %arg4[%c0, %c0_0, %c0_1], %0 {strides = array<i32>} : memref<6x6x32xbf16, #tpu.memory_space<vmem>>, vector<6x6x32xbf16>,
    %c0_i32 = arith.constant 0 : i32
    %c4_i32 = arith.constant 4 : i32
    %2 = arith.addi %c0_i32, %c4_i32 : i32
    %c1_i32 = arith.constant 1 : i32
    scf.for %arg6 = %c0_i32 to %2 step %c1_i32  : i32 {
      %c0_15 = arith.constant 0 : index
      %16 = arith.index_cast %arg6 : i32 to index
      %c0_16 = arith.constant 0 : index
      %c0_17 = arith.constant 0 : index
      %17 = vector.load %arg1[%c0_15, %16, %c0_16, %c0_17] : memref<1x4x4x32xbf16, #tpu.memory_space<vmem>>, vector<1x1x4x32xbf16>
      %18 = vector.shape_cast %17 : vector<1x1x4x32xbf16> to vector<4x32xbf16>
      %c1_i32_18 = arith.constant 1 : i32
      %19 = arith.addi %arg6, %c1_i32_18 : i32
      %20 = arith.index_cast %19 : i32 to index
      %c1 = arith.constant 1 : index
      %c0_19 = arith.constant 0 : index
      %21 = vector.load %arg4[%20, %c1, %c0_19] : memref<6x6x32xbf16, #tpu.memory_space<vmem>>, vector<1x4x32xbf16>
      %22 = vector.shape_cast %21 : vector<1x4x32xbf16> to vector<4x32xbf16>
      %23 = vector.shape_cast %18 : vector<4x32xbf16> to vector<1x4x32xbf16>
      tpu.vector_store %arg4[%20, %c1, %c0_19], %23 {strides = array<i32>} : memref<6x6x32xbf16, #tpu.memory_space<vmem>>, vector<1x4x32xbf16>,
    }
    %c4_i32_2 = arith.constant 4 : i32
    %cst_3 = arith.constant 0.000000e+00 : f32
    %3 = vector.broadcast %cst_3 : f32 to vector<1x16xf32>
    %c0_i32_4 = arith.constant 0 : i32
    %c4_i32_5 = arith.constant 4 : i32
    %4 = arith.addi %c0_i32_4, %c4_i32_5 : i32
    %c1_i32_6 = arith.constant 1 : i32
    %5:2 = scf.for %arg6 = %c0_i32_4 to %4 step %c1_i32_6 iter_args(%arg7 = %3, %arg8 = %3) -> (vector<1x16xf32>, vector<1x16xf32>)  : i32 {
      %c0_i32_15 = arith.constant 0 : i32
      %16 = arith.addi %arg6, %c0_i32_15 : i32
      %c0_i32_16 = arith.constant 0 : i32
      %17 = arith.addi %16, %c0_i32_16 : i32
      %18 = arith.index_cast %17 : i32 to index
      %c0_17 = arith.constant 0 : index
      %c0_18 = arith.constant 0 : index
      %19 = vector.load %arg4[%18, %c0_17, %c0_18] : memref<6x6x32xbf16, #tpu.memory_space<vmem>>, vector<1x4x32xbf16>
      %20 = vector.shape_cast %19 : vector<1x4x32xbf16> to vector<4x32xbf16>
      %c0_19 = arith.constant 0 : index
      %c0_20 = arith.constant 0 : index
      %c0_21 = arith.constant 0 : index
      %c0_22 = arith.constant 0 : index
      %21 = vector.load %arg2[%c0_19, %c0_20, %c0_21, %c0_22] : memref<4x4x32x16xbf16, #tpu.memory_space<vmem>>, vector<1x1x32x16xbf16>
      %22 = vector.shape_cast %21 : vector<1x1x32x16xbf16> to vector<32x16xbf16>
      %cst_23 = arith.constant dense<0.000000e+00> : vector<4x16xf32>
      %23 = tpu.matmul %20, %22, %cst_23 {dimension_numbers = #tpu.dot_dimension_numbers<[1], [0], [0], [1], [0, 0, 1, 1], [], []>} : vector<4x32xbf16>, vector<32x16xbf16>, vector<4x16xf32> -> vector<4x16xf32>
      %c0_i32_24 = arith.constant 0 : i32
      %24 = arith.addi %arg6, %c0_i32_24 : i32
      %c0_i32_25 = arith.constant 0 : i32
      %25 = arith.addi %24, %c0_i32_25 : i32
      %26 = arith.index_cast %25 : i32 to index
      %c1 = arith.constant 1 : index
      %c0_26 = arith.constant 0 : index
      %27 = vector.load %arg4[%26, %c1, %c0_26] : memref<6x6x32xbf16, #tpu.memory_space<vmem>>, vector<1x4x32xbf16>
      %28 = vector.shape_cast %27 : vector<1x4x32xbf16> to vector<4x32xbf16>
      %c0_27 = arith.constant 0 : index
      %c1_28 = arith.constant 1 : index
      %c0_29 = arith.constant 0 : index
      %c0_30 = arith.constant 0 : index
      %29 = vector.load %arg2[%c0_27, %c1_28, %c0_29, %c0_30] : memref<4x4x32x16xbf16, #tpu.memory_space<vmem>>, vector<1x1x32x16xbf16>
      %30 = vector.shape_cast %29 : vector<1x1x32x16xbf16> to vector<32x16xbf16>
      %cst_31 = arith.constant dense<0.000000e+00> : vector<4x16xf32>
      %31 = tpu.matmul %28, %30, %cst_31 {dimension_numbers = #tpu.dot_dimension_numbers<[1], [0], [0], [1], [0, 0, 1, 1], [], []>} : vector<4x32xbf16>, vector<32x16xbf16>, vector<4x16xf32> -> vector<4x16xf32>
      %32 = arith.addf %23, %31 : vector<4x16xf32>
      %c0_i32_32 = arith.constant 0 : i32
      %33 = arith.addi %arg6, %c0_i32_32 : i32
      %c1_i32_33 = arith.constant 1 : i32
      %34 = arith.addi %33, %c1_i32_33 : i32
      %35 = arith.index_cast %34 : i32 to index
      %c0_34 = arith.constant 0 : index
      %c0_35 = arith.constant 0 : index
      %36 = vector.load %arg4[%35, %c0_34, %c0_35] : memref<6x6x32xbf16, #tpu.memory_space<vmem>>, vector<1x4x32xbf16>
      %37 = vector.shape_cast %36 : vector<1x4x32xbf16> to vector<4x32xbf16>
      %c0_36 = arith.constant 0 : index
      %c2 = arith.constant 2 : index
      %c0_37 = arith.constant 0 : index
      %c0_38 = arith.constant 0 : index
      %38 = vector.load %arg2[%c0_36, %c2, %c0_37, %c0_38] : memref<4x4x32x16xbf16, #tpu.memory_space<vmem>>, vector<1x1x32x16xbf16>
      %39 = vector.shape_cast %38 : vector<1x1x32x16xbf16> to vector<32x16xbf16>
      %cst_39 = arith.constant dense<0.000000e+00> : vector<4x16xf32>
      %40 = tpu.matmul %37, %39, %cst_39 {dimension_numbers = #tpu.dot_dimension_numbers<[1], [0], [0], [1], [0, 0, 1, 1], [], []>} : vector<4x32xbf16>, vector<32x16xbf16>, vector<4x16xf32> -> vector<4x16xf32>
      %41 = arith.addf %32, %40 : vector<4x16xf32>
      %c0_i32_40 = arith.constant 0 : i32
      %42 = arith.addi %arg6, %c0_i32_40 : i32
      %c1_i32_41 = arith.constant 1 : i32
      %43 = arith.addi %42, %c1_i32_41 : i32
      %44 = arith.index_cast %43 : i32 to index
      %c1_42 = arith.constant 1 : index
      %c0_43 = arith.constant 0 : index
      %45 = vector.load %arg4[%44, %c1_42, %c0_43] : memref<6x6x32xbf16, #tpu.memory_space<vmem>>, vector<1x4x32xbf16>
      %46 = vector.shape_cast %45 : vector<1x4x32xbf16> to vector<4x32xbf16>
      %c0_44 = arith.constant 0 : index
      %c3 = arith.constant 3 : index
      %c0_45 = arith.constant 0 : index
      %c0_46 = arith.constant 0 : index
      %47 = vector.load %arg2[%c0_44, %c3, %c0_45, %c0_46] : memref<4x4x32x16xbf16, #tpu.memory_space<vmem>>, vector<1x1x32x16xbf16>
      %48 = vector.shape_cast %47 : vector<1x1x32x16xbf16> to vector<32x16xbf16>
      %cst_47 = arith.constant dense<0.000000e+00> : vector<4x16xf32>
      %49 = tpu.matmul %46, %48, %cst_47 {dimension_numbers = #tpu.dot_dimension_numbers<[1], [0], [0], [1], [0, 0, 1, 1], [], []>} : vector<4x32xbf16>, vector<32x16xbf16>, vector<4x16xf32> -> vector<4x16xf32>
      %50 = arith.addf %41, %49 : vector<4x16xf32>
      %c0_48 = arith.constant 0 : index
      %51 = arith.index_cast %arg6 : i32 to index
      %c0_49 = arith.constant 0 : index
      %c0_50 = arith.constant 0 : index
      %52 = vector.load %arg5[%c0_48, %51, %c0_49, %c0_50] : memref<4x4x4x16xf32, #tpu.memory_space<vmem>>, vector<1x1x4x16xf32>
      %53 = vector.shape_cast %52 : vector<1x1x4x16xf32> to vector<4x16xf32>
      %54 = vector.shape_cast %50 : vector<4x16xf32> to vector<1x1x4x16xf32>
      tpu.vector_store %arg5[%c0_48, %51, %c0_49, %c0_50], %54 {strides = array<i32>} : memref<4x4x4x16xf32, #tpu.memory_space<vmem>>, vector<1x1x4x16xf32>,
      %cst_51 = arith.constant dense<0.000000e+00> : vector<16xf32>
      %55 = vector.multi_reduction <add>, %50, %cst_51 [0] : vector<4x16xf32> to vector<16xf32>
      %56 = vector.shape_cast %55 : vector<16xf32> to vector<1x16xf32>
      %57 = arith.addf %arg7, %56 : vector<1x16xf32>
      %58 = arith.mulf %50, %50 : vector<4x16xf32>
      %cst_52 = arith.constant dense<0.000000e+00> : vector<16xf32>
      %59 = vector.multi_reduction <add>, %58, %cst_52 [0] : vector<4x16xf32> to vector<16xf32>
      %60 = vector.shape_cast %59 : vector<16xf32> to vector<1x16xf32>
      %61 = arith.addf %arg8, %60 : vector<1x16xf32>
      %c0_i32_53 = arith.constant 0 : i32
      %62 = arith.addi %arg6, %c0_i32_53 : i32
      %c0_i32_54 = arith.constant 0 : i32
      %63 = arith.addi %62, %c0_i32_54 : i32
      %64 = arith.index_cast %63 : i32 to index
      %c1_55 = arith.constant 1 : index
      %c0_56 = arith.constant 0 : index
      %65 = vector.load %arg4[%64, %c1_55, %c0_56] : memref<6x6x32xbf16, #tpu.memory_space<vmem>>, vector<1x4x32xbf16>
      %66 = vector.shape_cast %65 : vector<1x4x32xbf16> to vector<4x32xbf16>
      %c1_57 = arith.constant 1 : index
      %c0_58 = arith.constant 0 : index
      %c0_59 = arith.constant 0 : index
      %c0_60 = arith.constant 0 : index
      %67 = vector.load %arg2[%c1_57, %c0_58, %c0_59, %c0_60] : memref<4x4x32x16xbf16, #tpu.memory_space<vmem>>, vector<1x1x32x16xbf16>
      %68 = vector.shape_cast %67 : vector<1x1x32x16xbf16> to vector<32x16xbf16>
      %cst_61 = arith.constant dense<0.000000e+00> : vector<4x16xf32>
      %69 = tpu.matmul %66, %68, %cst_61 {dimension_numbers = #tpu.dot_dimension_numbers<[1], [0], [0], [1], [0, 0, 1, 1], [], []>} : vector<4x32xbf16>, vector<32x16xbf16>, vector<4x16xf32> -> vector<4x16xf32>
      %c0_i32_62 = arith.constant 0 : i32
      %70 = arith.addi %arg6, %c0_i32_62 : i32
      %c0_i32_63 = arith.constant 0 : i32
      %71 = arith.addi %70, %c0_i32_63 : i32
      %72 = arith.index_cast %71 : i32 to index
      %c2_64 = arith.constant 2 : index
      %c0_65 = arith.constant 0 : index
      %73 = vector.load %arg4[%72, %c2_64, %c0_65] : memref<6x6x32xbf16, #tpu.memory_space<vmem>>, vector<1x4x32xbf16>
      %74 = vector.shape_cast %73 : vector<1x4x32xbf16> to vector<4x32xbf16>
      %c1_66 = arith.constant 1 : index
      %c1_67 = arith.constant 1 : index
      %c0_68 = arith.constant 0 : index
      %c0_69 = arith.constant 0 : index
      %75 = vector.load %arg2[%c1_66, %c1_67, %c0_68, %c0_69] : memref<4x4x32x16xbf16, #tpu.memory_space<vmem>>, vector<1x1x32x16xbf16>
      %76 = vector.shape_cast %75 : vector<1x1x32x16xbf16> to vector<32x16xbf16>
      %cst_70 = arith.constant dense<0.000000e+00> : vector<4x16xf32>
      %77 = tpu.matmul %74, %76, %cst_70 {dimension_numbers = #tpu.dot_dimension_numbers<[1], [0], [0], [1], [0, 0, 1, 1], [], []>} : vector<4x32xbf16>, vector<32x16xbf16>, vector<4x16xf32> -> vector<4x16xf32>
      %78 = arith.addf %69, %77 : vector<4x16xf32>
      %c0_i32_71 = arith.constant 0 : i32
      %79 = arith.addi %arg6, %c0_i32_71 : i32
      %c1_i32_72 = arith.constant 1 : i32
      %80 = arith.addi %79, %c1_i32_72 : i32
      %81 = arith.index_cast %80 : i32 to index
      %c1_73 = arith.constant 1 : index
      %c0_74 = arith.constant 0 : index
      %82 = vector.load %arg4[%81, %c1_73, %c0_74] : memref<6x6x32xbf16, #tpu.memory_space<vmem>>, vector<1x4x32xbf16>
      %83 = vector.shape_cast %82 : vector<1x4x32xbf16> to vector<4x32xbf16>
      %c1_75 = arith.constant 1 : index
      %c2_76 = arith.constant 2 : index
      %c0_77 = arith.constant 0 : index
      %c0_78 = arith.constant 0 : index
      %84 = vector.load %arg2[%c1_75, %c2_76, %c0_77, %c0_78] : memref<4x4x32x16xbf16, #tpu.memory_space<vmem>>, vector<1x1x32x16xbf16>
      %85 = vector.shape_cast %84 : vector<1x1x32x16xbf16> to vector<32x16xbf16>
      %cst_79 = arith.constant dense<0.000000e+00> : vector<4x16xf32>
      %86 = tpu.matmul %83, %85, %cst_79 {dimension_numbers = #tpu.dot_dimension_numbers<[1], [0], [0], [1], [0, 0, 1, 1], [], []>} : vector<4x32xbf16>, vector<32x16xbf16>, vector<4x16xf32> -> vector<4x16xf32>
      %87 = arith.addf %78, %86 : vector<4x16xf32>
      %c0_i32_80 = arith.constant 0 : i32
      %88 = arith.addi %arg6, %c0_i32_80 : i32
      %c1_i32_81 = arith.constant 1 : i32
      %89 = arith.addi %88, %c1_i32_81 : i32
      %90 = arith.index_cast %89 : i32 to index
      %c2_82 = arith.constant 2 : index
      %c0_83 = arith.constant 0 : index
      %91 = vector.load %arg4[%90, %c2_82, %c0_83] : memref<6x6x32xbf16, #tpu.memory_space<vmem>>, vector<1x4x32xbf16>
      %92 = vector.shape_cast %91 : vector<1x4x32xbf16> to vector<4x32xbf16>
      %c1_84 = arith.constant 1 : index
      %c3_85 = arith.constant 3 : index
      %c0_86 = arith.constant 0 : index
      %c0_87 = arith.constant 0 : index
      %93 = vector.load %arg2[%c1_84, %c3_85, %c0_86, %c0_87] : memref<4x4x32x16xbf16, #tpu.memory_space<vmem>>, vector<1x1x32x16xbf16>
      %94 = vector.shape_cast %93 : vector<1x1x32x16xbf16> to vector<32x16xbf16>
      %cst_88 = arith.constant dense<0.000000e+00> : vector<4x16xf32>
      %95 = tpu.matmul %92, %94, %cst_88 {dimension_numbers = #tpu.dot_dimension_numbers<[1], [0], [0], [1], [0, 0, 1, 1], [], []>} : vector<4x32xbf16>, vector<32x16xbf16>, vector<4x16xf32> -> vector<4x16xf32>
      %96 = arith.addf %87, %95 : vector<4x16xf32>
      %c1_89 = arith.constant 1 : index
      %97 = arith.index_cast %arg6 : i32 to index
      %c0_90 = arith.constant 0 : index
      %c0_91 = arith.constant 0 : index
      %98 = vector.load %arg5[%c1_89, %97, %c0_90, %c0_91] : memref<4x4x4x16xf32, #tpu.memory_space<vmem>>, vector<1x1x4x16xf32>
      %99 = vector.shape_cast %98 : vector<1x1x4x16xf32> to vector<4x16xf32>
      %100 = vector.shape_cast %96 : vector<4x16xf32> to vector<1x1x4x16xf32>
      tpu.vector_store %arg5[%c1_89, %97, %c0_90, %c0_91], %100 {strides = array<i32>} : memref<4x4x4x16xf32, #tpu.memory_space<vmem>>, vector<1x1x4x16xf32>,
      %cst_92 = arith.constant dense<0.000000e+00> : vector<16xf32>
      %101 = vector.multi_reduction <add>, %96, %cst_92 [0] : vector<4x16xf32> to vector<16xf32>
      %102 = vector.shape_cast %101 : vector<16xf32> to vector<1x16xf32>
      %103 = arith.addf %57, %102 : vector<1x16xf32>
      %104 = arith.mulf %96, %96 : vector<4x16xf32>
      %cst_93 = arith.constant dense<0.000000e+00> : vector<16xf32>
      %105 = vector.multi_reduction <add>, %104, %cst_93 [0] : vector<4x16xf32> to vector<16xf32>
      %106 = vector.shape_cast %105 : vector<16xf32> to vector<1x16xf32>
      %107 = arith.addf %61, %106 : vector<1x16xf32>
      %c1_i32_94 = arith.constant 1 : i32
      %108 = arith.addi %arg6, %c1_i32_94 : i32
      %c0_i32_95 = arith.constant 0 : i32
      %109 = arith.addi %108, %c0_i32_95 : i32
      %110 = arith.index_cast %109 : i32 to index
      %c0_96 = arith.constant 0 : index
      %c0_97 = arith.constant 0 : index
      %111 = vector.load %arg4[%110, %c0_96, %c0_97] : memref<6x6x32xbf16, #tpu.memory_space<vmem>>, vector<1x4x32xbf16>
      %112 = vector.shape_cast %111 : vector<1x4x32xbf16> to vector<4x32xbf16>
      %c2_98 = arith.constant 2 : index
      %c0_99 = arith.constant 0 : index
      %c0_100 = arith.constant 0 : index
      %c0_101 = arith.constant 0 : index
      %113 = vector.load %arg2[%c2_98, %c0_99, %c0_100, %c0_101] : memref<4x4x32x16xbf16, #tpu.memory_space<vmem>>, vector<1x1x32x16xbf16>
      %114 = vector.shape_cast %113 : vector<1x1x32x16xbf16> to vector<32x16xbf16>
      %cst_102 = arith.constant dense<0.000000e+00> : vector<4x16xf32>
      %115 = tpu.matmul %112, %114, %cst_102 {dimension_numbers = #tpu.dot_dimension_numbers<[1], [0], [0], [1], [0, 0, 1, 1], [], []>} : vector<4x32xbf16>, vector<32x16xbf16>, vector<4x16xf32> -> vector<4x16xf32>
      %c1_i32_103 = arith.constant 1 : i32
      %116 = arith.addi %arg6, %c1_i32_103 : i32
      %c0_i32_104 = arith.constant 0 : i32
      %117 = arith.addi %116, %c0_i32_104 : i32
      %118 = arith.index_cast %117 : i32 to index
      %c1_105 = arith.constant 1 : index
      %c0_106 = arith.constant 0 : index
      %119 = vector.load %arg4[%118, %c1_105, %c0_106] : memref<6x6x32xbf16, #tpu.memory_space<vmem>>, vector<1x4x32xbf16>
      %120 = vector.shape_cast %119 : vector<1x4x32xbf16> to vector<4x32xbf16>
      %c2_107 = arith.constant 2 : index
      %c1_108 = arith.constant 1 : index
      %c0_109 = arith.constant 0 : index
      %c0_110 = arith.constant 0 : index
      %121 = vector.load %arg2[%c2_107, %c1_108, %c0_109, %c0_110] : memref<4x4x32x16xbf16, #tpu.memory_space<vmem>>, vector<1x1x32x16xbf16>
      %122 = vector.shape_cast %121 : vector<1x1x32x16xbf16> to vector<32x16xbf16>
      %cst_111 = arith.constant dense<0.000000e+00> : vector<4x16xf32>
      %123 = tpu.matmul %120, %122, %cst_111 {dimension_numbers = #tpu.dot_dimension_numbers<[1], [0], [0], [1], [0, 0, 1, 1], [], []>} : vector<4x32xbf16>, vector<32x16xbf16>, vector<4x16xf32> -> vector<4x16xf32>
      %124 = arith.addf %115, %123 : vector<4x16xf32>
      %c1_i32_112 = arith.constant 1 : i32
      %125 = arith.addi %arg6, %c1_i32_112 : i32
      %c1_i32_113 = arith.constant 1 : i32
      %126 = arith.addi %125, %c1_i32_113 : i32
      %127 = arith.index_cast %126 : i32 to index
      %c0_114 = arith.constant 0 : index
      %c0_115 = arith.constant 0 : index
      %128 = vector.load %arg4[%127, %c0_114, %c0_115] : memref<6x6x32xbf16, #tpu.memory_space<vmem>>, vector<1x4x32xbf16>
      %129 = vector.shape_cast %128 : vector<1x4x32xbf16> to vector<4x32xbf16>
      %c2_116 = arith.constant 2 : index
      %c2_117 = arith.constant 2 : index
      %c0_118 = arith.constant 0 : index
      %c0_119 = arith.constant 0 : index
      %130 = vector.load %arg2[%c2_116, %c2_117, %c0_118, %c0_119] : memref<4x4x32x16xbf16, #tpu.memory_space<vmem>>, vector<1x1x32x16xbf16>
      %131 = vector.shape_cast %130 : vector<1x1x32x16xbf16> to vector<32x16xbf16>
      %cst_120 = arith.constant dense<0.000000e+00> : vector<4x16xf32>
      %132 = tpu.matmul %129, %131, %cst_120 {dimension_numbers = #tpu.dot_dimension_numbers<[1], [0], [0], [1], [0, 0, 1, 1], [], []>} : vector<4x32xbf16>, vector<32x16xbf16>, vector<4x16xf32> -> vector<4x16xf32>
      %133 = arith.addf %124, %132 : vector<4x16xf32>
      %c1_i32_121 = arith.constant 1 : i32
      %134 = arith.addi %arg6, %c1_i32_121 : i32
      %c1_i32_122 = arith.constant 1 : i32
      %135 = arith.addi %134, %c1_i32_122 : i32
      %136 = arith.index_cast %135 : i32 to index
      %c1_123 = arith.constant 1 : index
      %c0_124 = arith.constant 0 : index
      %137 = vector.load %arg4[%136, %c1_123, %c0_124] : memref<6x6x32xbf16, #tpu.memory_space<vmem>>, vector<1x4x32xbf16>
      %138 = vector.shape_cast %137 : vector<1x4x32xbf16> to vector<4x32xbf16>
      %c2_125 = arith.constant 2 : index
      %c3_126 = arith.constant 3 : index
      %c0_127 = arith.constant 0 : index
      %c0_128 = arith.constant 0 : index
      %139 = vector.load %arg2[%c2_125, %c3_126, %c0_127, %c0_128] : memref<4x4x32x16xbf16, #tpu.memory_space<vmem>>, vector<1x1x32x16xbf16>
      %140 = vector.shape_cast %139 : vector<1x1x32x16xbf16> to vector<32x16xbf16>
      %cst_129 = arith.constant dense<0.000000e+00> : vector<4x16xf32>
      %141 = tpu.matmul %138, %140, %cst_129 {dimension_numbers = #tpu.dot_dimension_numbers<[1], [0], [0], [1], [0, 0, 1, 1], [], []>} : vector<4x32xbf16>, vector<32x16xbf16>, vector<4x16xf32> -> vector<4x16xf32>
      %142 = arith.addf %133, %141 : vector<4x16xf32>
      %c2_130 = arith.constant 2 : index
      %143 = arith.index_cast %arg6 : i32 to index
      %c0_131 = arith.constant 0 : index
      %c0_132 = arith.constant 0 : index
      %144 = vector.load %arg5[%c2_130, %143, %c0_131, %c0_132] : memref<4x4x4x16xf32, #tpu.memory_space<vmem>>, vector<1x1x4x16xf32>
      %145 = vector.shape_cast %144 : vector<1x1x4x16xf32> to vector<4x16xf32>
      %146 = vector.shape_cast %142 : vector<4x16xf32> to vector<1x1x4x16xf32>
      tpu.vector_store %arg5[%c2_130, %143, %c0_131, %c0_132], %146 {strides = array<i32>} : memref<4x4x4x16xf32, #tpu.memory_space<vmem>>, vector<1x1x4x16xf32>,
      %cst_133 = arith.constant dense<0.000000e+00> : vector<16xf32>
      %147 = vector.multi_reduction <add>, %142, %cst_133 [0] : vector<4x16xf32> to vector<16xf32>
      %148 = vector.shape_cast %147 : vector<16xf32> to vector<1x16xf32>
      %149 = arith.addf %103, %148 : vector<1x16xf32>
      %150 = arith.mulf %142, %142 : vector<4x16xf32>
      %cst_134 = arith.constant dense<0.000000e+00> : vector<16xf32>
      %151 = vector.multi_reduction <add>, %150, %cst_134 [0] : vector<4x16xf32> to vector<16xf32>
      %152 = vector.shape_cast %151 : vector<16xf32> to vector<1x16xf32>
      %153 = arith.addf %107, %152 : vector<1x16xf32>
      %c1_i32_135 = arith.constant 1 : i32
      %154 = arith.addi %arg6, %c1_i32_135 : i32
      %c0_i32_136 = arith.constant 0 : i32
      %155 = arith.addi %154, %c0_i32_136 : i32
      %156 = arith.index_cast %155 : i32 to index
      %c1_137 = arith.constant 1 : index
      %c0_138 = arith.constant 0 : index
      %157 = vector.load %arg4[%156, %c1_137, %c0_138] : memref<6x6x32xbf16, #tpu.memory_space<vmem>>, vector<1x4x32xbf16>
      %158 = vector.shape_cast %157 : vector<1x4x32xbf16> to vector<4x32xbf16>
      %c3_139 = arith.constant 3 : index
      %c0_140 = arith.constant 0 : index
      %c0_141 = arith.constant 0 : index
      %c0_142 = arith.constant 0 : index
      %159 = vector.load %arg2[%c3_139, %c0_140, %c0_141, %c0_142] : memref<4x4x32x16xbf16, #tpu.memory_space<vmem>>, vector<1x1x32x16xbf16>
      %160 = vector.shape_cast %159 : vector<1x1x32x16xbf16> to vector<32x16xbf16>
      %cst_143 = arith.constant dense<0.000000e+00> : vector<4x16xf32>
      %161 = tpu.matmul %158, %160, %cst_143 {dimension_numbers = #tpu.dot_dimension_numbers<[1], [0], [0], [1], [0, 0, 1, 1], [], []>} : vector<4x32xbf16>, vector<32x16xbf16>, vector<4x16xf32> -> vector<4x16xf32>
      %c1_i32_144 = arith.constant 1 : i32
      %162 = arith.addi %arg6, %c1_i32_144 : i32
      %c0_i32_145 = arith.constant 0 : i32
      %163 = arith.addi %162, %c0_i32_145 : i32
      %164 = arith.index_cast %163 : i32 to index
      %c2_146 = arith.constant 2 : index
      %c0_147 = arith.constant 0 : index
      %165 = vector.load %arg4[%164, %c2_146, %c0_147] : memref<6x6x32xbf16, #tpu.memory_space<vmem>>, vector<1x4x32xbf16>
      %166 = vector.shape_cast %165 : vector<1x4x32xbf16> to vector<4x32xbf16>
      %c3_148 = arith.constant 3 : index
      %c1_149 = arith.constant 1 : index
      %c0_150 = arith.constant 0 : index
      %c0_151 = arith.constant 0 : index
      %167 = vector.load %arg2[%c3_148, %c1_149, %c0_150, %c0_151] : memref<4x4x32x16xbf16, #tpu.memory_space<vmem>>, vector<1x1x32x16xbf16>
      %168 = vector.shape_cast %167 : vector<1x1x32x16xbf16> to vector<32x16xbf16>
      %cst_152 = arith.constant dense<0.000000e+00> : vector<4x16xf32>
      %169 = tpu.matmul %166, %168, %cst_152 {dimension_numbers = #tpu.dot_dimension_numbers<[1], [0], [0], [1], [0, 0, 1, 1], [], []>} : vector<4x32xbf16>, vector<32x16xbf16>, vector<4x16xf32> -> vector<4x16xf32>
      %170 = arith.addf %161, %169 : vector<4x16xf32>
      %c1_i32_153 = arith.constant 1 : i32
      %171 = arith.addi %arg6, %c1_i32_153 : i32
      %c1_i32_154 = arith.constant 1 : i32
      %172 = arith.addi %171, %c1_i32_154 : i32
      %173 = arith.index_cast %172 : i32 to index
      %c1_155 = arith.constant 1 : index
      %c0_156 = arith.constant 0 : index
      %174 = vector.load %arg4[%173, %c1_155, %c0_156] : memref<6x6x32xbf16, #tpu.memory_space<vmem>>, vector<1x4x32xbf16>
      %175 = vector.shape_cast %174 : vector<1x4x32xbf16> to vector<4x32xbf16>
      %c3_157 = arith.constant 3 : index
      %c2_158 = arith.constant 2 : index
      %c0_159 = arith.constant 0 : index
      %c0_160 = arith.constant 0 : index
      %176 = vector.load %arg2[%c3_157, %c2_158, %c0_159, %c0_160] : memref<4x4x32x16xbf16, #tpu.memory_space<vmem>>, vector<1x1x32x16xbf16>
      %177 = vector.shape_cast %176 : vector<1x1x32x16xbf16> to vector<32x16xbf16>
      %cst_161 = arith.constant dense<0.000000e+00> : vector<4x16xf32>
      %178 = tpu.matmul %175, %177, %cst_161 {dimension_numbers = #tpu.dot_dimension_numbers<[1], [0], [0], [1], [0, 0, 1, 1], [], []>} : vector<4x32xbf16>, vector<32x16xbf16>, vector<4x16xf32> -> vector<4x16xf32>
      %179 = arith.addf %170, %178 : vector<4x16xf32>
      %c1_i32_162 = arith.constant 1 : i32
      %180 = arith.addi %arg6, %c1_i32_162 : i32
      %c1_i32_163 = arith.constant 1 : i32
      %181 = arith.addi %180, %c1_i32_163 : i32
      %182 = arith.index_cast %181 : i32 to index
      %c2_164 = arith.constant 2 : index
      %c0_165 = arith.constant 0 : index
      %183 = vector.load %arg4[%182, %c2_164, %c0_165] : memref<6x6x32xbf16, #tpu.memory_space<vmem>>, vector<1x4x32xbf16>
      %184 = vector.shape_cast %183 : vector<1x4x32xbf16> to vector<4x32xbf16>
      %c3_166 = arith.constant 3 : index
      %c3_167 = arith.constant 3 : index
      %c0_168 = arith.constant 0 : index
      %c0_169 = arith.constant 0 : index
      %185 = vector.load %arg2[%c3_166, %c3_167, %c0_168, %c0_169] : memref<4x4x32x16xbf16, #tpu.memory_space<vmem>>, vector<1x1x32x16xbf16>
      %186 = vector.shape_cast %185 : vector<1x1x32x16xbf16> to vector<32x16xbf16>
      %cst_170 = arith.constant dense<0.000000e+00> : vector<4x16xf32>
      %187 = tpu.matmul %184, %186, %cst_170 {dimension_numbers = #tpu.dot_dimension_numbers<[1], [0], [0], [1], [0, 0, 1, 1], [], []>} : vector<4x32xbf16>, vector<32x16xbf16>, vector<4x16xf32> -> vector<4x16xf32>
      %188 = arith.addf %179, %187 : vector<4x16xf32>
      %c3_171 = arith.constant 3 : index
      %189 = arith.index_cast %arg6 : i32 to index
      %c0_172 = arith.constant 0 : index
      %c0_173 = arith.constant 0 : index
      %190 = vector.load %arg5[%c3_171, %189, %c0_172, %c0_173] : memref<4x4x4x16xf32, #tpu.memory_space<vmem>>, vector<1x1x4x16xf32>
      %191 = vector.shape_cast %190 : vector<1x1x4x16xf32> to vector<4x16xf32>
      %192 = vector.shape_cast %188 : vector<4x16xf32> to vector<1x1x4x16xf32>
      tpu.vector_store %arg5[%c3_171, %189, %c0_172, %c0_173], %192 {strides = array<i32>} : memref<4x4x4x16xf32, #tpu.memory_space<vmem>>, vector<1x1x4x16xf32>,
      %cst_174 = arith.constant dense<0.000000e+00> : vector<16xf32>
      %193 = vector.multi_reduction <add>, %188, %cst_174 [0] : vector<4x16xf32> to vector<16xf32>
      %194 = vector.shape_cast %193 : vector<16xf32> to vector<1x16xf32>
      %195 = arith.addf %149, %194 : vector<1x16xf32>
      %196 = arith.mulf %188, %188 : vector<4x16xf32>
      %cst_175 = arith.constant dense<0.000000e+00> : vector<16xf32>
      %197 = vector.multi_reduction <add>, %196, %cst_175 [0] : vector<4x16xf32> to vector<16xf32>
      %198 = vector.shape_cast %197 : vector<16xf32> to vector<1x16xf32>
      %199 = arith.addf %153, %198 : vector<1x16xf32>
      scf.yield %195, %199 : vector<1x16xf32>, vector<1x16xf32>
    }
    %c4_i32_7 = arith.constant 4 : i32
    %cst_8 = arith.constant 6.400000e+01 : f32
    %6 = vector.broadcast %cst_8 : f32 to vector<1x16xf32>
    %7 = arith.divf %5#0, %6 : vector<1x16xf32>
    %cst_9 = arith.constant 6.400000e+01 : f32
    %8 = vector.broadcast %cst_9 : f32 to vector<1x16xf32>
    %9 = arith.divf %5#1, %8 : vector<1x16xf32>
    %10 = arith.mulf %7, %7 : vector<1x16xf32>
    %11 = arith.subf %9, %10 : vector<1x16xf32>
    %cst_10 = arith.constant 9.99999974E-6 : f32
    %12 = vector.broadcast %cst_10 : f32 to vector<1x16xf32>
    %13 = arith.addf %11, %12 : vector<1x16xf32>
    %14 = math.rsqrt %13 : vector<1x16xf32>
    %c0_i32_11 = arith.constant 0 : i32
    %c4_i32_12 = arith.constant 4 : i32
    %15 = arith.addi %c0_i32_11, %c4_i32_12 : i32
    %c1_i32_13 = arith.constant 1 : i32
    scf.for %arg6 = %c0_i32_11 to %15 step %c1_i32_13  : i32 {
      %c0_15 = arith.constant 0 : index
      %16 = arith.index_cast %arg6 : i32 to index
      %c0_16 = arith.constant 0 : index
      %c0_17 = arith.constant 0 : index
      %17 = vector.load %arg5[%c0_15, %16, %c0_16, %c0_17] : memref<4x4x4x16xf32, #tpu.memory_space<vmem>>, vector<1x1x4x16xf32>
      %18 = vector.shape_cast %17 : vector<1x1x4x16xf32> to vector<4x16xf32>
      %19 = vector.broadcast %7 : vector<1x16xf32> to vector<4x16xf32>
      %20 = arith.subf %18, %19 : vector<4x16xf32>
      %21 = vector.broadcast %14 : vector<1x16xf32> to vector<4x16xf32>
      %22 = arith.mulf %20, %21 : vector<4x16xf32>
      %cst_18 = arith.constant 0.000000e+00 : f32
      %23 = vector.broadcast %cst_18 : f32 to vector<4x16xf32>
      %24 = arith.maximumf %22, %23 : vector<4x16xf32>
      %25 = arith.truncf %24 : vector<4x16xf32> to vector<4x16xbf16>
      %c0_19 = arith.constant 0 : index
      %26 = arith.index_cast %arg6 : i32 to index
      %c0_20 = arith.constant 0 : index
      %c0_21 = arith.constant 0 : index
      %c0_22 = arith.constant 0 : index
      %27 = vector.load %arg3[%c0_19, %26, %c0_20, %c0_21, %c0_22] : memref<1x4x2x4x32xbf16, #tpu.memory_space<vmem>>, vector<1x1x1x4x16xbf16>
      %28 = vector.shape_cast %27 : vector<1x1x1x4x16xbf16> to vector<4x16xbf16>
      %29 = vector.shape_cast %25 : vector<4x16xbf16> to vector<1x1x1x4x16xbf16>
      tpu.vector_store %arg3[%c0_19, %26, %c0_20, %c0_21, %c0_22], %29 {strides = array<i32>} : memref<1x4x2x4x32xbf16, #tpu.memory_space<vmem>>, vector<1x1x1x4x16xbf16>,
      %c1 = arith.constant 1 : index
      %30 = arith.index_cast %arg6 : i32 to index
      %c0_23 = arith.constant 0 : index
      %c0_24 = arith.constant 0 : index
      %31 = vector.load %arg5[%c1, %30, %c0_23, %c0_24] : memref<4x4x4x16xf32, #tpu.memory_space<vmem>>, vector<1x1x4x16xf32>
      %32 = vector.shape_cast %31 : vector<1x1x4x16xf32> to vector<4x16xf32>
      %33 = vector.broadcast %7 : vector<1x16xf32> to vector<4x16xf32>
      %34 = arith.subf %32, %33 : vector<4x16xf32>
      %35 = vector.broadcast %14 : vector<1x16xf32> to vector<4x16xf32>
      %36 = arith.mulf %34, %35 : vector<4x16xf32>
      %cst_25 = arith.constant 0.000000e+00 : f32
      %37 = vector.broadcast %cst_25 : f32 to vector<4x16xf32>
      %38 = arith.maximumf %36, %37 : vector<4x16xf32>
      %39 = arith.truncf %38 : vector<4x16xf32> to vector<4x16xbf16>
      %c0_26 = arith.constant 0 : index
      %40 = arith.index_cast %arg6 : i32 to index
      %c0_27 = arith.constant 0 : index
      %c0_28 = arith.constant 0 : index
      %c16 = arith.constant 16 : index
      %41 = vector.load %arg3[%c0_26, %40, %c0_27, %c0_28, %c16] : memref<1x4x2x4x32xbf16, #tpu.memory_space<vmem>>, vector<1x1x1x4x16xbf16>
      %42 = vector.shape_cast %41 : vector<1x1x1x4x16xbf16> to vector<4x16xbf16>
      %43 = vector.shape_cast %39 : vector<4x16xbf16> to vector<1x1x1x4x16xbf16>
      tpu.vector_store %arg3[%c0_26, %40, %c0_27, %c0_28, %c16], %43 {strides = array<i32>} : memref<1x4x2x4x32xbf16, #tpu.memory_space<vmem>>, vector<1x1x1x4x16xbf16>,
      %c2 = arith.constant 2 : index
      %44 = arith.index_cast %arg6 : i32 to index
      %c0_29 = arith.constant 0 : index
      %c0_30 = arith.constant 0 : index
      %45 = vector.load %arg5[%c2, %44, %c0_29, %c0_30] : memref<4x4x4x16xf32, #tpu.memory_space<vmem>>, vector<1x1x4x16xf32>
      %46 = vector.shape_cast %45 : vector<1x1x4x16xf32> to vector<4x16xf32>
      %47 = vector.broadcast %7 : vector<1x16xf32> to vector<4x16xf32>
      %48 = arith.subf %46, %47 : vector<4x16xf32>
      %49 = vector.broadcast %14 : vector<1x16xf32> to vector<4x16xf32>
      %50 = arith.mulf %48, %49 : vector<4x16xf32>
      %cst_31 = arith.constant 0.000000e+00 : f32
      %51 = vector.broadcast %cst_31 : f32 to vector<4x16xf32>
      %52 = arith.maximumf %50, %51 : vector<4x16xf32>
      %53 = arith.truncf %52 : vector<4x16xf32> to vector<4x16xbf16>
      %c0_32 = arith.constant 0 : index
      %54 = arith.index_cast %arg6 : i32 to index
      %c1_33 = arith.constant 1 : index
      %c0_34 = arith.constant 0 : index
      %c0_35 = arith.constant 0 : index
      %55 = vector.load %arg3[%c0_32, %54, %c1_33, %c0_34, %c0_35] : memref<1x4x2x4x32xbf16, #tpu.memory_space<vmem>>, vector<1x1x1x4x16xbf16>
      %56 = vector.shape_cast %55 : vector<1x1x1x4x16xbf16> to vector<4x16xbf16>
      %57 = vector.shape_cast %53 : vector<4x16xbf16> to vector<1x1x1x4x16xbf16>
      tpu.vector_store %arg3[%c0_32, %54, %c1_33, %c0_34, %c0_35], %57 {strides = array<i32>} : memref<1x4x2x4x32xbf16, #tpu.memory_space<vmem>>, vector<1x1x1x4x16xbf16>,
      %c3 = arith.constant 3 : index
      %58 = arith.index_cast %arg6 : i32 to index
      %c0_36 = arith.constant 0 : index
      %c0_37 = arith.constant 0 : index
      %59 = vector.load %arg5[%c3, %58, %c0_36, %c0_37] : memref<4x4x4x16xf32, #tpu.memory_space<vmem>>, vector<1x1x4x16xf32>
      %60 = vector.shape_cast %59 : vector<1x1x4x16xf32> to vector<4x16xf32>
      %61 = vector.broadcast %7 : vector<1x16xf32> to vector<4x16xf32>
      %62 = arith.subf %60, %61 : vector<4x16xf32>
      %63 = vector.broadcast %14 : vector<1x16xf32> to vector<4x16xf32>
      %64 = arith.mulf %62, %63 : vector<4x16xf32>
      %cst_38 = arith.constant 0.000000e+00 : f32
      %65 = vector.broadcast %cst_38 : f32 to vector<4x16xf32>
      %66 = arith.maximumf %64, %65 : vector<4x16xf32>
      %67 = arith.truncf %66 : vector<4x16xf32> to vector<4x16xbf16>
      %c0_39 = arith.constant 0 : index
      %68 = arith.index_cast %arg6 : i32 to index
      %c1_40 = arith.constant 1 : index
      %c0_41 = arith.constant 0 : index
      %c16_42 = arith.constant 16 : index
      %69 = vector.load %arg3[%c0_39, %68, %c1_40, %c0_41, %c16_42] : memref<1x4x2x4x32xbf16, #tpu.memory_space<vmem>>, vector<1x1x1x4x16xbf16>
      %70 = vector.shape_cast %69 : vector<1x1x1x4x16xbf16> to vector<4x16xbf16>
      %71 = vector.shape_cast %67 : vector<4x16xbf16> to vector<1x1x1x4x16xbf16>
      tpu.vector_store %arg3[%c0_39, %68, %c1_40, %c0_41, %c16_42], %71 {strides = array<i32>} : memref<1x4x2x4x32xbf16, #tpu.memory_space<vmem>>, vector<1x1x1x4x16xbf16>,
    }
    %c4_i32_14 = arith.constant 4 : i32
    return
  }
  func.func @transform_0(%arg0: i32) -> (i32, i32, i32, i32) {
    %c0_i32 = arith.constant 0 : i32
    %c0_i32_0 = arith.constant 0 : i32
    %c0_i32_1 = arith.constant 0 : i32
    %c0_i32_2 = arith.constant 0 : i32
    return %arg0, %c0_i32, %c0_i32_0, %c0_i32_1 : i32, i32, i32, i32
  }
  func.func @transform_1(%arg0: i32) -> (i32, i32, i32, i32) {
    %c0_i32 = arith.constant 0 : i32
    %c0_i32_0 = arith.constant 0 : i32
    %c0_i32_1 = arith.constant 0 : i32
    %c0_i32_2 = arith.constant 0 : i32
    %c0_i32_3 = arith.constant 0 : i32
    return %c0_i32, %c0_i32_0, %c0_i32_1, %c0_i32_2 : i32, i32, i32, i32
  }
  func.func @transform_2(%arg0: i32) -> (i32, i32, i32, i32, i32) {
    %c0_i32 = arith.constant 0 : i32
    %c0_i32_0 = arith.constant 0 : i32
    %c0_i32_1 = arith.constant 0 : i32
    %c0_i32_2 = arith.constant 0 : i32
    %c0_i32_3 = arith.constant 0 : i32
    return %arg0, %c0_i32, %c0_i32_0, %c0_i32_1, %c0_i32_2 : i32, i32, i32, i32, i32
  }
}

module attributes {stable_mosaic.version = 11 : i64} {
  func.func @_uplayer_kernel(%arg0: i32, %arg1: memref<1x8x8x16xbf16, #tpu.memory_space<vmem>>, %arg2: memref<4x4x16x8xbf16, #tpu.memory_space<vmem>>, %arg3: memref<1x8x2x8x16xbf16, #tpu.memory_space<vmem>>, %arg4: memref<10x10x16xbf16, #tpu.memory_space<vmem>>, %arg5: memref<4x8x8x8xf32, #tpu.memory_space<vmem>>) attributes {dimension_semantics = [#tpu.dimension_semantics<parallel>], iteration_bounds = array<i64: 2>, scalar_prefetch = 0 : i64, scratch_operands = 2 : i64, tpu.core_type = #tpu.core_type<tc>, window_params = [{transform_indices = @transform_0, window_bounds = array<i64: 1, 8, 8, 16>}, {pipeline_mode = #tpu.pipeline_mode<synchronous>, transform_indices = @transform_1, window_bounds = array<i64: 4, 4, 16, 8>}, {transform_indices = @transform_2, window_bounds = array<i64: 1, 8, 2, 8, 16>}]} {
    %cst = arith.constant 0.000000e+00 : bf16
    %0 = vector.broadcast %cst : bf16 to vector<10x10x16xbf16>
    %c0 = arith.constant 0 : index
    %c0_0 = arith.constant 0 : index
    %c0_1 = arith.constant 0 : index
    %1 = vector.load %arg4[%c0, %c0_0, %c0_1] : memref<10x10x16xbf16, #tpu.memory_space<vmem>>, vector<10x10x16xbf16>
    tpu.vector_store %arg4[%c0, %c0_0, %c0_1], %0 {strides = array<i32>} : memref<10x10x16xbf16, #tpu.memory_space<vmem>>, vector<10x10x16xbf16>,
    %c0_i32 = arith.constant 0 : i32
    %c8_i32 = arith.constant 8 : i32
    %2 = arith.addi %c0_i32, %c8_i32 : i32
    %c1_i32 = arith.constant 1 : i32
    scf.for %arg6 = %c0_i32 to %2 step %c1_i32  : i32 {
      %c0_15 = arith.constant 0 : index
      %16 = arith.index_cast %arg6 : i32 to index
      %c0_16 = arith.constant 0 : index
      %c0_17 = arith.constant 0 : index
      %17 = vector.load %arg1[%c0_15, %16, %c0_16, %c0_17] : memref<1x8x8x16xbf16, #tpu.memory_space<vmem>>, vector<1x1x8x16xbf16>
      %18 = vector.shape_cast %17 : vector<1x1x8x16xbf16> to vector<8x16xbf16>
      %c1_i32_18 = arith.constant 1 : i32
      %19 = arith.addi %arg6, %c1_i32_18 : i32
      %20 = arith.index_cast %19 : i32 to index
      %c1 = arith.constant 1 : index
      %c0_19 = arith.constant 0 : index
      %21 = vector.load %arg4[%20, %c1, %c0_19] : memref<10x10x16xbf16, #tpu.memory_space<vmem>>, vector<1x8x16xbf16>
      %22 = vector.shape_cast %21 : vector<1x8x16xbf16> to vector<8x16xbf16>
      %23 = vector.shape_cast %18 : vector<8x16xbf16> to vector<1x8x16xbf16>
      tpu.vector_store %arg4[%20, %c1, %c0_19], %23 {strides = array<i32>} : memref<10x10x16xbf16, #tpu.memory_space<vmem>>, vector<1x8x16xbf16>,
    }
    %c8_i32_2 = arith.constant 8 : i32
    %cst_3 = arith.constant 0.000000e+00 : f32
    %3 = vector.broadcast %cst_3 : f32 to vector<1x8xf32>
    %c0_i32_4 = arith.constant 0 : i32
    %c8_i32_5 = arith.constant 8 : i32
    %4 = arith.addi %c0_i32_4, %c8_i32_5 : i32
    %c1_i32_6 = arith.constant 1 : i32
    %5:2 = scf.for %arg6 = %c0_i32_4 to %4 step %c1_i32_6 iter_args(%arg7 = %3, %arg8 = %3) -> (vector<1x8xf32>, vector<1x8xf32>)  : i32 {
      %c0_i32_15 = arith.constant 0 : i32
      %16 = arith.addi %arg6, %c0_i32_15 : i32
      %c0_i32_16 = arith.constant 0 : i32
      %17 = arith.addi %16, %c0_i32_16 : i32
      %18 = arith.index_cast %17 : i32 to index
      %c0_17 = arith.constant 0 : index
      %c0_18 = arith.constant 0 : index
      %19 = vector.load %arg4[%18, %c0_17, %c0_18] : memref<10x10x16xbf16, #tpu.memory_space<vmem>>, vector<1x8x16xbf16>
      %20 = vector.shape_cast %19 : vector<1x8x16xbf16> to vector<8x16xbf16>
      %c0_19 = arith.constant 0 : index
      %c0_20 = arith.constant 0 : index
      %c0_21 = arith.constant 0 : index
      %c0_22 = arith.constant 0 : index
      %21 = vector.load %arg2[%c0_19, %c0_20, %c0_21, %c0_22] : memref<4x4x16x8xbf16, #tpu.memory_space<vmem>>, vector<1x1x16x8xbf16>
      %22 = vector.shape_cast %21 : vector<1x1x16x8xbf16> to vector<16x8xbf16>
      %cst_23 = arith.constant dense<0.000000e+00> : vector<8x8xf32>
      %23 = tpu.matmul %20, %22, %cst_23 {dimension_numbers = #tpu.dot_dimension_numbers<[1], [0], [0], [1], [0, 0, 1, 1], [], []>} : vector<8x16xbf16>, vector<16x8xbf16>, vector<8x8xf32> -> vector<8x8xf32>
      %c0_i32_24 = arith.constant 0 : i32
      %24 = arith.addi %arg6, %c0_i32_24 : i32
      %c0_i32_25 = arith.constant 0 : i32
      %25 = arith.addi %24, %c0_i32_25 : i32
      %26 = arith.index_cast %25 : i32 to index
      %c1 = arith.constant 1 : index
      %c0_26 = arith.constant 0 : index
      %27 = vector.load %arg4[%26, %c1, %c0_26] : memref<10x10x16xbf16, #tpu.memory_space<vmem>>, vector<1x8x16xbf16>
      %28 = vector.shape_cast %27 : vector<1x8x16xbf16> to vector<8x16xbf16>
      %c0_27 = arith.constant 0 : index
      %c1_28 = arith.constant 1 : index
      %c0_29 = arith.constant 0 : index
      %c0_30 = arith.constant 0 : index
      %29 = vector.load %arg2[%c0_27, %c1_28, %c0_29, %c0_30] : memref<4x4x16x8xbf16, #tpu.memory_space<vmem>>, vector<1x1x16x8xbf16>
      %30 = vector.shape_cast %29 : vector<1x1x16x8xbf16> to vector<16x8xbf16>
      %cst_31 = arith.constant dense<0.000000e+00> : vector<8x8xf32>
      %31 = tpu.matmul %28, %30, %cst_31 {dimension_numbers = #tpu.dot_dimension_numbers<[1], [0], [0], [1], [0, 0, 1, 1], [], []>} : vector<8x16xbf16>, vector<16x8xbf16>, vector<8x8xf32> -> vector<8x8xf32>
      %32 = arith.addf %23, %31 : vector<8x8xf32>
      %c0_i32_32 = arith.constant 0 : i32
      %33 = arith.addi %arg6, %c0_i32_32 : i32
      %c1_i32_33 = arith.constant 1 : i32
      %34 = arith.addi %33, %c1_i32_33 : i32
      %35 = arith.index_cast %34 : i32 to index
      %c0_34 = arith.constant 0 : index
      %c0_35 = arith.constant 0 : index
      %36 = vector.load %arg4[%35, %c0_34, %c0_35] : memref<10x10x16xbf16, #tpu.memory_space<vmem>>, vector<1x8x16xbf16>
      %37 = vector.shape_cast %36 : vector<1x8x16xbf16> to vector<8x16xbf16>
      %c0_36 = arith.constant 0 : index
      %c2 = arith.constant 2 : index
      %c0_37 = arith.constant 0 : index
      %c0_38 = arith.constant 0 : index
      %38 = vector.load %arg2[%c0_36, %c2, %c0_37, %c0_38] : memref<4x4x16x8xbf16, #tpu.memory_space<vmem>>, vector<1x1x16x8xbf16>
      %39 = vector.shape_cast %38 : vector<1x1x16x8xbf16> to vector<16x8xbf16>
      %cst_39 = arith.constant dense<0.000000e+00> : vector<8x8xf32>
      %40 = tpu.matmul %37, %39, %cst_39 {dimension_numbers = #tpu.dot_dimension_numbers<[1], [0], [0], [1], [0, 0, 1, 1], [], []>} : vector<8x16xbf16>, vector<16x8xbf16>, vector<8x8xf32> -> vector<8x8xf32>
      %41 = arith.addf %32, %40 : vector<8x8xf32>
      %c0_i32_40 = arith.constant 0 : i32
      %42 = arith.addi %arg6, %c0_i32_40 : i32
      %c1_i32_41 = arith.constant 1 : i32
      %43 = arith.addi %42, %c1_i32_41 : i32
      %44 = arith.index_cast %43 : i32 to index
      %c1_42 = arith.constant 1 : index
      %c0_43 = arith.constant 0 : index
      %45 = vector.load %arg4[%44, %c1_42, %c0_43] : memref<10x10x16xbf16, #tpu.memory_space<vmem>>, vector<1x8x16xbf16>
      %46 = vector.shape_cast %45 : vector<1x8x16xbf16> to vector<8x16xbf16>
      %c0_44 = arith.constant 0 : index
      %c3 = arith.constant 3 : index
      %c0_45 = arith.constant 0 : index
      %c0_46 = arith.constant 0 : index
      %47 = vector.load %arg2[%c0_44, %c3, %c0_45, %c0_46] : memref<4x4x16x8xbf16, #tpu.memory_space<vmem>>, vector<1x1x16x8xbf16>
      %48 = vector.shape_cast %47 : vector<1x1x16x8xbf16> to vector<16x8xbf16>
      %cst_47 = arith.constant dense<0.000000e+00> : vector<8x8xf32>
      %49 = tpu.matmul %46, %48, %cst_47 {dimension_numbers = #tpu.dot_dimension_numbers<[1], [0], [0], [1], [0, 0, 1, 1], [], []>} : vector<8x16xbf16>, vector<16x8xbf16>, vector<8x8xf32> -> vector<8x8xf32>
      %50 = arith.addf %41, %49 : vector<8x8xf32>
      %c0_48 = arith.constant 0 : index
      %51 = arith.index_cast %arg6 : i32 to index
      %c0_49 = arith.constant 0 : index
      %c0_50 = arith.constant 0 : index
      %52 = vector.load %arg5[%c0_48, %51, %c0_49, %c0_50] : memref<4x8x8x8xf32, #tpu.memory_space<vmem>>, vector<1x1x8x8xf32>
      %53 = vector.shape_cast %52 : vector<1x1x8x8xf32> to vector<8x8xf32>
      %54 = vector.shape_cast %50 : vector<8x8xf32> to vector<1x1x8x8xf32>
      tpu.vector_store %arg5[%c0_48, %51, %c0_49, %c0_50], %54 {strides = array<i32>} : memref<4x8x8x8xf32, #tpu.memory_space<vmem>>, vector<1x1x8x8xf32>,
      %cst_51 = arith.constant dense<0.000000e+00> : vector<8xf32>
      %55 = vector.multi_reduction <add>, %50, %cst_51 [0] : vector<8x8xf32> to vector<8xf32>
      %56 = vector.shape_cast %55 : vector<8xf32> to vector<1x8xf32>
      %57 = arith.addf %arg7, %56 : vector<1x8xf32>
      %58 = arith.mulf %50, %50 : vector<8x8xf32>
      %cst_52 = arith.constant dense<0.000000e+00> : vector<8xf32>
      %59 = vector.multi_reduction <add>, %58, %cst_52 [0] : vector<8x8xf32> to vector<8xf32>
      %60 = vector.shape_cast %59 : vector<8xf32> to vector<1x8xf32>
      %61 = arith.addf %arg8, %60 : vector<1x8xf32>
      %c0_i32_53 = arith.constant 0 : i32
      %62 = arith.addi %arg6, %c0_i32_53 : i32
      %c0_i32_54 = arith.constant 0 : i32
      %63 = arith.addi %62, %c0_i32_54 : i32
      %64 = arith.index_cast %63 : i32 to index
      %c1_55 = arith.constant 1 : index
      %c0_56 = arith.constant 0 : index
      %65 = vector.load %arg4[%64, %c1_55, %c0_56] : memref<10x10x16xbf16, #tpu.memory_space<vmem>>, vector<1x8x16xbf16>
      %66 = vector.shape_cast %65 : vector<1x8x16xbf16> to vector<8x16xbf16>
      %c1_57 = arith.constant 1 : index
      %c0_58 = arith.constant 0 : index
      %c0_59 = arith.constant 0 : index
      %c0_60 = arith.constant 0 : index
      %67 = vector.load %arg2[%c1_57, %c0_58, %c0_59, %c0_60] : memref<4x4x16x8xbf16, #tpu.memory_space<vmem>>, vector<1x1x16x8xbf16>
      %68 = vector.shape_cast %67 : vector<1x1x16x8xbf16> to vector<16x8xbf16>
      %cst_61 = arith.constant dense<0.000000e+00> : vector<8x8xf32>
      %69 = tpu.matmul %66, %68, %cst_61 {dimension_numbers = #tpu.dot_dimension_numbers<[1], [0], [0], [1], [0, 0, 1, 1], [], []>} : vector<8x16xbf16>, vector<16x8xbf16>, vector<8x8xf32> -> vector<8x8xf32>
      %c0_i32_62 = arith.constant 0 : i32
      %70 = arith.addi %arg6, %c0_i32_62 : i32
      %c0_i32_63 = arith.constant 0 : i32
      %71 = arith.addi %70, %c0_i32_63 : i32
      %72 = arith.index_cast %71 : i32 to index
      %c2_64 = arith.constant 2 : index
      %c0_65 = arith.constant 0 : index
      %73 = vector.load %arg4[%72, %c2_64, %c0_65] : memref<10x10x16xbf16, #tpu.memory_space<vmem>>, vector<1x8x16xbf16>
      %74 = vector.shape_cast %73 : vector<1x8x16xbf16> to vector<8x16xbf16>
      %c1_66 = arith.constant 1 : index
      %c1_67 = arith.constant 1 : index
      %c0_68 = arith.constant 0 : index
      %c0_69 = arith.constant 0 : index
      %75 = vector.load %arg2[%c1_66, %c1_67, %c0_68, %c0_69] : memref<4x4x16x8xbf16, #tpu.memory_space<vmem>>, vector<1x1x16x8xbf16>
      %76 = vector.shape_cast %75 : vector<1x1x16x8xbf16> to vector<16x8xbf16>
      %cst_70 = arith.constant dense<0.000000e+00> : vector<8x8xf32>
      %77 = tpu.matmul %74, %76, %cst_70 {dimension_numbers = #tpu.dot_dimension_numbers<[1], [0], [0], [1], [0, 0, 1, 1], [], []>} : vector<8x16xbf16>, vector<16x8xbf16>, vector<8x8xf32> -> vector<8x8xf32>
      %78 = arith.addf %69, %77 : vector<8x8xf32>
      %c0_i32_71 = arith.constant 0 : i32
      %79 = arith.addi %arg6, %c0_i32_71 : i32
      %c1_i32_72 = arith.constant 1 : i32
      %80 = arith.addi %79, %c1_i32_72 : i32
      %81 = arith.index_cast %80 : i32 to index
      %c1_73 = arith.constant 1 : index
      %c0_74 = arith.constant 0 : index
      %82 = vector.load %arg4[%81, %c1_73, %c0_74] : memref<10x10x16xbf16, #tpu.memory_space<vmem>>, vector<1x8x16xbf16>
      %83 = vector.shape_cast %82 : vector<1x8x16xbf16> to vector<8x16xbf16>
      %c1_75 = arith.constant 1 : index
      %c2_76 = arith.constant 2 : index
      %c0_77 = arith.constant 0 : index
      %c0_78 = arith.constant 0 : index
      %84 = vector.load %arg2[%c1_75, %c2_76, %c0_77, %c0_78] : memref<4x4x16x8xbf16, #tpu.memory_space<vmem>>, vector<1x1x16x8xbf16>
      %85 = vector.shape_cast %84 : vector<1x1x16x8xbf16> to vector<16x8xbf16>
      %cst_79 = arith.constant dense<0.000000e+00> : vector<8x8xf32>
      %86 = tpu.matmul %83, %85, %cst_79 {dimension_numbers = #tpu.dot_dimension_numbers<[1], [0], [0], [1], [0, 0, 1, 1], [], []>} : vector<8x16xbf16>, vector<16x8xbf16>, vector<8x8xf32> -> vector<8x8xf32>
      %87 = arith.addf %78, %86 : vector<8x8xf32>
      %c0_i32_80 = arith.constant 0 : i32
      %88 = arith.addi %arg6, %c0_i32_80 : i32
      %c1_i32_81 = arith.constant 1 : i32
      %89 = arith.addi %88, %c1_i32_81 : i32
      %90 = arith.index_cast %89 : i32 to index
      %c2_82 = arith.constant 2 : index
      %c0_83 = arith.constant 0 : index
      %91 = vector.load %arg4[%90, %c2_82, %c0_83] : memref<10x10x16xbf16, #tpu.memory_space<vmem>>, vector<1x8x16xbf16>
      %92 = vector.shape_cast %91 : vector<1x8x16xbf16> to vector<8x16xbf16>
      %c1_84 = arith.constant 1 : index
      %c3_85 = arith.constant 3 : index
      %c0_86 = arith.constant 0 : index
      %c0_87 = arith.constant 0 : index
      %93 = vector.load %arg2[%c1_84, %c3_85, %c0_86, %c0_87] : memref<4x4x16x8xbf16, #tpu.memory_space<vmem>>, vector<1x1x16x8xbf16>
      %94 = vector.shape_cast %93 : vector<1x1x16x8xbf16> to vector<16x8xbf16>
      %cst_88 = arith.constant dense<0.000000e+00> : vector<8x8xf32>
      %95 = tpu.matmul %92, %94, %cst_88 {dimension_numbers = #tpu.dot_dimension_numbers<[1], [0], [0], [1], [0, 0, 1, 1], [], []>} : vector<8x16xbf16>, vector<16x8xbf16>, vector<8x8xf32> -> vector<8x8xf32>
      %96 = arith.addf %87, %95 : vector<8x8xf32>
      %c1_89 = arith.constant 1 : index
      %97 = arith.index_cast %arg6 : i32 to index
      %c0_90 = arith.constant 0 : index
      %c0_91 = arith.constant 0 : index
      %98 = vector.load %arg5[%c1_89, %97, %c0_90, %c0_91] : memref<4x8x8x8xf32, #tpu.memory_space<vmem>>, vector<1x1x8x8xf32>
      %99 = vector.shape_cast %98 : vector<1x1x8x8xf32> to vector<8x8xf32>
      %100 = vector.shape_cast %96 : vector<8x8xf32> to vector<1x1x8x8xf32>
      tpu.vector_store %arg5[%c1_89, %97, %c0_90, %c0_91], %100 {strides = array<i32>} : memref<4x8x8x8xf32, #tpu.memory_space<vmem>>, vector<1x1x8x8xf32>,
      %cst_92 = arith.constant dense<0.000000e+00> : vector<8xf32>
      %101 = vector.multi_reduction <add>, %96, %cst_92 [0] : vector<8x8xf32> to vector<8xf32>
      %102 = vector.shape_cast %101 : vector<8xf32> to vector<1x8xf32>
      %103 = arith.addf %57, %102 : vector<1x8xf32>
      %104 = arith.mulf %96, %96 : vector<8x8xf32>
      %cst_93 = arith.constant dense<0.000000e+00> : vector<8xf32>
      %105 = vector.multi_reduction <add>, %104, %cst_93 [0] : vector<8x8xf32> to vector<8xf32>
      %106 = vector.shape_cast %105 : vector<8xf32> to vector<1x8xf32>
      %107 = arith.addf %61, %106 : vector<1x8xf32>
      %c1_i32_94 = arith.constant 1 : i32
      %108 = arith.addi %arg6, %c1_i32_94 : i32
      %c0_i32_95 = arith.constant 0 : i32
      %109 = arith.addi %108, %c0_i32_95 : i32
      %110 = arith.index_cast %109 : i32 to index
      %c0_96 = arith.constant 0 : index
      %c0_97 = arith.constant 0 : index
      %111 = vector.load %arg4[%110, %c0_96, %c0_97] : memref<10x10x16xbf16, #tpu.memory_space<vmem>>, vector<1x8x16xbf16>
      %112 = vector.shape_cast %111 : vector<1x8x16xbf16> to vector<8x16xbf16>
      %c2_98 = arith.constant 2 : index
      %c0_99 = arith.constant 0 : index
      %c0_100 = arith.constant 0 : index
      %c0_101 = arith.constant 0 : index
      %113 = vector.load %arg2[%c2_98, %c0_99, %c0_100, %c0_101] : memref<4x4x16x8xbf16, #tpu.memory_space<vmem>>, vector<1x1x16x8xbf16>
      %114 = vector.shape_cast %113 : vector<1x1x16x8xbf16> to vector<16x8xbf16>
      %cst_102 = arith.constant dense<0.000000e+00> : vector<8x8xf32>
      %115 = tpu.matmul %112, %114, %cst_102 {dimension_numbers = #tpu.dot_dimension_numbers<[1], [0], [0], [1], [0, 0, 1, 1], [], []>} : vector<8x16xbf16>, vector<16x8xbf16>, vector<8x8xf32> -> vector<8x8xf32>
      %c1_i32_103 = arith.constant 1 : i32
      %116 = arith.addi %arg6, %c1_i32_103 : i32
      %c0_i32_104 = arith.constant 0 : i32
      %117 = arith.addi %116, %c0_i32_104 : i32
      %118 = arith.index_cast %117 : i32 to index
      %c1_105 = arith.constant 1 : index
      %c0_106 = arith.constant 0 : index
      %119 = vector.load %arg4[%118, %c1_105, %c0_106] : memref<10x10x16xbf16, #tpu.memory_space<vmem>>, vector<1x8x16xbf16>
      %120 = vector.shape_cast %119 : vector<1x8x16xbf16> to vector<8x16xbf16>
      %c2_107 = arith.constant 2 : index
      %c1_108 = arith.constant 1 : index
      %c0_109 = arith.constant 0 : index
      %c0_110 = arith.constant 0 : index
      %121 = vector.load %arg2[%c2_107, %c1_108, %c0_109, %c0_110] : memref<4x4x16x8xbf16, #tpu.memory_space<vmem>>, vector<1x1x16x8xbf16>
      %122 = vector.shape_cast %121 : vector<1x1x16x8xbf16> to vector<16x8xbf16>
      %cst_111 = arith.constant dense<0.000000e+00> : vector<8x8xf32>
      %123 = tpu.matmul %120, %122, %cst_111 {dimension_numbers = #tpu.dot_dimension_numbers<[1], [0], [0], [1], [0, 0, 1, 1], [], []>} : vector<8x16xbf16>, vector<16x8xbf16>, vector<8x8xf32> -> vector<8x8xf32>
      %124 = arith.addf %115, %123 : vector<8x8xf32>
      %c1_i32_112 = arith.constant 1 : i32
      %125 = arith.addi %arg6, %c1_i32_112 : i32
      %c1_i32_113 = arith.constant 1 : i32
      %126 = arith.addi %125, %c1_i32_113 : i32
      %127 = arith.index_cast %126 : i32 to index
      %c0_114 = arith.constant 0 : index
      %c0_115 = arith.constant 0 : index
      %128 = vector.load %arg4[%127, %c0_114, %c0_115] : memref<10x10x16xbf16, #tpu.memory_space<vmem>>, vector<1x8x16xbf16>
      %129 = vector.shape_cast %128 : vector<1x8x16xbf16> to vector<8x16xbf16>
      %c2_116 = arith.constant 2 : index
      %c2_117 = arith.constant 2 : index
      %c0_118 = arith.constant 0 : index
      %c0_119 = arith.constant 0 : index
      %130 = vector.load %arg2[%c2_116, %c2_117, %c0_118, %c0_119] : memref<4x4x16x8xbf16, #tpu.memory_space<vmem>>, vector<1x1x16x8xbf16>
      %131 = vector.shape_cast %130 : vector<1x1x16x8xbf16> to vector<16x8xbf16>
      %cst_120 = arith.constant dense<0.000000e+00> : vector<8x8xf32>
      %132 = tpu.matmul %129, %131, %cst_120 {dimension_numbers = #tpu.dot_dimension_numbers<[1], [0], [0], [1], [0, 0, 1, 1], [], []>} : vector<8x16xbf16>, vector<16x8xbf16>, vector<8x8xf32> -> vector<8x8xf32>
      %133 = arith.addf %124, %132 : vector<8x8xf32>
      %c1_i32_121 = arith.constant 1 : i32
      %134 = arith.addi %arg6, %c1_i32_121 : i32
      %c1_i32_122 = arith.constant 1 : i32
      %135 = arith.addi %134, %c1_i32_122 : i32
      %136 = arith.index_cast %135 : i32 to index
      %c1_123 = arith.constant 1 : index
      %c0_124 = arith.constant 0 : index
      %137 = vector.load %arg4[%136, %c1_123, %c0_124] : memref<10x10x16xbf16, #tpu.memory_space<vmem>>, vector<1x8x16xbf16>
      %138 = vector.shape_cast %137 : vector<1x8x16xbf16> to vector<8x16xbf16>
      %c2_125 = arith.constant 2 : index
      %c3_126 = arith.constant 3 : index
      %c0_127 = arith.constant 0 : index
      %c0_128 = arith.constant 0 : index
      %139 = vector.load %arg2[%c2_125, %c3_126, %c0_127, %c0_128] : memref<4x4x16x8xbf16, #tpu.memory_space<vmem>>, vector<1x1x16x8xbf16>
      %140 = vector.shape_cast %139 : vector<1x1x16x8xbf16> to vector<16x8xbf16>
      %cst_129 = arith.constant dense<0.000000e+00> : vector<8x8xf32>
      %141 = tpu.matmul %138, %140, %cst_129 {dimension_numbers = #tpu.dot_dimension_numbers<[1], [0], [0], [1], [0, 0, 1, 1], [], []>} : vector<8x16xbf16>, vector<16x8xbf16>, vector<8x8xf32> -> vector<8x8xf32>
      %142 = arith.addf %133, %141 : vector<8x8xf32>
      %c2_130 = arith.constant 2 : index
      %143 = arith.index_cast %arg6 : i32 to index
      %c0_131 = arith.constant 0 : index
      %c0_132 = arith.constant 0 : index
      %144 = vector.load %arg5[%c2_130, %143, %c0_131, %c0_132] : memref<4x8x8x8xf32, #tpu.memory_space<vmem>>, vector<1x1x8x8xf32>
      %145 = vector.shape_cast %144 : vector<1x1x8x8xf32> to vector<8x8xf32>
      %146 = vector.shape_cast %142 : vector<8x8xf32> to vector<1x1x8x8xf32>
      tpu.vector_store %arg5[%c2_130, %143, %c0_131, %c0_132], %146 {strides = array<i32>} : memref<4x8x8x8xf32, #tpu.memory_space<vmem>>, vector<1x1x8x8xf32>,
      %cst_133 = arith.constant dense<0.000000e+00> : vector<8xf32>
      %147 = vector.multi_reduction <add>, %142, %cst_133 [0] : vector<8x8xf32> to vector<8xf32>
      %148 = vector.shape_cast %147 : vector<8xf32> to vector<1x8xf32>
      %149 = arith.addf %103, %148 : vector<1x8xf32>
      %150 = arith.mulf %142, %142 : vector<8x8xf32>
      %cst_134 = arith.constant dense<0.000000e+00> : vector<8xf32>
      %151 = vector.multi_reduction <add>, %150, %cst_134 [0] : vector<8x8xf32> to vector<8xf32>
      %152 = vector.shape_cast %151 : vector<8xf32> to vector<1x8xf32>
      %153 = arith.addf %107, %152 : vector<1x8xf32>
      %c1_i32_135 = arith.constant 1 : i32
      %154 = arith.addi %arg6, %c1_i32_135 : i32
      %c0_i32_136 = arith.constant 0 : i32
      %155 = arith.addi %154, %c0_i32_136 : i32
      %156 = arith.index_cast %155 : i32 to index
      %c1_137 = arith.constant 1 : index
      %c0_138 = arith.constant 0 : index
      %157 = vector.load %arg4[%156, %c1_137, %c0_138] : memref<10x10x16xbf16, #tpu.memory_space<vmem>>, vector<1x8x16xbf16>
      %158 = vector.shape_cast %157 : vector<1x8x16xbf16> to vector<8x16xbf16>
      %c3_139 = arith.constant 3 : index
      %c0_140 = arith.constant 0 : index
      %c0_141 = arith.constant 0 : index
      %c0_142 = arith.constant 0 : index
      %159 = vector.load %arg2[%c3_139, %c0_140, %c0_141, %c0_142] : memref<4x4x16x8xbf16, #tpu.memory_space<vmem>>, vector<1x1x16x8xbf16>
      %160 = vector.shape_cast %159 : vector<1x1x16x8xbf16> to vector<16x8xbf16>
      %cst_143 = arith.constant dense<0.000000e+00> : vector<8x8xf32>
      %161 = tpu.matmul %158, %160, %cst_143 {dimension_numbers = #tpu.dot_dimension_numbers<[1], [0], [0], [1], [0, 0, 1, 1], [], []>} : vector<8x16xbf16>, vector<16x8xbf16>, vector<8x8xf32> -> vector<8x8xf32>
      %c1_i32_144 = arith.constant 1 : i32
      %162 = arith.addi %arg6, %c1_i32_144 : i32
      %c0_i32_145 = arith.constant 0 : i32
      %163 = arith.addi %162, %c0_i32_145 : i32
      %164 = arith.index_cast %163 : i32 to index
      %c2_146 = arith.constant 2 : index
      %c0_147 = arith.constant 0 : index
      %165 = vector.load %arg4[%164, %c2_146, %c0_147] : memref<10x10x16xbf16, #tpu.memory_space<vmem>>, vector<1x8x16xbf16>
      %166 = vector.shape_cast %165 : vector<1x8x16xbf16> to vector<8x16xbf16>
      %c3_148 = arith.constant 3 : index
      %c1_149 = arith.constant 1 : index
      %c0_150 = arith.constant 0 : index
      %c0_151 = arith.constant 0 : index
      %167 = vector.load %arg2[%c3_148, %c1_149, %c0_150, %c0_151] : memref<4x4x16x8xbf16, #tpu.memory_space<vmem>>, vector<1x1x16x8xbf16>
      %168 = vector.shape_cast %167 : vector<1x1x16x8xbf16> to vector<16x8xbf16>
      %cst_152 = arith.constant dense<0.000000e+00> : vector<8x8xf32>
      %169 = tpu.matmul %166, %168, %cst_152 {dimension_numbers = #tpu.dot_dimension_numbers<[1], [0], [0], [1], [0, 0, 1, 1], [], []>} : vector<8x16xbf16>, vector<16x8xbf16>, vector<8x8xf32> -> vector<8x8xf32>
      %170 = arith.addf %161, %169 : vector<8x8xf32>
      %c1_i32_153 = arith.constant 1 : i32
      %171 = arith.addi %arg6, %c1_i32_153 : i32
      %c1_i32_154 = arith.constant 1 : i32
      %172 = arith.addi %171, %c1_i32_154 : i32
      %173 = arith.index_cast %172 : i32 to index
      %c1_155 = arith.constant 1 : index
      %c0_156 = arith.constant 0 : index
      %174 = vector.load %arg4[%173, %c1_155, %c0_156] : memref<10x10x16xbf16, #tpu.memory_space<vmem>>, vector<1x8x16xbf16>
      %175 = vector.shape_cast %174 : vector<1x8x16xbf16> to vector<8x16xbf16>
      %c3_157 = arith.constant 3 : index
      %c2_158 = arith.constant 2 : index
      %c0_159 = arith.constant 0 : index
      %c0_160 = arith.constant 0 : index
      %176 = vector.load %arg2[%c3_157, %c2_158, %c0_159, %c0_160] : memref<4x4x16x8xbf16, #tpu.memory_space<vmem>>, vector<1x1x16x8xbf16>
      %177 = vector.shape_cast %176 : vector<1x1x16x8xbf16> to vector<16x8xbf16>
      %cst_161 = arith.constant dense<0.000000e+00> : vector<8x8xf32>
      %178 = tpu.matmul %175, %177, %cst_161 {dimension_numbers = #tpu.dot_dimension_numbers<[1], [0], [0], [1], [0, 0, 1, 1], [], []>} : vector<8x16xbf16>, vector<16x8xbf16>, vector<8x8xf32> -> vector<8x8xf32>
      %179 = arith.addf %170, %178 : vector<8x8xf32>
      %c1_i32_162 = arith.constant 1 : i32
      %180 = arith.addi %arg6, %c1_i32_162 : i32
      %c1_i32_163 = arith.constant 1 : i32
      %181 = arith.addi %180, %c1_i32_163 : i32
      %182 = arith.index_cast %181 : i32 to index
      %c2_164 = arith.constant 2 : index
      %c0_165 = arith.constant 0 : index
      %183 = vector.load %arg4[%182, %c2_164, %c0_165] : memref<10x10x16xbf16, #tpu.memory_space<vmem>>, vector<1x8x16xbf16>
      %184 = vector.shape_cast %183 : vector<1x8x16xbf16> to vector<8x16xbf16>
      %c3_166 = arith.constant 3 : index
      %c3_167 = arith.constant 3 : index
      %c0_168 = arith.constant 0 : index
      %c0_169 = arith.constant 0 : index
      %185 = vector.load %arg2[%c3_166, %c3_167, %c0_168, %c0_169] : memref<4x4x16x8xbf16, #tpu.memory_space<vmem>>, vector<1x1x16x8xbf16>
      %186 = vector.shape_cast %185 : vector<1x1x16x8xbf16> to vector<16x8xbf16>
      %cst_170 = arith.constant dense<0.000000e+00> : vector<8x8xf32>
      %187 = tpu.matmul %184, %186, %cst_170 {dimension_numbers = #tpu.dot_dimension_numbers<[1], [0], [0], [1], [0, 0, 1, 1], [], []>} : vector<8x16xbf16>, vector<16x8xbf16>, vector<8x8xf32> -> vector<8x8xf32>
      %188 = arith.addf %179, %187 : vector<8x8xf32>
      %c3_171 = arith.constant 3 : index
      %189 = arith.index_cast %arg6 : i32 to index
      %c0_172 = arith.constant 0 : index
      %c0_173 = arith.constant 0 : index
      %190 = vector.load %arg5[%c3_171, %189, %c0_172, %c0_173] : memref<4x8x8x8xf32, #tpu.memory_space<vmem>>, vector<1x1x8x8xf32>
      %191 = vector.shape_cast %190 : vector<1x1x8x8xf32> to vector<8x8xf32>
      %192 = vector.shape_cast %188 : vector<8x8xf32> to vector<1x1x8x8xf32>
      tpu.vector_store %arg5[%c3_171, %189, %c0_172, %c0_173], %192 {strides = array<i32>} : memref<4x8x8x8xf32, #tpu.memory_space<vmem>>, vector<1x1x8x8xf32>,
      %cst_174 = arith.constant dense<0.000000e+00> : vector<8xf32>
      %193 = vector.multi_reduction <add>, %188, %cst_174 [0] : vector<8x8xf32> to vector<8xf32>
      %194 = vector.shape_cast %193 : vector<8xf32> to vector<1x8xf32>
      %195 = arith.addf %149, %194 : vector<1x8xf32>
      %196 = arith.mulf %188, %188 : vector<8x8xf32>
      %cst_175 = arith.constant dense<0.000000e+00> : vector<8xf32>
      %197 = vector.multi_reduction <add>, %196, %cst_175 [0] : vector<8x8xf32> to vector<8xf32>
      %198 = vector.shape_cast %197 : vector<8xf32> to vector<1x8xf32>
      %199 = arith.addf %153, %198 : vector<1x8xf32>
      scf.yield %195, %199 : vector<1x8xf32>, vector<1x8xf32>
    }
    %c8_i32_7 = arith.constant 8 : i32
    %cst_8 = arith.constant 2.560000e+02 : f32
    %6 = vector.broadcast %cst_8 : f32 to vector<1x8xf32>
    %7 = arith.divf %5#0, %6 : vector<1x8xf32>
    %cst_9 = arith.constant 2.560000e+02 : f32
    %8 = vector.broadcast %cst_9 : f32 to vector<1x8xf32>
    %9 = arith.divf %5#1, %8 : vector<1x8xf32>
    %10 = arith.mulf %7, %7 : vector<1x8xf32>
    %11 = arith.subf %9, %10 : vector<1x8xf32>
    %cst_10 = arith.constant 9.99999974E-6 : f32
    %12 = vector.broadcast %cst_10 : f32 to vector<1x8xf32>
    %13 = arith.addf %11, %12 : vector<1x8xf32>
    %14 = math.rsqrt %13 : vector<1x8xf32>
    %c0_i32_11 = arith.constant 0 : i32
    %c8_i32_12 = arith.constant 8 : i32
    %15 = arith.addi %c0_i32_11, %c8_i32_12 : i32
    %c1_i32_13 = arith.constant 1 : i32
    scf.for %arg6 = %c0_i32_11 to %15 step %c1_i32_13  : i32 {
      %c0_15 = arith.constant 0 : index
      %16 = arith.index_cast %arg6 : i32 to index
      %c0_16 = arith.constant 0 : index
      %c0_17 = arith.constant 0 : index
      %17 = vector.load %arg5[%c0_15, %16, %c0_16, %c0_17] : memref<4x8x8x8xf32, #tpu.memory_space<vmem>>, vector<1x1x8x8xf32>
      %18 = vector.shape_cast %17 : vector<1x1x8x8xf32> to vector<8x8xf32>
      %19 = vector.broadcast %7 : vector<1x8xf32> to vector<8x8xf32>
      %20 = arith.subf %18, %19 : vector<8x8xf32>
      %21 = vector.broadcast %14 : vector<1x8xf32> to vector<8x8xf32>
      %22 = arith.mulf %20, %21 : vector<8x8xf32>
      %cst_18 = arith.constant 0.000000e+00 : f32
      %23 = vector.broadcast %cst_18 : f32 to vector<8x8xf32>
      %24 = arith.maximumf %22, %23 : vector<8x8xf32>
      %25 = arith.truncf %24 : vector<8x8xf32> to vector<8x8xbf16>
      %c0_19 = arith.constant 0 : index
      %26 = arith.index_cast %arg6 : i32 to index
      %c0_20 = arith.constant 0 : index
      %c0_21 = arith.constant 0 : index
      %c0_22 = arith.constant 0 : index
      %27 = vector.load %arg3[%c0_19, %26, %c0_20, %c0_21, %c0_22] : memref<1x8x2x8x16xbf16, #tpu.memory_space<vmem>>, vector<1x1x1x8x8xbf16>
      %28 = vector.shape_cast %27 : vector<1x1x1x8x8xbf16> to vector<8x8xbf16>
      %29 = vector.shape_cast %25 : vector<8x8xbf16> to vector<1x1x1x8x8xbf16>
      tpu.vector_store %arg3[%c0_19, %26, %c0_20, %c0_21, %c0_22], %29 {strides = array<i32>} : memref<1x8x2x8x16xbf16, #tpu.memory_space<vmem>>, vector<1x1x1x8x8xbf16>,
      %c1 = arith.constant 1 : index
      %30 = arith.index_cast %arg6 : i32 to index
      %c0_23 = arith.constant 0 : index
      %c0_24 = arith.constant 0 : index
      %31 = vector.load %arg5[%c1, %30, %c0_23, %c0_24] : memref<4x8x8x8xf32, #tpu.memory_space<vmem>>, vector<1x1x8x8xf32>
      %32 = vector.shape_cast %31 : vector<1x1x8x8xf32> to vector<8x8xf32>
      %33 = vector.broadcast %7 : vector<1x8xf32> to vector<8x8xf32>
      %34 = arith.subf %32, %33 : vector<8x8xf32>
      %35 = vector.broadcast %14 : vector<1x8xf32> to vector<8x8xf32>
      %36 = arith.mulf %34, %35 : vector<8x8xf32>
      %cst_25 = arith.constant 0.000000e+00 : f32
      %37 = vector.broadcast %cst_25 : f32 to vector<8x8xf32>
      %38 = arith.maximumf %36, %37 : vector<8x8xf32>
      %39 = arith.truncf %38 : vector<8x8xf32> to vector<8x8xbf16>
      %c0_26 = arith.constant 0 : index
      %40 = arith.index_cast %arg6 : i32 to index
      %c0_27 = arith.constant 0 : index
      %c0_28 = arith.constant 0 : index
      %c8 = arith.constant 8 : index
      %41 = vector.load %arg3[%c0_26, %40, %c0_27, %c0_28, %c8] : memref<1x8x2x8x16xbf16, #tpu.memory_space<vmem>>, vector<1x1x1x8x8xbf16>
      %42 = vector.shape_cast %41 : vector<1x1x1x8x8xbf16> to vector<8x8xbf16>
      %43 = vector.shape_cast %39 : vector<8x8xbf16> to vector<1x1x1x8x8xbf16>
      tpu.vector_store %arg3[%c0_26, %40, %c0_27, %c0_28, %c8], %43 {strides = array<i32>} : memref<1x8x2x8x16xbf16, #tpu.memory_space<vmem>>, vector<1x1x1x8x8xbf16>,
      %c2 = arith.constant 2 : index
      %44 = arith.index_cast %arg6 : i32 to index
      %c0_29 = arith.constant 0 : index
      %c0_30 = arith.constant 0 : index
      %45 = vector.load %arg5[%c2, %44, %c0_29, %c0_30] : memref<4x8x8x8xf32, #tpu.memory_space<vmem>>, vector<1x1x8x8xf32>
      %46 = vector.shape_cast %45 : vector<1x1x8x8xf32> to vector<8x8xf32>
      %47 = vector.broadcast %7 : vector<1x8xf32> to vector<8x8xf32>
      %48 = arith.subf %46, %47 : vector<8x8xf32>
      %49 = vector.broadcast %14 : vector<1x8xf32> to vector<8x8xf32>
      %50 = arith.mulf %48, %49 : vector<8x8xf32>
      %cst_31 = arith.constant 0.000000e+00 : f32
      %51 = vector.broadcast %cst_31 : f32 to vector<8x8xf32>
      %52 = arith.maximumf %50, %51 : vector<8x8xf32>
      %53 = arith.truncf %52 : vector<8x8xf32> to vector<8x8xbf16>
      %c0_32 = arith.constant 0 : index
      %54 = arith.index_cast %arg6 : i32 to index
      %c1_33 = arith.constant 1 : index
      %c0_34 = arith.constant 0 : index
      %c0_35 = arith.constant 0 : index
      %55 = vector.load %arg3[%c0_32, %54, %c1_33, %c0_34, %c0_35] : memref<1x8x2x8x16xbf16, #tpu.memory_space<vmem>>, vector<1x1x1x8x8xbf16>
      %56 = vector.shape_cast %55 : vector<1x1x1x8x8xbf16> to vector<8x8xbf16>
      %57 = vector.shape_cast %53 : vector<8x8xbf16> to vector<1x1x1x8x8xbf16>
      tpu.vector_store %arg3[%c0_32, %54, %c1_33, %c0_34, %c0_35], %57 {strides = array<i32>} : memref<1x8x2x8x16xbf16, #tpu.memory_space<vmem>>, vector<1x1x1x8x8xbf16>,
      %c3 = arith.constant 3 : index
      %58 = arith.index_cast %arg6 : i32 to index
      %c0_36 = arith.constant 0 : index
      %c0_37 = arith.constant 0 : index
      %59 = vector.load %arg5[%c3, %58, %c0_36, %c0_37] : memref<4x8x8x8xf32, #tpu.memory_space<vmem>>, vector<1x1x8x8xf32>
      %60 = vector.shape_cast %59 : vector<1x1x8x8xf32> to vector<8x8xf32>
      %61 = vector.broadcast %7 : vector<1x8xf32> to vector<8x8xf32>
      %62 = arith.subf %60, %61 : vector<8x8xf32>
      %63 = vector.broadcast %14 : vector<1x8xf32> to vector<8x8xf32>
      %64 = arith.mulf %62, %63 : vector<8x8xf32>
      %cst_38 = arith.constant 0.000000e+00 : f32
      %65 = vector.broadcast %cst_38 : f32 to vector<8x8xf32>
      %66 = arith.maximumf %64, %65 : vector<8x8xf32>
      %67 = arith.truncf %66 : vector<8x8xf32> to vector<8x8xbf16>
      %c0_39 = arith.constant 0 : index
      %68 = arith.index_cast %arg6 : i32 to index
      %c1_40 = arith.constant 1 : index
      %c0_41 = arith.constant 0 : index
      %c8_42 = arith.constant 8 : index
      %69 = vector.load %arg3[%c0_39, %68, %c1_40, %c0_41, %c8_42] : memref<1x8x2x8x16xbf16, #tpu.memory_space<vmem>>, vector<1x1x1x8x8xbf16>
      %70 = vector.shape_cast %69 : vector<1x1x1x8x8xbf16> to vector<8x8xbf16>
      %71 = vector.shape_cast %67 : vector<8x8xbf16> to vector<1x1x1x8x8xbf16>
      tpu.vector_store %arg3[%c0_39, %68, %c1_40, %c0_41, %c8_42], %71 {strides = array<i32>} : memref<1x8x2x8x16xbf16, #tpu.memory_space<vmem>>, vector<1x1x1x8x8xbf16>,
    }
    %c8_i32_14 = arith.constant 8 : i32
    return
  }
  func.func @transform_0(%arg0: i32) -> (i32, i32, i32, i32) {
    %c0_i32 = arith.constant 0 : i32
    %c0_i32_0 = arith.constant 0 : i32
    %c0_i32_1 = arith.constant 0 : i32
    %c0_i32_2 = arith.constant 0 : i32
    return %arg0, %c0_i32, %c0_i32_0, %c0_i32_1 : i32, i32, i32, i32
  }
  func.func @transform_1(%arg0: i32) -> (i32, i32, i32, i32) {
    %c0_i32 = arith.constant 0 : i32
    %c0_i32_0 = arith.constant 0 : i32
    %c0_i32_1 = arith.constant 0 : i32
    %c0_i32_2 = arith.constant 0 : i32
    %c0_i32_3 = arith.constant 0 : i32
    return %c0_i32, %c0_i32_0, %c0_i32_1, %c0_i32_2 : i32, i32, i32, i32
  }
  func.func @transform_2(%arg0: i32) -> (i32, i32, i32, i32, i32) {
    %c0_i32 = arith.constant 0 : i32
    %c0_i32_0 = arith.constant 0 : i32
    %c0_i32_1 = arith.constant 0 : i32
    %c0_i32_2 = arith.constant 0 : i32
    %c0_i32_3 = arith.constant 0 : i32
    return %arg0, %c0_i32, %c0_i32_0, %c0_i32_1, %c0_i32_2 : i32, i32, i32, i32, i32
  }
}

module attributes {stable_mosaic.version = 11 : i64} {
  func.func @_uplayer_kernel(%arg0: i32, %arg1: memref<1x16x16x8xbf16, #tpu.memory_space<vmem>>, %arg2: memref<4x4x8x4xbf16, #tpu.memory_space<vmem>>, %arg3: memref<1x16x2x16x8xbf16, #tpu.memory_space<vmem>>, %arg4: memref<18x18x8xbf16, #tpu.memory_space<vmem>>, %arg5: memref<4x16x16x4xf32, #tpu.memory_space<vmem>>) attributes {dimension_semantics = [#tpu.dimension_semantics<parallel>], iteration_bounds = array<i64: 2>, scalar_prefetch = 0 : i64, scratch_operands = 2 : i64, tpu.core_type = #tpu.core_type<tc>, window_params = [{transform_indices = @transform_0, window_bounds = array<i64: 1, 16, 16, 8>}, {pipeline_mode = #tpu.pipeline_mode<synchronous>, transform_indices = @transform_1, window_bounds = array<i64: 4, 4, 8, 4>}, {transform_indices = @transform_2, window_bounds = array<i64: 1, 16, 2, 16, 8>}]} {
    %cst = arith.constant 0.000000e+00 : bf16
    %0 = vector.broadcast %cst : bf16 to vector<18x18x8xbf16>
    %c0 = arith.constant 0 : index
    %c0_0 = arith.constant 0 : index
    %c0_1 = arith.constant 0 : index
    %1 = vector.load %arg4[%c0, %c0_0, %c0_1] : memref<18x18x8xbf16, #tpu.memory_space<vmem>>, vector<18x18x8xbf16>
    tpu.vector_store %arg4[%c0, %c0_0, %c0_1], %0 {strides = array<i32>} : memref<18x18x8xbf16, #tpu.memory_space<vmem>>, vector<18x18x8xbf16>,
    %c0_i32 = arith.constant 0 : i32
    %c16_i32 = arith.constant 16 : i32
    %2 = arith.addi %c0_i32, %c16_i32 : i32
    %c1_i32 = arith.constant 1 : i32
    scf.for %arg6 = %c0_i32 to %2 step %c1_i32  : i32 {
      %c0_15 = arith.constant 0 : index
      %16 = arith.index_cast %arg6 : i32 to index
      %c0_16 = arith.constant 0 : index
      %c0_17 = arith.constant 0 : index
      %17 = vector.load %arg1[%c0_15, %16, %c0_16, %c0_17] : memref<1x16x16x8xbf16, #tpu.memory_space<vmem>>, vector<1x1x16x8xbf16>
      %18 = vector.shape_cast %17 : vector<1x1x16x8xbf16> to vector<16x8xbf16>
      %c1_i32_18 = arith.constant 1 : i32
      %19 = arith.addi %arg6, %c1_i32_18 : i32
      %20 = arith.index_cast %19 : i32 to index
      %c1 = arith.constant 1 : index
      %c0_19 = arith.constant 0 : index
      %21 = vector.load %arg4[%20, %c1, %c0_19] : memref<18x18x8xbf16, #tpu.memory_space<vmem>>, vector<1x16x8xbf16>
      %22 = vector.shape_cast %21 : vector<1x16x8xbf16> to vector<16x8xbf16>
      %23 = vector.shape_cast %18 : vector<16x8xbf16> to vector<1x16x8xbf16>
      tpu.vector_store %arg4[%20, %c1, %c0_19], %23 {strides = array<i32>} : memref<18x18x8xbf16, #tpu.memory_space<vmem>>, vector<1x16x8xbf16>,
    }
    %c16_i32_2 = arith.constant 16 : i32
    %cst_3 = arith.constant 0.000000e+00 : f32
    %3 = vector.broadcast %cst_3 : f32 to vector<1x4xf32>
    %c0_i32_4 = arith.constant 0 : i32
    %c16_i32_5 = arith.constant 16 : i32
    %4 = arith.addi %c0_i32_4, %c16_i32_5 : i32
    %c1_i32_6 = arith.constant 1 : i32
    %5:2 = scf.for %arg6 = %c0_i32_4 to %4 step %c1_i32_6 iter_args(%arg7 = %3, %arg8 = %3) -> (vector<1x4xf32>, vector<1x4xf32>)  : i32 {
      %c0_i32_15 = arith.constant 0 : i32
      %16 = arith.addi %arg6, %c0_i32_15 : i32
      %c0_i32_16 = arith.constant 0 : i32
      %17 = arith.addi %16, %c0_i32_16 : i32
      %18 = arith.index_cast %17 : i32 to index
      %c0_17 = arith.constant 0 : index
      %c0_18 = arith.constant 0 : index
      %19 = vector.load %arg4[%18, %c0_17, %c0_18] : memref<18x18x8xbf16, #tpu.memory_space<vmem>>, vector<1x16x8xbf16>
      %20 = vector.shape_cast %19 : vector<1x16x8xbf16> to vector<16x8xbf16>
      %c0_19 = arith.constant 0 : index
      %c0_20 = arith.constant 0 : index
      %c0_21 = arith.constant 0 : index
      %c0_22 = arith.constant 0 : index
      %21 = vector.load %arg2[%c0_19, %c0_20, %c0_21, %c0_22] : memref<4x4x8x4xbf16, #tpu.memory_space<vmem>>, vector<1x1x8x4xbf16>
      %22 = vector.shape_cast %21 : vector<1x1x8x4xbf16> to vector<8x4xbf16>
      %cst_23 = arith.constant dense<0.000000e+00> : vector<16x4xf32>
      %23 = tpu.matmul %20, %22, %cst_23 {dimension_numbers = #tpu.dot_dimension_numbers<[1], [0], [0], [1], [0, 0, 1, 1], [], []>} : vector<16x8xbf16>, vector<8x4xbf16>, vector<16x4xf32> -> vector<16x4xf32>
      %c0_i32_24 = arith.constant 0 : i32
      %24 = arith.addi %arg6, %c0_i32_24 : i32
      %c0_i32_25 = arith.constant 0 : i32
      %25 = arith.addi %24, %c0_i32_25 : i32
      %26 = arith.index_cast %25 : i32 to index
      %c1 = arith.constant 1 : index
      %c0_26 = arith.constant 0 : index
      %27 = vector.load %arg4[%26, %c1, %c0_26] : memref<18x18x8xbf16, #tpu.memory_space<vmem>>, vector<1x16x8xbf16>
      %28 = vector.shape_cast %27 : vector<1x16x8xbf16> to vector<16x8xbf16>
      %c0_27 = arith.constant 0 : index
      %c1_28 = arith.constant 1 : index
      %c0_29 = arith.constant 0 : index
      %c0_30 = arith.constant 0 : index
      %29 = vector.load %arg2[%c0_27, %c1_28, %c0_29, %c0_30] : memref<4x4x8x4xbf16, #tpu.memory_space<vmem>>, vector<1x1x8x4xbf16>
      %30 = vector.shape_cast %29 : vector<1x1x8x4xbf16> to vector<8x4xbf16>
      %cst_31 = arith.constant dense<0.000000e+00> : vector<16x4xf32>
      %31 = tpu.matmul %28, %30, %cst_31 {dimension_numbers = #tpu.dot_dimension_numbers<[1], [0], [0], [1], [0, 0, 1, 1], [], []>} : vector<16x8xbf16>, vector<8x4xbf16>, vector<16x4xf32> -> vector<16x4xf32>
      %32 = arith.addf %23, %31 : vector<16x4xf32>
      %c0_i32_32 = arith.constant 0 : i32
      %33 = arith.addi %arg6, %c0_i32_32 : i32
      %c1_i32_33 = arith.constant 1 : i32
      %34 = arith.addi %33, %c1_i32_33 : i32
      %35 = arith.index_cast %34 : i32 to index
      %c0_34 = arith.constant 0 : index
      %c0_35 = arith.constant 0 : index
      %36 = vector.load %arg4[%35, %c0_34, %c0_35] : memref<18x18x8xbf16, #tpu.memory_space<vmem>>, vector<1x16x8xbf16>
      %37 = vector.shape_cast %36 : vector<1x16x8xbf16> to vector<16x8xbf16>
      %c0_36 = arith.constant 0 : index
      %c2 = arith.constant 2 : index
      %c0_37 = arith.constant 0 : index
      %c0_38 = arith.constant 0 : index
      %38 = vector.load %arg2[%c0_36, %c2, %c0_37, %c0_38] : memref<4x4x8x4xbf16, #tpu.memory_space<vmem>>, vector<1x1x8x4xbf16>
      %39 = vector.shape_cast %38 : vector<1x1x8x4xbf16> to vector<8x4xbf16>
      %cst_39 = arith.constant dense<0.000000e+00> : vector<16x4xf32>
      %40 = tpu.matmul %37, %39, %cst_39 {dimension_numbers = #tpu.dot_dimension_numbers<[1], [0], [0], [1], [0, 0, 1, 1], [], []>} : vector<16x8xbf16>, vector<8x4xbf16>, vector<16x4xf32> -> vector<16x4xf32>
      %41 = arith.addf %32, %40 : vector<16x4xf32>
      %c0_i32_40 = arith.constant 0 : i32
      %42 = arith.addi %arg6, %c0_i32_40 : i32
      %c1_i32_41 = arith.constant 1 : i32
      %43 = arith.addi %42, %c1_i32_41 : i32
      %44 = arith.index_cast %43 : i32 to index
      %c1_42 = arith.constant 1 : index
      %c0_43 = arith.constant 0 : index
      %45 = vector.load %arg4[%44, %c1_42, %c0_43] : memref<18x18x8xbf16, #tpu.memory_space<vmem>>, vector<1x16x8xbf16>
      %46 = vector.shape_cast %45 : vector<1x16x8xbf16> to vector<16x8xbf16>
      %c0_44 = arith.constant 0 : index
      %c3 = arith.constant 3 : index
      %c0_45 = arith.constant 0 : index
      %c0_46 = arith.constant 0 : index
      %47 = vector.load %arg2[%c0_44, %c3, %c0_45, %c0_46] : memref<4x4x8x4xbf16, #tpu.memory_space<vmem>>, vector<1x1x8x4xbf16>
      %48 = vector.shape_cast %47 : vector<1x1x8x4xbf16> to vector<8x4xbf16>
      %cst_47 = arith.constant dense<0.000000e+00> : vector<16x4xf32>
      %49 = tpu.matmul %46, %48, %cst_47 {dimension_numbers = #tpu.dot_dimension_numbers<[1], [0], [0], [1], [0, 0, 1, 1], [], []>} : vector<16x8xbf16>, vector<8x4xbf16>, vector<16x4xf32> -> vector<16x4xf32>
      %50 = arith.addf %41, %49 : vector<16x4xf32>
      %c0_48 = arith.constant 0 : index
      %51 = arith.index_cast %arg6 : i32 to index
      %c0_49 = arith.constant 0 : index
      %c0_50 = arith.constant 0 : index
      %52 = vector.load %arg5[%c0_48, %51, %c0_49, %c0_50] : memref<4x16x16x4xf32, #tpu.memory_space<vmem>>, vector<1x1x16x4xf32>
      %53 = vector.shape_cast %52 : vector<1x1x16x4xf32> to vector<16x4xf32>
      %54 = vector.shape_cast %50 : vector<16x4xf32> to vector<1x1x16x4xf32>
      tpu.vector_store %arg5[%c0_48, %51, %c0_49, %c0_50], %54 {strides = array<i32>} : memref<4x16x16x4xf32, #tpu.memory_space<vmem>>, vector<1x1x16x4xf32>,
      %cst_51 = arith.constant dense<0.000000e+00> : vector<4xf32>
      %55 = vector.multi_reduction <add>, %50, %cst_51 [0] : vector<16x4xf32> to vector<4xf32>
      %56 = vector.shape_cast %55 : vector<4xf32> to vector<1x4xf32>
      %57 = arith.addf %arg7, %56 : vector<1x4xf32>
      %58 = arith.mulf %50, %50 : vector<16x4xf32>
      %cst_52 = arith.constant dense<0.000000e+00> : vector<4xf32>
      %59 = vector.multi_reduction <add>, %58, %cst_52 [0] : vector<16x4xf32> to vector<4xf32>
      %60 = vector.shape_cast %59 : vector<4xf32> to vector<1x4xf32>
      %61 = arith.addf %arg8, %60 : vector<1x4xf32>
      %c0_i32_53 = arith.constant 0 : i32
      %62 = arith.addi %arg6, %c0_i32_53 : i32
      %c0_i32_54 = arith.constant 0 : i32
      %63 = arith.addi %62, %c0_i32_54 : i32
      %64 = arith.index_cast %63 : i32 to index
      %c1_55 = arith.constant 1 : index
      %c0_56 = arith.constant 0 : index
      %65 = vector.load %arg4[%64, %c1_55, %c0_56] : memref<18x18x8xbf16, #tpu.memory_space<vmem>>, vector<1x16x8xbf16>
      %66 = vector.shape_cast %65 : vector<1x16x8xbf16> to vector<16x8xbf16>
      %c1_57 = arith.constant 1 : index
      %c0_58 = arith.constant 0 : index
      %c0_59 = arith.constant 0 : index
      %c0_60 = arith.constant 0 : index
      %67 = vector.load %arg2[%c1_57, %c0_58, %c0_59, %c0_60] : memref<4x4x8x4xbf16, #tpu.memory_space<vmem>>, vector<1x1x8x4xbf16>
      %68 = vector.shape_cast %67 : vector<1x1x8x4xbf16> to vector<8x4xbf16>
      %cst_61 = arith.constant dense<0.000000e+00> : vector<16x4xf32>
      %69 = tpu.matmul %66, %68, %cst_61 {dimension_numbers = #tpu.dot_dimension_numbers<[1], [0], [0], [1], [0, 0, 1, 1], [], []>} : vector<16x8xbf16>, vector<8x4xbf16>, vector<16x4xf32> -> vector<16x4xf32>
      %c0_i32_62 = arith.constant 0 : i32
      %70 = arith.addi %arg6, %c0_i32_62 : i32
      %c0_i32_63 = arith.constant 0 : i32
      %71 = arith.addi %70, %c0_i32_63 : i32
      %72 = arith.index_cast %71 : i32 to index
      %c2_64 = arith.constant 2 : index
      %c0_65 = arith.constant 0 : index
      %73 = vector.load %arg4[%72, %c2_64, %c0_65] : memref<18x18x8xbf16, #tpu.memory_space<vmem>>, vector<1x16x8xbf16>
      %74 = vector.shape_cast %73 : vector<1x16x8xbf16> to vector<16x8xbf16>
      %c1_66 = arith.constant 1 : index
      %c1_67 = arith.constant 1 : index
      %c0_68 = arith.constant 0 : index
      %c0_69 = arith.constant 0 : index
      %75 = vector.load %arg2[%c1_66, %c1_67, %c0_68, %c0_69] : memref<4x4x8x4xbf16, #tpu.memory_space<vmem>>, vector<1x1x8x4xbf16>
      %76 = vector.shape_cast %75 : vector<1x1x8x4xbf16> to vector<8x4xbf16>
      %cst_70 = arith.constant dense<0.000000e+00> : vector<16x4xf32>
      %77 = tpu.matmul %74, %76, %cst_70 {dimension_numbers = #tpu.dot_dimension_numbers<[1], [0], [0], [1], [0, 0, 1, 1], [], []>} : vector<16x8xbf16>, vector<8x4xbf16>, vector<16x4xf32> -> vector<16x4xf32>
      %78 = arith.addf %69, %77 : vector<16x4xf32>
      %c0_i32_71 = arith.constant 0 : i32
      %79 = arith.addi %arg6, %c0_i32_71 : i32
      %c1_i32_72 = arith.constant 1 : i32
      %80 = arith.addi %79, %c1_i32_72 : i32
      %81 = arith.index_cast %80 : i32 to index
      %c1_73 = arith.constant 1 : index
      %c0_74 = arith.constant 0 : index
      %82 = vector.load %arg4[%81, %c1_73, %c0_74] : memref<18x18x8xbf16, #tpu.memory_space<vmem>>, vector<1x16x8xbf16>
      %83 = vector.shape_cast %82 : vector<1x16x8xbf16> to vector<16x8xbf16>
      %c1_75 = arith.constant 1 : index
      %c2_76 = arith.constant 2 : index
      %c0_77 = arith.constant 0 : index
      %c0_78 = arith.constant 0 : index
      %84 = vector.load %arg2[%c1_75, %c2_76, %c0_77, %c0_78] : memref<4x4x8x4xbf16, #tpu.memory_space<vmem>>, vector<1x1x8x4xbf16>
      %85 = vector.shape_cast %84 : vector<1x1x8x4xbf16> to vector<8x4xbf16>
      %cst_79 = arith.constant dense<0.000000e+00> : vector<16x4xf32>
      %86 = tpu.matmul %83, %85, %cst_79 {dimension_numbers = #tpu.dot_dimension_numbers<[1], [0], [0], [1], [0, 0, 1, 1], [], []>} : vector<16x8xbf16>, vector<8x4xbf16>, vector<16x4xf32> -> vector<16x4xf32>
      %87 = arith.addf %78, %86 : vector<16x4xf32>
      %c0_i32_80 = arith.constant 0 : i32
      %88 = arith.addi %arg6, %c0_i32_80 : i32
      %c1_i32_81 = arith.constant 1 : i32
      %89 = arith.addi %88, %c1_i32_81 : i32
      %90 = arith.index_cast %89 : i32 to index
      %c2_82 = arith.constant 2 : index
      %c0_83 = arith.constant 0 : index
      %91 = vector.load %arg4[%90, %c2_82, %c0_83] : memref<18x18x8xbf16, #tpu.memory_space<vmem>>, vector<1x16x8xbf16>
      %92 = vector.shape_cast %91 : vector<1x16x8xbf16> to vector<16x8xbf16>
      %c1_84 = arith.constant 1 : index
      %c3_85 = arith.constant 3 : index
      %c0_86 = arith.constant 0 : index
      %c0_87 = arith.constant 0 : index
      %93 = vector.load %arg2[%c1_84, %c3_85, %c0_86, %c0_87] : memref<4x4x8x4xbf16, #tpu.memory_space<vmem>>, vector<1x1x8x4xbf16>
      %94 = vector.shape_cast %93 : vector<1x1x8x4xbf16> to vector<8x4xbf16>
      %cst_88 = arith.constant dense<0.000000e+00> : vector<16x4xf32>
      %95 = tpu.matmul %92, %94, %cst_88 {dimension_numbers = #tpu.dot_dimension_numbers<[1], [0], [0], [1], [0, 0, 1, 1], [], []>} : vector<16x8xbf16>, vector<8x4xbf16>, vector<16x4xf32> -> vector<16x4xf32>
      %96 = arith.addf %87, %95 : vector<16x4xf32>
      %c1_89 = arith.constant 1 : index
      %97 = arith.index_cast %arg6 : i32 to index
      %c0_90 = arith.constant 0 : index
      %c0_91 = arith.constant 0 : index
      %98 = vector.load %arg5[%c1_89, %97, %c0_90, %c0_91] : memref<4x16x16x4xf32, #tpu.memory_space<vmem>>, vector<1x1x16x4xf32>
      %99 = vector.shape_cast %98 : vector<1x1x16x4xf32> to vector<16x4xf32>
      %100 = vector.shape_cast %96 : vector<16x4xf32> to vector<1x1x16x4xf32>
      tpu.vector_store %arg5[%c1_89, %97, %c0_90, %c0_91], %100 {strides = array<i32>} : memref<4x16x16x4xf32, #tpu.memory_space<vmem>>, vector<1x1x16x4xf32>,
      %cst_92 = arith.constant dense<0.000000e+00> : vector<4xf32>
      %101 = vector.multi_reduction <add>, %96, %cst_92 [0] : vector<16x4xf32> to vector<4xf32>
      %102 = vector.shape_cast %101 : vector<4xf32> to vector<1x4xf32>
      %103 = arith.addf %57, %102 : vector<1x4xf32>
      %104 = arith.mulf %96, %96 : vector<16x4xf32>
      %cst_93 = arith.constant dense<0.000000e+00> : vector<4xf32>
      %105 = vector.multi_reduction <add>, %104, %cst_93 [0] : vector<16x4xf32> to vector<4xf32>
      %106 = vector.shape_cast %105 : vector<4xf32> to vector<1x4xf32>
      %107 = arith.addf %61, %106 : vector<1x4xf32>
      %c1_i32_94 = arith.constant 1 : i32
      %108 = arith.addi %arg6, %c1_i32_94 : i32
      %c0_i32_95 = arith.constant 0 : i32
      %109 = arith.addi %108, %c0_i32_95 : i32
      %110 = arith.index_cast %109 : i32 to index
      %c0_96 = arith.constant 0 : index
      %c0_97 = arith.constant 0 : index
      %111 = vector.load %arg4[%110, %c0_96, %c0_97] : memref<18x18x8xbf16, #tpu.memory_space<vmem>>, vector<1x16x8xbf16>
      %112 = vector.shape_cast %111 : vector<1x16x8xbf16> to vector<16x8xbf16>
      %c2_98 = arith.constant 2 : index
      %c0_99 = arith.constant 0 : index
      %c0_100 = arith.constant 0 : index
      %c0_101 = arith.constant 0 : index
      %113 = vector.load %arg2[%c2_98, %c0_99, %c0_100, %c0_101] : memref<4x4x8x4xbf16, #tpu.memory_space<vmem>>, vector<1x1x8x4xbf16>
      %114 = vector.shape_cast %113 : vector<1x1x8x4xbf16> to vector<8x4xbf16>
      %cst_102 = arith.constant dense<0.000000e+00> : vector<16x4xf32>
      %115 = tpu.matmul %112, %114, %cst_102 {dimension_numbers = #tpu.dot_dimension_numbers<[1], [0], [0], [1], [0, 0, 1, 1], [], []>} : vector<16x8xbf16>, vector<8x4xbf16>, vector<16x4xf32> -> vector<16x4xf32>
      %c1_i32_103 = arith.constant 1 : i32
      %116 = arith.addi %arg6, %c1_i32_103 : i32
      %c0_i32_104 = arith.constant 0 : i32
      %117 = arith.addi %116, %c0_i32_104 : i32
      %118 = arith.index_cast %117 : i32 to index
      %c1_105 = arith.constant 1 : index
      %c0_106 = arith.constant 0 : index
      %119 = vector.load %arg4[%118, %c1_105, %c0_106] : memref<18x18x8xbf16, #tpu.memory_space<vmem>>, vector<1x16x8xbf16>
      %120 = vector.shape_cast %119 : vector<1x16x8xbf16> to vector<16x8xbf16>
      %c2_107 = arith.constant 2 : index
      %c1_108 = arith.constant 1 : index
      %c0_109 = arith.constant 0 : index
      %c0_110 = arith.constant 0 : index
      %121 = vector.load %arg2[%c2_107, %c1_108, %c0_109, %c0_110] : memref<4x4x8x4xbf16, #tpu.memory_space<vmem>>, vector<1x1x8x4xbf16>
      %122 = vector.shape_cast %121 : vector<1x1x8x4xbf16> to vector<8x4xbf16>
      %cst_111 = arith.constant dense<0.000000e+00> : vector<16x4xf32>
      %123 = tpu.matmul %120, %122, %cst_111 {dimension_numbers = #tpu.dot_dimension_numbers<[1], [0], [0], [1], [0, 0, 1, 1], [], []>} : vector<16x8xbf16>, vector<8x4xbf16>, vector<16x4xf32> -> vector<16x4xf32>
      %124 = arith.addf %115, %123 : vector<16x4xf32>
      %c1_i32_112 = arith.constant 1 : i32
      %125 = arith.addi %arg6, %c1_i32_112 : i32
      %c1_i32_113 = arith.constant 1 : i32
      %126 = arith.addi %125, %c1_i32_113 : i32
      %127 = arith.index_cast %126 : i32 to index
      %c0_114 = arith.constant 0 : index
      %c0_115 = arith.constant 0 : index
      %128 = vector.load %arg4[%127, %c0_114, %c0_115] : memref<18x18x8xbf16, #tpu.memory_space<vmem>>, vector<1x16x8xbf16>
      %129 = vector.shape_cast %128 : vector<1x16x8xbf16> to vector<16x8xbf16>
      %c2_116 = arith.constant 2 : index
      %c2_117 = arith.constant 2 : index
      %c0_118 = arith.constant 0 : index
      %c0_119 = arith.constant 0 : index
      %130 = vector.load %arg2[%c2_116, %c2_117, %c0_118, %c0_119] : memref<4x4x8x4xbf16, #tpu.memory_space<vmem>>, vector<1x1x8x4xbf16>
      %131 = vector.shape_cast %130 : vector<1x1x8x4xbf16> to vector<8x4xbf16>
      %cst_120 = arith.constant dense<0.000000e+00> : vector<16x4xf32>
      %132 = tpu.matmul %129, %131, %cst_120 {dimension_numbers = #tpu.dot_dimension_numbers<[1], [0], [0], [1], [0, 0, 1, 1], [], []>} : vector<16x8xbf16>, vector<8x4xbf16>, vector<16x4xf32> -> vector<16x4xf32>
      %133 = arith.addf %124, %132 : vector<16x4xf32>
      %c1_i32_121 = arith.constant 1 : i32
      %134 = arith.addi %arg6, %c1_i32_121 : i32
      %c1_i32_122 = arith.constant 1 : i32
      %135 = arith.addi %134, %c1_i32_122 : i32
      %136 = arith.index_cast %135 : i32 to index
      %c1_123 = arith.constant 1 : index
      %c0_124 = arith.constant 0 : index
      %137 = vector.load %arg4[%136, %c1_123, %c0_124] : memref<18x18x8xbf16, #tpu.memory_space<vmem>>, vector<1x16x8xbf16>
      %138 = vector.shape_cast %137 : vector<1x16x8xbf16> to vector<16x8xbf16>
      %c2_125 = arith.constant 2 : index
      %c3_126 = arith.constant 3 : index
      %c0_127 = arith.constant 0 : index
      %c0_128 = arith.constant 0 : index
      %139 = vector.load %arg2[%c2_125, %c3_126, %c0_127, %c0_128] : memref<4x4x8x4xbf16, #tpu.memory_space<vmem>>, vector<1x1x8x4xbf16>
      %140 = vector.shape_cast %139 : vector<1x1x8x4xbf16> to vector<8x4xbf16>
      %cst_129 = arith.constant dense<0.000000e+00> : vector<16x4xf32>
      %141 = tpu.matmul %138, %140, %cst_129 {dimension_numbers = #tpu.dot_dimension_numbers<[1], [0], [0], [1], [0, 0, 1, 1], [], []>} : vector<16x8xbf16>, vector<8x4xbf16>, vector<16x4xf32> -> vector<16x4xf32>
      %142 = arith.addf %133, %141 : vector<16x4xf32>
      %c2_130 = arith.constant 2 : index
      %143 = arith.index_cast %arg6 : i32 to index
      %c0_131 = arith.constant 0 : index
      %c0_132 = arith.constant 0 : index
      %144 = vector.load %arg5[%c2_130, %143, %c0_131, %c0_132] : memref<4x16x16x4xf32, #tpu.memory_space<vmem>>, vector<1x1x16x4xf32>
      %145 = vector.shape_cast %144 : vector<1x1x16x4xf32> to vector<16x4xf32>
      %146 = vector.shape_cast %142 : vector<16x4xf32> to vector<1x1x16x4xf32>
      tpu.vector_store %arg5[%c2_130, %143, %c0_131, %c0_132], %146 {strides = array<i32>} : memref<4x16x16x4xf32, #tpu.memory_space<vmem>>, vector<1x1x16x4xf32>,
      %cst_133 = arith.constant dense<0.000000e+00> : vector<4xf32>
      %147 = vector.multi_reduction <add>, %142, %cst_133 [0] : vector<16x4xf32> to vector<4xf32>
      %148 = vector.shape_cast %147 : vector<4xf32> to vector<1x4xf32>
      %149 = arith.addf %103, %148 : vector<1x4xf32>
      %150 = arith.mulf %142, %142 : vector<16x4xf32>
      %cst_134 = arith.constant dense<0.000000e+00> : vector<4xf32>
      %151 = vector.multi_reduction <add>, %150, %cst_134 [0] : vector<16x4xf32> to vector<4xf32>
      %152 = vector.shape_cast %151 : vector<4xf32> to vector<1x4xf32>
      %153 = arith.addf %107, %152 : vector<1x4xf32>
      %c1_i32_135 = arith.constant 1 : i32
      %154 = arith.addi %arg6, %c1_i32_135 : i32
      %c0_i32_136 = arith.constant 0 : i32
      %155 = arith.addi %154, %c0_i32_136 : i32
      %156 = arith.index_cast %155 : i32 to index
      %c1_137 = arith.constant 1 : index
      %c0_138 = arith.constant 0 : index
      %157 = vector.load %arg4[%156, %c1_137, %c0_138] : memref<18x18x8xbf16, #tpu.memory_space<vmem>>, vector<1x16x8xbf16>
      %158 = vector.shape_cast %157 : vector<1x16x8xbf16> to vector<16x8xbf16>
      %c3_139 = arith.constant 3 : index
      %c0_140 = arith.constant 0 : index
      %c0_141 = arith.constant 0 : index
      %c0_142 = arith.constant 0 : index
      %159 = vector.load %arg2[%c3_139, %c0_140, %c0_141, %c0_142] : memref<4x4x8x4xbf16, #tpu.memory_space<vmem>>, vector<1x1x8x4xbf16>
      %160 = vector.shape_cast %159 : vector<1x1x8x4xbf16> to vector<8x4xbf16>
      %cst_143 = arith.constant dense<0.000000e+00> : vector<16x4xf32>
      %161 = tpu.matmul %158, %160, %cst_143 {dimension_numbers = #tpu.dot_dimension_numbers<[1], [0], [0], [1], [0, 0, 1, 1], [], []>} : vector<16x8xbf16>, vector<8x4xbf16>, vector<16x4xf32> -> vector<16x4xf32>
      %c1_i32_144 = arith.constant 1 : i32
      %162 = arith.addi %arg6, %c1_i32_144 : i32
      %c0_i32_145 = arith.constant 0 : i32
      %163 = arith.addi %162, %c0_i32_145 : i32
      %164 = arith.index_cast %163 : i32 to index
      %c2_146 = arith.constant 2 : index
      %c0_147 = arith.constant 0 : index
      %165 = vector.load %arg4[%164, %c2_146, %c0_147] : memref<18x18x8xbf16, #tpu.memory_space<vmem>>, vector<1x16x8xbf16>
      %166 = vector.shape_cast %165 : vector<1x16x8xbf16> to vector<16x8xbf16>
      %c3_148 = arith.constant 3 : index
      %c1_149 = arith.constant 1 : index
      %c0_150 = arith.constant 0 : index
      %c0_151 = arith.constant 0 : index
      %167 = vector.load %arg2[%c3_148, %c1_149, %c0_150, %c0_151] : memref<4x4x8x4xbf16, #tpu.memory_space<vmem>>, vector<1x1x8x4xbf16>
      %168 = vector.shape_cast %167 : vector<1x1x8x4xbf16> to vector<8x4xbf16>
      %cst_152 = arith.constant dense<0.000000e+00> : vector<16x4xf32>
      %169 = tpu.matmul %166, %168, %cst_152 {dimension_numbers = #tpu.dot_dimension_numbers<[1], [0], [0], [1], [0, 0, 1, 1], [], []>} : vector<16x8xbf16>, vector<8x4xbf16>, vector<16x4xf32> -> vector<16x4xf32>
      %170 = arith.addf %161, %169 : vector<16x4xf32>
      %c1_i32_153 = arith.constant 1 : i32
      %171 = arith.addi %arg6, %c1_i32_153 : i32
      %c1_i32_154 = arith.constant 1 : i32
      %172 = arith.addi %171, %c1_i32_154 : i32
      %173 = arith.index_cast %172 : i32 to index
      %c1_155 = arith.constant 1 : index
      %c0_156 = arith.constant 0 : index
      %174 = vector.load %arg4[%173, %c1_155, %c0_156] : memref<18x18x8xbf16, #tpu.memory_space<vmem>>, vector<1x16x8xbf16>
      %175 = vector.shape_cast %174 : vector<1x16x8xbf16> to vector<16x8xbf16>
      %c3_157 = arith.constant 3 : index
      %c2_158 = arith.constant 2 : index
      %c0_159 = arith.constant 0 : index
      %c0_160 = arith.constant 0 : index
      %176 = vector.load %arg2[%c3_157, %c2_158, %c0_159, %c0_160] : memref<4x4x8x4xbf16, #tpu.memory_space<vmem>>, vector<1x1x8x4xbf16>
      %177 = vector.shape_cast %176 : vector<1x1x8x4xbf16> to vector<8x4xbf16>
      %cst_161 = arith.constant dense<0.000000e+00> : vector<16x4xf32>
      %178 = tpu.matmul %175, %177, %cst_161 {dimension_numbers = #tpu.dot_dimension_numbers<[1], [0], [0], [1], [0, 0, 1, 1], [], []>} : vector<16x8xbf16>, vector<8x4xbf16>, vector<16x4xf32> -> vector<16x4xf32>
      %179 = arith.addf %170, %178 : vector<16x4xf32>
      %c1_i32_162 = arith.constant 1 : i32
      %180 = arith.addi %arg6, %c1_i32_162 : i32
      %c1_i32_163 = arith.constant 1 : i32
      %181 = arith.addi %180, %c1_i32_163 : i32
      %182 = arith.index_cast %181 : i32 to index
      %c2_164 = arith.constant 2 : index
      %c0_165 = arith.constant 0 : index
      %183 = vector.load %arg4[%182, %c2_164, %c0_165] : memref<18x18x8xbf16, #tpu.memory_space<vmem>>, vector<1x16x8xbf16>
      %184 = vector.shape_cast %183 : vector<1x16x8xbf16> to vector<16x8xbf16>
      %c3_166 = arith.constant 3 : index
      %c3_167 = arith.constant 3 : index
      %c0_168 = arith.constant 0 : index
      %c0_169 = arith.constant 0 : index
      %185 = vector.load %arg2[%c3_166, %c3_167, %c0_168, %c0_169] : memref<4x4x8x4xbf16, #tpu.memory_space<vmem>>, vector<1x1x8x4xbf16>
      %186 = vector.shape_cast %185 : vector<1x1x8x4xbf16> to vector<8x4xbf16>
      %cst_170 = arith.constant dense<0.000000e+00> : vector<16x4xf32>
      %187 = tpu.matmul %184, %186, %cst_170 {dimension_numbers = #tpu.dot_dimension_numbers<[1], [0], [0], [1], [0, 0, 1, 1], [], []>} : vector<16x8xbf16>, vector<8x4xbf16>, vector<16x4xf32> -> vector<16x4xf32>
      %188 = arith.addf %179, %187 : vector<16x4xf32>
      %c3_171 = arith.constant 3 : index
      %189 = arith.index_cast %arg6 : i32 to index
      %c0_172 = arith.constant 0 : index
      %c0_173 = arith.constant 0 : index
      %190 = vector.load %arg5[%c3_171, %189, %c0_172, %c0_173] : memref<4x16x16x4xf32, #tpu.memory_space<vmem>>, vector<1x1x16x4xf32>
      %191 = vector.shape_cast %190 : vector<1x1x16x4xf32> to vector<16x4xf32>
      %192 = vector.shape_cast %188 : vector<16x4xf32> to vector<1x1x16x4xf32>
      tpu.vector_store %arg5[%c3_171, %189, %c0_172, %c0_173], %192 {strides = array<i32>} : memref<4x16x16x4xf32, #tpu.memory_space<vmem>>, vector<1x1x16x4xf32>,
      %cst_174 = arith.constant dense<0.000000e+00> : vector<4xf32>
      %193 = vector.multi_reduction <add>, %188, %cst_174 [0] : vector<16x4xf32> to vector<4xf32>
      %194 = vector.shape_cast %193 : vector<4xf32> to vector<1x4xf32>
      %195 = arith.addf %149, %194 : vector<1x4xf32>
      %196 = arith.mulf %188, %188 : vector<16x4xf32>
      %cst_175 = arith.constant dense<0.000000e+00> : vector<4xf32>
      %197 = vector.multi_reduction <add>, %196, %cst_175 [0] : vector<16x4xf32> to vector<4xf32>
      %198 = vector.shape_cast %197 : vector<4xf32> to vector<1x4xf32>
      %199 = arith.addf %153, %198 : vector<1x4xf32>
      scf.yield %195, %199 : vector<1x4xf32>, vector<1x4xf32>
    }
    %c16_i32_7 = arith.constant 16 : i32
    %cst_8 = arith.constant 1.024000e+03 : f32
    %6 = vector.broadcast %cst_8 : f32 to vector<1x4xf32>
    %7 = arith.divf %5#0, %6 : vector<1x4xf32>
    %cst_9 = arith.constant 1.024000e+03 : f32
    %8 = vector.broadcast %cst_9 : f32 to vector<1x4xf32>
    %9 = arith.divf %5#1, %8 : vector<1x4xf32>
    %10 = arith.mulf %7, %7 : vector<1x4xf32>
    %11 = arith.subf %9, %10 : vector<1x4xf32>
    %cst_10 = arith.constant 9.99999974E-6 : f32
    %12 = vector.broadcast %cst_10 : f32 to vector<1x4xf32>
    %13 = arith.addf %11, %12 : vector<1x4xf32>
    %14 = math.rsqrt %13 : vector<1x4xf32>
    %c0_i32_11 = arith.constant 0 : i32
    %c16_i32_12 = arith.constant 16 : i32
    %15 = arith.addi %c0_i32_11, %c16_i32_12 : i32
    %c1_i32_13 = arith.constant 1 : i32
    scf.for %arg6 = %c0_i32_11 to %15 step %c1_i32_13  : i32 {
      %c0_15 = arith.constant 0 : index
      %16 = arith.index_cast %arg6 : i32 to index
      %c0_16 = arith.constant 0 : index
      %c0_17 = arith.constant 0 : index
      %17 = vector.load %arg5[%c0_15, %16, %c0_16, %c0_17] : memref<4x16x16x4xf32, #tpu.memory_space<vmem>>, vector<1x1x16x4xf32>
      %18 = vector.shape_cast %17 : vector<1x1x16x4xf32> to vector<16x4xf32>
      %19 = vector.broadcast %7 : vector<1x4xf32> to vector<16x4xf32>
      %20 = arith.subf %18, %19 : vector<16x4xf32>
      %21 = vector.broadcast %14 : vector<1x4xf32> to vector<16x4xf32>
      %22 = arith.mulf %20, %21 : vector<16x4xf32>
      %cst_18 = arith.constant 0.000000e+00 : f32
      %23 = vector.broadcast %cst_18 : f32 to vector<16x4xf32>
      %24 = arith.maximumf %22, %23 : vector<16x4xf32>
      %25 = arith.truncf %24 : vector<16x4xf32> to vector<16x4xbf16>
      %c0_19 = arith.constant 0 : index
      %26 = arith.index_cast %arg6 : i32 to index
      %c0_20 = arith.constant 0 : index
      %c0_21 = arith.constant 0 : index
      %c0_22 = arith.constant 0 : index
      %27 = vector.load %arg3[%c0_19, %26, %c0_20, %c0_21, %c0_22] : memref<1x16x2x16x8xbf16, #tpu.memory_space<vmem>>, vector<1x1x1x16x4xbf16>
      %28 = vector.shape_cast %27 : vector<1x1x1x16x4xbf16> to vector<16x4xbf16>
      %29 = vector.shape_cast %25 : vector<16x4xbf16> to vector<1x1x1x16x4xbf16>
      tpu.vector_store %arg3[%c0_19, %26, %c0_20, %c0_21, %c0_22], %29 {strides = array<i32>} : memref<1x16x2x16x8xbf16, #tpu.memory_space<vmem>>, vector<1x1x1x16x4xbf16>,
      %c1 = arith.constant 1 : index
      %30 = arith.index_cast %arg6 : i32 to index
      %c0_23 = arith.constant 0 : index
      %c0_24 = arith.constant 0 : index
      %31 = vector.load %arg5[%c1, %30, %c0_23, %c0_24] : memref<4x16x16x4xf32, #tpu.memory_space<vmem>>, vector<1x1x16x4xf32>
      %32 = vector.shape_cast %31 : vector<1x1x16x4xf32> to vector<16x4xf32>
      %33 = vector.broadcast %7 : vector<1x4xf32> to vector<16x4xf32>
      %34 = arith.subf %32, %33 : vector<16x4xf32>
      %35 = vector.broadcast %14 : vector<1x4xf32> to vector<16x4xf32>
      %36 = arith.mulf %34, %35 : vector<16x4xf32>
      %cst_25 = arith.constant 0.000000e+00 : f32
      %37 = vector.broadcast %cst_25 : f32 to vector<16x4xf32>
      %38 = arith.maximumf %36, %37 : vector<16x4xf32>
      %39 = arith.truncf %38 : vector<16x4xf32> to vector<16x4xbf16>
      %c0_26 = arith.constant 0 : index
      %40 = arith.index_cast %arg6 : i32 to index
      %c0_27 = arith.constant 0 : index
      %c0_28 = arith.constant 0 : index
      %c4 = arith.constant 4 : index
      %41 = vector.load %arg3[%c0_26, %40, %c0_27, %c0_28, %c4] : memref<1x16x2x16x8xbf16, #tpu.memory_space<vmem>>, vector<1x1x1x16x4xbf16>
      %42 = vector.shape_cast %41 : vector<1x1x1x16x4xbf16> to vector<16x4xbf16>
      %43 = vector.shape_cast %39 : vector<16x4xbf16> to vector<1x1x1x16x4xbf16>
      tpu.vector_store %arg3[%c0_26, %40, %c0_27, %c0_28, %c4], %43 {strides = array<i32>} : memref<1x16x2x16x8xbf16, #tpu.memory_space<vmem>>, vector<1x1x1x16x4xbf16>,
      %c2 = arith.constant 2 : index
      %44 = arith.index_cast %arg6 : i32 to index
      %c0_29 = arith.constant 0 : index
      %c0_30 = arith.constant 0 : index
      %45 = vector.load %arg5[%c2, %44, %c0_29, %c0_30] : memref<4x16x16x4xf32, #tpu.memory_space<vmem>>, vector<1x1x16x4xf32>
      %46 = vector.shape_cast %45 : vector<1x1x16x4xf32> to vector<16x4xf32>
      %47 = vector.broadcast %7 : vector<1x4xf32> to vector<16x4xf32>
      %48 = arith.subf %46, %47 : vector<16x4xf32>
      %49 = vector.broadcast %14 : vector<1x4xf32> to vector<16x4xf32>
      %50 = arith.mulf %48, %49 : vector<16x4xf32>
      %cst_31 = arith.constant 0.000000e+00 : f32
      %51 = vector.broadcast %cst_31 : f32 to vector<16x4xf32>
      %52 = arith.maximumf %50, %51 : vector<16x4xf32>
      %53 = arith.truncf %52 : vector<16x4xf32> to vector<16x4xbf16>
      %c0_32 = arith.constant 0 : index
      %54 = arith.index_cast %arg6 : i32 to index
      %c1_33 = arith.constant 1 : index
      %c0_34 = arith.constant 0 : index
      %c0_35 = arith.constant 0 : index
      %55 = vector.load %arg3[%c0_32, %54, %c1_33, %c0_34, %c0_35] : memref<1x16x2x16x8xbf16, #tpu.memory_space<vmem>>, vector<1x1x1x16x4xbf16>
      %56 = vector.shape_cast %55 : vector<1x1x1x16x4xbf16> to vector<16x4xbf16>
      %57 = vector.shape_cast %53 : vector<16x4xbf16> to vector<1x1x1x16x4xbf16>
      tpu.vector_store %arg3[%c0_32, %54, %c1_33, %c0_34, %c0_35], %57 {strides = array<i32>} : memref<1x16x2x16x8xbf16, #tpu.memory_space<vmem>>, vector<1x1x1x16x4xbf16>,
      %c3 = arith.constant 3 : index
      %58 = arith.index_cast %arg6 : i32 to index
      %c0_36 = arith.constant 0 : index
      %c0_37 = arith.constant 0 : index
      %59 = vector.load %arg5[%c3, %58, %c0_36, %c0_37] : memref<4x16x16x4xf32, #tpu.memory_space<vmem>>, vector<1x1x16x4xf32>
      %60 = vector.shape_cast %59 : vector<1x1x16x4xf32> to vector<16x4xf32>
      %61 = vector.broadcast %7 : vector<1x4xf32> to vector<16x4xf32>
      %62 = arith.subf %60, %61 : vector<16x4xf32>
      %63 = vector.broadcast %14 : vector<1x4xf32> to vector<16x4xf32>
      %64 = arith.mulf %62, %63 : vector<16x4xf32>
      %cst_38 = arith.constant 0.000000e+00 : f32
      %65 = vector.broadcast %cst_38 : f32 to vector<16x4xf32>
      %66 = arith.maximumf %64, %65 : vector<16x4xf32>
      %67 = arith.truncf %66 : vector<16x4xf32> to vector<16x4xbf16>
      %c0_39 = arith.constant 0 : index
      %68 = arith.index_cast %arg6 : i32 to index
      %c1_40 = arith.constant 1 : index
      %c0_41 = arith.constant 0 : index
      %c4_42 = arith.constant 4 : index
      %69 = vector.load %arg3[%c0_39, %68, %c1_40, %c0_41, %c4_42] : memref<1x16x2x16x8xbf16, #tpu.memory_space<vmem>>, vector<1x1x1x16x4xbf16>
      %70 = vector.shape_cast %69 : vector<1x1x1x16x4xbf16> to vector<16x4xbf16>
      %71 = vector.shape_cast %67 : vector<16x4xbf16> to vector<1x1x1x16x4xbf16>
      tpu.vector_store %arg3[%c0_39, %68, %c1_40, %c0_41, %c4_42], %71 {strides = array<i32>} : memref<1x16x2x16x8xbf16, #tpu.memory_space<vmem>>, vector<1x1x1x16x4xbf16>,
    }
    %c16_i32_14 = arith.constant 16 : i32
    return
  }
  func.func @transform_0(%arg0: i32) -> (i32, i32, i32, i32) {
    %c0_i32 = arith.constant 0 : i32
    %c0_i32_0 = arith.constant 0 : i32
    %c0_i32_1 = arith.constant 0 : i32
    %c0_i32_2 = arith.constant 0 : i32
    return %arg0, %c0_i32, %c0_i32_0, %c0_i32_1 : i32, i32, i32, i32
  }
  func.func @transform_1(%arg0: i32) -> (i32, i32, i32, i32) {
    %c0_i32 = arith.constant 0 : i32
    %c0_i32_0 = arith.constant 0 : i32
    %c0_i32_1 = arith.constant 0 : i32
    %c0_i32_2 = arith.constant 0 : i32
    %c0_i32_3 = arith.constant 0 : i32
    return %c0_i32, %c0_i32_0, %c0_i32_1, %c0_i32_2 : i32, i32, i32, i32
  }
  func.func @transform_2(%arg0: i32) -> (i32, i32, i32, i32, i32) {
    %c0_i32 = arith.constant 0 : i32
    %c0_i32_0 = arith.constant 0 : i32
    %c0_i32_1 = arith.constant 0 : i32
    %c0_i32_2 = arith.constant 0 : i32
    %c0_i32_3 = arith.constant 0 : i32
    return %arg0, %c0_i32, %c0_i32_0, %c0_i32_1, %c0_i32_2 : i32, i32, i32, i32, i32
  }
}

module attributes {stable_mosaic.version = 11 : i64} {
  func.func @_uplayer_kernel(%arg0: i32, %arg1: memref<1x32x32x4xbf16, #tpu.memory_space<vmem>>, %arg2: memref<4x4x4x2xbf16, #tpu.memory_space<vmem>>, %arg3: memref<1x32x2x32x4xbf16, #tpu.memory_space<vmem>>, %arg4: memref<34x34x4xbf16, #tpu.memory_space<vmem>>, %arg5: memref<4x32x32x2xf32, #tpu.memory_space<vmem>>) attributes {dimension_semantics = [#tpu.dimension_semantics<parallel>], iteration_bounds = array<i64: 2>, scalar_prefetch = 0 : i64, scratch_operands = 2 : i64, tpu.core_type = #tpu.core_type<tc>, window_params = [{transform_indices = @transform_0, window_bounds = array<i64: 1, 32, 32, 4>}, {pipeline_mode = #tpu.pipeline_mode<synchronous>, transform_indices = @transform_1, window_bounds = array<i64: 4, 4, 4, 2>}, {transform_indices = @transform_2, window_bounds = array<i64: 1, 32, 2, 32, 4>}]} {
    %cst = arith.constant 0.000000e+00 : bf16
    %0 = vector.broadcast %cst : bf16 to vector<34x34x4xbf16>
    %c0 = arith.constant 0 : index
    %c0_0 = arith.constant 0 : index
    %c0_1 = arith.constant 0 : index
    %1 = vector.load %arg4[%c0, %c0_0, %c0_1] : memref<34x34x4xbf16, #tpu.memory_space<vmem>>, vector<34x34x4xbf16>
    tpu.vector_store %arg4[%c0, %c0_0, %c0_1], %0 {strides = array<i32>} : memref<34x34x4xbf16, #tpu.memory_space<vmem>>, vector<34x34x4xbf16>,
    %c0_i32 = arith.constant 0 : i32
    %c32_i32 = arith.constant 32 : i32
    %2 = arith.addi %c0_i32, %c32_i32 : i32
    %c1_i32 = arith.constant 1 : i32
    scf.for %arg6 = %c0_i32 to %2 step %c1_i32  : i32 {
      %c0_15 = arith.constant 0 : index
      %16 = arith.index_cast %arg6 : i32 to index
      %c0_16 = arith.constant 0 : index
      %c0_17 = arith.constant 0 : index
      %17 = vector.load %arg1[%c0_15, %16, %c0_16, %c0_17] : memref<1x32x32x4xbf16, #tpu.memory_space<vmem>>, vector<1x1x32x4xbf16>
      %18 = vector.shape_cast %17 : vector<1x1x32x4xbf16> to vector<32x4xbf16>
      %c1_i32_18 = arith.constant 1 : i32
      %19 = arith.addi %arg6, %c1_i32_18 : i32
      %20 = arith.index_cast %19 : i32 to index
      %c1 = arith.constant 1 : index
      %c0_19 = arith.constant 0 : index
      %21 = vector.load %arg4[%20, %c1, %c0_19] : memref<34x34x4xbf16, #tpu.memory_space<vmem>>, vector<1x32x4xbf16>
      %22 = vector.shape_cast %21 : vector<1x32x4xbf16> to vector<32x4xbf16>
      %23 = vector.shape_cast %18 : vector<32x4xbf16> to vector<1x32x4xbf16>
      tpu.vector_store %arg4[%20, %c1, %c0_19], %23 {strides = array<i32>} : memref<34x34x4xbf16, #tpu.memory_space<vmem>>, vector<1x32x4xbf16>,
    }
    %c32_i32_2 = arith.constant 32 : i32
    %cst_3 = arith.constant 0.000000e+00 : f32
    %3 = vector.broadcast %cst_3 : f32 to vector<1x2xf32>
    %c0_i32_4 = arith.constant 0 : i32
    %c32_i32_5 = arith.constant 32 : i32
    %4 = arith.addi %c0_i32_4, %c32_i32_5 : i32
    %c1_i32_6 = arith.constant 1 : i32
    %5:2 = scf.for %arg6 = %c0_i32_4 to %4 step %c1_i32_6 iter_args(%arg7 = %3, %arg8 = %3) -> (vector<1x2xf32>, vector<1x2xf32>)  : i32 {
      %c0_i32_15 = arith.constant 0 : i32
      %16 = arith.addi %arg6, %c0_i32_15 : i32
      %c0_i32_16 = arith.constant 0 : i32
      %17 = arith.addi %16, %c0_i32_16 : i32
      %18 = arith.index_cast %17 : i32 to index
      %c0_17 = arith.constant 0 : index
      %c0_18 = arith.constant 0 : index
      %19 = vector.load %arg4[%18, %c0_17, %c0_18] : memref<34x34x4xbf16, #tpu.memory_space<vmem>>, vector<1x32x4xbf16>
      %20 = vector.shape_cast %19 : vector<1x32x4xbf16> to vector<32x4xbf16>
      %c0_19 = arith.constant 0 : index
      %c0_20 = arith.constant 0 : index
      %c0_21 = arith.constant 0 : index
      %c0_22 = arith.constant 0 : index
      %21 = vector.load %arg2[%c0_19, %c0_20, %c0_21, %c0_22] : memref<4x4x4x2xbf16, #tpu.memory_space<vmem>>, vector<1x1x4x2xbf16>
      %22 = vector.shape_cast %21 : vector<1x1x4x2xbf16> to vector<4x2xbf16>
      %cst_23 = arith.constant dense<0.000000e+00> : vector<32x2xf32>
      %23 = tpu.matmul %20, %22, %cst_23 {dimension_numbers = #tpu.dot_dimension_numbers<[1], [0], [0], [1], [0, 0, 1, 1], [], []>} : vector<32x4xbf16>, vector<4x2xbf16>, vector<32x2xf32> -> vector<32x2xf32>
      %c0_i32_24 = arith.constant 0 : i32
      %24 = arith.addi %arg6, %c0_i32_24 : i32
      %c0_i32_25 = arith.constant 0 : i32
      %25 = arith.addi %24, %c0_i32_25 : i32
      %26 = arith.index_cast %25 : i32 to index
      %c1 = arith.constant 1 : index
      %c0_26 = arith.constant 0 : index
      %27 = vector.load %arg4[%26, %c1, %c0_26] : memref<34x34x4xbf16, #tpu.memory_space<vmem>>, vector<1x32x4xbf16>
      %28 = vector.shape_cast %27 : vector<1x32x4xbf16> to vector<32x4xbf16>
      %c0_27 = arith.constant 0 : index
      %c1_28 = arith.constant 1 : index
      %c0_29 = arith.constant 0 : index
      %c0_30 = arith.constant 0 : index
      %29 = vector.load %arg2[%c0_27, %c1_28, %c0_29, %c0_30] : memref<4x4x4x2xbf16, #tpu.memory_space<vmem>>, vector<1x1x4x2xbf16>
      %30 = vector.shape_cast %29 : vector<1x1x4x2xbf16> to vector<4x2xbf16>
      %cst_31 = arith.constant dense<0.000000e+00> : vector<32x2xf32>
      %31 = tpu.matmul %28, %30, %cst_31 {dimension_numbers = #tpu.dot_dimension_numbers<[1], [0], [0], [1], [0, 0, 1, 1], [], []>} : vector<32x4xbf16>, vector<4x2xbf16>, vector<32x2xf32> -> vector<32x2xf32>
      %32 = arith.addf %23, %31 : vector<32x2xf32>
      %c0_i32_32 = arith.constant 0 : i32
      %33 = arith.addi %arg6, %c0_i32_32 : i32
      %c1_i32_33 = arith.constant 1 : i32
      %34 = arith.addi %33, %c1_i32_33 : i32
      %35 = arith.index_cast %34 : i32 to index
      %c0_34 = arith.constant 0 : index
      %c0_35 = arith.constant 0 : index
      %36 = vector.load %arg4[%35, %c0_34, %c0_35] : memref<34x34x4xbf16, #tpu.memory_space<vmem>>, vector<1x32x4xbf16>
      %37 = vector.shape_cast %36 : vector<1x32x4xbf16> to vector<32x4xbf16>
      %c0_36 = arith.constant 0 : index
      %c2 = arith.constant 2 : index
      %c0_37 = arith.constant 0 : index
      %c0_38 = arith.constant 0 : index
      %38 = vector.load %arg2[%c0_36, %c2, %c0_37, %c0_38] : memref<4x4x4x2xbf16, #tpu.memory_space<vmem>>, vector<1x1x4x2xbf16>
      %39 = vector.shape_cast %38 : vector<1x1x4x2xbf16> to vector<4x2xbf16>
      %cst_39 = arith.constant dense<0.000000e+00> : vector<32x2xf32>
      %40 = tpu.matmul %37, %39, %cst_39 {dimension_numbers = #tpu.dot_dimension_numbers<[1], [0], [0], [1], [0, 0, 1, 1], [], []>} : vector<32x4xbf16>, vector<4x2xbf16>, vector<32x2xf32> -> vector<32x2xf32>
      %41 = arith.addf %32, %40 : vector<32x2xf32>
      %c0_i32_40 = arith.constant 0 : i32
      %42 = arith.addi %arg6, %c0_i32_40 : i32
      %c1_i32_41 = arith.constant 1 : i32
      %43 = arith.addi %42, %c1_i32_41 : i32
      %44 = arith.index_cast %43 : i32 to index
      %c1_42 = arith.constant 1 : index
      %c0_43 = arith.constant 0 : index
      %45 = vector.load %arg4[%44, %c1_42, %c0_43] : memref<34x34x4xbf16, #tpu.memory_space<vmem>>, vector<1x32x4xbf16>
      %46 = vector.shape_cast %45 : vector<1x32x4xbf16> to vector<32x4xbf16>
      %c0_44 = arith.constant 0 : index
      %c3 = arith.constant 3 : index
      %c0_45 = arith.constant 0 : index
      %c0_46 = arith.constant 0 : index
      %47 = vector.load %arg2[%c0_44, %c3, %c0_45, %c0_46] : memref<4x4x4x2xbf16, #tpu.memory_space<vmem>>, vector<1x1x4x2xbf16>
      %48 = vector.shape_cast %47 : vector<1x1x4x2xbf16> to vector<4x2xbf16>
      %cst_47 = arith.constant dense<0.000000e+00> : vector<32x2xf32>
      %49 = tpu.matmul %46, %48, %cst_47 {dimension_numbers = #tpu.dot_dimension_numbers<[1], [0], [0], [1], [0, 0, 1, 1], [], []>} : vector<32x4xbf16>, vector<4x2xbf16>, vector<32x2xf32> -> vector<32x2xf32>
      %50 = arith.addf %41, %49 : vector<32x2xf32>
      %c0_48 = arith.constant 0 : index
      %51 = arith.index_cast %arg6 : i32 to index
      %c0_49 = arith.constant 0 : index
      %c0_50 = arith.constant 0 : index
      %52 = vector.load %arg5[%c0_48, %51, %c0_49, %c0_50] : memref<4x32x32x2xf32, #tpu.memory_space<vmem>>, vector<1x1x32x2xf32>
      %53 = vector.shape_cast %52 : vector<1x1x32x2xf32> to vector<32x2xf32>
      %54 = vector.shape_cast %50 : vector<32x2xf32> to vector<1x1x32x2xf32>
      tpu.vector_store %arg5[%c0_48, %51, %c0_49, %c0_50], %54 {strides = array<i32>} : memref<4x32x32x2xf32, #tpu.memory_space<vmem>>, vector<1x1x32x2xf32>,
      %cst_51 = arith.constant dense<0.000000e+00> : vector<2xf32>
      %55 = vector.multi_reduction <add>, %50, %cst_51 [0] : vector<32x2xf32> to vector<2xf32>
      %56 = vector.shape_cast %55 : vector<2xf32> to vector<1x2xf32>
      %57 = arith.addf %arg7, %56 : vector<1x2xf32>
      %58 = arith.mulf %50, %50 : vector<32x2xf32>
      %cst_52 = arith.constant dense<0.000000e+00> : vector<2xf32>
      %59 = vector.multi_reduction <add>, %58, %cst_52 [0] : vector<32x2xf32> to vector<2xf32>
      %60 = vector.shape_cast %59 : vector<2xf32> to vector<1x2xf32>
      %61 = arith.addf %arg8, %60 : vector<1x2xf32>
      %c0_i32_53 = arith.constant 0 : i32
      %62 = arith.addi %arg6, %c0_i32_53 : i32
      %c0_i32_54 = arith.constant 0 : i32
      %63 = arith.addi %62, %c0_i32_54 : i32
      %64 = arith.index_cast %63 : i32 to index
      %c1_55 = arith.constant 1 : index
      %c0_56 = arith.constant 0 : index
      %65 = vector.load %arg4[%64, %c1_55, %c0_56] : memref<34x34x4xbf16, #tpu.memory_space<vmem>>, vector<1x32x4xbf16>
      %66 = vector.shape_cast %65 : vector<1x32x4xbf16> to vector<32x4xbf16>
      %c1_57 = arith.constant 1 : index
      %c0_58 = arith.constant 0 : index
      %c0_59 = arith.constant 0 : index
      %c0_60 = arith.constant 0 : index
      %67 = vector.load %arg2[%c1_57, %c0_58, %c0_59, %c0_60] : memref<4x4x4x2xbf16, #tpu.memory_space<vmem>>, vector<1x1x4x2xbf16>
      %68 = vector.shape_cast %67 : vector<1x1x4x2xbf16> to vector<4x2xbf16>
      %cst_61 = arith.constant dense<0.000000e+00> : vector<32x2xf32>
      %69 = tpu.matmul %66, %68, %cst_61 {dimension_numbers = #tpu.dot_dimension_numbers<[1], [0], [0], [1], [0, 0, 1, 1], [], []>} : vector<32x4xbf16>, vector<4x2xbf16>, vector<32x2xf32> -> vector<32x2xf32>
      %c0_i32_62 = arith.constant 0 : i32
      %70 = arith.addi %arg6, %c0_i32_62 : i32
      %c0_i32_63 = arith.constant 0 : i32
      %71 = arith.addi %70, %c0_i32_63 : i32
      %72 = arith.index_cast %71 : i32 to index
      %c2_64 = arith.constant 2 : index
      %c0_65 = arith.constant 0 : index
      %73 = vector.load %arg4[%72, %c2_64, %c0_65] : memref<34x34x4xbf16, #tpu.memory_space<vmem>>, vector<1x32x4xbf16>
      %74 = vector.shape_cast %73 : vector<1x32x4xbf16> to vector<32x4xbf16>
      %c1_66 = arith.constant 1 : index
      %c1_67 = arith.constant 1 : index
      %c0_68 = arith.constant 0 : index
      %c0_69 = arith.constant 0 : index
      %75 = vector.load %arg2[%c1_66, %c1_67, %c0_68, %c0_69] : memref<4x4x4x2xbf16, #tpu.memory_space<vmem>>, vector<1x1x4x2xbf16>
      %76 = vector.shape_cast %75 : vector<1x1x4x2xbf16> to vector<4x2xbf16>
      %cst_70 = arith.constant dense<0.000000e+00> : vector<32x2xf32>
      %77 = tpu.matmul %74, %76, %cst_70 {dimension_numbers = #tpu.dot_dimension_numbers<[1], [0], [0], [1], [0, 0, 1, 1], [], []>} : vector<32x4xbf16>, vector<4x2xbf16>, vector<32x2xf32> -> vector<32x2xf32>
      %78 = arith.addf %69, %77 : vector<32x2xf32>
      %c0_i32_71 = arith.constant 0 : i32
      %79 = arith.addi %arg6, %c0_i32_71 : i32
      %c1_i32_72 = arith.constant 1 : i32
      %80 = arith.addi %79, %c1_i32_72 : i32
      %81 = arith.index_cast %80 : i32 to index
      %c1_73 = arith.constant 1 : index
      %c0_74 = arith.constant 0 : index
      %82 = vector.load %arg4[%81, %c1_73, %c0_74] : memref<34x34x4xbf16, #tpu.memory_space<vmem>>, vector<1x32x4xbf16>
      %83 = vector.shape_cast %82 : vector<1x32x4xbf16> to vector<32x4xbf16>
      %c1_75 = arith.constant 1 : index
      %c2_76 = arith.constant 2 : index
      %c0_77 = arith.constant 0 : index
      %c0_78 = arith.constant 0 : index
      %84 = vector.load %arg2[%c1_75, %c2_76, %c0_77, %c0_78] : memref<4x4x4x2xbf16, #tpu.memory_space<vmem>>, vector<1x1x4x2xbf16>
      %85 = vector.shape_cast %84 : vector<1x1x4x2xbf16> to vector<4x2xbf16>
      %cst_79 = arith.constant dense<0.000000e+00> : vector<32x2xf32>
      %86 = tpu.matmul %83, %85, %cst_79 {dimension_numbers = #tpu.dot_dimension_numbers<[1], [0], [0], [1], [0, 0, 1, 1], [], []>} : vector<32x4xbf16>, vector<4x2xbf16>, vector<32x2xf32> -> vector<32x2xf32>
      %87 = arith.addf %78, %86 : vector<32x2xf32>
      %c0_i32_80 = arith.constant 0 : i32
      %88 = arith.addi %arg6, %c0_i32_80 : i32
      %c1_i32_81 = arith.constant 1 : i32
      %89 = arith.addi %88, %c1_i32_81 : i32
      %90 = arith.index_cast %89 : i32 to index
      %c2_82 = arith.constant 2 : index
      %c0_83 = arith.constant 0 : index
      %91 = vector.load %arg4[%90, %c2_82, %c0_83] : memref<34x34x4xbf16, #tpu.memory_space<vmem>>, vector<1x32x4xbf16>
      %92 = vector.shape_cast %91 : vector<1x32x4xbf16> to vector<32x4xbf16>
      %c1_84 = arith.constant 1 : index
      %c3_85 = arith.constant 3 : index
      %c0_86 = arith.constant 0 : index
      %c0_87 = arith.constant 0 : index
      %93 = vector.load %arg2[%c1_84, %c3_85, %c0_86, %c0_87] : memref<4x4x4x2xbf16, #tpu.memory_space<vmem>>, vector<1x1x4x2xbf16>
      %94 = vector.shape_cast %93 : vector<1x1x4x2xbf16> to vector<4x2xbf16>
      %cst_88 = arith.constant dense<0.000000e+00> : vector<32x2xf32>
      %95 = tpu.matmul %92, %94, %cst_88 {dimension_numbers = #tpu.dot_dimension_numbers<[1], [0], [0], [1], [0, 0, 1, 1], [], []>} : vector<32x4xbf16>, vector<4x2xbf16>, vector<32x2xf32> -> vector<32x2xf32>
      %96 = arith.addf %87, %95 : vector<32x2xf32>
      %c1_89 = arith.constant 1 : index
      %97 = arith.index_cast %arg6 : i32 to index
      %c0_90 = arith.constant 0 : index
      %c0_91 = arith.constant 0 : index
      %98 = vector.load %arg5[%c1_89, %97, %c0_90, %c0_91] : memref<4x32x32x2xf32, #tpu.memory_space<vmem>>, vector<1x1x32x2xf32>
      %99 = vector.shape_cast %98 : vector<1x1x32x2xf32> to vector<32x2xf32>
      %100 = vector.shape_cast %96 : vector<32x2xf32> to vector<1x1x32x2xf32>
      tpu.vector_store %arg5[%c1_89, %97, %c0_90, %c0_91], %100 {strides = array<i32>} : memref<4x32x32x2xf32, #tpu.memory_space<vmem>>, vector<1x1x32x2xf32>,
      %cst_92 = arith.constant dense<0.000000e+00> : vector<2xf32>
      %101 = vector.multi_reduction <add>, %96, %cst_92 [0] : vector<32x2xf32> to vector<2xf32>
      %102 = vector.shape_cast %101 : vector<2xf32> to vector<1x2xf32>
      %103 = arith.addf %57, %102 : vector<1x2xf32>
      %104 = arith.mulf %96, %96 : vector<32x2xf32>
      %cst_93 = arith.constant dense<0.000000e+00> : vector<2xf32>
      %105 = vector.multi_reduction <add>, %104, %cst_93 [0] : vector<32x2xf32> to vector<2xf32>
      %106 = vector.shape_cast %105 : vector<2xf32> to vector<1x2xf32>
      %107 = arith.addf %61, %106 : vector<1x2xf32>
      %c1_i32_94 = arith.constant 1 : i32
      %108 = arith.addi %arg6, %c1_i32_94 : i32
      %c0_i32_95 = arith.constant 0 : i32
      %109 = arith.addi %108, %c0_i32_95 : i32
      %110 = arith.index_cast %109 : i32 to index
      %c0_96 = arith.constant 0 : index
      %c0_97 = arith.constant 0 : index
      %111 = vector.load %arg4[%110, %c0_96, %c0_97] : memref<34x34x4xbf16, #tpu.memory_space<vmem>>, vector<1x32x4xbf16>
      %112 = vector.shape_cast %111 : vector<1x32x4xbf16> to vector<32x4xbf16>
      %c2_98 = arith.constant 2 : index
      %c0_99 = arith.constant 0 : index
      %c0_100 = arith.constant 0 : index
      %c0_101 = arith.constant 0 : index
      %113 = vector.load %arg2[%c2_98, %c0_99, %c0_100, %c0_101] : memref<4x4x4x2xbf16, #tpu.memory_space<vmem>>, vector<1x1x4x2xbf16>
      %114 = vector.shape_cast %113 : vector<1x1x4x2xbf16> to vector<4x2xbf16>
      %cst_102 = arith.constant dense<0.000000e+00> : vector<32x2xf32>
      %115 = tpu.matmul %112, %114, %cst_102 {dimension_numbers = #tpu.dot_dimension_numbers<[1], [0], [0], [1], [0, 0, 1, 1], [], []>} : vector<32x4xbf16>, vector<4x2xbf16>, vector<32x2xf32> -> vector<32x2xf32>
      %c1_i32_103 = arith.constant 1 : i32
      %116 = arith.addi %arg6, %c1_i32_103 : i32
      %c0_i32_104 = arith.constant 0 : i32
      %117 = arith.addi %116, %c0_i32_104 : i32
      %118 = arith.index_cast %117 : i32 to index
      %c1_105 = arith.constant 1 : index
      %c0_106 = arith.constant 0 : index
      %119 = vector.load %arg4[%118, %c1_105, %c0_106] : memref<34x34x4xbf16, #tpu.memory_space<vmem>>, vector<1x32x4xbf16>
      %120 = vector.shape_cast %119 : vector<1x32x4xbf16> to vector<32x4xbf16>
      %c2_107 = arith.constant 2 : index
      %c1_108 = arith.constant 1 : index
      %c0_109 = arith.constant 0 : index
      %c0_110 = arith.constant 0 : index
      %121 = vector.load %arg2[%c2_107, %c1_108, %c0_109, %c0_110] : memref<4x4x4x2xbf16, #tpu.memory_space<vmem>>, vector<1x1x4x2xbf16>
      %122 = vector.shape_cast %121 : vector<1x1x4x2xbf16> to vector<4x2xbf16>
      %cst_111 = arith.constant dense<0.000000e+00> : vector<32x2xf32>
      %123 = tpu.matmul %120, %122, %cst_111 {dimension_numbers = #tpu.dot_dimension_numbers<[1], [0], [0], [1], [0, 0, 1, 1], [], []>} : vector<32x4xbf16>, vector<4x2xbf16>, vector<32x2xf32> -> vector<32x2xf32>
      %124 = arith.addf %115, %123 : vector<32x2xf32>
      %c1_i32_112 = arith.constant 1 : i32
      %125 = arith.addi %arg6, %c1_i32_112 : i32
      %c1_i32_113 = arith.constant 1 : i32
      %126 = arith.addi %125, %c1_i32_113 : i32
      %127 = arith.index_cast %126 : i32 to index
      %c0_114 = arith.constant 0 : index
      %c0_115 = arith.constant 0 : index
      %128 = vector.load %arg4[%127, %c0_114, %c0_115] : memref<34x34x4xbf16, #tpu.memory_space<vmem>>, vector<1x32x4xbf16>
      %129 = vector.shape_cast %128 : vector<1x32x4xbf16> to vector<32x4xbf16>
      %c2_116 = arith.constant 2 : index
      %c2_117 = arith.constant 2 : index
      %c0_118 = arith.constant 0 : index
      %c0_119 = arith.constant 0 : index
      %130 = vector.load %arg2[%c2_116, %c2_117, %c0_118, %c0_119] : memref<4x4x4x2xbf16, #tpu.memory_space<vmem>>, vector<1x1x4x2xbf16>
      %131 = vector.shape_cast %130 : vector<1x1x4x2xbf16> to vector<4x2xbf16>
      %cst_120 = arith.constant dense<0.000000e+00> : vector<32x2xf32>
      %132 = tpu.matmul %129, %131, %cst_120 {dimension_numbers = #tpu.dot_dimension_numbers<[1], [0], [0], [1], [0, 0, 1, 1], [], []>} : vector<32x4xbf16>, vector<4x2xbf16>, vector<32x2xf32> -> vector<32x2xf32>
      %133 = arith.addf %124, %132 : vector<32x2xf32>
      %c1_i32_121 = arith.constant 1 : i32
      %134 = arith.addi %arg6, %c1_i32_121 : i32
      %c1_i32_122 = arith.constant 1 : i32
      %135 = arith.addi %134, %c1_i32_122 : i32
      %136 = arith.index_cast %135 : i32 to index
      %c1_123 = arith.constant 1 : index
      %c0_124 = arith.constant 0 : index
      %137 = vector.load %arg4[%136, %c1_123, %c0_124] : memref<34x34x4xbf16, #tpu.memory_space<vmem>>, vector<1x32x4xbf16>
      %138 = vector.shape_cast %137 : vector<1x32x4xbf16> to vector<32x4xbf16>
      %c2_125 = arith.constant 2 : index
      %c3_126 = arith.constant 3 : index
      %c0_127 = arith.constant 0 : index
      %c0_128 = arith.constant 0 : index
      %139 = vector.load %arg2[%c2_125, %c3_126, %c0_127, %c0_128] : memref<4x4x4x2xbf16, #tpu.memory_space<vmem>>, vector<1x1x4x2xbf16>
      %140 = vector.shape_cast %139 : vector<1x1x4x2xbf16> to vector<4x2xbf16>
      %cst_129 = arith.constant dense<0.000000e+00> : vector<32x2xf32>
      %141 = tpu.matmul %138, %140, %cst_129 {dimension_numbers = #tpu.dot_dimension_numbers<[1], [0], [0], [1], [0, 0, 1, 1], [], []>} : vector<32x4xbf16>, vector<4x2xbf16>, vector<32x2xf32> -> vector<32x2xf32>
      %142 = arith.addf %133, %141 : vector<32x2xf32>
      %c2_130 = arith.constant 2 : index
      %143 = arith.index_cast %arg6 : i32 to index
      %c0_131 = arith.constant 0 : index
      %c0_132 = arith.constant 0 : index
      %144 = vector.load %arg5[%c2_130, %143, %c0_131, %c0_132] : memref<4x32x32x2xf32, #tpu.memory_space<vmem>>, vector<1x1x32x2xf32>
      %145 = vector.shape_cast %144 : vector<1x1x32x2xf32> to vector<32x2xf32>
      %146 = vector.shape_cast %142 : vector<32x2xf32> to vector<1x1x32x2xf32>
      tpu.vector_store %arg5[%c2_130, %143, %c0_131, %c0_132], %146 {strides = array<i32>} : memref<4x32x32x2xf32, #tpu.memory_space<vmem>>, vector<1x1x32x2xf32>,
      %cst_133 = arith.constant dense<0.000000e+00> : vector<2xf32>
      %147 = vector.multi_reduction <add>, %142, %cst_133 [0] : vector<32x2xf32> to vector<2xf32>
      %148 = vector.shape_cast %147 : vector<2xf32> to vector<1x2xf32>
      %149 = arith.addf %103, %148 : vector<1x2xf32>
      %150 = arith.mulf %142, %142 : vector<32x2xf32>
      %cst_134 = arith.constant dense<0.000000e+00> : vector<2xf32>
      %151 = vector.multi_reduction <add>, %150, %cst_134 [0] : vector<32x2xf32> to vector<2xf32>
      %152 = vector.shape_cast %151 : vector<2xf32> to vector<1x2xf32>
      %153 = arith.addf %107, %152 : vector<1x2xf32>
      %c1_i32_135 = arith.constant 1 : i32
      %154 = arith.addi %arg6, %c1_i32_135 : i32
      %c0_i32_136 = arith.constant 0 : i32
      %155 = arith.addi %154, %c0_i32_136 : i32
      %156 = arith.index_cast %155 : i32 to index
      %c1_137 = arith.constant 1 : index
      %c0_138 = arith.constant 0 : index
      %157 = vector.load %arg4[%156, %c1_137, %c0_138] : memref<34x34x4xbf16, #tpu.memory_space<vmem>>, vector<1x32x4xbf16>
      %158 = vector.shape_cast %157 : vector<1x32x4xbf16> to vector<32x4xbf16>
      %c3_139 = arith.constant 3 : index
      %c0_140 = arith.constant 0 : index
      %c0_141 = arith.constant 0 : index
      %c0_142 = arith.constant 0 : index
      %159 = vector.load %arg2[%c3_139, %c0_140, %c0_141, %c0_142] : memref<4x4x4x2xbf16, #tpu.memory_space<vmem>>, vector<1x1x4x2xbf16>
      %160 = vector.shape_cast %159 : vector<1x1x4x2xbf16> to vector<4x2xbf16>
      %cst_143 = arith.constant dense<0.000000e+00> : vector<32x2xf32>
      %161 = tpu.matmul %158, %160, %cst_143 {dimension_numbers = #tpu.dot_dimension_numbers<[1], [0], [0], [1], [0, 0, 1, 1], [], []>} : vector<32x4xbf16>, vector<4x2xbf16>, vector<32x2xf32> -> vector<32x2xf32>
      %c1_i32_144 = arith.constant 1 : i32
      %162 = arith.addi %arg6, %c1_i32_144 : i32
      %c0_i32_145 = arith.constant 0 : i32
      %163 = arith.addi %162, %c0_i32_145 : i32
      %164 = arith.index_cast %163 : i32 to index
      %c2_146 = arith.constant 2 : index
      %c0_147 = arith.constant 0 : index
      %165 = vector.load %arg4[%164, %c2_146, %c0_147] : memref<34x34x4xbf16, #tpu.memory_space<vmem>>, vector<1x32x4xbf16>
      %166 = vector.shape_cast %165 : vector<1x32x4xbf16> to vector<32x4xbf16>
      %c3_148 = arith.constant 3 : index
      %c1_149 = arith.constant 1 : index
      %c0_150 = arith.constant 0 : index
      %c0_151 = arith.constant 0 : index
      %167 = vector.load %arg2[%c3_148, %c1_149, %c0_150, %c0_151] : memref<4x4x4x2xbf16, #tpu.memory_space<vmem>>, vector<1x1x4x2xbf16>
      %168 = vector.shape_cast %167 : vector<1x1x4x2xbf16> to vector<4x2xbf16>
      %cst_152 = arith.constant dense<0.000000e+00> : vector<32x2xf32>
      %169 = tpu.matmul %166, %168, %cst_152 {dimension_numbers = #tpu.dot_dimension_numbers<[1], [0], [0], [1], [0, 0, 1, 1], [], []>} : vector<32x4xbf16>, vector<4x2xbf16>, vector<32x2xf32> -> vector<32x2xf32>
      %170 = arith.addf %161, %169 : vector<32x2xf32>
      %c1_i32_153 = arith.constant 1 : i32
      %171 = arith.addi %arg6, %c1_i32_153 : i32
      %c1_i32_154 = arith.constant 1 : i32
      %172 = arith.addi %171, %c1_i32_154 : i32
      %173 = arith.index_cast %172 : i32 to index
      %c1_155 = arith.constant 1 : index
      %c0_156 = arith.constant 0 : index
      %174 = vector.load %arg4[%173, %c1_155, %c0_156] : memref<34x34x4xbf16, #tpu.memory_space<vmem>>, vector<1x32x4xbf16>
      %175 = vector.shape_cast %174 : vector<1x32x4xbf16> to vector<32x4xbf16>
      %c3_157 = arith.constant 3 : index
      %c2_158 = arith.constant 2 : index
      %c0_159 = arith.constant 0 : index
      %c0_160 = arith.constant 0 : index
      %176 = vector.load %arg2[%c3_157, %c2_158, %c0_159, %c0_160] : memref<4x4x4x2xbf16, #tpu.memory_space<vmem>>, vector<1x1x4x2xbf16>
      %177 = vector.shape_cast %176 : vector<1x1x4x2xbf16> to vector<4x2xbf16>
      %cst_161 = arith.constant dense<0.000000e+00> : vector<32x2xf32>
      %178 = tpu.matmul %175, %177, %cst_161 {dimension_numbers = #tpu.dot_dimension_numbers<[1], [0], [0], [1], [0, 0, 1, 1], [], []>} : vector<32x4xbf16>, vector<4x2xbf16>, vector<32x2xf32> -> vector<32x2xf32>
      %179 = arith.addf %170, %178 : vector<32x2xf32>
      %c1_i32_162 = arith.constant 1 : i32
      %180 = arith.addi %arg6, %c1_i32_162 : i32
      %c1_i32_163 = arith.constant 1 : i32
      %181 = arith.addi %180, %c1_i32_163 : i32
      %182 = arith.index_cast %181 : i32 to index
      %c2_164 = arith.constant 2 : index
      %c0_165 = arith.constant 0 : index
      %183 = vector.load %arg4[%182, %c2_164, %c0_165] : memref<34x34x4xbf16, #tpu.memory_space<vmem>>, vector<1x32x4xbf16>
      %184 = vector.shape_cast %183 : vector<1x32x4xbf16> to vector<32x4xbf16>
      %c3_166 = arith.constant 3 : index
      %c3_167 = arith.constant 3 : index
      %c0_168 = arith.constant 0 : index
      %c0_169 = arith.constant 0 : index
      %185 = vector.load %arg2[%c3_166, %c3_167, %c0_168, %c0_169] : memref<4x4x4x2xbf16, #tpu.memory_space<vmem>>, vector<1x1x4x2xbf16>
      %186 = vector.shape_cast %185 : vector<1x1x4x2xbf16> to vector<4x2xbf16>
      %cst_170 = arith.constant dense<0.000000e+00> : vector<32x2xf32>
      %187 = tpu.matmul %184, %186, %cst_170 {dimension_numbers = #tpu.dot_dimension_numbers<[1], [0], [0], [1], [0, 0, 1, 1], [], []>} : vector<32x4xbf16>, vector<4x2xbf16>, vector<32x2xf32> -> vector<32x2xf32>
      %188 = arith.addf %179, %187 : vector<32x2xf32>
      %c3_171 = arith.constant 3 : index
      %189 = arith.index_cast %arg6 : i32 to index
      %c0_172 = arith.constant 0 : index
      %c0_173 = arith.constant 0 : index
      %190 = vector.load %arg5[%c3_171, %189, %c0_172, %c0_173] : memref<4x32x32x2xf32, #tpu.memory_space<vmem>>, vector<1x1x32x2xf32>
      %191 = vector.shape_cast %190 : vector<1x1x32x2xf32> to vector<32x2xf32>
      %192 = vector.shape_cast %188 : vector<32x2xf32> to vector<1x1x32x2xf32>
      tpu.vector_store %arg5[%c3_171, %189, %c0_172, %c0_173], %192 {strides = array<i32>} : memref<4x32x32x2xf32, #tpu.memory_space<vmem>>, vector<1x1x32x2xf32>,
      %cst_174 = arith.constant dense<0.000000e+00> : vector<2xf32>
      %193 = vector.multi_reduction <add>, %188, %cst_174 [0] : vector<32x2xf32> to vector<2xf32>
      %194 = vector.shape_cast %193 : vector<2xf32> to vector<1x2xf32>
      %195 = arith.addf %149, %194 : vector<1x2xf32>
      %196 = arith.mulf %188, %188 : vector<32x2xf32>
      %cst_175 = arith.constant dense<0.000000e+00> : vector<2xf32>
      %197 = vector.multi_reduction <add>, %196, %cst_175 [0] : vector<32x2xf32> to vector<2xf32>
      %198 = vector.shape_cast %197 : vector<2xf32> to vector<1x2xf32>
      %199 = arith.addf %153, %198 : vector<1x2xf32>
      scf.yield %195, %199 : vector<1x2xf32>, vector<1x2xf32>
    }
    %c32_i32_7 = arith.constant 32 : i32
    %cst_8 = arith.constant 4.096000e+03 : f32
    %6 = vector.broadcast %cst_8 : f32 to vector<1x2xf32>
    %7 = arith.divf %5#0, %6 : vector<1x2xf32>
    %cst_9 = arith.constant 4.096000e+03 : f32
    %8 = vector.broadcast %cst_9 : f32 to vector<1x2xf32>
    %9 = arith.divf %5#1, %8 : vector<1x2xf32>
    %10 = arith.mulf %7, %7 : vector<1x2xf32>
    %11 = arith.subf %9, %10 : vector<1x2xf32>
    %cst_10 = arith.constant 9.99999974E-6 : f32
    %12 = vector.broadcast %cst_10 : f32 to vector<1x2xf32>
    %13 = arith.addf %11, %12 : vector<1x2xf32>
    %14 = math.rsqrt %13 : vector<1x2xf32>
    %c0_i32_11 = arith.constant 0 : i32
    %c32_i32_12 = arith.constant 32 : i32
    %15 = arith.addi %c0_i32_11, %c32_i32_12 : i32
    %c1_i32_13 = arith.constant 1 : i32
    scf.for %arg6 = %c0_i32_11 to %15 step %c1_i32_13  : i32 {
      %c0_15 = arith.constant 0 : index
      %16 = arith.index_cast %arg6 : i32 to index
      %c0_16 = arith.constant 0 : index
      %c0_17 = arith.constant 0 : index
      %17 = vector.load %arg5[%c0_15, %16, %c0_16, %c0_17] : memref<4x32x32x2xf32, #tpu.memory_space<vmem>>, vector<1x1x32x2xf32>
      %18 = vector.shape_cast %17 : vector<1x1x32x2xf32> to vector<32x2xf32>
      %19 = vector.broadcast %7 : vector<1x2xf32> to vector<32x2xf32>
      %20 = arith.subf %18, %19 : vector<32x2xf32>
      %21 = vector.broadcast %14 : vector<1x2xf32> to vector<32x2xf32>
      %22 = arith.mulf %20, %21 : vector<32x2xf32>
      %cst_18 = arith.constant 0.000000e+00 : f32
      %23 = vector.broadcast %cst_18 : f32 to vector<32x2xf32>
      %24 = arith.maximumf %22, %23 : vector<32x2xf32>
      %25 = arith.truncf %24 : vector<32x2xf32> to vector<32x2xbf16>
      %c0_19 = arith.constant 0 : index
      %26 = arith.index_cast %arg6 : i32 to index
      %c0_20 = arith.constant 0 : index
      %c0_21 = arith.constant 0 : index
      %c0_22 = arith.constant 0 : index
      %27 = vector.load %arg3[%c0_19, %26, %c0_20, %c0_21, %c0_22] : memref<1x32x2x32x4xbf16, #tpu.memory_space<vmem>>, vector<1x1x1x32x2xbf16>
      %28 = vector.shape_cast %27 : vector<1x1x1x32x2xbf16> to vector<32x2xbf16>
      %29 = vector.shape_cast %25 : vector<32x2xbf16> to vector<1x1x1x32x2xbf16>
      tpu.vector_store %arg3[%c0_19, %26, %c0_20, %c0_21, %c0_22], %29 {strides = array<i32>} : memref<1x32x2x32x4xbf16, #tpu.memory_space<vmem>>, vector<1x1x1x32x2xbf16>,
      %c1 = arith.constant 1 : index
      %30 = arith.index_cast %arg6 : i32 to index
      %c0_23 = arith.constant 0 : index
      %c0_24 = arith.constant 0 : index
      %31 = vector.load %arg5[%c1, %30, %c0_23, %c0_24] : memref<4x32x32x2xf32, #tpu.memory_space<vmem>>, vector<1x1x32x2xf32>
      %32 = vector.shape_cast %31 : vector<1x1x32x2xf32> to vector<32x2xf32>
      %33 = vector.broadcast %7 : vector<1x2xf32> to vector<32x2xf32>
      %34 = arith.subf %32, %33 : vector<32x2xf32>
      %35 = vector.broadcast %14 : vector<1x2xf32> to vector<32x2xf32>
      %36 = arith.mulf %34, %35 : vector<32x2xf32>
      %cst_25 = arith.constant 0.000000e+00 : f32
      %37 = vector.broadcast %cst_25 : f32 to vector<32x2xf32>
      %38 = arith.maximumf %36, %37 : vector<32x2xf32>
      %39 = arith.truncf %38 : vector<32x2xf32> to vector<32x2xbf16>
      %c0_26 = arith.constant 0 : index
      %40 = arith.index_cast %arg6 : i32 to index
      %c0_27 = arith.constant 0 : index
      %c0_28 = arith.constant 0 : index
      %c2 = arith.constant 2 : index
      %41 = vector.load %arg3[%c0_26, %40, %c0_27, %c0_28, %c2] : memref<1x32x2x32x4xbf16, #tpu.memory_space<vmem>>, vector<1x1x1x32x2xbf16>
      %42 = vector.shape_cast %41 : vector<1x1x1x32x2xbf16> to vector<32x2xbf16>
      %43 = vector.shape_cast %39 : vector<32x2xbf16> to vector<1x1x1x32x2xbf16>
      tpu.vector_store %arg3[%c0_26, %40, %c0_27, %c0_28, %c2], %43 {strides = array<i32>} : memref<1x32x2x32x4xbf16, #tpu.memory_space<vmem>>, vector<1x1x1x32x2xbf16>,
      %c2_29 = arith.constant 2 : index
      %44 = arith.index_cast %arg6 : i32 to index
      %c0_30 = arith.constant 0 : index
      %c0_31 = arith.constant 0 : index
      %45 = vector.load %arg5[%c2_29, %44, %c0_30, %c0_31] : memref<4x32x32x2xf32, #tpu.memory_space<vmem>>, vector<1x1x32x2xf32>
      %46 = vector.shape_cast %45 : vector<1x1x32x2xf32> to vector<32x2xf32>
      %47 = vector.broadcast %7 : vector<1x2xf32> to vector<32x2xf32>
      %48 = arith.subf %46, %47 : vector<32x2xf32>
      %49 = vector.broadcast %14 : vector<1x2xf32> to vector<32x2xf32>
      %50 = arith.mulf %48, %49 : vector<32x2xf32>
      %cst_32 = arith.constant 0.000000e+00 : f32
      %51 = vector.broadcast %cst_32 : f32 to vector<32x2xf32>
      %52 = arith.maximumf %50, %51 : vector<32x2xf32>
      %53 = arith.truncf %52 : vector<32x2xf32> to vector<32x2xbf16>
      %c0_33 = arith.constant 0 : index
      %54 = arith.index_cast %arg6 : i32 to index
      %c1_34 = arith.constant 1 : index
      %c0_35 = arith.constant 0 : index
      %c0_36 = arith.constant 0 : index
      %55 = vector.load %arg3[%c0_33, %54, %c1_34, %c0_35, %c0_36] : memref<1x32x2x32x4xbf16, #tpu.memory_space<vmem>>, vector<1x1x1x32x2xbf16>
      %56 = vector.shape_cast %55 : vector<1x1x1x32x2xbf16> to vector<32x2xbf16>
      %57 = vector.shape_cast %53 : vector<32x2xbf16> to vector<1x1x1x32x2xbf16>
      tpu.vector_store %arg3[%c0_33, %54, %c1_34, %c0_35, %c0_36], %57 {strides = array<i32>} : memref<1x32x2x32x4xbf16, #tpu.memory_space<vmem>>, vector<1x1x1x32x2xbf16>,
      %c3 = arith.constant 3 : index
      %58 = arith.index_cast %arg6 : i32 to index
      %c0_37 = arith.constant 0 : index
      %c0_38 = arith.constant 0 : index
      %59 = vector.load %arg5[%c3, %58, %c0_37, %c0_38] : memref<4x32x32x2xf32, #tpu.memory_space<vmem>>, vector<1x1x32x2xf32>
      %60 = vector.shape_cast %59 : vector<1x1x32x2xf32> to vector<32x2xf32>
      %61 = vector.broadcast %7 : vector<1x2xf32> to vector<32x2xf32>
      %62 = arith.subf %60, %61 : vector<32x2xf32>
      %63 = vector.broadcast %14 : vector<1x2xf32> to vector<32x2xf32>
      %64 = arith.mulf %62, %63 : vector<32x2xf32>
      %cst_39 = arith.constant 0.000000e+00 : f32
      %65 = vector.broadcast %cst_39 : f32 to vector<32x2xf32>
      %66 = arith.maximumf %64, %65 : vector<32x2xf32>
      %67 = arith.truncf %66 : vector<32x2xf32> to vector<32x2xbf16>
      %c0_40 = arith.constant 0 : index
      %68 = arith.index_cast %arg6 : i32 to index
      %c1_41 = arith.constant 1 : index
      %c0_42 = arith.constant 0 : index
      %c2_43 = arith.constant 2 : index
      %69 = vector.load %arg3[%c0_40, %68, %c1_41, %c0_42, %c2_43] : memref<1x32x2x32x4xbf16, #tpu.memory_space<vmem>>, vector<1x1x1x32x2xbf16>
      %70 = vector.shape_cast %69 : vector<1x1x1x32x2xbf16> to vector<32x2xbf16>
      %71 = vector.shape_cast %67 : vector<32x2xbf16> to vector<1x1x1x32x2xbf16>
      tpu.vector_store %arg3[%c0_40, %68, %c1_41, %c0_42, %c2_43], %71 {strides = array<i32>} : memref<1x32x2x32x4xbf16, #tpu.memory_space<vmem>>, vector<1x1x1x32x2xbf16>,
    }
    %c32_i32_14 = arith.constant 32 : i32
    return
  }
  func.func @transform_0(%arg0: i32) -> (i32, i32, i32, i32) {
    %c0_i32 = arith.constant 0 : i32
    %c0_i32_0 = arith.constant 0 : i32
    %c0_i32_1 = arith.constant 0 : i32
    %c0_i32_2 = arith.constant 0 : i32
    return %arg0, %c0_i32, %c0_i32_0, %c0_i32_1 : i32, i32, i32, i32
  }
  func.func @transform_1(%arg0: i32) -> (i32, i32, i32, i32) {
    %c0_i32 = arith.constant 0 : i32
    %c0_i32_0 = arith.constant 0 : i32
    %c0_i32_1 = arith.constant 0 : i32
    %c0_i32_2 = arith.constant 0 : i32
    %c0_i32_3 = arith.constant 0 : i32
    return %c0_i32, %c0_i32_0, %c0_i32_1, %c0_i32_2 : i32, i32, i32, i32
  }
  func.func @transform_2(%arg0: i32) -> (i32, i32, i32, i32, i32) {
    %c0_i32 = arith.constant 0 : i32
    %c0_i32_0 = arith.constant 0 : i32
    %c0_i32_1 = arith.constant 0 : i32
    %c0_i32_2 = arith.constant 0 : i32
    %c0_i32_3 = arith.constant 0 : i32
    return %arg0, %c0_i32, %c0_i32_0, %c0_i32_1, %c0_i32_2 : i32, i32, i32, i32, i32
  }
}

module attributes {stable_mosaic.version = 11 : i64} {
  func.func @_uplayer_kernel(%arg0: i32, %arg1: memref<1x64x64x2xbf16, #tpu.memory_space<vmem>>, %arg2: memref<4x4x2x1xbf16, #tpu.memory_space<vmem>>, %arg3: memref<1x64x2x64x2xf32, #tpu.memory_space<vmem>>, %arg4: memref<66x66x2xbf16, #tpu.memory_space<vmem>>) attributes {dimension_semantics = [#tpu.dimension_semantics<parallel>], iteration_bounds = array<i64: 2>, scalar_prefetch = 0 : i64, scratch_operands = 1 : i64, tpu.core_type = #tpu.core_type<tc>, window_params = [{transform_indices = @transform_0, window_bounds = array<i64: 1, 64, 64, 2>}, {pipeline_mode = #tpu.pipeline_mode<synchronous>, transform_indices = @transform_1, window_bounds = array<i64: 4, 4, 2, 1>}, {transform_indices = @transform_2, window_bounds = array<i64: 1, 64, 2, 64, 2>}]} {
    %cst = arith.constant 0.000000e+00 : bf16
    %0 = vector.broadcast %cst : bf16 to vector<66x66x2xbf16>
    %c0 = arith.constant 0 : index
    %c0_0 = arith.constant 0 : index
    %c0_1 = arith.constant 0 : index
    %1 = vector.load %arg4[%c0, %c0_0, %c0_1] : memref<66x66x2xbf16, #tpu.memory_space<vmem>>, vector<66x66x2xbf16>
    tpu.vector_store %arg4[%c0, %c0_0, %c0_1], %0 {strides = array<i32>} : memref<66x66x2xbf16, #tpu.memory_space<vmem>>, vector<66x66x2xbf16>,
    %c0_i32 = arith.constant 0 : i32
    %c64_i32 = arith.constant 64 : i32
    %2 = arith.addi %c0_i32, %c64_i32 : i32
    %c1_i32 = arith.constant 1 : i32
    scf.for %arg5 = %c0_i32 to %2 step %c1_i32  : i32 {
      %c0_7 = arith.constant 0 : index
      %4 = arith.index_cast %arg5 : i32 to index
      %c0_8 = arith.constant 0 : index
      %c0_9 = arith.constant 0 : index
      %5 = vector.load %arg1[%c0_7, %4, %c0_8, %c0_9] : memref<1x64x64x2xbf16, #tpu.memory_space<vmem>>, vector<1x1x64x2xbf16>
      %6 = vector.shape_cast %5 : vector<1x1x64x2xbf16> to vector<64x2xbf16>
      %c1_i32_10 = arith.constant 1 : i32
      %7 = arith.addi %arg5, %c1_i32_10 : i32
      %8 = arith.index_cast %7 : i32 to index
      %c1 = arith.constant 1 : index
      %c0_11 = arith.constant 0 : index
      %9 = vector.load %arg4[%8, %c1, %c0_11] : memref<66x66x2xbf16, #tpu.memory_space<vmem>>, vector<1x64x2xbf16>
      %10 = vector.shape_cast %9 : vector<1x64x2xbf16> to vector<64x2xbf16>
      %11 = vector.shape_cast %6 : vector<64x2xbf16> to vector<1x64x2xbf16>
      tpu.vector_store %arg4[%8, %c1, %c0_11], %11 {strides = array<i32>} : memref<66x66x2xbf16, #tpu.memory_space<vmem>>, vector<1x64x2xbf16>,
    }
    %c64_i32_2 = arith.constant 64 : i32
    %c0_i32_3 = arith.constant 0 : i32
    %c64_i32_4 = arith.constant 64 : i32
    %3 = arith.addi %c0_i32_3, %c64_i32_4 : i32
    %c1_i32_5 = arith.constant 1 : i32
    scf.for %arg5 = %c0_i32_3 to %3 step %c1_i32_5  : i32 {
      %c0_i32_7 = arith.constant 0 : i32
      %4 = arith.addi %arg5, %c0_i32_7 : i32
      %c0_i32_8 = arith.constant 0 : i32
      %5 = arith.addi %4, %c0_i32_8 : i32
      %6 = arith.index_cast %5 : i32 to index
      %c0_9 = arith.constant 0 : index
      %c0_10 = arith.constant 0 : index
      %7 = vector.load %arg4[%6, %c0_9, %c0_10] : memref<66x66x2xbf16, #tpu.memory_space<vmem>>, vector<1x64x2xbf16>
      %8 = vector.shape_cast %7 : vector<1x64x2xbf16> to vector<64x2xbf16>
      %c0_11 = arith.constant 0 : index
      %c0_12 = arith.constant 0 : index
      %c0_13 = arith.constant 0 : index
      %c0_14 = arith.constant 0 : index
      %9 = vector.load %arg2[%c0_11, %c0_12, %c0_13, %c0_14] : memref<4x4x2x1xbf16, #tpu.memory_space<vmem>>, vector<1x1x2x1xbf16>
      %10 = vector.shape_cast %9 : vector<1x1x2x1xbf16> to vector<2x1xbf16>
      %cst_15 = arith.constant dense<0.000000e+00> : vector<64x1xf32>
      %11 = tpu.matmul %8, %10, %cst_15 {dimension_numbers = #tpu.dot_dimension_numbers<[1], [0], [0], [1], [0, 0, 1, 1], [], []>} : vector<64x2xbf16>, vector<2x1xbf16>, vector<64x1xf32> -> vector<64x1xf32>
      %c0_i32_16 = arith.constant 0 : i32
      %12 = arith.addi %arg5, %c0_i32_16 : i32
      %c0_i32_17 = arith.constant 0 : i32
      %13 = arith.addi %12, %c0_i32_17 : i32
      %14 = arith.index_cast %13 : i32 to index
      %c1 = arith.constant 1 : index
      %c0_18 = arith.constant 0 : index
      %15 = vector.load %arg4[%14, %c1, %c0_18] : memref<66x66x2xbf16, #tpu.memory_space<vmem>>, vector<1x64x2xbf16>
      %16 = vector.shape_cast %15 : vector<1x64x2xbf16> to vector<64x2xbf16>
      %c0_19 = arith.constant 0 : index
      %c1_20 = arith.constant 1 : index
      %c0_21 = arith.constant 0 : index
      %c0_22 = arith.constant 0 : index
      %17 = vector.load %arg2[%c0_19, %c1_20, %c0_21, %c0_22] : memref<4x4x2x1xbf16, #tpu.memory_space<vmem>>, vector<1x1x2x1xbf16>
      %18 = vector.shape_cast %17 : vector<1x1x2x1xbf16> to vector<2x1xbf16>
      %cst_23 = arith.constant dense<0.000000e+00> : vector<64x1xf32>
      %19 = tpu.matmul %16, %18, %cst_23 {dimension_numbers = #tpu.dot_dimension_numbers<[1], [0], [0], [1], [0, 0, 1, 1], [], []>} : vector<64x2xbf16>, vector<2x1xbf16>, vector<64x1xf32> -> vector<64x1xf32>
      %20 = arith.addf %11, %19 : vector<64x1xf32>
      %c0_i32_24 = arith.constant 0 : i32
      %21 = arith.addi %arg5, %c0_i32_24 : i32
      %c1_i32_25 = arith.constant 1 : i32
      %22 = arith.addi %21, %c1_i32_25 : i32
      %23 = arith.index_cast %22 : i32 to index
      %c0_26 = arith.constant 0 : index
      %c0_27 = arith.constant 0 : index
      %24 = vector.load %arg4[%23, %c0_26, %c0_27] : memref<66x66x2xbf16, #tpu.memory_space<vmem>>, vector<1x64x2xbf16>
      %25 = vector.shape_cast %24 : vector<1x64x2xbf16> to vector<64x2xbf16>
      %c0_28 = arith.constant 0 : index
      %c2 = arith.constant 2 : index
      %c0_29 = arith.constant 0 : index
      %c0_30 = arith.constant 0 : index
      %26 = vector.load %arg2[%c0_28, %c2, %c0_29, %c0_30] : memref<4x4x2x1xbf16, #tpu.memory_space<vmem>>, vector<1x1x2x1xbf16>
      %27 = vector.shape_cast %26 : vector<1x1x2x1xbf16> to vector<2x1xbf16>
      %cst_31 = arith.constant dense<0.000000e+00> : vector<64x1xf32>
      %28 = tpu.matmul %25, %27, %cst_31 {dimension_numbers = #tpu.dot_dimension_numbers<[1], [0], [0], [1], [0, 0, 1, 1], [], []>} : vector<64x2xbf16>, vector<2x1xbf16>, vector<64x1xf32> -> vector<64x1xf32>
      %29 = arith.addf %20, %28 : vector<64x1xf32>
      %c0_i32_32 = arith.constant 0 : i32
      %30 = arith.addi %arg5, %c0_i32_32 : i32
      %c1_i32_33 = arith.constant 1 : i32
      %31 = arith.addi %30, %c1_i32_33 : i32
      %32 = arith.index_cast %31 : i32 to index
      %c1_34 = arith.constant 1 : index
      %c0_35 = arith.constant 0 : index
      %33 = vector.load %arg4[%32, %c1_34, %c0_35] : memref<66x66x2xbf16, #tpu.memory_space<vmem>>, vector<1x64x2xbf16>
      %34 = vector.shape_cast %33 : vector<1x64x2xbf16> to vector<64x2xbf16>
      %c0_36 = arith.constant 0 : index
      %c3 = arith.constant 3 : index
      %c0_37 = arith.constant 0 : index
      %c0_38 = arith.constant 0 : index
      %35 = vector.load %arg2[%c0_36, %c3, %c0_37, %c0_38] : memref<4x4x2x1xbf16, #tpu.memory_space<vmem>>, vector<1x1x2x1xbf16>
      %36 = vector.shape_cast %35 : vector<1x1x2x1xbf16> to vector<2x1xbf16>
      %cst_39 = arith.constant dense<0.000000e+00> : vector<64x1xf32>
      %37 = tpu.matmul %34, %36, %cst_39 {dimension_numbers = #tpu.dot_dimension_numbers<[1], [0], [0], [1], [0, 0, 1, 1], [], []>} : vector<64x2xbf16>, vector<2x1xbf16>, vector<64x1xf32> -> vector<64x1xf32>
      %38 = arith.addf %29, %37 : vector<64x1xf32>
      %39 = math.tanh %38 : vector<64x1xf32>
      %c0_40 = arith.constant 0 : index
      %40 = arith.index_cast %arg5 : i32 to index
      %c0_41 = arith.constant 0 : index
      %c0_42 = arith.constant 0 : index
      %c0_43 = arith.constant 0 : index
      %41 = vector.load %arg3[%c0_40, %40, %c0_41, %c0_42, %c0_43] : memref<1x64x2x64x2xf32, #tpu.memory_space<vmem>>, vector<1x1x1x64x1xf32>
      %42 = vector.shape_cast %41 : vector<1x1x1x64x1xf32> to vector<64x1xf32>
      %43 = vector.shape_cast %39 : vector<64x1xf32> to vector<1x1x1x64x1xf32>
      tpu.vector_store %arg3[%c0_40, %40, %c0_41, %c0_42, %c0_43], %43 {strides = array<i32>} : memref<1x64x2x64x2xf32, #tpu.memory_space<vmem>>, vector<1x1x1x64x1xf32>,
      %c0_i32_44 = arith.constant 0 : i32
      %44 = arith.addi %arg5, %c0_i32_44 : i32
      %c0_i32_45 = arith.constant 0 : i32
      %45 = arith.addi %44, %c0_i32_45 : i32
      %46 = arith.index_cast %45 : i32 to index
      %c1_46 = arith.constant 1 : index
      %c0_47 = arith.constant 0 : index
      %47 = vector.load %arg4[%46, %c1_46, %c0_47] : memref<66x66x2xbf16, #tpu.memory_space<vmem>>, vector<1x64x2xbf16>
      %48 = vector.shape_cast %47 : vector<1x64x2xbf16> to vector<64x2xbf16>
      %c1_48 = arith.constant 1 : index
      %c0_49 = arith.constant 0 : index
      %c0_50 = arith.constant 0 : index
      %c0_51 = arith.constant 0 : index
      %49 = vector.load %arg2[%c1_48, %c0_49, %c0_50, %c0_51] : memref<4x4x2x1xbf16, #tpu.memory_space<vmem>>, vector<1x1x2x1xbf16>
      %50 = vector.shape_cast %49 : vector<1x1x2x1xbf16> to vector<2x1xbf16>
      %cst_52 = arith.constant dense<0.000000e+00> : vector<64x1xf32>
      %51 = tpu.matmul %48, %50, %cst_52 {dimension_numbers = #tpu.dot_dimension_numbers<[1], [0], [0], [1], [0, 0, 1, 1], [], []>} : vector<64x2xbf16>, vector<2x1xbf16>, vector<64x1xf32> -> vector<64x1xf32>
      %c0_i32_53 = arith.constant 0 : i32
      %52 = arith.addi %arg5, %c0_i32_53 : i32
      %c0_i32_54 = arith.constant 0 : i32
      %53 = arith.addi %52, %c0_i32_54 : i32
      %54 = arith.index_cast %53 : i32 to index
      %c2_55 = arith.constant 2 : index
      %c0_56 = arith.constant 0 : index
      %55 = vector.load %arg4[%54, %c2_55, %c0_56] : memref<66x66x2xbf16, #tpu.memory_space<vmem>>, vector<1x64x2xbf16>
      %56 = vector.shape_cast %55 : vector<1x64x2xbf16> to vector<64x2xbf16>
      %c1_57 = arith.constant 1 : index
      %c1_58 = arith.constant 1 : index
      %c0_59 = arith.constant 0 : index
      %c0_60 = arith.constant 0 : index
      %57 = vector.load %arg2[%c1_57, %c1_58, %c0_59, %c0_60] : memref<4x4x2x1xbf16, #tpu.memory_space<vmem>>, vector<1x1x2x1xbf16>
      %58 = vector.shape_cast %57 : vector<1x1x2x1xbf16> to vector<2x1xbf16>
      %cst_61 = arith.constant dense<0.000000e+00> : vector<64x1xf32>
      %59 = tpu.matmul %56, %58, %cst_61 {dimension_numbers = #tpu.dot_dimension_numbers<[1], [0], [0], [1], [0, 0, 1, 1], [], []>} : vector<64x2xbf16>, vector<2x1xbf16>, vector<64x1xf32> -> vector<64x1xf32>
      %60 = arith.addf %51, %59 : vector<64x1xf32>
      %c0_i32_62 = arith.constant 0 : i32
      %61 = arith.addi %arg5, %c0_i32_62 : i32
      %c1_i32_63 = arith.constant 1 : i32
      %62 = arith.addi %61, %c1_i32_63 : i32
      %63 = arith.index_cast %62 : i32 to index
      %c1_64 = arith.constant 1 : index
      %c0_65 = arith.constant 0 : index
      %64 = vector.load %arg4[%63, %c1_64, %c0_65] : memref<66x66x2xbf16, #tpu.memory_space<vmem>>, vector<1x64x2xbf16>
      %65 = vector.shape_cast %64 : vector<1x64x2xbf16> to vector<64x2xbf16>
      %c1_66 = arith.constant 1 : index
      %c2_67 = arith.constant 2 : index
      %c0_68 = arith.constant 0 : index
      %c0_69 = arith.constant 0 : index
      %66 = vector.load %arg2[%c1_66, %c2_67, %c0_68, %c0_69] : memref<4x4x2x1xbf16, #tpu.memory_space<vmem>>, vector<1x1x2x1xbf16>
      %67 = vector.shape_cast %66 : vector<1x1x2x1xbf16> to vector<2x1xbf16>
      %cst_70 = arith.constant dense<0.000000e+00> : vector<64x1xf32>
      %68 = tpu.matmul %65, %67, %cst_70 {dimension_numbers = #tpu.dot_dimension_numbers<[1], [0], [0], [1], [0, 0, 1, 1], [], []>} : vector<64x2xbf16>, vector<2x1xbf16>, vector<64x1xf32> -> vector<64x1xf32>
      %69 = arith.addf %60, %68 : vector<64x1xf32>
      %c0_i32_71 = arith.constant 0 : i32
      %70 = arith.addi %arg5, %c0_i32_71 : i32
      %c1_i32_72 = arith.constant 1 : i32
      %71 = arith.addi %70, %c1_i32_72 : i32
      %72 = arith.index_cast %71 : i32 to index
      %c2_73 = arith.constant 2 : index
      %c0_74 = arith.constant 0 : index
      %73 = vector.load %arg4[%72, %c2_73, %c0_74] : memref<66x66x2xbf16, #tpu.memory_space<vmem>>, vector<1x64x2xbf16>
      %74 = vector.shape_cast %73 : vector<1x64x2xbf16> to vector<64x2xbf16>
      %c1_75 = arith.constant 1 : index
      %c3_76 = arith.constant 3 : index
      %c0_77 = arith.constant 0 : index
      %c0_78 = arith.constant 0 : index
      %75 = vector.load %arg2[%c1_75, %c3_76, %c0_77, %c0_78] : memref<4x4x2x1xbf16, #tpu.memory_space<vmem>>, vector<1x1x2x1xbf16>
      %76 = vector.shape_cast %75 : vector<1x1x2x1xbf16> to vector<2x1xbf16>
      %cst_79 = arith.constant dense<0.000000e+00> : vector<64x1xf32>
      %77 = tpu.matmul %74, %76, %cst_79 {dimension_numbers = #tpu.dot_dimension_numbers<[1], [0], [0], [1], [0, 0, 1, 1], [], []>} : vector<64x2xbf16>, vector<2x1xbf16>, vector<64x1xf32> -> vector<64x1xf32>
      %78 = arith.addf %69, %77 : vector<64x1xf32>
      %79 = math.tanh %78 : vector<64x1xf32>
      %c0_80 = arith.constant 0 : index
      %80 = arith.index_cast %arg5 : i32 to index
      %c0_81 = arith.constant 0 : index
      %c0_82 = arith.constant 0 : index
      %c1_83 = arith.constant 1 : index
      %81 = vector.load %arg3[%c0_80, %80, %c0_81, %c0_82, %c1_83] : memref<1x64x2x64x2xf32, #tpu.memory_space<vmem>>, vector<1x1x1x64x1xf32>
      %82 = vector.shape_cast %81 : vector<1x1x1x64x1xf32> to vector<64x1xf32>
      %83 = vector.shape_cast %79 : vector<64x1xf32> to vector<1x1x1x64x1xf32>
      tpu.vector_store %arg3[%c0_80, %80, %c0_81, %c0_82, %c1_83], %83 {strides = array<i32>} : memref<1x64x2x64x2xf32, #tpu.memory_space<vmem>>, vector<1x1x1x64x1xf32>,
      %c1_i32_84 = arith.constant 1 : i32
      %84 = arith.addi %arg5, %c1_i32_84 : i32
      %c0_i32_85 = arith.constant 0 : i32
      %85 = arith.addi %84, %c0_i32_85 : i32
      %86 = arith.index_cast %85 : i32 to index
      %c0_86 = arith.constant 0 : index
      %c0_87 = arith.constant 0 : index
      %87 = vector.load %arg4[%86, %c0_86, %c0_87] : memref<66x66x2xbf16, #tpu.memory_space<vmem>>, vector<1x64x2xbf16>
      %88 = vector.shape_cast %87 : vector<1x64x2xbf16> to vector<64x2xbf16>
      %c2_88 = arith.constant 2 : index
      %c0_89 = arith.constant 0 : index
      %c0_90 = arith.constant 0 : index
      %c0_91 = arith.constant 0 : index
      %89 = vector.load %arg2[%c2_88, %c0_89, %c0_90, %c0_91] : memref<4x4x2x1xbf16, #tpu.memory_space<vmem>>, vector<1x1x2x1xbf16>
      %90 = vector.shape_cast %89 : vector<1x1x2x1xbf16> to vector<2x1xbf16>
      %cst_92 = arith.constant dense<0.000000e+00> : vector<64x1xf32>
      %91 = tpu.matmul %88, %90, %cst_92 {dimension_numbers = #tpu.dot_dimension_numbers<[1], [0], [0], [1], [0, 0, 1, 1], [], []>} : vector<64x2xbf16>, vector<2x1xbf16>, vector<64x1xf32> -> vector<64x1xf32>
      %c1_i32_93 = arith.constant 1 : i32
      %92 = arith.addi %arg5, %c1_i32_93 : i32
      %c0_i32_94 = arith.constant 0 : i32
      %93 = arith.addi %92, %c0_i32_94 : i32
      %94 = arith.index_cast %93 : i32 to index
      %c1_95 = arith.constant 1 : index
      %c0_96 = arith.constant 0 : index
      %95 = vector.load %arg4[%94, %c1_95, %c0_96] : memref<66x66x2xbf16, #tpu.memory_space<vmem>>, vector<1x64x2xbf16>
      %96 = vector.shape_cast %95 : vector<1x64x2xbf16> to vector<64x2xbf16>
      %c2_97 = arith.constant 2 : index
      %c1_98 = arith.constant 1 : index
      %c0_99 = arith.constant 0 : index
      %c0_100 = arith.constant 0 : index
      %97 = vector.load %arg2[%c2_97, %c1_98, %c0_99, %c0_100] : memref<4x4x2x1xbf16, #tpu.memory_space<vmem>>, vector<1x1x2x1xbf16>
      %98 = vector.shape_cast %97 : vector<1x1x2x1xbf16> to vector<2x1xbf16>
      %cst_101 = arith.constant dense<0.000000e+00> : vector<64x1xf32>
      %99 = tpu.matmul %96, %98, %cst_101 {dimension_numbers = #tpu.dot_dimension_numbers<[1], [0], [0], [1], [0, 0, 1, 1], [], []>} : vector<64x2xbf16>, vector<2x1xbf16>, vector<64x1xf32> -> vector<64x1xf32>
      %100 = arith.addf %91, %99 : vector<64x1xf32>
      %c1_i32_102 = arith.constant 1 : i32
      %101 = arith.addi %arg5, %c1_i32_102 : i32
      %c1_i32_103 = arith.constant 1 : i32
      %102 = arith.addi %101, %c1_i32_103 : i32
      %103 = arith.index_cast %102 : i32 to index
      %c0_104 = arith.constant 0 : index
      %c0_105 = arith.constant 0 : index
      %104 = vector.load %arg4[%103, %c0_104, %c0_105] : memref<66x66x2xbf16, #tpu.memory_space<vmem>>, vector<1x64x2xbf16>
      %105 = vector.shape_cast %104 : vector<1x64x2xbf16> to vector<64x2xbf16>
      %c2_106 = arith.constant 2 : index
      %c2_107 = arith.constant 2 : index
      %c0_108 = arith.constant 0 : index
      %c0_109 = arith.constant 0 : index
      %106 = vector.load %arg2[%c2_106, %c2_107, %c0_108, %c0_109] : memref<4x4x2x1xbf16, #tpu.memory_space<vmem>>, vector<1x1x2x1xbf16>
      %107 = vector.shape_cast %106 : vector<1x1x2x1xbf16> to vector<2x1xbf16>
      %cst_110 = arith.constant dense<0.000000e+00> : vector<64x1xf32>
      %108 = tpu.matmul %105, %107, %cst_110 {dimension_numbers = #tpu.dot_dimension_numbers<[1], [0], [0], [1], [0, 0, 1, 1], [], []>} : vector<64x2xbf16>, vector<2x1xbf16>, vector<64x1xf32> -> vector<64x1xf32>
      %109 = arith.addf %100, %108 : vector<64x1xf32>
      %c1_i32_111 = arith.constant 1 : i32
      %110 = arith.addi %arg5, %c1_i32_111 : i32
      %c1_i32_112 = arith.constant 1 : i32
      %111 = arith.addi %110, %c1_i32_112 : i32
      %112 = arith.index_cast %111 : i32 to index
      %c1_113 = arith.constant 1 : index
      %c0_114 = arith.constant 0 : index
      %113 = vector.load %arg4[%112, %c1_113, %c0_114] : memref<66x66x2xbf16, #tpu.memory_space<vmem>>, vector<1x64x2xbf16>
      %114 = vector.shape_cast %113 : vector<1x64x2xbf16> to vector<64x2xbf16>
      %c2_115 = arith.constant 2 : index
      %c3_116 = arith.constant 3 : index
      %c0_117 = arith.constant 0 : index
      %c0_118 = arith.constant 0 : index
      %115 = vector.load %arg2[%c2_115, %c3_116, %c0_117, %c0_118] : memref<4x4x2x1xbf16, #tpu.memory_space<vmem>>, vector<1x1x2x1xbf16>
      %116 = vector.shape_cast %115 : vector<1x1x2x1xbf16> to vector<2x1xbf16>
      %cst_119 = arith.constant dense<0.000000e+00> : vector<64x1xf32>
      %117 = tpu.matmul %114, %116, %cst_119 {dimension_numbers = #tpu.dot_dimension_numbers<[1], [0], [0], [1], [0, 0, 1, 1], [], []>} : vector<64x2xbf16>, vector<2x1xbf16>, vector<64x1xf32> -> vector<64x1xf32>
      %118 = arith.addf %109, %117 : vector<64x1xf32>
      %119 = math.tanh %118 : vector<64x1xf32>
      %c0_120 = arith.constant 0 : index
      %120 = arith.index_cast %arg5 : i32 to index
      %c1_121 = arith.constant 1 : index
      %c0_122 = arith.constant 0 : index
      %c0_123 = arith.constant 0 : index
      %121 = vector.load %arg3[%c0_120, %120, %c1_121, %c0_122, %c0_123] : memref<1x64x2x64x2xf32, #tpu.memory_space<vmem>>, vector<1x1x1x64x1xf32>
      %122 = vector.shape_cast %121 : vector<1x1x1x64x1xf32> to vector<64x1xf32>
      %123 = vector.shape_cast %119 : vector<64x1xf32> to vector<1x1x1x64x1xf32>
      tpu.vector_store %arg3[%c0_120, %120, %c1_121, %c0_122, %c0_123], %123 {strides = array<i32>} : memref<1x64x2x64x2xf32, #tpu.memory_space<vmem>>, vector<1x1x1x64x1xf32>,
      %c1_i32_124 = arith.constant 1 : i32
      %124 = arith.addi %arg5, %c1_i32_124 : i32
      %c0_i32_125 = arith.constant 0 : i32
      %125 = arith.addi %124, %c0_i32_125 : i32
      %126 = arith.index_cast %125 : i32 to index
      %c1_126 = arith.constant 1 : index
      %c0_127 = arith.constant 0 : index
      %127 = vector.load %arg4[%126, %c1_126, %c0_127] : memref<66x66x2xbf16, #tpu.memory_space<vmem>>, vector<1x64x2xbf16>
      %128 = vector.shape_cast %127 : vector<1x64x2xbf16> to vector<64x2xbf16>
      %c3_128 = arith.constant 3 : index
      %c0_129 = arith.constant 0 : index
      %c0_130 = arith.constant 0 : index
      %c0_131 = arith.constant 0 : index
      %129 = vector.load %arg2[%c3_128, %c0_129, %c0_130, %c0_131] : memref<4x4x2x1xbf16, #tpu.memory_space<vmem>>, vector<1x1x2x1xbf16>
      %130 = vector.shape_cast %129 : vector<1x1x2x1xbf16> to vector<2x1xbf16>
      %cst_132 = arith.constant dense<0.000000e+00> : vector<64x1xf32>
      %131 = tpu.matmul %128, %130, %cst_132 {dimension_numbers = #tpu.dot_dimension_numbers<[1], [0], [0], [1], [0, 0, 1, 1], [], []>} : vector<64x2xbf16>, vector<2x1xbf16>, vector<64x1xf32> -> vector<64x1xf32>
      %c1_i32_133 = arith.constant 1 : i32
      %132 = arith.addi %arg5, %c1_i32_133 : i32
      %c0_i32_134 = arith.constant 0 : i32
      %133 = arith.addi %132, %c0_i32_134 : i32
      %134 = arith.index_cast %133 : i32 to index
      %c2_135 = arith.constant 2 : index
      %c0_136 = arith.constant 0 : index
      %135 = vector.load %arg4[%134, %c2_135, %c0_136] : memref<66x66x2xbf16, #tpu.memory_space<vmem>>, vector<1x64x2xbf16>
      %136 = vector.shape_cast %135 : vector<1x64x2xbf16> to vector<64x2xbf16>
      %c3_137 = arith.constant 3 : index
      %c1_138 = arith.constant 1 : index
      %c0_139 = arith.constant 0 : index
      %c0_140 = arith.constant 0 : index
      %137 = vector.load %arg2[%c3_137, %c1_138, %c0_139, %c0_140] : memref<4x4x2x1xbf16, #tpu.memory_space<vmem>>, vector<1x1x2x1xbf16>
      %138 = vector.shape_cast %137 : vector<1x1x2x1xbf16> to vector<2x1xbf16>
      %cst_141 = arith.constant dense<0.000000e+00> : vector<64x1xf32>
      %139 = tpu.matmul %136, %138, %cst_141 {dimension_numbers = #tpu.dot_dimension_numbers<[1], [0], [0], [1], [0, 0, 1, 1], [], []>} : vector<64x2xbf16>, vector<2x1xbf16>, vector<64x1xf32> -> vector<64x1xf32>
      %140 = arith.addf %131, %139 : vector<64x1xf32>
      %c1_i32_142 = arith.constant 1 : i32
      %141 = arith.addi %arg5, %c1_i32_142 : i32
      %c1_i32_143 = arith.constant 1 : i32
      %142 = arith.addi %141, %c1_i32_143 : i32
      %143 = arith.index_cast %142 : i32 to index
      %c1_144 = arith.constant 1 : index
      %c0_145 = arith.constant 0 : index
      %144 = vector.load %arg4[%143, %c1_144, %c0_145] : memref<66x66x2xbf16, #tpu.memory_space<vmem>>, vector<1x64x2xbf16>
      %145 = vector.shape_cast %144 : vector<1x64x2xbf16> to vector<64x2xbf16>
      %c3_146 = arith.constant 3 : index
      %c2_147 = arith.constant 2 : index
      %c0_148 = arith.constant 0 : index
      %c0_149 = arith.constant 0 : index
      %146 = vector.load %arg2[%c3_146, %c2_147, %c0_148, %c0_149] : memref<4x4x2x1xbf16, #tpu.memory_space<vmem>>, vector<1x1x2x1xbf16>
      %147 = vector.shape_cast %146 : vector<1x1x2x1xbf16> to vector<2x1xbf16>
      %cst_150 = arith.constant dense<0.000000e+00> : vector<64x1xf32>
      %148 = tpu.matmul %145, %147, %cst_150 {dimension_numbers = #tpu.dot_dimension_numbers<[1], [0], [0], [1], [0, 0, 1, 1], [], []>} : vector<64x2xbf16>, vector<2x1xbf16>, vector<64x1xf32> -> vector<64x1xf32>
      %149 = arith.addf %140, %148 : vector<64x1xf32>
      %c1_i32_151 = arith.constant 1 : i32
      %150 = arith.addi %arg5, %c1_i32_151 : i32
      %c1_i32_152 = arith.constant 1 : i32
      %151 = arith.addi %150, %c1_i32_152 : i32
      %152 = arith.index_cast %151 : i32 to index
      %c2_153 = arith.constant 2 : index
      %c0_154 = arith.constant 0 : index
      %153 = vector.load %arg4[%152, %c2_153, %c0_154] : memref<66x66x2xbf16, #tpu.memory_space<vmem>>, vector<1x64x2xbf16>
      %154 = vector.shape_cast %153 : vector<1x64x2xbf16> to vector<64x2xbf16>
      %c3_155 = arith.constant 3 : index
      %c3_156 = arith.constant 3 : index
      %c0_157 = arith.constant 0 : index
      %c0_158 = arith.constant 0 : index
      %155 = vector.load %arg2[%c3_155, %c3_156, %c0_157, %c0_158] : memref<4x4x2x1xbf16, #tpu.memory_space<vmem>>, vector<1x1x2x1xbf16>
      %156 = vector.shape_cast %155 : vector<1x1x2x1xbf16> to vector<2x1xbf16>
      %cst_159 = arith.constant dense<0.000000e+00> : vector<64x1xf32>
      %157 = tpu.matmul %154, %156, %cst_159 {dimension_numbers = #tpu.dot_dimension_numbers<[1], [0], [0], [1], [0, 0, 1, 1], [], []>} : vector<64x2xbf16>, vector<2x1xbf16>, vector<64x1xf32> -> vector<64x1xf32>
      %158 = arith.addf %149, %157 : vector<64x1xf32>
      %159 = math.tanh %158 : vector<64x1xf32>
      %c0_160 = arith.constant 0 : index
      %160 = arith.index_cast %arg5 : i32 to index
      %c1_161 = arith.constant 1 : index
      %c0_162 = arith.constant 0 : index
      %c1_163 = arith.constant 1 : index
      %161 = vector.load %arg3[%c0_160, %160, %c1_161, %c0_162, %c1_163] : memref<1x64x2x64x2xf32, #tpu.memory_space<vmem>>, vector<1x1x1x64x1xf32>
      %162 = vector.shape_cast %161 : vector<1x1x1x64x1xf32> to vector<64x1xf32>
      %163 = vector.shape_cast %159 : vector<64x1xf32> to vector<1x1x1x64x1xf32>
      tpu.vector_store %arg3[%c0_160, %160, %c1_161, %c0_162, %c1_163], %163 {strides = array<i32>} : memref<1x64x2x64x2xf32, #tpu.memory_space<vmem>>, vector<1x1x1x64x1xf32>,
    }
    %c64_i32_6 = arith.constant 64 : i32
    return
  }
  func.func @transform_0(%arg0: i32) -> (i32, i32, i32, i32) {
    %c0_i32 = arith.constant 0 : i32
    %c0_i32_0 = arith.constant 0 : i32
    %c0_i32_1 = arith.constant 0 : i32
    %c0_i32_2 = arith.constant 0 : i32
    return %arg0, %c0_i32, %c0_i32_0, %c0_i32_1 : i32, i32, i32, i32
  }
  func.func @transform_1(%arg0: i32) -> (i32, i32, i32, i32) {
    %c0_i32 = arith.constant 0 : i32
    %c0_i32_0 = arith.constant 0 : i32
    %c0_i32_1 = arith.constant 0 : i32
    %c0_i32_2 = arith.constant 0 : i32
    %c0_i32_3 = arith.constant 0 : i32
    return %c0_i32, %c0_i32_0, %c0_i32_1, %c0_i32_2 : i32, i32, i32, i32
  }
  func.func @transform_2(%arg0: i32) -> (i32, i32, i32, i32, i32) {
    %c0_i32 = arith.constant 0 : i32
    %c0_i32_0 = arith.constant 0 : i32
    %c0_i32_1 = arith.constant 0 : i32
    %c0_i32_2 = arith.constant 0 : i32
    %c0_i32_3 = arith.constant 0 : i32
    return %arg0, %c0_i32, %c0_i32_0, %c0_i32_1, %c0_i32_2 : i32, i32, i32, i32, i32
  }
}

</mosaic_0001>

<bundles_post_ra>
// kernel: dc_decoder_forward.6
= control target key start
LH: loop header
LB: loop body
LE: loop exit
PB: predicated region body
PF: predicated region fallthrough
CT: control target
= control target key end

     0   :  { %vm18_vm0 = vcmask 1043456   ;;  %v1715_v0 = vmov 0.0   ;;  %vm1716_vm1 = vmmov 0   ;;  %vm14_vm2 = vcmask 64512   ;;  %s2438_s1 = inlined_call_operand.vmem [shape: bf16[16,8,32], index: 1, kind: input, shape index: {}]   ;;  %s2439_s0 = inlined_call_operand.vmem [shape: bf16[2,8], index: 0, kind: input, shape index: {}]   ;;  %s2440_s2 = inlined_call_operand.vmem [shape: bf16[2,16,32], index: 2, kind: output, shape index: {}]  }
   0x1   :  { %1613 = vmatprep.subr.bf16.mxu0 %v1715_v0  ;;  %1619 = vmatprep.subr.bf16.mxu1 %v1715_v0  ;;  %v13_v1 = vld [vmem:[%s2438_s1] sm:$0xf]  ;;  %v1535_v2 = vld [vmem:[%s2438_s1 + $0x4] sm:$0xf]  ;;  %v1537_v5 = vld [vmem:[%s2438_s1 + $0x8] sm:$0xf] }
   0x2   :  { %v20_v3 = vsel %vm18_vm0, %v13_v1, 0  ;;  %v65_v4 = vsel %vm18_vm0, %v1535_v2, 0  ;;  %1615 = vmatprep.mubr.msk.bf16.mxu0 %vm1716_vm1, %v1715_v0  ;;  %1621 = vmatprep.mubr.msk.bf16.mxu1 %vm1716_vm1, %v1715_v0  ;;  %v1539_v6 = vld [vmem:[%s2438_s1 + $0xc] sm:$0xf]  ;;  %v1757_v7 = vld [vmem:[%s2439_s0] sm:$0x1] }
   0x3   :  { %1614 = vmatpush3.bf16.msra.mxu0 %v20_v3  ;;  %1620 = vmatpush3.bf16.msra.mxu1 %v65_v4  ;;  %v110_v8 = vsel %vm18_vm0, %v1537_v5, 0  ;;  %v155_v9 = vsel %vm18_vm0, %v1539_v6, 0  ;;  %v1541_v10 = vld [vmem:[%s2438_s1 + $0x10] sm:$0xf]  ;;  %v1543_v11 = vld [vmem:[%s2438_s1 + $0x14] sm:$0xf] }
   0x4   :  { %1625 = vmatprep.subr.bf16.mxu0 %v1715_v0  ;;  %1631 = vmatprep.subr.bf16.mxu1 %v1715_v0  ;;  %v200_v12 = vsel %vm18_vm0, %v1541_v10, 0  ;;  %v245_v13 = vsel %vm18_vm0, %v1543_v11, 0  ;;  %v1545_v14 = vld [vmem:[%s2438_s1 + $0x18] sm:$0xf]  ;;  %v1547_v15 = vld [vmem:[%s2438_s1 + $0x1c] sm:$0xf] }
   0x5   :  { %v290_v16 = vsel %vm18_vm0, %v1545_v14, 0  ;;  %v335_v17 = vsel %vm18_vm0, %v1547_v15, 0  ;;  %v1549_v18 = vld [vmem:[%s2438_s1 + $0x20] sm:$0xf]  ;;  %v1551_v19 = vld [vmem:[%s2438_s1 + $0x24] sm:$0xf] }
   0x6   :  { %1616 = vmatmul.mubr.msk.bf16.vlgmr.msra.gmra.mrb[0].mxu0 %vm14_vm2, %v1757_v7  ;;  %1622 = vmatmul.mubr.msk.bf16.vlgmr.msra.gmra.mrb[0].mxu1 %vm14_vm2, %v1757_v7  ;;  %v380_v20 = vsel %vm18_vm0, %v1549_v18, 0  ;;  %v425_v21 = vsel %vm18_vm0, %v1551_v19, 0  ;;  %v1553_v22 = vld [vmem:[%s2438_s1 + $0x28] sm:$0xf]  ;;  %v1555_v23 = vld [vmem:[%s2438_s1 + $0x2c] sm:$0xf] }
   0x7   :  { %1626 = vmatpush3.bf16.msra.mxu0 %v110_v8  ;;  %1632 = vmatpush3.bf16.msra.mxu1 %v155_v9  ;;  %v470_v24 = vsel %vm18_vm0, %v1553_v22, 0  ;;  %v515_v25 = vsel %vm18_vm0, %v1555_v23, 0  ;;  %v1557_v26 = vld [vmem:[%s2438_s1 + $0x30] sm:$0xf]  ;;  %v1559_v27 = vld [vmem:[%s2438_s1 + $0x34] sm:$0xf] }
   0x8   :  { %1627 = vmatprep.mubr.msk.bf16.mxu0 %vm1716_vm1, %v1715_v0  ;;  %1633 = vmatprep.mubr.msk.bf16.mxu1 %vm1716_vm1, %v1715_v0  ;;  %v560_v28 = vsel %vm18_vm0, %v1557_v26, 0  ;;  %v605_v29 = vsel %vm18_vm0, %v1559_v27, 0  ;;  %v1561_v30 = vld [vmem:[%s2438_s1 + $0x38] sm:$0xf]  ;;  %v1563_v31 = vld [vmem:[%s2438_s1 + $0x3c] sm:$0xf] }
   0x9   :  { %1637 = vmatprep.subr.bf16.mxu0 %v1715_v0  ;;  %1643 = vmatprep.subr.bf16.mxu1 %v1715_v0  ;;  %v650_v32 = vsel %vm18_vm0, %v1561_v30, 0  ;;  %v695_v33 = vsel %vm18_vm0, %v1563_v31, 0  ;;  %vm829_vm3 = vcmask 253952   ;;  %vm830_vm4 = vsmask.f32 256 }
   0xa   :  { %vm924_vm5 = vcmask 254977   ;;  %vm925_vm6 = vsmask.f32 1280  ;;  %vm1019_vm7 = vcmask 256002   ;;  %vm1020_vm8 = vsmask.f32 2304  ;;  %vm2031_vm13 = vmand %vm829_vm3, %vm830_vm4 }
   0xb   :  { %vm877_vm9 = vsmask.f32 7938  ;;  %vm1114_vm10 = vcmask 257027   ;;  %vm1115_vm11 = vsmask.f32 3328  ;;  %vm2041_vm14 = vmand %vm924_vm5, %vm925_vm6 }
   0xc   :  { %vm972_vm12 = vsmask.f32 7942  ;;  %vm1067_vm15 = vsmask.f32 7946  ;;  %vm2083_vm0 = vmand %vm1019_vm7, %vm1020_vm8 }
   0xd   :  { %vm2127_vm4 = vmand %vm829_vm3, %vm877_vm9 }
   0xe   :  { %1628 = vmatmul.mubr.msk.bf16.vlgmr.msra.gmra.mrb[4].mxu0 %vm14_vm2, %v1757_v7  ;;  %1634 = vmatmul.mubr.msk.bf16.vlgmr.msra.gmra.mrb[4].mxu1 %vm14_vm2, %v1757_v7  ;;  %vm2148_vm3 = vmand %vm924_vm5, %vm972_vm12 }
   0xf   :  { %1638 = vmatpush3.bf16.msra.mxu0 %v200_v12  ;;  %1644 = vmatpush3.bf16.msra.mxu1 %v245_v13  ;;  %vm2211_vm5 = vmand %vm1019_vm7, %vm1067_vm15 }
  0x10   :  { %1639 = vmatprep.mubr.msk.bf16.mxu0 %vm1716_vm1, %v1715_v0  ;;  %1645 = vmatprep.mubr.msk.bf16.mxu1 %vm1716_vm1, %v1715_v0 }
  0x11   :  { %1649 = vmatprep.subr.bf16.mxu0 %v1715_v0  ;;  %1655 = vmatprep.subr.bf16.mxu1 %v1715_v0 }
  0x16   :  { %1640 = vmatmul.mubr.msk.bf16.vlgmr.msra.gmra.mrb[8].mxu0 %vm14_vm2, %v1757_v7  ;;  %1646 = vmatmul.mubr.msk.bf16.vlgmr.msra.gmra.mrb[8].mxu1 %vm14_vm2, %v1757_v7 }
  0x17   :  { %1650 = vmatpush3.bf16.msra.mxu0 %v290_v16  ;;  %1656 = vmatpush3.bf16.msra.mxu1 %v335_v17 }
  0x18   :  { %1651 = vmatprep.mubr.msk.bf16.mxu0 %vm1716_vm1, %v1715_v0  ;;  %1657 = vmatprep.mubr.msk.bf16.mxu1 %vm1716_vm1, %v1715_v0 }
  0x19   :  { %1661 = vmatprep.subr.bf16.mxu0 %v1715_v0  ;;  %1667 = vmatprep.subr.bf16.mxu1 %v1715_v0 }
  0x1e   :  { %1652 = vmatmul.mubr.msk.bf16.vlgmr.msra.gmra.mrb[12].mxu0 %vm14_vm2, %v1757_v7  ;;  %1658 = vmatmul.mubr.msk.bf16.vlgmr.msra.gmra.mrb[12].mxu1 %vm14_vm2, %v1757_v7 }
  0x1f   :  { %1662 = vmatpush3.bf16.msra.mxu0 %v380_v20  ;;  %1668 = vmatpush3.bf16.msra.mxu1 %v425_v21 }
  0x20   :  { %1663 = vmatprep.mubr.msk.bf16.mxu0 %vm1716_vm1, %v1715_v0  ;;  %1669 = vmatprep.mubr.msk.bf16.mxu1 %vm1716_vm1, %v1715_v0 }
  0x21   :  { %1673 = vmatprep.subr.bf16.mxu0 %v1715_v0  ;;  %1679 = vmatprep.subr.bf16.mxu1 %v1715_v0 }
  0x26   :  { %1664 = vmatmul.mubr.msk.bf16.vlgmr.msra.gmra.mrb[16].mxu0 %vm14_vm2, %v1757_v7  ;;  %1670 = vmatmul.mubr.msk.bf16.vlgmr.msra.gmra.mrb[16].mxu1 %vm14_vm2, %v1757_v7 }
  0x27   :  { %1674 = vmatpush3.bf16.msra.mxu0 %v470_v24  ;;  %1680 = vmatpush3.bf16.msra.mxu1 %v515_v25 }
  0x28   :  { %1675 = vmatprep.mubr.msk.bf16.mxu0 %vm1716_vm1, %v1715_v0  ;;  %1681 = vmatprep.mubr.msk.bf16.mxu1 %vm1716_vm1, %v1715_v0 }
  0x29   :  { %1685 = vmatprep.subr.bf16.mxu0 %v1715_v0  ;;  %1691 = vmatprep.subr.bf16.mxu1 %v1715_v0 }
  0x2e   :  { %1676 = vmatmul.mubr.msk.bf16.vlgmr.msra.gmra.mrb[20].mxu0 %vm14_vm2, %v1757_v7  ;;  %1682 = vmatmul.mubr.msk.bf16.vlgmr.msra.gmra.mrb[20].mxu1 %vm14_vm2, %v1757_v7 }
  0x2f   :  { %1686 = vmatpush3.bf16.msra.mxu0 %v560_v28  ;;  %1692 = vmatpush3.bf16.msra.mxu1 %v605_v29 }
  0x30   :  { %1687 = vmatprep.mubr.msk.bf16.mxu0 %vm1716_vm1, %v1715_v0  ;;  %1693 = vmatprep.mubr.msk.bf16.mxu1 %vm1716_vm1, %v1715_v0 }
  0x31   :  { %1697 = vmatprep.subr.bf16.mxu0 %v1715_v0  ;;  %1703 = vmatprep.subr.bf16.mxu1 %v1715_v0 }
  0x36   :  { %1688 = vmatmul.mubr.msk.bf16.vlgmr.msra.gmra.mrb[24].mxu0 %vm14_vm2, %v1757_v7  ;;  %1694 = vmatmul.mubr.msk.bf16.vlgmr.msra.gmra.mrb[24].mxu1 %vm14_vm2, %v1757_v7 }
  0x37   :  { %1698 = vmatpush3.bf16.msra.mxu0 %v650_v32  ;;  %1704 = vmatpush3.bf16.msra.mxu1 %v695_v33 }
  0x38   :  { %1699 = vmatprep.mubr.msk.bf16.mxu0 %vm1716_vm1, %v1715_v0  ;;  %1705 = vmatprep.mubr.msk.bf16.mxu1 %vm1716_vm1, %v1715_v0  ;;  %vm1162_vm1 = vsmask.f32 7950 }
  0x39   :  { %vm2234_vm6 = vmand %vm1114_vm10, %vm1162_vm1 }
  0x3e   :  { %1700 = vmatmul.mubr.msk.bf16.vlgmr.msra.gmra.mrb[28].mxu0 %vm14_vm2, %v1757_v7  ;;  %1706 = vmatmul.mubr.msk.bf16.vlgmr.msra.gmra.mrb[28].mxu1 %vm14_vm2, %v1757_v7  ;;  %vm2112_vm2 = vmand %vm1114_vm10, %vm1115_vm11 }
  0xd9   :  { %v1883_v34 = vpop.f32.mrb[0].mxu0  ;;  %v1885_v35 = vpop.f32.mrb[0].mxu1 }
  0xda   :  { %v737_v36 = vmul.f32 %v1883_v34, %v1883_v34  ;;  %v738_v37 = vadd.f32 %v1885_v35, %v1883_v34  ;;  %v739_v38 = vmul.f32 %v1885_v35, %v1885_v35  ;;  %v1617_v39 = vpop.f32.mrb[1].mxu0  ;;  %v1623_v40 = vpop.f32.mrb[1].mxu1 }
  0xdb   :  { %v59_v41 = vpop.f32.mrb[2].mxu0  ;;  %v104_v42 = vpop.f32.mrb[2].mxu1 }
  0xdc   :  { %v740_v43 = vadd.f32 %v739_v38, %v737_v36  ;;  %v1618_v44 = vpop.f32.mrb[3].mxu0  ;;  %v1624_v45 = vpop.f32.mrb[3].mxu1 }
  0xe1   :  { %v1893_v46 = vpop.f32.mrb[4].mxu0  ;;  %v1895_v47 = vpop.f32.mrb[4].mxu1 }
  0xe2   :  { %v741_v48 = vadd.f32 %v738_v37, %v1893_v46  ;;  %v742_v49 = vmul.f32 %v1893_v46, %v1893_v46  ;;  %v745_v50 = vmul.f32 %v1895_v47, %v1895_v47  ;;  %v1629_v51 = vpop.f32.mrb[5].mxu0  ;;  %v1635_v52 = vpop.f32.mrb[5].mxu1 }
  0xe3   :  { %v149_v53 = vpop.f32.mrb[6].mxu0  ;;  %v194_v54 = vpop.f32.mrb[6].mxu1 }
  0xe4   :  { %v743_v55 = vadd.f32 %v742_v49, %v740_v43  ;;  %v744_v56 = vadd.f32 %v741_v48, %v1895_v47  ;;  %v1630_v57 = vpop.f32.mrb[7].mxu0  ;;  %v1636_v58 = vpop.f32.mrb[7].mxu1 }
  0xe6   :  { %v746_v59 = vadd.f32 %v745_v50, %v743_v55 }
  0xe9   :  { %v1903_v60 = vpop.f32.mrb[8].mxu0  ;;  %v1905_v61 = vpop.f32.mrb[8].mxu1 }
  0xea   :  { %v747_v62 = vadd.f32 %v744_v56, %v1903_v60  ;;  %v748_v63 = vmul.f32 %v1903_v60, %v1903_v60  ;;  %v751_v0 = vmul.f32 %v1905_v61, %v1905_v61  ;;  %v1641_v1 = vpop.f32.mrb[9].mxu0  ;;  %v1647_v2 = vpop.f32.mrb[9].mxu1 }
  0xeb   :  { %v239_v3 = vpop.f32.mrb[10].mxu0  ;;  %v284_v4 = vpop.f32.mrb[10].mxu1 }
  0xec   :  { %v749_v5 = vadd.f32 %v748_v63, %v746_v59  ;;  %v750_v6 = vadd.f32 %v747_v62, %v1905_v61  ;;  %v1642_v7 = vpop.f32.mrb[11].mxu0  ;;  %v1648_v8 = vpop.f32.mrb[11].mxu1 }
  0xee   :  { %v752_v9 = vadd.f32 %v751_v0, %v749_v5 }
  0xf1   :  { %v1913_v10 = vpop.f32.mrb[12].mxu0  ;;  %v1915_v11 = vpop.f32.mrb[12].mxu1 }
  0xf2   :  { %v753_v12 = vadd.f32 %v750_v6, %v1913_v10  ;;  %v754_v13 = vmul.f32 %v1913_v10, %v1913_v10  ;;  %v757_v14 = vmul.f32 %v1915_v11, %v1915_v11  ;;  %v1653_v15 = vpop.f32.mrb[13].mxu0  ;;  %v1659_v16 = vpop.f32.mrb[13].mxu1 }
  0xf3   :  { %v329_v17 = vpop.f32.mrb[14].mxu0  ;;  %v374_v18 = vpop.f32.mrb[14].mxu1 }
  0xf4   :  { %v755_v19 = vadd.f32 %v754_v13, %v752_v9  ;;  %v756_v20 = vadd.f32 %v753_v12, %v1915_v11  ;;  %v1654_v21 = vpop.f32.mrb[15].mxu0  ;;  %v1660_v22 = vpop.f32.mrb[15].mxu1 }
  0xf6   :  { %v758_v23 = vadd.f32 %v757_v14, %v755_v19 }
  0xf9   :  { %v1923_v24 = vpop.f32.mrb[16].mxu0  ;;  %v1925_v25 = vpop.f32.mrb[16].mxu1 }
  0xfa   :  { %v759_v26 = vadd.f32 %v756_v20, %v1923_v24  ;;  %v760_v27 = vmul.f32 %v1923_v24, %v1923_v24  ;;  %v763_v28 = vmul.f32 %v1925_v25, %v1925_v25  ;;  %v1665_v29 = vpop.f32.mrb[17].mxu0  ;;  %v1671_v30 = vpop.f32.mrb[17].mxu1 }
  0xfb   :  { %v419_v31 = vpop.f32.mrb[18].mxu0  ;;  %v464_v32 = vpop.f32.mrb[18].mxu1 }
  0xfc   :  { %v761_v33 = vadd.f32 %v760_v27, %v758_v23  ;;  %v762_v36 = vadd.f32 %v759_v26, %v1925_v25  ;;  %v1666_v37 = vpop.f32.mrb[19].mxu0  ;;  %v1672_v38 = vpop.f32.mrb[19].mxu1 }
  0xfe   :  { %v764_v39 = vadd.f32 %v763_v28, %v761_v33 }
 0x101   :  { %v1933_v40 = vpop.f32.mrb[20].mxu0  ;;  %v1935_v41 = vpop.f32.mrb[20].mxu1 }
 0x102   :  { %v765_v42 = vadd.f32 %v762_v36, %v1933_v40  ;;  %v766_v43 = vmul.f32 %v1933_v40, %v1933_v40  ;;  %v769_v44 = vmul.f32 %v1935_v41, %v1935_v41  ;;  %v1677_v45 = vpop.f32.mrb[21].mxu0  ;;  %v1683_v48 = vpop.f32.mrb[21].mxu1 }
 0x103   :  { %v509_v49 = vpop.f32.mrb[22].mxu0  ;;  %v554_v50 = vpop.f32.mrb[22].mxu1  ;;  %v798_v45 = vlaneseq  ;;  %v1718_v48 = vmov 286326784  }
 0x104   :  { %v767_v51 = vadd.f32 %v766_v43, %v764_v39  ;;  %v768_v52 = vadd.f32 %v765_v42, %v1935_v41  ;;  %v1678_v53 = vpop.f32.mrb[23].mxu0  ;;  %v1684_v54 = vpop.f32.mrb[23].mxu1  ;;  %v1717_v43 = vmov 1966171168   ;;  %v814_v49 = vunpack.c.l.s4 %v1718_v48 }
 0x106   :  { %v770_v55 = vadd.f32 %v769_v44, %v767_v51  ;;  %v796_v44 = vunpack.c.l.s4 %v1717_v43  ;;  %v799_v51 = vshrl.u32 %v798_v45, 7 }
 0x108   :  { %v797_v50 = vunpack.c.0.s8 %v796_v44 }
 0x109   :  { %v1943_v56 = vpop.f32.mrb[24].mxu0  ;;  %v1945_v57 = vpop.f32.mrb[24].mxu1 }
 0x10a   :  { %v771_v58 = vadd.f32 %v768_v52, %v1943_v56  ;;  %v772_v59 = vmul.f32 %v1943_v56, %v1943_v56  ;;  %v775_v62 = vmul.f32 %v1945_v57, %v1945_v57  ;;  %v1689_v63 = vpop.f32.mrb[25].mxu0  ;;  %v1695_v0 = vpop.f32.mrb[25].mxu1  ;;  %v815_v52 = vunpack.c.0.s8 %v814_v49 }
 0x10b   :  { %v599_v1 = vpop.f32.mrb[26].mxu0  ;;  %v644_v2 = vpop.f32.mrb[26].mxu1  ;;  %v2001_v54 = vsub.s32 %v797_v50, %v799_v51 }
 0x10c   :  { %v773_v3 = vadd.f32 %v772_v59, %v770_v55  ;;  %v774_v4 = vadd.f32 %v771_v58, %v1945_v57  ;;  %v1690_v5 = vpop.f32.mrb[27].mxu0  ;;  %v1696_v6 = vpop.f32.mrb[27].mxu1  ;;  %v2003_v55 = vsub.s32 %v815_v52, %v799_v51  ;;  %v832_v52 = vld [vmem:[%s2440_s2] sm:$0x1] }
 0x10e   :  { %v776_v7 = vadd.f32 %v775_v62, %v773_v3 }
 0x111   :  { %v1953_v8 = vpop.f32.mrb[28].mxu0  ;;  %v1955_v9 = vpop.f32.mrb[28].mxu1 }
 0x112   :  { %v777_v12 = vadd.f32 %v774_v4, %v1953_v8  ;;  %v778_v13 = vmul.f32 %v1953_v8, %v1953_v8  ;;  %v781_v14 = vmul.f32 %v1955_v9, %v1955_v9  ;;  %v1701_v15 = vpop.f32.mrb[29].mxu0  ;;  %v1707_v16 = vpop.f32.mrb[29].mxu1 }
 0x113   :  { %v689_v17 = vpop.f32.mrb[30].mxu0  ;;  %v734_v18 = vpop.f32.mrb[30].mxu1 }
 0x114   :  { %v779_v19 = vadd.f32 %v778_v13, %v776_v7  ;;  %v780_v20 = vadd.f32 %v777_v12, %v1955_v9  ;;  %v1702_v21 = vpop.f32.mrb[31].mxu0  ;;  %v1708_v22 = vpop.f32.mrb[31].mxu1 }
 0x116   :  { %v782_v23 = vadd.f32 %v781_v14, %v779_v19  ;;  %v1963_v26 = vmul.f32 0.0625, %v780_v20 }
 0x118   :  { %v785_v27 = vmul.f32 0.0625, %v782_v23  ;;  %v786_v28 = vmul.f32 %v1963_v26, %v1963_v26  ;;  %v790_v29 = vsub.f32 %v1883_v34, %v1963_v26  ;;  %v838_v30 = vsub.f32 %v1885_v35, %v1963_v26 }
 0x119   :  { %v885_v31 = vsub.f32 %v1893_v46, %v1963_v26  ;;  %v933_v32 = vsub.f32 %v1895_v47, %v1963_v26  ;;  %v980_v33 = vsub.f32 %v1903_v60, %v1963_v26  ;;  %v1028_v36 = vsub.f32 %v1905_v61, %v1963_v26 }
 0x11a   :  { %v787_v37 = vsub.f32 %v785_v27, %v786_v28  ;;  %v1075_v38 = vsub.f32 %v1913_v10, %v1963_v26  ;;  %v1123_v34 = vsub.f32 %v1915_v11, %v1963_v26  ;;  %v1170_v35 = vsub.f32 %v1923_v24, %v1963_v26 }
 0x11b   :  { %v1215_v46 = vsub.f32 %v1925_v25, %v1963_v26  ;;  %v1260_v47 = vsub.f32 %v1933_v40, %v1963_v26  ;;  %v1305_v60 = vsub.f32 %v1935_v41, %v1963_v26  ;;  %v1350_v61 = vsub.f32 %v1943_v56, %v1963_v26 }
 0x11c   :  { %v788_v39 = vadd.f32 1e-05, %v787_v37  ;;  %v1395_v10 = vsub.f32 %v1945_v57, %v1963_v26  ;;  %v1440_v11 = vsub.f32 %v1953_v8, %v1963_v26  ;;  %v1485_v42 = vsub.f32 %v1955_v9, %v1963_v26 }
 0x11e   :  { %1713 = vrsqrt.f32 %v788_v39 }
 0x128   :  { %v1999_v53 = vpop.eup %1713 }
 0x129   :  { %v791_v58 = vmul.f32 %v1999_v53, %v790_v29  ;;  %v839_v59 = vmul.f32 %v1999_v53, %v838_v30  ;;  %v886_v62 = vmul.f32 %v1999_v53, %v885_v31  ;;  %v934_v63 = vmul.f32 %v1999_v53, %v933_v32 }
 0x12a   :  { %v981_v0 = vmul.f32 %v1999_v53, %v980_v33  ;;  %v1029_v1 = vmul.f32 %v1999_v53, %v1028_v36  ;;  %v1076_v2 = vmul.f32 %v1999_v53, %v1075_v38  ;;  %v1124_v3 = vmul.f32 %v1999_v53, %v1123_v34 }
 0x12b   :  { %v792_v4 = vmax.f32 %v791_v58, 0.0  ;;  %v840_v5 = vmax.f32 %v839_v59, 0.0  ;;  %v887_v6 = vmax.f32 %v886_v62, 0.0  ;;  %v935_v7 = vmax.f32 %v934_v63, 0.0 }
 0x12c   :  { %v982_v12 = vmax.f32 %v981_v0, 0.0  ;;  %v1030_v13 = vmax.f32 %v1029_v1, 0.0  ;;  %v1077_v14 = vmax.f32 %v1076_v2, 0.0  ;;  %v1125_v15 = vmax.f32 %v1124_v3, 0.0  ;;  %v927_v3 = vld [vmem:[%s2440_s2] sm:$0x2] }
 0x12d   :  { %v793_v16 = vpack.c.bf16 %v792_v4, %v792_v4  ;;  %v841_v17 = vpack.c.bf16 %v840_v5, %v840_v5  ;;  %v888_v18 = vpack.c.bf16 %v887_v6, %v887_v6  ;;  %v936_v19 = vpack.c.bf16 %v935_v7, %v935_v7  ;;  %v835_v6 = vld [vmem:[%s2440_s2 + $0x8] sm:$0x1] }
 0x12e   :  { %v983_v20 = vpack.c.bf16 %v982_v12, %v982_v12  ;;  %v1031_v21 = vpack.c.bf16 %v1030_v13, %v1030_v13  ;;  %v1078_v22 = vpack.c.bf16 %v1077_v14, %v1077_v14  ;;  %v1126_v23 = vpack.c.bf16 %v1125_v15, %v1125_v15 }
 0x12f   :  { %v801_v27 = vrot.slane %v793_v16, %v2001_v54  ;;  %v849_v28 = vrot.slane %v841_v17, %v2001_v54  ;;  %v896_v29 = vrot.slane %v888_v18, %v2001_v54  ;;  %v944_v30 = vrot.slane %v936_v19, %v2001_v54  ;;  %v930_v17 = vld [vmem:[%s2440_s2 + $0x8] sm:$0x2] }
 0x130   :  { %v991_v31 = vrot.slane %v983_v20, %v2001_v54  ;;  %v1039_v32 = vrot.slane %v1031_v21, %v2001_v54  ;;  %v1086_v33 = vrot.slane %v1078_v22, %v2001_v54  ;;  %v1134_v36 = vrot.slane %v1126_v23, %v2001_v54 }
 0x131   :  { %v808_v37 = vrot.slane %v801_v27, %v2001_v54  ;;  %v856_v38 = vrot.slane %v849_v28, %v2001_v54  ;;  %v903_v34 = vrot.slane %v896_v29, %v2001_v54  ;;  %v951_v39 = vrot.slane %v944_v30, %v2001_v54  ;;  %v1022_v30 = vld [vmem:[%s2440_s2] sm:$0x4] }
 0x132   :  { %v998_v43 = vrot.slane %v991_v31, %v2001_v54  ;;  %v2027_v44 = vrot.slane %v1039_v32, %v2001_v54  ;;  %v1093_v4 = vrot.slane %v1086_v33, %v2001_v54  ;;  %v2050_v5 = vrot.slane %v1134_v36, %v2001_v54 }
 0x133   :  { %v810_v45 = vunpack.i.h.s16 %v808_v37  ;;  %v1565_v48 = vpack.i.b16 %v808_v37, %v808_v37  ;;  %v858_v49 = vunpack.i.h.s16 %v856_v38  ;;  %v1566_v50 = vpack.i.b16 %v856_v38, %v856_v38  ;;  %v1025_v37 = vld [vmem:[%s2440_s2 + $0x8] sm:$0x4] }
 0x134   :  { %v905_v58 = vunpack.i.h.s16 %v903_v34  ;;  %v1567_v59 = vpack.i.b16 %v903_v34, %v903_v34  ;;  %v953_v62 = vunpack.i.h.s16 %v951_v39  ;;  %v1568_v63 = vpack.i.b16 %v951_v39, %v951_v39 }
 0x135   :  { %v812_v0 = vpack.i.b16 %v810_v45, %v810_v45  ;;  %v819_v1 = vrot.slane %v1565_v48, %v2003_v55  ;;  %v2055_v7 = vpack.i.b16 %v858_v49, %v858_v49  ;;  %v2058_v12 = vrot.slane %v1566_v50, %v2003_v55  ;;  %v1117_v48 = vld [vmem:[%s2440_s2] sm:$0x8] }
 0x136   :  { %v907_v13 = vpack.i.b16 %v905_v58, %v905_v58  ;;  %v914_v14 = vrot.slane %v1567_v59, %v2003_v55  ;;  %v2067_v18 = vpack.i.b16 %v953_v62, %v953_v62  ;;  %v1000_v19 = vunpack.i.h.s16 %v998_v43 }
 0x137   :  { %v826_v15 = vrot.slane %v812_v0, %v2003_v55  ;;  %v833_v16 = vsel %vm2031_vm13, %v819_v1, %v832_v52  ;;  %v962_v22 = vrot.slane %v1568_v63, %v2003_v55  ;;  %v1569_v23 = vpack.i.b16 %v998_v43, %v998_v43  ;;  %v1120_v1 = vld [vmem:[%s2440_s2 + $0x8] sm:$0x8] }
 0x138   :  { %834 = vst [vmem:[%s2440_s2] sm:$0x1] %v833_v16  ;;  %v921_v20 = vrot.slane %v907_v13, %v2003_v55  ;;  %v928_v21 = vsel %vm2041_vm14, %v914_v14, %v927_v3  ;;  %v1002_v28 = vpack.i.b16 %v1000_v19, %v1000_v19  ;;  %v1048_v31 = vunpack.i.h.s16 %v2027_v44 }
 0x139   :  { %v836_v27 = vsel %vm2031_vm13, %v826_v15, %v835_v6  ;;  %929 = vst [vmem:[%s2440_s2] sm:$0x2] %v928_v21  ;;  %v1570_v32 = vpack.i.b16 %v2027_v44, %v2027_v44  ;;  %v1009_v36 = vrot.slane %v1569_v23, %v2003_v55  ;;  %v1095_v38 = vunpack.i.h.s16 %v1093_v4 }
 0x13a   :  { %837 = vst [vmem:[%s2440_s2 + $0x8] sm:$0x1] %v836_v27  ;;  %v931_v33 = vsel %vm2041_vm14, %v921_v20, %v930_v17  ;;  %v1571_v34 = vpack.i.b16 %v1093_v4, %v1093_v4  ;;  %v874_v39 = vrot.slane %v2055_v7, %v2003_v55  ;;  %v1016_v43 = vrot.slane %v1002_v28, %v2003_v55 }
 0x13b   :  { %932 = vst [vmem:[%s2440_s2 + $0x8] sm:$0x2] %v931_v33  ;;  %v2108_v44 = vpack.i.b16 %v1048_v31, %v1048_v31  ;;  %v1143_v49 = vunpack.i.h.s16 %v2050_v5  ;;  %v969_v50 = vrot.slane %v2067_v18, %v2003_v55  ;;  %v1023_v52 = vsel %vm2083_vm0, %v1009_v36, %v1022_v30 }
 0x13c   :  { %v1097_v58 = vpack.i.b16 %v1095_v38, %v1095_v38  ;;  %v1104_v59 = vrot.slane %v1571_v34, %v2003_v55  ;;  %1024 = vst [vmem:[%s2440_s2] sm:$0x4] %v1023_v52  ;;  %v1026_v63 = vsel %vm2083_vm0, %v1016_v43, %v1025_v37  ;;  %v1057_v0 = vrot.slane %v1570_v32, %v2003_v55 }
 0x13d   :  { %v1572_v3 = vpack.i.b16 %v2050_v5, %v2050_v5  ;;  %v1171_v4 = vmul.f32 %v1999_v53, %v1170_v35  ;;  %1027 = vst [vmem:[%s2440_s2 + $0x8] sm:$0x4] %v1026_v63  ;;  %v1064_v7 = vrot.slane %v2108_v44, %v2003_v55  ;;  %v1216_v35 = vmul.f32 %v1999_v53, %v1215_v46 }
 0x13e   :  { %v1111_v5 = vrot.slane %v1097_v58, %v2003_v55  ;;  %v1118_v24 = vsel %vm2112_vm2, %v1104_v59, %v1117_v48  ;;  %v1145_v14 = vpack.i.b16 %v1143_v49, %v1143_v49  ;;  %v1261_v16 = vmul.f32 %v1999_v53, %v1260_v47 }
 0x13f   :  { %v879_v13 = vld [vmem:[%s2440_s2] sm:$0x1]  ;;  %1119 = vst [vmem:[%s2440_s2] sm:$0x8] %v1118_v24  ;;  %v1172_v15 = vmax.f32 %v1171_v4, 0.0  ;;  %v1306_v25 = vmul.f32 %v1999_v53, %v1305_v60  ;;  %v1217_v19 = vmax.f32 %v1216_v35, 0.0  ;;  %v1351_v40 = vmul.f32 %v1999_v53, %v1350_v61 }
 0x140   :  { %v880_v46 = vsel %vm2127_vm4, %v2058_v12, %v879_v13  ;;  %v974_v17 = vld [vmem:[%s2440_s2] sm:$0x2]  ;;  %v1121_v18 = vsel %vm2112_vm2, %v1111_v5, %v1120_v1  ;;  %v1262_v12 = vmax.f32 %v1261_v16, 0.0  ;;  %v1396_v27 = vmul.f32 %v1999_v53, %v1395_v10 }
 0x141   :  { %881 = vst [vmem:[%s2440_s2] sm:$0x1] %v880_v46  ;;  %v882_v41 = vld [vmem:[%s2440_s2 + $0x8] sm:$0x1]  ;;  %v975_v47 = vsel %vm2148_vm3, %v962_v22, %v974_v17  ;;  %1122 = vst [vmem:[%s2440_s2 + $0x8] sm:$0x8] %v1121_v18  ;;  %v1173_v60 = vpack.c.bf16 %v1172_v15, %v1172_v15  ;;  %v1307_v56 = vmax.f32 %v1306_v25, 0.0  ;;  %v1218_v22 = vpack.c.bf16 %v1217_v19, %v1217_v19 }
 0x142   :  { %v883_v61 = vsel %vm2127_vm4, %v874_v39, %v882_v41  ;;  %976 = vst [vmem:[%s2440_s2] sm:$0x2] %v975_v47  ;;  %v977_v20 = vld [vmem:[%s2440_s2 + $0x8] sm:$0x2]  ;;  %v1352_v23 = vmax.f32 %v1351_v40, 0.0  ;;  %v1263_v31 = vpack.c.bf16 %v1262_v12, %v1262_v12  ;;  %v1152_v10 = vrot.slane %v1572_v3, %v2003_v55  ;;  %v1209_v3 = vld [vmem:[%s2440_s2 + $0x4] sm:$0x1] }
 0x143   :  { %884 = vst [vmem:[%s2440_s2 + $0x8] sm:$0x1] %v883_v61  ;;  %v978_v28 = vsel %vm2148_vm3, %v969_v50, %v977_v20  ;;  %v1181_v30 = vrot.slane %v1173_v60, %v2001_v54  ;;  %v1308_v32 = vpack.c.bf16 %v1307_v56, %v1307_v56  ;;  %v1069_v57 = vld [vmem:[%s2440_s2] sm:$0x4]  ;;  %v1226_v36 = vrot.slane %v1218_v22, %v2001_v54  ;;  %v1299_v19 = vld [vmem:[%s2440_s2 + $0x4] sm:$0x2] }
 0x144   :  { %979 = vst [vmem:[%s2440_s2 + $0x8] sm:$0x2] %v978_v28  ;;  %v1353_v37 = vpack.c.bf16 %v1352_v23, %v1352_v23  ;;  %v2243_v38 = vmul.f32 %v1999_v53, %v1440_v11  ;;  %v1070_v34 = vsel %vm2211_vm5, %v1057_v0, %v1069_v57  ;;  %v1072_v39 = vld [vmem:[%s2440_s2 + $0x8] sm:$0x4]  ;;  %v1159_v43 = vrot.slane %v1145_v14, %v2003_v55  ;;  %v1212_v14 = vld [vmem:[%s2440_s2 + $0xc] sm:$0x1] }
 0x145   :  { %v1188_v44 = vrot.slane %v1181_v30, %v2001_v54  ;;  %v1271_v48 = vrot.slane %v1263_v31, %v2001_v54  ;;  %1071 = vst [vmem:[%s2440_s2] sm:$0x4] %v1070_v34  ;;  %v1073_v8 = vsel %vm2211_vm5, %v1064_v7, %v1072_v39  ;;  %v1316_v49 = vrot.slane %v1308_v32, %v2001_v54  ;;  %v1302_v47 = vld [vmem:[%s2440_s2 + $0xc] sm:$0x2]  ;;  %v1389_v28 = vld [vmem:[%s2440_s2 + $0x4] sm:$0x4] }
 0x146   :  { %v1164_v11 = vld [vmem:[%s2440_s2] sm:$0x8]  ;;  %v1361_v50 = vrot.slane %v1353_v37, %v2001_v54  ;;  %v1397_v52 = vmax.f32 %v1396_v27, 0.0  ;;  %1074 = vst [vmem:[%s2440_s2 + $0x8] sm:$0x4] %v1073_v8  ;;  %v1233_v4 = vrot.slane %v1226_v36, %v2001_v54  ;;  %v1442_v57 = vmax.f32 %v2243_v38, 0.0 }
 0x147   :  { %v1165_v58 = vsel %vm2234_vm6, %v1152_v10, %v1164_v11  ;;  %v1190_v59 = vunpack.i.h.s16 %v1188_v44  ;;  %v1573_v63 = vpack.i.b16 %v1188_v44, %v1188_v44  ;;  %v1278_v0 = vrot.slane %v1271_v48, %v2001_v54  ;;  %v1392_v32 = vld [vmem:[%s2440_s2 + $0xc] sm:$0x4] }
 0x148   :  { %1166 = vst [vmem:[%s2440_s2] sm:$0x8] %v1165_v58  ;;  %v1167_v1 = vld [vmem:[%s2440_s2 + $0x8] sm:$0x8]  ;;  %v1368_v7 = vrot.slane %v1361_v50, %v2001_v54  ;;  %v1323_v16 = vrot.slane %v1316_v49, %v2001_v54  ;;  %v1398_v25 = vpack.c.bf16 %v1397_v52, %v1397_v52  ;;  %v1235_v40 = vunpack.i.h.s16 %v1233_v4 }
 0x149   :  { %v1168_v5 = vsel %vm2234_vm6, %v1159_v43, %v1167_v1  ;;  %v1192_v24 = vpack.i.b16 %v1190_v59, %v1190_v59  ;;  %v1199_v35 = vrot.slane %v1573_v63, %v2003_v55  ;;  %v1280_v13 = vunpack.i.h.s16 %v1278_v0 }
 0x14a   :  { %1169 = vst [vmem:[%s2440_s2 + $0x8] sm:$0x8] %v1168_v5  ;;  %v1575_v15 = vpack.i.b16 %v1278_v0, %v1278_v0  ;;  %v1370_v60 = vunpack.i.h.s16 %v1368_v7  ;;  %v1574_v56 = vpack.i.b16 %v1233_v4, %v1233_v4  ;;  %v1577_v20 = vpack.i.b16 %v1368_v7, %v1368_v7 }
 0x14b   :  { %v1206_v46 = vrot.slane %v1192_v24, %v2003_v55  ;;  %v1210_v17 = vsel %vm2031_vm13, %v1199_v35, %v1209_v3  ;;  %v1282_v18 = vpack.i.b16 %v1280_v13, %v1280_v13  ;;  %v1325_v23 = vunpack.i.h.s16 %v1323_v16  ;;  %v1479_v13 = vld [vmem:[%s2440_s2 + $0x4] sm:$0x8] }
 0x14c   :  { %1211 = vst [vmem:[%s2440_s2 + $0x4] sm:$0x1] %v1210_v17  ;;  %v1289_v41 = vrot.slane %v1575_v15, %v2003_v55  ;;  %v1372_v27 = vpack.i.b16 %v1370_v60, %v1370_v60  ;;  %v1406_v51 = vrot.slane %v1398_v25, %v2001_v54  ;;  %v1379_v31 = vrot.slane %v1577_v20, %v2003_v55  ;;  %v1482_v17 = vld [vmem:[%s2440_s2 + $0xc] sm:$0x8] }
 0x14d   :  { %v1213_v12 = vsel %vm2031_vm13, %v1206_v46, %v1212_v14  ;;  %v1296_v61 = vrot.slane %v1282_v18, %v2003_v55  ;;  %v1486_v10 = vmul.f32 %v1999_v53, %v1485_v42  ;;  %v1237_v36 = vpack.i.b16 %v1235_v40, %v1235_v40 }
 0x14e   :  { %1214 = vst [vmem:[%s2440_s2 + $0xc] sm:$0x1] %v1213_v12  ;;  %v1300_v22 = vsel %vm2041_vm14, %v1289_v41, %v1299_v19  ;;  %v1386_v2 = vrot.slane %v1372_v27, %v2003_v55  ;;  %v1413_v37 = vrot.slane %v1406_v51, %v2001_v54  ;;  %v1576_v34 = vpack.i.b16 %v1323_v16, %v1323_v16 }
 0x14f   :  { %1301 = vst [vmem:[%s2440_s2 + $0x4] sm:$0x2] %v1300_v22  ;;  %v1303_v30 = vsel %vm2041_vm14, %v1296_v61, %v1302_v47  ;;  %v1390_v39 = vsel %vm2083_vm0, %v1379_v31, %v1389_v28  ;;  %v1443_v43 = vpack.c.bf16 %v1442_v57, %v1442_v57  ;;  %v1487_v38 = vmax.f32 %v1486_v10, 0.0 }
 0x150   :  { %1304 = vst [vmem:[%s2440_s2 + $0xc] sm:$0x2] %v1303_v30  ;;  %v1244_v44 = vrot.slane %v1574_v56, %v2003_v55  ;;  %v1327_v9 = vpack.i.b16 %v1325_v23, %v1325_v23  ;;  %1391 = vst [vmem:[%s2440_s2 + $0x4] sm:$0x4] %v1390_v39  ;;  %v1393_v26 = vsel %vm2083_vm0, %v1386_v2, %v1392_v32  ;;  %v1415_v42 = vunpack.i.h.s16 %v1413_v37 }
 0x151   :  { %1394 = vst [vmem:[%s2440_s2 + $0xc] sm:$0x4] %v1393_v26  ;;  %v1451_v48 = vrot.slane %v1443_v43, %v2001_v54  ;;  %v1488_v8 = vpack.c.bf16 %v1487_v38, %v1487_v38  ;;  %v1251_v11 = vrot.slane %v1237_v36, %v2003_v55  ;;  %v1578_v50 = vpack.i.b16 %v1413_v37, %v1413_v37 }
 0x152   :  { %v1334_v52 = vrot.slane %v1576_v34, %v2003_v55  ;;  %v1417_v58 = vpack.i.b16 %v1415_v42, %v1415_v42  ;;  %v1341_v1 = vrot.slane %v1327_v9, %v2003_v55 }
 0x153   :  { %v1254_v53 = vld [vmem:[%s2440_s2 + $0x4] sm:$0x1]  ;;  %v1458_v59 = vrot.slane %v1451_v48, %v2001_v54  ;;  %v1496_v63 = vrot.slane %v1488_v8, %v2001_v54  ;;  %v1424_v35 = vrot.slane %v1578_v50, %v2003_v55 }
 0x154   :  { %v1255_v49 = vsel %vm2127_vm4, %v1244_v44, %v1254_v53  ;;  %v1431_v15 = vrot.slane %v1417_v58, %v2003_v55 }
 0x155   :  { %1256 = vst [vmem:[%s2440_s2 + $0x4] sm:$0x1] %v1255_v49  ;;  %v1257_v29 = vld [vmem:[%s2440_s2 + $0xc] sm:$0x1]  ;;  %v1460_v5 = vunpack.i.h.s16 %v1458_v59  ;;  %v1579_v62 = vpack.i.b16 %v1458_v59, %v1458_v59  ;;  %v1503_v14 = vrot.slane %v1496_v63, %v2001_v54 }
 0x156   :  { %v1258_v0 = vsel %vm2127_vm4, %v1251_v11, %v1257_v29  ;;  %v1344_v3 = vld [vmem:[%s2440_s2 + $0x4] sm:$0x2] }
 0x157   :  { %1259 = vst [vmem:[%s2440_s2 + $0xc] sm:$0x1] %v1258_v0  ;;  %v1345_v4 = vsel %vm2148_vm3, %v1334_v52, %v1344_v3  ;;  %v1347_v7 = vld [vmem:[%s2440_s2 + $0xc] sm:$0x2]  ;;  %v1434_v16 = vld [vmem:[%s2440_s2 + $0x4] sm:$0x4]  ;;  %v1462_v6 = vpack.i.b16 %v1460_v5, %v1460_v5  ;;  %v1469_v25 = vrot.slane %v1579_v62, %v2003_v55  ;;  %v1505_v41 = vunpack.i.h.s16 %v1503_v14 }
 0x158   :  { %1346 = vst [vmem:[%s2440_s2 + $0x4] sm:$0x2] %v1345_v4  ;;  %v1348_v24 = vsel %vm2148_vm3, %v1341_v1, %v1347_v7  ;;  %v1435_v46 = vsel %vm2211_vm5, %v1424_v35, %v1434_v16  ;;  %v1437_v54 = vld [vmem:[%s2440_s2 + $0xc] sm:$0x4]  ;;  %v1580_v21 = vpack.i.b16 %v1503_v14, %v1503_v14 }
 0x159   :  { %1349 = vst [vmem:[%s2440_s2 + $0xc] sm:$0x2] %v1348_v24  ;;  %1436 = vst [vmem:[%s2440_s2 + $0x4] sm:$0x4] %v1435_v46  ;;  %v1438_v18 = vsel %vm2211_vm5, %v1431_v15, %v1437_v54  ;;  %v1476_v19 = vrot.slane %v1462_v6, %v2003_v55  ;;  %v1480_v40 = vsel %vm2112_vm2, %v1469_v25, %v1479_v13 }
 0x15a   :  { %1439 = vst [vmem:[%s2440_s2 + $0xc] sm:$0x4] %v1438_v18  ;;  %1481 = vst [vmem:[%s2440_s2 + $0x4] sm:$0x8] %v1480_v40  ;;  %v1507_v60 = vpack.i.b16 %v1505_v41, %v1505_v41  ;;  %v1514_v12 = vrot.slane %v1580_v21, %v2003_v55 }
 0x15b   :  { %v1483_v47 = vsel %vm2112_vm2, %v1476_v19, %v1482_v17 }
 0x15c   :  { %1484 = vst [vmem:[%s2440_s2 + $0xc] sm:$0x8] %v1483_v47  ;;  %v1521_v61 = vrot.slane %v1507_v60, %v2003_v55 }
 0x161   :  { %v1524_v56 = vld [vmem:[%s2440_s2 + $0x4] sm:$0x8] }
 0x162   :  { %v1525_v20 = vsel %vm2234_vm6, %v1514_v12, %v1524_v56 }
 0x163   :  { %1526 = vst [vmem:[%s2440_s2 + $0x4] sm:$0x8] %v1525_v20  ;;  %v1527_v45 = vld [vmem:[%s2440_s2 + $0xc] sm:$0x8] }
 0x164   :  { %v1528_v22 = vsel %vm2234_vm6, %v1521_v61, %v1527_v45 }
 0x165   :  { %1529 = vst [vmem:[%s2440_s2 + $0xc] sm:$0x8] %v1528_v22 }

// kernel: dc_decoder_forward.7
= control target key start
LH: loop header
LB: loop body
LE: loop exit
PB: predicated region body
PF: predicated region fallthrough
CT: control target
= control target key end

     0   :  { %s2121_s9 = smov 0   ;;  %s2398_s0 = inlined_call_operand.vmem [shape: bf16[2,4,4,32], index: 0, kind: input, shape index: {}]   ;;  %s2399_s1 = inlined_call_operand.vmem [shape: bf16[4,4,32,16], index: 1, kind: input, shape index: {}]   ;;  %s2400_s2 = inlined_call_operand.vmem [shape: bf16[2,4,2,4,32], index: 2, kind: output, shape index: {}]  }
   0x1 LB: > { %s1555_s10 = sadd.s32 4294967295, %s2079_s9   ;;  %p1559_p0 = scmp.ge.s32.totalorder %s2079_s9, 1  ;;  %s2079_s9 = sphi %s2121_s9, %s12_s9  }
   0x2   : > { %p112_p1 = scmp.lt.s32.totalorder %s2079_s9, 3 }
   0x4   : > { %p113_p2 = pnand %p1559_p0, %p112_p1 }
   0x5   : > { %p134_p3 = scmp.lt.s32.totalorder (!%p113_p2), %s1555_s10, 1  ;;  %vm145_vm0 = vcmask (!%p113_p2), 256000   ;;  %v2101_v0 = vmov (!%p113_p2), 0   ;;  %s2081_s19 = smov (!%p113_p2), 0  }
   0x6   : > { %116 = sbr.rel (%p113_p2) target bundleno = 502 (0x1f6), region = 28  ;;  %146 = vst.msk [vmem:[#allocation2] sm:$0x7] (!%p113_p2), %vm145_vm0, %v2101_v0  ;;  %147 = vst.msk [vmem:[#allocation2 + $0x4] sm:$0x7] (!%p113_p2), %vm145_vm0, %v2101_v0 }
   0x7   : > { %148 = vst.msk [vmem:[#allocation2 + $0x8] sm:$0x7] (!%p113_p2), %vm145_vm0, %v2101_v0  ;;  %149 = vst.msk [vmem:[#allocation2 + $0xc] sm:$0x7] (!%p113_p2), %vm145_vm0, %v2101_v0 }
   0x8   : > { %150 = vst.msk [vmem:[#allocation2 + $0x10] sm:$0x7] (!%p113_p2), %vm145_vm0, %v2101_v0  ;;  %151 = vst.msk [vmem:[#allocation2 + $0x14] sm:$0x7] (!%p113_p2), %vm145_vm0, %v2101_v0 }
   0xd   : > { %s2404_s10 = smov (!%p134_p3, %s1555_s10), 1 }
   0xe   : > { %s1726_s11 = sshll.u32 %s2404_s10, 3  ;;  %s1727_s12 = sshll.u32 %s2404_s10, 4 }
   0xf   : > { %s138_s15 = scalar_lea.vmem %s2398_s0, %s1726_s11  ;;  %s2141_s18 = scalar_lea.vmem %s2400_s2, %s1727_s12 }
  0x10 LB: >> { %s1564_s20 = sshll.u32 %s2083_s19, 1  ;;  %s1566_s21 = sshll.u32 %s2083_s19, 2  ;;  %vm181_vm1 = vsmask.f32 2306  ;;  %s2083_s19 = sphi %s2081_s19, %s157_s19  }
  0x11   : >> { %s159_s22 = scalar_lea.vmem %s138_s15, %s1564_s20  ;;  %vm182_vm2 = vmand %vm145_vm0, %vm181_vm1  ;;  %s1472_s23 = scalar_lea.vmem [#allocation2], %s1566_s21 }
  0x12   : >> { %v1565_v1 = vld.sshfl [vmem:[%s159_s22] sm:$0x3 pattern:$0x76325410]  ;;  %v1567_v5 = vld [vmem:[%s1472_s23 + $0x4] sm:$0x7] }
  0x13   : >> { %v171_v2 = vshrl.u32 %v1565_v1, 16  ;;  %v174_v3 = vshll.u32 %v1565_v1, 16  ;;  %s157_s19 = sadd.s32 1, %s2083_s19  }
  0x14   : >> { %p154_p4 = scmp.ge.s32.totalorder %s157_s19, 4  }
  0x15   : >> { %v173_v4 = vrot.slane %v171_v2, 7  ;;  %v2144_v8 = vmov (%p154_p4), 0.0   ;;  %v2146_v9 = vmov (%p154_p4), 0.0   ;;  %s2148_s24 = smov (%p154_p4), 0  }
  0x16   : > { %156 = sbr.rel (!%p154_p4) target bundleno = 16 (0x10), region = 109 }
  0x17   : >> { %v176_v6 = vor.u32 %v174_v3, %v173_v4 }
  0x19   : >> { %v184_v7 = vsel %vm182_vm2, %v176_v6, %v1567_v5 }
  0x1a   : >> { %1568 = vst [vmem:[%s1472_s23 + $0x4] sm:$0x7] %v184_v7 }
  0x1d LB: >> { %v2007_v10 = vld [vmem:[%s2399_s1 + $0x50] sm:$0xff]   ;;  %v2102_v11 = vmov 0.0   ;;  %v2009_v13 = vld [vmem:[%s2399_s1 + $0x58] sm:$0xff]   ;;  %vm2103_vm3 = vmmov 0   ;;  %s1569_s3 = sshll.u32 %s2095_s24, 2  ;;  %vm229_vm4 = vcmask 261120   ;;  %s2095_s24 = sphi %s2148_s24, %s191_s24   ;;  %v2091_v9 = vphi %v2146_v9, %v2402_v9   ;;  %v2087_v8 = vphi %v2144_v8, %v2401_v8  }
  0x1e   : >> { %1810 = vmatprep.subr.bf16.mxu1 %v2102_v11  ;;  %1778 = vmatprep.subr.bf16.mxu0 %v2102_v11  ;;  %v2008_v12 = vld [vmem:[%s2399_s1 + $0x10] sm:$0xff]   ;;  %v2010_v14 = vld [vmem:[%s2399_s1 + $0x18] sm:$0xff]   ;;  %s2180_s6 = scalar_lea.vmem [#allocation2], %s1569_s3  ;;  %v2014_v18 = vld [vmem:[%s2399_s1 + $0x40] sm:$0xff]   ;;  %vm467_vm5 = vcmask 125952   ;;  %s191_s24 = sadd.s32 1, %s2095_s24  }
  0x1f   : >> { %1811 = vmatpush3.bf16.msra.mxu1 %v2007_v10  ;;  %1814 = vmatprep.mubr.msk.bf16.mxu1 %vm2103_vm3, %v2102_v11  ;;  %v2013_v22 = vld [vmem:[%s2399_s1] sm:$0xff]   ;;  %v2016_v23 = vld [vmem:[%s2399_s1 + $0x48] sm:$0xff]   ;;  %v2024_v41 = vld [vmem:[%s2399_s1 + $0x70] sm:$0xff]   ;;  %p188_p5 = scmp.ge.s32.totalorder %s191_s24, 4  }
  0x20   : >> { %1779 = vmatpush3.bf16.msra.mxu0 %v2008_v12  ;;  %1812 = vmatprep.subr.bf16.mxu1 %v2102_v11  ;;  %v2015_v28 = vld [vmem:[%s2399_s1 + $0x8] sm:$0xff]   ;;  %v2019_v31 = vld [vmem:[%s2399_s1 + $0x60] sm:$0xff]   ;;  %v2023_v44 = vld [vmem:[%s2399_s1 + $0x30] sm:$0xff]  }
  0x21   : >> { %1780 = vmatprep.subr.bf16.mxu0 %v2102_v11  ;;  %v2011_v15 = vld [vmem:[%s2180_s6] ss:$0 sps:$4 sm:$0x66]   ;;  %1782 = vmatprep.mubr.msk.bf16.mxu0 %vm2103_vm3, %v2102_v11  ;;  %v2022_v32 = vld [vmem:[%s2180_s6 + $0x4] ss:$0 sps:$4 sm:$0x77]  }
  0x22   : >> { %v2012_v16 = vld [vmem:[%s2180_s6] ss:$0 sps:$4 sm:$0x77]   ;;  %v501_v17 = vrot.slane %v2011_v15, 1  ;;  %v634_v34 = vshll.u32 %v2022_v32, 16  ;;  %v2021_v36 = vld [vmem:[%s2399_s1 + $0x68] sm:$0xff]  }
  0x23   : >> { %1813 = vmatpush3.bf16.msra.mxu1 %v2009_v13  ;;  %v211_v19 = vshrl.u32 %v2012_v16, 16  ;;  %v213_v20 = vshll.u32 %v2012_v16, 16  ;;  %v2017_v24 = vld [vmem:[%s2180_s6] ss:$0 sps:$4 sm:$0x77]   ;;  %v632_v37 = vshrl.u32 %v2022_v32, 16 }
  0x24   : >> { %1781 = vmatpush3.bf16.msra.mxu0 %v2010_v14  ;;  %1818 = vmatprep.subr.bf16.mxu1 %v2102_v11  ;;  %v563_v26 = vshll.u32 %v2017_v24, 16  ;;  %v561_v27 = vshrl.u32 %v2017_v24, 16  ;;  %v2018_v33 = vld [vmem:[%s2399_s1 + $0x20] sm:$0xff]   ;;  %v636_v38 = vrot.slane %v634_v34, 1  ;;  %v2020_v39 = vld [vmem:[%s2399_s1 + $0x28] sm:$0xff]   ;;  %v2026_v45 = vld [vmem:[%s2399_s1 + $0x78] sm:$0xff]  }
  0x25   : >> { %1786 = vmatprep.subr.bf16.mxu0 %v2102_v11  ;;  %v215_v21 = vrot.slane %v213_v20, 1  ;;  %v196_v35 = vld [vmem:[%s2180_s6] sm:$0x3]  ;;  %v1582_v42 = vld [vmem:[%s2180_s6 + $0x4] sm:$0x3]  ;;  %v2025_v48 = vld [vmem:[%s2399_s1 + $0x38] sm:$0xff]  }
  0x26   : >> { %1815 = vmatmul.mubr.msk.bf16.vlgmr.msra.gmra.mrb[0].mxu1 %vm229_vm4, %v501_v17  ;;  %v565_v29 = vrot.slane %v563_v26, 1  ;;  %v637_v40 = vor.u32 %v636_v38, %v632_v37  ;;  %v2029_v43 = vld [vmem:[%s2180_s6 + $0x4] ss:$0 sps:$4 sm:$0x77]   ;;  %v2028_v53 = vld [vmem:[%s2399_s1 + $0xd0] sm:$0xff]   ;;  %v2031_v58 = vld [vmem:[%s2399_s1 + $0xd8] sm:$0xff]  }
  0x27   : >> { %1819 = vmatpush3.bf16.msra.mxu1 %v2014_v18  ;;  %1822 = vmatprep.mubr.msk.bf16.mxu1 %vm2103_vm3, %v2102_v11  ;;  %v216_v25 = vor.u32 %v215_v21, %v211_v19  ;;  %v2027_v46 = vld [vmem:[%s2180_s6 + $0x4] ss:$0 sps:$4 sm:$0x66]   ;;  %v405_v47 = vshll.u32 %v2029_v43, 16  ;;  %v403_v51 = vshrl.u32 %v2029_v43, 16  ;;  %v2030_v57 = vld [vmem:[%s2399_s1 + $0x90] sm:$0xff]  }
  0x28   : >> { %1820 = vmatprep.subr.bf16.mxu1 %v2102_v11  ;;  %v566_v30 = vor.u32 %v565_v29, %v561_v27  ;;  %v703_v49 = vrot.slane %v2027_v46, 1  ;;  %v2034_v50 = vld [vmem:[%s2180_s6 + $0x4] ss:$0 sps:$4 sm:$0x77]   ;;  %v2032_v63 = vld [vmem:[%s2399_s1 + $0x98] sm:$0xff]   ;;  %v2038_v4 = vld [vmem:[%s2399_s1 + $0xc8] sm:$0xff]  }
  0x29   : >> { %1783 = vmatmul.mubr.msk.bf16.vlgmr.msra.gmra.mrb[0].mxu0 %vm229_vm4, %v216_v25  ;;  %v407_v52 = vrot.slane %v405_v47, 1  ;;  %v2033_v55 = vld [vmem:[%s2180_s6 + $0x4] ss:$0 sps:$4 sm:$0x66]   ;;  %v798_v56 = vshll.u32 %v2034_v50, 16  ;;  %v796_v60 = vshrl.u32 %v2034_v50, 16 }
  0x2a   : >> { %1787 = vmatpush3.bf16.msra.mxu0 %v2013_v22  ;;  %1790 = vmatprep.mubr.msk.bf16.mxu0 %vm2103_vm3, %v2102_v11  ;;  %v1084_v59 = vrot.slane %v2033_v55, 1  ;;  %v2039_v62 = vld [vmem:[%s2180_s6 + $0x4] ss:$0 sps:$4 sm:$0x77]   ;;  %v2037_v7 = vld [vmem:[%s2399_s1 + $0x88] sm:$0xff]   ;;  %v2046_v22 = vld [vmem:[%s2399_s1 + $0xf0] sm:$0xff]  }
  0x2b   : >> { %1821 = vmatpush3.bf16.msra.mxu1 %v2016_v23  ;;  %1788 = vmatprep.subr.bf16.mxu0 %v2102_v11  ;;  %v408_v54 = vor.u32 %v407_v52, %v403_v51  ;;  %v800_v61 = vrot.slane %v798_v56, 1  ;;  %v2036_v0 = vld [vmem:[%s2399_s1 + $0xc0] sm:$0xff]   ;;  %v1146_v2 = vshll.u32 %v2039_v62, 16  ;;  %v1144_v5 = vshrl.u32 %v2039_v62, 16  ;;  %v2043_v17 = vld [vmem:[%s2399_s1 + $0xe8] sm:$0xff]   ;;  %v2045_v25 = vld [vmem:[%s2399_s1 + $0xb0] sm:$0xff]  }
  0x2c   : >> { %1826 = vmatprep.subr.bf16.mxu1 %v2102_v11  ;;  %v2035_v3 = vld [vmem:[%s2399_s1 + $0x80] sm:$0xff]   ;;  %v2044_v12 = vld [vmem:[%s2180_s6 + $0x8] ss:$0 sps:$4 sm:$0x77]   ;;  %v2048_v26 = vld [vmem:[%s2399_s1 + $0xf8] sm:$0xff]  }
  0x2d   : >> { %v801_v1 = vor.u32 %v800_v61, %v796_v60  ;;  %v1148_v6 = vrot.slane %v1146_v2, 1  ;;  %v2041_v13 = vld [vmem:[%s2399_s1 + $0xe0] sm:$0xff]   ;;  %v1217_v14 = vshll.u32 %v2044_v12, 16  ;;  %v1215_v18 = vshrl.u32 %v2044_v12, 16  ;;  %v2042_v20 = vld [vmem:[%s2399_s1 + $0xa8] sm:$0xff]   ;;  %v2047_v29 = vld [vmem:[%s2399_s1 + $0xb8] sm:$0xff]  }
  0x2e   : >> { %1789 = vmatpush3.bf16.msra.mxu0 %v2015_v28  ;;  %v1636_v15 = vld [vmem:[%s2180_s6 + $0x4] sm:$0x3]  ;;  %v2050_v23 = vld [vmem:[%s2180_s6 + $0x8] ss:$0 sps:$4 sm:$0x77]  }
  0x2f   : >> { %1794 = vmatprep.subr.bf16.mxu0 %v2102_v11  ;;  %v1149_v10 = vor.u32 %v1148_v6, %v1144_v5  ;;  %v2040_v16 = vld [vmem:[%s2399_s1 + $0xa0] sm:$0xff]   ;;  %v1219_v19 = vrot.slane %v1217_v14, 1  ;;  %v1654_v24 = vld [vmem:[%s2180_s6 + $0x8] sm:$0x3]  ;;  %v989_v28 = vshll.u32 %v2050_v23, 16 }
  0x30   : >> { %v2049_v27 = vld [vmem:[%s2180_s6 + $0x8] ss:$0 sps:$4 sm:$0x66]   ;;  %s2358_s6 = scalar_lea.vmem [#allocation3], %s1569_s3  ;;  %s2385_s3 = smov (%p188_p5), 0  }
  0x31   : >> { %v1220_v21 = vor.u32 %v1219_v19, %v1215_v18  ;;  %v991_v32 = vrot.slane %v989_v28, 1 }
  0x32   : >> { %1823 = vmatmul.mubr.msk.bf16.vlgmr.msra.gmra.mrb[0].mxu1 %vm229_vm4, %v566_v30  ;;  %v1286_v30 = vrot.slane %v2049_v27, 1 }
  0x33   : >> { %1827 = vmatpush3.bf16.msra.mxu1 %v2019_v31  ;;  %1830 = vmatprep.mubr.msk.bf16.mxu1 %vm2103_vm3, %v2102_v11  ;;  %v987_v31 = vshrl.u32 %v2050_v23, 16 }
  0x34   : >> { %1828 = vmatprep.subr.bf16.mxu1 %v2102_v11 }
  0x35   : >> { %1791 = vmatmul.mubr.msk.bf16.vlgmr.msra.gmra.mrb[0].mxu0 %vm229_vm4, %v196_v35 }
  0x36   : >> { %1795 = vmatpush3.bf16.msra.mxu0 %v2018_v33  ;;  %1798 = vmatprep.mubr.msk.bf16.mxu0 %vm2103_vm3, %v2102_v11  ;;  %v992_v33 = vor.u32 %v991_v32, %v987_v31 }
  0x37   : >> { %1829 = vmatpush3.bf16.msra.mxu1 %v2021_v36  ;;  %1796 = vmatprep.subr.bf16.mxu0 %v2102_v11 }
  0x38   : >> { %1834 = vmatprep.subr.bf16.mxu1 %v2102_v11 }
  0x3a   : >> { %1797 = vmatpush3.bf16.msra.mxu0 %v2020_v39 }
  0x3b   : >> { %1802 = vmatprep.subr.bf16.mxu0 %v2102_v11 }
  0x3e   : >> { %1831 = vmatmul.mubr.msk.bf16.vlgmr.msra.gmra.mrb[0].mxu1 %vm229_vm4, %v637_v40 }
  0x3f   : >> { %1835 = vmatpush3.bf16.msra.mxu1 %v2024_v41  ;;  %1838 = vmatprep.mubr.msk.bf16.mxu1 %vm2103_vm3, %v2102_v11 }
  0x40   : >> { %1836 = vmatprep.subr.bf16.mxu1 %v2102_v11 }
  0x41   : >> { %1799 = vmatmul.mubr.msk.bf16.vlgmr.msra.gmra.mrb[0].mxu0 %vm229_vm4, %v1582_v42 }
  0x42   : >> { %1803 = vmatpush3.bf16.msra.mxu0 %v2023_v44  ;;  %1806 = vmatprep.mubr.msk.bf16.mxu0 %vm2103_vm3, %v2102_v11 }
  0x43   : >> { %1837 = vmatpush3.bf16.msra.mxu1 %v2026_v45  ;;  %1804 = vmatprep.subr.bf16.mxu0 %v2102_v11 }
  0x44   : >> { %1874 = vmatprep.subr.bf16.mxu1 %v2102_v11 }
  0x46   : >> { %1805 = vmatpush3.bf16.msra.mxu0 %v2025_v48 }
  0x47   : >> { %1842 = vmatprep.subr.bf16.mxu0 %v2102_v11 }
  0x4a   : >> { %1839 = vmatmul.mubr.msk.bf16.vlgmr.msra.gmra.mrb[0].mxu1 %vm229_vm4, %v703_v49 }
  0x4b   : >> { %1875 = vmatpush3.bf16.msra.mxu1 %v2028_v53  ;;  %1878 = vmatprep.mubr.msk.bf16.mxu1 %vm2103_vm3, %v2102_v11 }
  0x4c   : >> { %1876 = vmatprep.subr.bf16.mxu1 %v2102_v11 }
  0x4d   : >> { %1807 = vmatmul.mubr.msk.bf16.vlgmr.msra.gmra.mrb[0].mxu0 %vm229_vm4, %v408_v54 }
  0x4e   : >> { %1843 = vmatpush3.bf16.msra.mxu0 %v2030_v57  ;;  %1846 = vmatprep.mubr.msk.bf16.mxu0 %vm2103_vm3, %v2102_v11 }
  0x4f   : >> { %1877 = vmatpush3.bf16.msra.mxu1 %v2031_v58  ;;  %1844 = vmatprep.subr.bf16.mxu0 %v2102_v11 }
  0x50   : >> { %1882 = vmatprep.subr.bf16.mxu1 %v2102_v11 }
  0x52   : >> { %1879 = vmatmul.mubr.msk.bf16.vlgmr.msra.gmra.mrb[4].mxu1 %vm229_vm4, %v1084_v59  ;;  %1845 = vmatpush3.bf16.msra.mxu0 %v2032_v63 }
  0x53   : >> { %1883 = vmatpush3.bf16.msra.mxu1 %v2036_v0  ;;  %1850 = vmatprep.subr.bf16.mxu0 %v2102_v11 }
  0x54   : >> { %1884 = vmatprep.subr.bf16.mxu1 %v2102_v11  ;;  %1886 = vmatprep.mubr.msk.bf16.mxu1 %vm2103_vm3, %v2102_v11 }
  0x55   : >> { %1847 = vmatmul.mubr.msk.bf16.vlgmr.msra.gmra.mrb[4].mxu0 %vm229_vm4, %v801_v1 }
  0x56   : >> { %1851 = vmatpush3.bf16.msra.mxu0 %v2035_v3  ;;  %1854 = vmatprep.mubr.msk.bf16.mxu0 %vm2103_vm3, %v2102_v11 }
  0x57   : >> { %1885 = vmatpush3.bf16.msra.mxu1 %v2038_v4  ;;  %1852 = vmatprep.subr.bf16.mxu0 %v2102_v11 }
  0x58   : >> { %1890 = vmatprep.subr.bf16.mxu1 %v2102_v11 }
  0x5a   : >> { %1853 = vmatpush3.bf16.msra.mxu0 %v2037_v7 }
  0x5b   : >> { %1858 = vmatprep.subr.bf16.mxu0 %v2102_v11 }
  0x5e   : >> { %1887 = vmatmul.mubr.msk.bf16.vlgmr.msra.gmra.mrb[4].mxu1 %vm229_vm4, %v1149_v10 }
  0x5f   : >> { %1891 = vmatpush3.bf16.msra.mxu1 %v2041_v13  ;;  %1894 = vmatprep.mubr.msk.bf16.mxu1 %vm2103_vm3, %v2102_v11 }
  0x60   : >> { %1892 = vmatprep.subr.bf16.mxu1 %v2102_v11 }
  0x61   : >> { %1855 = vmatmul.mubr.msk.bf16.vlgmr.msra.gmra.mrb[4].mxu0 %vm229_vm4, %v1636_v15 }
  0x62   : >> { %1859 = vmatpush3.bf16.msra.mxu0 %v2040_v16  ;;  %1862 = vmatprep.mubr.msk.bf16.mxu0 %vm2103_vm3, %v2102_v11 }
  0x63   : >> { %1893 = vmatpush3.bf16.msra.mxu1 %v2043_v17  ;;  %1860 = vmatprep.subr.bf16.mxu0 %v2102_v11 }
  0x64   : >> { %1898 = vmatprep.subr.bf16.mxu1 %v2102_v11 }
  0x66   : >> { %1861 = vmatpush3.bf16.msra.mxu0 %v2042_v20 }
  0x67   : >> { %1866 = vmatprep.subr.bf16.mxu0 %v2102_v11 }
  0x6a   : >> { %1895 = vmatmul.mubr.msk.bf16.vlgmr.msra.gmra.mrb[4].mxu1 %vm229_vm4, %v1220_v21 }
  0x6b   : >> { %1899 = vmatpush3.bf16.msra.mxu1 %v2046_v22  ;;  %1902 = vmatprep.mubr.msk.bf16.mxu1 %vm2103_vm3, %v2102_v11 }
  0x6c   : >> { %1900 = vmatprep.subr.bf16.mxu1 %v2102_v11 }
  0x6d   : >> { %1863 = vmatmul.mubr.msk.bf16.vlgmr.msra.gmra.mrb[4].mxu0 %vm229_vm4, %v1654_v24 }
  0x6e   : >> { %1867 = vmatpush3.bf16.msra.mxu0 %v2045_v25  ;;  %1870 = vmatprep.mubr.msk.bf16.mxu0 %vm2103_vm3, %v2102_v11 }
  0x6f   : >> { %1901 = vmatpush3.bf16.msra.mxu1 %v2048_v26  ;;  %1868 = vmatprep.subr.bf16.mxu0 %v2102_v11 }
  0x72   : >> { %1869 = vmatpush3.bf16.msra.mxu0 %v2047_v29 }
  0x76   : >> { %1903 = vmatmul.mubr.msk.bf16.vlgmr.msra.gmra.mrb[4].mxu1 %vm229_vm4, %v1286_v30 }
  0x79   : >> { %1871 = vmatmul.mubr.msk.bf16.vlgmr.msra.gmra.mrb[4].mxu0 %vm229_vm4, %v992_v33 }
 0x11d   : >> { %v753_v34 = vpop.f32.mrb[0].mxu1 }
 0x11e   : >> { %1635 = vst.msk [vmem:[%s2358_s6 + $0x10] sm:$0xf] %vm467_vm5, %v753_v34  ;;  %v763_v11 = vsel %vm467_vm5, %v753_v34, 0.0  ;;  %v771_v35 = vmul.f32 %v753_v34, %v753_v34  ;;  %v1840_v36 = vpop.f32.mrb[1].mxu1 }
 0x11f   : >> { %v764_v37 = vrot.slane %v763_v11, 4  ;;  %v756_v38 = vpop.f32.mrb[2].mxu1 }
 0x120   : >> { %v772_v39 = vsel %vm467_vm5, %v771_v35, 0.0  ;;  %v1841_v40 = vpop.f32.mrb[3].mxu1  ;;  %v458_v43 = vpop.f32.mrb[0].mxu0 }
 0x121   : >> { %v765_v41 = vadd.f32 %v764_v37, %v763_v11  ;;  %v773_v42 = vrot.slane %v772_v39, 4  ;;  %468 = vst.msk [vmem:[%s2358_s6] sm:$0xf] %vm467_vm5, %v458_v43  ;;  %v469_v44 = vsel %vm467_vm5, %v458_v43, 0.0  ;;  %v477_v45 = vmul.f32 %v458_v43, %v458_v43  ;;  %v1808_v46 = vpop.f32.mrb[1].mxu0 }
 0x122   : >> { %v470_v49 = vrot.slane %v469_v44, 4  ;;  %v461_v50 = vpop.f32.mrb[2].mxu0 }
 0x123   : >> { %v766_v47 = vrot.slane %v765_v41, 2  ;;  %v774_v48 = vadd.f32 %v773_v42, %v772_v39  ;;  %v478_v51 = vsel %vm467_vm5, %v477_v45, 0.0  ;;  %v1809_v52 = vpop.f32.mrb[3].mxu0 }
 0x124   : >> { %v471_v54 = vadd.f32 %v470_v49, %v469_v44  ;;  %v479_v55 = vrot.slane %v478_v51, 4 }
 0x125   : >> { %v775_v53 = vrot.slane %v774_v48, 2  ;;  %v767_v56 = vadd.f32 %v766_v47, %v765_v41 }
 0x126   : >> { %v472_v57 = vrot.slane %v471_v54, 2  ;;  %v480_v58 = vadd.f32 %v479_v55, %v478_v51 }
 0x127   : >> { %v776_v59 = vadd.f32 %v775_v53, %v774_v48  ;;  %v768_v62 = vrot.slane %v767_v56, 1 }
 0x128   : >> { %v473_v60 = vadd.f32 %v472_v57, %v471_v54  ;;  %v481_v61 = vrot.slane %v480_v58, 2 }
 0x129   : >> { %v777_v1 = vrot.slane %v776_v59, 1  ;;  %v769_v4 = vadd.f32 %v768_v62, %v767_v56 }
 0x12a   : >> { %v474_v63 = vrot.slane %v473_v60, 1  ;;  %v482_v0 = vadd.f32 %v481_v61, %v480_v58 }
 0x12b   : >> { %v778_v7 = vadd.f32 %v777_v1, %v776_v59 }
 0x12c   : >> { %v475_v2 = vadd.f32 %v474_v63, %v473_v60  ;;  %v483_v3 = vrot.slane %v482_v0, 1 }
 0x12e   : >> { %v476_v5 = vadd.f32 %v2091_v9, %v475_v2  ;;  %v484_v6 = vadd.f32 %v483_v3, %v482_v0 }
 0x130   : >> { %v485_v10 = vadd.f32 %v2087_v8, %v484_v6  ;;  %v770_v12 = vadd.f32 %v769_v4, %v476_v5 }
 0x132   : >> { %v779_v13 = vadd.f32 %v778_v7, %v485_v10 }
 0x149   : >> { %v1336_v14 = vpop.f32.mrb[4].mxu1 }
 0x14a   : >> { %1710 = vst.msk [vmem:[%s2358_s6 + $0x30] sm:$0xf] %vm467_vm5, %v1336_v14  ;;  %v1346_v15 = vsel %vm467_vm5, %v1336_v14, 0.0  ;;  %v1354_v16 = vmul.f32 %v1336_v14, %v1336_v14  ;;  %v1904_v17 = vpop.f32.mrb[5].mxu1 }
 0x14b   : >> { %v1347_v18 = vrot.slane %v1346_v15, 4  ;;  %v1339_v19 = vpop.f32.mrb[6].mxu1 }
 0x14c   : >> { %v1355_v20 = vsel %vm467_vm5, %v1354_v16, 0.0  ;;  %v1905_v21 = vpop.f32.mrb[7].mxu1  ;;  %v1042_v23 = vpop.f32.mrb[4].mxu0 }
 0x14d   : >> { %v1348_v9 = vadd.f32 %v1347_v18, %v1346_v15  ;;  %v1356_v22 = vrot.slane %v1355_v20, 4  ;;  %1672 = vst.msk [vmem:[%s2358_s6 + $0x20] sm:$0xf] %vm467_vm5, %v1042_v23  ;;  %v1052_v8 = vsel %vm467_vm5, %v1042_v23, 0.0  ;;  %v1060_v24 = vmul.f32 %v1042_v23, %v1042_v23  ;;  %v1872_v25 = vpop.f32.mrb[5].mxu0 }
 0x14e   : >> { %v1053_v28 = vrot.slane %v1052_v8, 4  ;;  %v1045_v29 = vpop.f32.mrb[6].mxu0 }
 0x14f   : >> { %v1349_v26 = vrot.slane %v1348_v9, 2  ;;  %v1357_v27 = vadd.f32 %v1356_v22, %v1355_v20  ;;  %v1061_v30 = vsel %vm467_vm5, %v1060_v24, 0.0  ;;  %v1873_v31 = vpop.f32.mrb[7].mxu0 }
 0x150   : >> { %v1054_v33 = vadd.f32 %v1053_v28, %v1052_v8  ;;  %v1062_v34 = vrot.slane %v1061_v30, 4 }
 0x151   : >> { %v1358_v32 = vrot.slane %v1357_v27, 2  ;;  %v1350_v11 = vadd.f32 %v1349_v26, %v1348_v9 }
 0x152   : >> { %v1055_v35 = vrot.slane %v1054_v33, 2  ;;  %v1063_v36 = vadd.f32 %v1062_v34, %v1061_v30 }
 0x153   : >> { %v1359_v37 = vadd.f32 %v1358_v32, %v1357_v27  ;;  %v1351_v40 = vrot.slane %v1350_v11, 1 }
 0x154   : >> { %v1056_v38 = vadd.f32 %v1055_v35, %v1054_v33  ;;  %v1064_v39 = vrot.slane %v1063_v36, 2 }
 0x155   : >> { %v1360_v43 = vrot.slane %v1359_v37, 1  ;;  %v1352_v46 = vadd.f32 %v1351_v40, %v1350_v11 }
 0x156   : >> { %v1057_v41 = vrot.slane %v1056_v38, 1  ;;  %v1065_v42 = vadd.f32 %v1064_v39, %v1063_v36 }
 0x157   : >> { %v1361_v49 = vadd.f32 %v1360_v43, %v1359_v37 }
 0x158   : >> { %v1058_v44 = vadd.f32 %v1057_v41, %v1056_v38  ;;  %v1066_v45 = vrot.slane %v1065_v42, 1 }
 0x15a   : >> { %v1059_v47 = vadd.f32 %v1058_v44, %v770_v12  ;;  %v1067_v48 = vadd.f32 %v1066_v45, %v1065_v42  ;;  %190 = sbr.rel (!%p188_p5) target bundleno = 29 (0x1d), region = 120 }
 0x15c   : >> { %v1068_v50 = vadd.f32 %v1067_v48, %v779_v13  ;;  %v1353_v51 = vadd.f32 %v1352_v46, %v1059_v47  }
 0x15e   : >> { %v1362_v52 = vadd.f32 %v1361_v49, %v1068_v50   ;;  %v2402_v9 = vmov %v1353_v51  ;;  %v1364_v53 = vmul.f32 (%p188_p5), 0.015625, %v1353_v51 }
 0x160   : >> { %v2401_v8 = vmov %v1362_v52  ;;  %v1365_v54 = vmul.f32 (%p188_p5), 0.015625, %v1362_v52  ;;  %v1366_v55 = vmul.f32 (%p188_p5), %v1364_v53, %v1364_v53 }
 0x162   : > { %v1367_v56 = vsub.f32 %v1365_v54, %v1366_v55 }
 0x164   : > { %v1368_v57 = vadd.f32 1e-05, %v1367_v56 }
 0x166   : > { %2051 = vrsqrt.f32 %v1368_v57 }
 0x170   : > { %v2052_v58 = vpop.eup %2051 }
 0x171 LB: >> { %v1399_v59 = vlaneseq  ;;  %v2104_v60 = vmov 1983009808   ;;  %s1711_s24 = sshll.u32 %s2099_s3, 2  ;;  %vm1386_vm6 = vcmask 123904   ;;  %s2105_s21 = smov 16   ;;  %vm1406_vm7 = vcmask 255104   ;;  %s2099_s3 = sphi %s2385_s3, %s1375_s3  }
 0x172   : >> { %v1397_v61 = vunpack.c.l.s4 %v2104_v60  ;;  %s1377_s19 = scalar_lea.vmem [#allocation3], %s1711_s24  ;;  %s1385_s20 = scalar_lea.vmem %s2141_s18, %s1711_s24 }
 0x173   : >> { %v1400_v62 = vshrl.u32 %v1399_v59, 7  ;;  %v1715_v63 = vld [vmem:[%s1377_s19 + $0x10] sm:$0xf]  ;;  %v1717_v0 = vld [vmem:[%s1377_s19 + $0x20] sm:$0xf]  ;;  %s1375_s3 = sadd.s32 1, %s2099_s3  }
 0x174   : >> { %v1378_v1 = vld [vmem:[%s1377_s19] sm:$0xf]  ;;  %v1391_v2 = vsub.f32 %v1715_v63, %v1364_v53  ;;  %v1398_v3 = vunpack.c.0.s8 %v1397_v61  ;;  %v1722_v4 = vld [vmem:[%s1377_s19 + $0x30] sm:$0xf]  ;;  %v1411_v6 = vsub.f32 %v1717_v0, %v1364_v53  ;;  %p1372_p6 = scmp.ge.s32.totalorder %s1375_s3, 4  }
 0x175   : >> { %v1379_v5 = vsub.f32 %v1378_v1, %v1364_v53  ;;  %v1422_v7 = vsub.f32 %v1722_v4, %v1364_v53 }
 0x176   : >> { %v1392_v10 = vmul.f32 %v2052_v58, %v1391_v2  ;;  %v1412_v13 = vmul.f32 %v2052_v58, %v1411_v6  ;;  %v1401_v16 = vsub.s32 %v1398_v3, %v1400_v62 }
 0x177   : >> { %v1380_v12 = vmul.f32 %v2052_v58, %v1379_v5  ;;  %v1423_v14 = vmul.f32 %v2052_v58, %v1422_v7 }
 0x178   : >> { %v1393_v15 = vmax.f32 %v1392_v10, 0.0  ;;  %v1413_v18 = vmax.f32 %v1412_v13, 0.0 }
 0x179   : >> { %v1381_v17 = vmax.f32 %v1380_v12, 0.0  ;;  %v1424_v19 = vmax.f32 %v1423_v14, 0.0 }
 0x17a   : >> { %v1394_v20 = vpack.c.bf16 %v1393_v15, %v1393_v15  ;;  %v1414_v9 = vpack.c.bf16 %v1413_v18, %v1413_v18 }
 0x17b   : >> { %v1382_v21 = vpack.c.bf16 %v1381_v17, %v1381_v17  ;;  %v1425_v22 = vpack.c.bf16 %v1424_v19, %v1424_v19 }
 0x17c   : >> { %v1402_v23 = vrot.slane %v1394_v20, %v1401_v16  ;;  %1720 = vst.msk [vmem:[%s1385_s20 + $0x2] sm:$0x3] %vm1386_vm6, %v1414_v9 }
 0x17d   : >> { %1387 = vst.msk [vmem:[%s1385_s20] sm:$0x3] %vm1386_vm6, %v1382_v21  ;;  %v1433_v8 = vrot.slane %v1425_v22, %v1401_v16 }
 0x17e   : >> { %1403 = vrot.lane.b32.xlu0 %v1402_v23, %s2105_s21 }
 0x182   : >> { %1434 = vrot.lane.b32.xlu0 %v1433_v8, %s2105_s21 }
 0x1ef   : > { %1374 = sbr.rel (!%p1372_p6) target bundleno = 369 (0x171), region = 131 }
 0x1f0   : >> { %v1404_v24 = vpop.permute.xlu0 %1403 }
 0x1f1   : >> { %1407 = vst.msk [vmem:[%s1385_s20] sm:$0x3] %vm1406_vm7, %v1404_v24 }
 0x1f4   : >> { %v1435_v25 = vpop.permute.xlu0 %1434 }
 0x1f5   : >> { %1723 = vst.msk [vmem:[%s1385_s20 + $0x2] sm:$0x3] %vm1406_vm7, %v1435_v25 }
 0x1f6 PF: > { %s12_s9 = sadd.s32 1, %s2079_s9  }
 0x1f7   : > { %p9_p7 = scmp.ge.s32.totalorder %s12_s9, 4  }
 0x1f9   :  { %11 = sbr.rel (!%p9_p7) target bundleno = 1 (0x1), region = 142 }

// kernel: dc_decoder_forward.8
= control target key start
LH: loop header
LB: loop body
LE: loop exit
PB: predicated region body
PF: predicated region fallthrough
CT: control target
= control target key end

     0   :  { %s1924_s9 = smov 0   ;;  %s2162_s0 = inlined_call_operand.vmem [shape: bf16[2,8,8,16], index: 0, kind: input, shape index: {}]   ;;  %s2163_s1 = inlined_call_operand.vmem [shape: bf16[4,4,16,8], index: 1, kind: input, shape index: {}]   ;;  %s2164_s2 = inlined_call_operand.vmem [shape: bf16[2,8,2,8,16], index: 2, kind: output, shape index: {}]  }
   0x1 LB: > { %s1458_s10 = sadd.s32 4294967295, %s1883_s9   ;;  %p1462_p0 = scmp.ge.s32.totalorder %s1883_s9, 1  ;;  %s1883_s9 = sphi %s1924_s9, %s12_s9  }
   0x2   : > { %p112_p1 = scmp.lt.s32.totalorder %s1883_s9, 3 }
   0x4   : > { %p113_p2 = pnand %p1462_p0, %p112_p1 }
   0x5   : > { %p1932_p3 = scmp.lt.s32.totalorder (!%p113_p2), %s1458_s10, 1  ;;  %vm145_vm0 = vcmask (!%p113_p2), 125952   ;;  %vm147_vm1 = vcmask (!%p113_p2), 122880   ;;  %v1905_v0 = vmov (!%p113_p2), 0   ;;  %s1885_s20 = smov (!%p113_p2), 0  }
   0x6   : > { %116 = sbr.rel (%p113_p2) target bundleno = 503 (0x1f7), region = 28  ;;  %146 = vst.msk [vmem:[#allocation2] sm:$0xf] (!%p113_p2), %vm145_vm0, %v1905_v0  ;;  %149 = vst.msk [vmem:[#allocation2 + $0x8] sm:$0xf] (!%p113_p2), %vm145_vm0, %v1905_v0 }
   0x7   : > { %151 = vst.msk [vmem:[#allocation2 + $0x10] sm:$0xf] (!%p113_p2), %vm145_vm0, %v1905_v0  ;;  %153 = vst.msk [vmem:[#allocation2 + $0x18] sm:$0xf] (!%p113_p2), %vm145_vm0, %v1905_v0 }
   0x8   : > { %155 = vst.msk [vmem:[#allocation2 + $0x20] sm:$0xf] (!%p113_p2), %vm145_vm0, %v1905_v0  ;;  %157 = vst.msk [vmem:[#allocation2 + $0x28] sm:$0xf] (!%p113_p2), %vm145_vm0, %v1905_v0 }
   0x9   : > { %159 = vst.msk [vmem:[#allocation2 + $0x30] sm:$0xf] (!%p113_p2), %vm145_vm0, %v1905_v0  ;;  %161 = vst.msk [vmem:[#allocation2 + $0x38] sm:$0xf] (!%p113_p2), %vm145_vm0, %v1905_v0 }
   0xa   : > { %163 = vst.msk [vmem:[#allocation2 + $0x40] sm:$0xf] (!%p113_p2), %vm145_vm0, %v1905_v0  ;;  %165 = vst.msk [vmem:[#allocation2 + $0x48] sm:$0xf] (!%p113_p2), %vm145_vm0, %v1905_v0 }
   0xb   : > { %148 = vst.msk [vmem:[#allocation2 + $0x4] sm:$0x1] (!%p113_p2), %vm147_vm1, %v1905_v0  ;;  %150 = vst.msk [vmem:[#allocation2 + $0xc] sm:$0x1] (!%p113_p2), %vm147_vm1, %v1905_v0 }
   0xc   : > { %152 = vst.msk [vmem:[#allocation2 + $0x14] sm:$0x1] (!%p113_p2), %vm147_vm1, %v1905_v0  ;;  %154 = vst.msk [vmem:[#allocation2 + $0x1c] sm:$0x1] (!%p113_p2), %vm147_vm1, %v1905_v0 }
   0xd   : > { %156 = vst.msk [vmem:[#allocation2 + $0x24] sm:$0x1] %vm147_vm1, %v1905_v0  ;;  %158 = vst.msk [vmem:[#allocation2 + $0x2c] sm:$0x1] %vm147_vm1, %v1905_v0  ;;  %s2169_s10 = smov (!%p1932_p3, %s1458_s10), 1 }
   0xe   : > { %160 = vst.msk [vmem:[#allocation2 + $0x34] sm:$0x1] %vm147_vm1, %v1905_v0  ;;  %162 = vst.msk [vmem:[#allocation2 + $0x3c] sm:$0x1] %vm147_vm1, %v1905_v0  ;;  %s1592_s12 = sshll.u32 %s2169_s10, 5  ;;  %s1593_s13 = sshll.u32 %s2169_s10, 6 }
   0xf   : > { %164 = vst.msk [vmem:[#allocation2 + $0x44] sm:$0x1] %vm147_vm1, %v1905_v0  ;;  %166 = vst.msk [vmem:[#allocation2 + $0x4c] sm:$0x1] %vm147_vm1, %v1905_v0  ;;  %s138_s16 = scalar_lea.vmem %s2162_s0, %s1592_s12  ;;  %s1964_s19 = scalar_lea.vmem %s2164_s2, %s1593_s13 }
  0x10 LB: >> { %s1467_s21 = sshll.u32 %s1887_s20, 2  ;;  %s1468_s22 = sshll.u32 %s1887_s20, 3  ;;  %vm191_vm2 = vsmask.f32 7938  ;;  %vm197_vm3 = vsmask.f32 256  ;;  %s1887_s20 = sphi %s1885_s20, %s172_s20  }
  0x11   : >> { %s174_s23 = scalar_lea.vmem %s138_s16, %s1467_s21  ;;  %vm192_vm4 = vmand %vm145_vm0, %vm191_vm2  ;;  %s1375_s24 = scalar_lea.vmem [#allocation2], %s1468_s22 }
  0x12   : >> { %v175_v1 = vld [vmem:[%s174_s23] sm:$0xf]  ;;  %vm198_vm5 = vmand %vm147_vm1, %vm197_vm3  ;;  %s172_s20 = sadd.s32 1, %s1887_s20  }
  0x13   : >> { %v178_v2 = vshrl.u32 %v175_v1, 16  ;;  %v181_v3 = vshll.u32 %v175_v1, 16  ;;  %p169_p4 = scmp.ge.s32.totalorder %s172_s20, 8  }
  0x14   : > { %v1968_v11 = vmov (%p169_p4), 0.0   ;;  %v1970_v12 = vmov (%p169_p4), 0.0   ;;  %s1972_s25 = smov (%p169_p4), 0  }
  0x15   : >> { %v180_v4 = vrot.slane %v178_v2, 7  ;;  %171 = sbr.rel (!%p169_p4) target bundleno = 16 (0x10), region = 109 }
  0x16   : >> { %v1469_v5 = vld [vmem:[%s1375_s24 + $0x8] sm:$0xf]  ;;  %v1471_v6 = vld [vmem:[%s1375_s24 + $0xc] sm:$0x1] }
  0x17   : >> { %v183_v7 = vor.u32 %v181_v3, %v180_v4  ;;  %v184_v8 = vrot.slane %v180_v4, 4 }
  0x19   : >> { %v194_v9 = vsel %vm192_vm4, %v183_v7, %v1469_v5  ;;  %v200_v10 = vsel %vm198_vm5, %v184_v8, %v1471_v6 }
  0x1a   : >> { %1470 = vst [vmem:[%s1375_s24 + $0x8] sm:$0xf] %v194_v9  ;;  %1472 = vst [vmem:[%s1375_s24 + $0xc] sm:$0x1] %v200_v10 }
  0x1c LB: >> { %v1827_v13 = vld [vmem:[%s2163_s1 + $0x28] sm:$0xff]   ;;  %v1906_v14 = vmov 0.0   ;;  %vm1907_vm6 = vmmov 0   ;;  %s1594_s30 = sshll.u32 %s1899_s25, 3  ;;  %vm238_vm7 = vcmask 130048   ;;  %v1833_v24 = vld [vmem:[%s2163_s1 + $0x20] sm:$0xff]   ;;  %s1899_s25 = sphi %s1972_s25, %s207_s25   ;;  %v1895_v12 = vphi %v1970_v12, %v2167_v12   ;;  %v1891_v11 = vphi %v1968_v11, %v2166_v11  }
  0x1d   : >> { %1655 = vmatprep.subr.bf16.mxu1 %v1906_v14  ;;  %1631 = vmatprep.subr.bf16.mxu0 %v1906_v14  ;;  %v1828_v15 = vld [vmem:[%s2163_s1 + $0x8] sm:$0xff]   ;;  %s1998_s3 = scalar_lea.vmem [#allocation2], %s1594_s30  ;;  %v1832_v30 = vld [vmem:[%s2163_s1] sm:$0xff]   ;;  %v1835_v37 = vld [vmem:[%s2163_s1 + $0x30] sm:$0xff]   ;;  %vm458_vm8 = vcmask 64512   ;;  %s207_s25 = sadd.s32 1, %s1899_s25  }
  0x1e   : >> { %1656 = vmatpush3.bf16.msra.mxu1 %v1827_v13  ;;  %1657 = vmatprep.mubr.msk.bf16.mxu1 %vm1907_vm6, %v1906_v14  ;;  %v1834_v40 = vld [vmem:[%s2163_s1 + $0x10] sm:$0xff]   ;;  %v1838_v44 = vld [vmem:[%s2163_s1 + $0x38] sm:$0xff]   ;;  %v1842_v54 = vld [vmem:[%s2163_s1 + $0x68] sm:$0xff]   ;;  %p204_p5 = scmp.ge.s32.totalorder %s207_s25, 8  }
  0x1f   : >> { %1632 = vmatpush3.bf16.msra.mxu0 %v1828_v15  ;;  %1633 = vmatprep.mubr.msk.bf16.mxu0 %vm1907_vm6, %v1906_v14  ;;  %v1837_v48 = vld [vmem:[%s2163_s1 + $0x18] sm:$0xff]   ;;  %v1841_v0 = vld [vmem:[%s2163_s1 + $0x48] sm:$0xff]   ;;  %v1847_v5 = vld [vmem:[%s2163_s1 + $0x60] sm:$0xff]  }
  0x20   : >> { %1637 = vmatprep.subr.bf16.mxu0 %v1906_v14  ;;  %1661 = vmatprep.subr.bf16.mxu1 %v1906_v14  ;;  %v1846_v8 = vld [vmem:[%s2163_s1 + $0x40] sm:$0xff]  }
  0x21   : >> { %v477_v16 = vld [vmem:[%s1998_s3] sm:$0xf]  ;;  %v478_v17 = vld [vmem:[%s1998_s3 + $0x4] sm:$0x1]  ;;  %v1506_v34 = vld [vmem:[%s1998_s3 + $0x8] sm:$0xf] }
  0x22   : >> { %v482_v18 = vld [vmem:[%s1998_s3] sm:$0xe]  ;;  %v1503_v20 = vcombine.low %v477_v16, %v478_v17  ;;  %v216_v22 = vld [vmem:[%s1998_s3 + $0x4] sm:$0x1]  ;;  %v1507_v35 = vld [vmem:[%s1998_s3 + $0xc] sm:$0x1] }
  0x23   : >> { %v1500_v19 = vcombine.low %v482_v18, %v478_v17  ;;  %v213_v21 = vld [vmem:[%s1998_s3] sm:$0xf]  ;;  %v1510_v38 = vcombine.low %v1506_v34, %v1507_v35  ;;  %v1513_v45 = vld [vmem:[%s1998_s3 + $0x8] sm:$0xe]  ;;  %v1524_v52 = vld [vmem:[%s1998_s3 + $0xc] sm:$0x1] }
  0x24   : >> { %v1477_v23 = vcombine.low %v213_v21, %v216_v22  ;;  %v547_v28 = vshll.u32 %v1503_v20, 16  ;;  %v545_v32 = vshrl.u32 %v1503_v20, 16  ;;  %v1840_v46 = vld [vmem:[%s1998_s3 + $0x8] sm:$0x1f]   ;;  %v1516_v49 = vcombine.low %v1513_v45, %v1507_v35  ;;  %v1560_v13 = vld [vmem:[%s1998_s3 + $0x10] sm:$0xf] }
  0x25   : >> { %v491_v25 = vrot.slane %v1500_v19, 1  ;;  %v613_v39 = vshll.u32 %v1510_v38, 16  ;;  %v611_v41 = vshrl.u32 %v1510_v38, 16  ;;  %v1483_v47 = vld [vmem:[%s1998_s3 + $0x8] sm:$0xf]  ;;  %v402_v50 = vshll.u32 %v1840_v46, 16 }
  0x26   : >> { %v226_v26 = vshrl.u32 %v1477_v23, 16  ;;  %v228_v27 = vshll.u32 %v1477_v23, 16  ;;  %v549_v33 = vrot.slane %v547_v28, 1  ;;  %v1521_v51 = vld [vmem:[%s1998_s3 + $0x8] sm:$0xf]  ;;  %v674_v53 = vrot.slane %v1516_v49, 1 }
  0x27   : >> { %1658 = vmatmul.mubr.msk.bf16.vlgmr.msra.gmra.mrb[0].mxu1 %vm238_vm7, %v491_v25  ;;  %v615_v42 = vrot.slane %v613_v39, 1  ;;  %v400_v55 = vshrl.u32 %v1840_v46, 16  ;;  %v404_v56 = vrot.slane %v402_v50, 1  ;;  %v1548_v57 = vld [vmem:[%s1998_s3 + $0xc] sm:$0x1]  ;;  %v1527_v59 = vcombine.low %v1521_v51, %v1524_v52  ;;  %v1849_v18 = vld [vmem:[%s2163_s1 + $0x70] sm:$0xff]  }
  0x28   : >> { %v230_v29 = vrot.slane %v228_v27, 1  ;;  %1662 = vmatpush3.bf16.msra.mxu1 %v1833_v24  ;;  %1663 = vmatprep.mubr.msk.bf16.mxu1 %vm1907_vm6, %v1906_v14  ;;  %v550_v36 = vor.u32 %v549_v33, %v545_v32  ;;  %v1551_v58 = vld [vmem:[%s1998_s3 + $0x8] sm:$0xe]  ;;  %v1561_v15 = vld [vmem:[%s1998_s3 + $0x14] sm:$0x1]  ;;  %v1852_v24 = vld [vmem:[%s2163_s1 + $0x78] sm:$0xff]  }
  0x29   : >> { %1667 = vmatprep.subr.bf16.mxu1 %v1906_v14  ;;  %v616_v43 = vor.u32 %v615_v42, %v611_v41  ;;  %v1554_v60 = vcombine.low %v1551_v58, %v1548_v57  ;;  %v405_v61 = vor.u32 %v404_v56, %v400_v55  ;;  %v1547_v62 = vld [vmem:[%s1998_s3 + $0x8] sm:$0xf]  ;;  %v761_v63 = vshll.u32 %v1527_v59, 16  ;;  %v1848_v20 = vld [vmem:[%s2163_s1 + $0x50] sm:$0xff]   ;;  %v1851_v28 = vld [vmem:[%s2163_s1 + $0x58] sm:$0xff]  }
  0x2a   : >> { %v231_v31 = vor.u32 %v230_v29, %v226_v26  ;;  %v1557_v2 = vcombine.low %v1547_v62, %v1548_v57  ;;  %v759_v3 = vshrl.u32 %v1527_v59, 16  ;;  %v1564_v17 = vcombine.low %v1560_v13, %v1561_v15  ;;  %v1567_v25 = vld [vmem:[%s1998_s3 + $0x10] sm:$0xe] }
  0x2b   : >> { %v1022_v1 = vrot.slane %v1554_v60, 1  ;;  %v763_v4 = vrot.slane %v761_v63, 1  ;;  %v1854_v26 = vld [vmem:[%s1998_s3 + $0x10] sm:$0x1f]   ;;  %v1570_v29 = vcombine.low %v1567_v25, %v1561_v15 }
  0x2c   : >> { %1634 = vmatmul.mubr.msk.bf16.vlgmr.msra.gmra.mrb[0].mxu0 %vm238_vm7, %v231_v31  ;;  %v1078_v6 = vshll.u32 %v1557_v2, 16  ;;  %v1076_v9 = vshrl.u32 %v1557_v2, 16  ;;  %v1144_v19 = vshll.u32 %v1564_v17, 16  ;;  %v1533_v27 = vld [vmem:[%s1998_s3 + $0x10] sm:$0xf]  ;;  %v932_v32 = vshrl.u32 %v1854_v26, 16 }
  0x2d   : >> { %1638 = vmatpush3.bf16.msra.mxu0 %v1832_v30  ;;  %1639 = vmatprep.mubr.msk.bf16.mxu0 %vm1907_vm6, %v1906_v14  ;;  %v764_v7 = vor.u32 %v763_v4, %v759_v3  ;;  %v934_v30 = vshll.u32 %v1854_v26, 16  ;;  %v1205_v31 = vrot.slane %v1570_v29, 1  ;;  %s2122_s3 = scalar_lea.vmem [#allocation3], %s1594_s30  ;;  %s2149_s30 = smov (%p204_p5), 0  }
  0x2e   : >> { %1643 = vmatprep.subr.bf16.mxu0 %v1906_v14  ;;  %v1080_v10 = vrot.slane %v1078_v6, 1  ;;  %v1146_v22 = vrot.slane %v1144_v19, 1 }
  0x2f   : >> { %v936_v33 = vrot.slane %v934_v30, 1 }
  0x30   : >> { %v1081_v16 = vor.u32 %v1080_v10, %v1076_v9 }
  0x31   : >> { %v937_v34 = vor.u32 %v936_v33, %v932_v32 }
  0x33   : >> { %1664 = vmatmul.mubr.msk.bf16.vlgmr.msra.gmra.mrb[0].mxu1 %vm238_vm7, %v550_v36 }
  0x34   : >> { %1668 = vmatpush3.bf16.msra.mxu1 %v1835_v37  ;;  %1669 = vmatprep.mubr.msk.bf16.mxu1 %vm1907_vm6, %v1906_v14 }
  0x35   : >> { %1673 = vmatprep.subr.bf16.mxu1 %v1906_v14 }
  0x38   : >> { %1640 = vmatmul.mubr.msk.bf16.vlgmr.msra.gmra.mrb[0].mxu0 %vm238_vm7, %v213_v21  ;;  %v1142_v21 = vshrl.u32 %v1564_v17, 16 }
  0x39   : >> { %1644 = vmatpush3.bf16.msra.mxu0 %v1834_v40  ;;  %1645 = vmatprep.mubr.msk.bf16.mxu0 %vm1907_vm6, %v1906_v14 }
  0x3a   : >> { %1649 = vmatprep.subr.bf16.mxu0 %v1906_v14  ;;  %v1147_v23 = vor.u32 %v1146_v22, %v1142_v21 }
  0x3f   : >> { %1670 = vmatmul.mubr.msk.bf16.vlgmr.msra.gmra.mrb[0].mxu1 %vm238_vm7, %v616_v43 }
  0x40   : >> { %1674 = vmatpush3.bf16.msra.mxu1 %v1838_v44  ;;  %1675 = vmatprep.mubr.msk.bf16.mxu1 %vm1907_vm6, %v1906_v14 }
  0x41   : >> { %1703 = vmatprep.subr.bf16.mxu1 %v1906_v14 }
  0x44   : >> { %1646 = vmatmul.mubr.msk.bf16.vlgmr.msra.gmra.mrb[0].mxu0 %vm238_vm7, %v1483_v47 }
  0x45   : >> { %1650 = vmatpush3.bf16.msra.mxu0 %v1837_v48  ;;  %1651 = vmatprep.mubr.msk.bf16.mxu0 %vm1907_vm6, %v1906_v14 }
  0x46   : >> { %1679 = vmatprep.subr.bf16.mxu0 %v1906_v14 }
  0x4b   : >> { %1676 = vmatmul.mubr.msk.bf16.vlgmr.msra.gmra.mrb[0].mxu1 %vm238_vm7, %v674_v53 }
  0x4c   : >> { %1704 = vmatpush3.bf16.msra.mxu1 %v1842_v54  ;;  %1705 = vmatprep.mubr.msk.bf16.mxu1 %vm1907_vm6, %v1906_v14 }
  0x4d   : >> { %1709 = vmatprep.subr.bf16.mxu1 %v1906_v14 }
  0x50   : >> { %1652 = vmatmul.mubr.msk.bf16.vlgmr.msra.gmra.mrb[0].mxu0 %vm238_vm7, %v405_v61 }
  0x51   : >> { %1680 = vmatpush3.bf16.msra.mxu0 %v1841_v0  ;;  %1681 = vmatprep.mubr.msk.bf16.mxu0 %vm1907_vm6, %v1906_v14 }
  0x52   : >> { %1685 = vmatprep.subr.bf16.mxu0 %v1906_v14 }
  0x53   : >> { %1706 = vmatmul.mubr.msk.bf16.vlgmr.msra.gmra.mrb[4].mxu1 %vm238_vm7, %v1022_v1 }
  0x54   : >> { %1710 = vmatpush3.bf16.msra.mxu1 %v1847_v5  ;;  %1711 = vmatprep.mubr.msk.bf16.mxu1 %vm1907_vm6, %v1906_v14 }
  0x55   : >> { %1715 = vmatprep.subr.bf16.mxu1 %v1906_v14 }
  0x58   : >> { %1682 = vmatmul.mubr.msk.bf16.vlgmr.msra.gmra.mrb[4].mxu0 %vm238_vm7, %v764_v7 }
  0x59   : >> { %1686 = vmatpush3.bf16.msra.mxu0 %v1846_v8  ;;  %1687 = vmatprep.mubr.msk.bf16.mxu0 %vm1907_vm6, %v1906_v14 }
  0x5a   : >> { %1691 = vmatprep.subr.bf16.mxu0 %v1906_v14 }
  0x5f   : >> { %1712 = vmatmul.mubr.msk.bf16.vlgmr.msra.gmra.mrb[4].mxu1 %vm238_vm7, %v1081_v16 }
  0x60   : >> { %1716 = vmatpush3.bf16.msra.mxu1 %v1849_v18  ;;  %1717 = vmatprep.mubr.msk.bf16.mxu1 %vm1907_vm6, %v1906_v14 }
  0x61   : >> { %1721 = vmatprep.subr.bf16.mxu1 %v1906_v14 }
  0x64   : >> { %1688 = vmatmul.mubr.msk.bf16.vlgmr.msra.gmra.mrb[4].mxu0 %vm238_vm7, %v1521_v51 }
  0x65   : >> { %1692 = vmatpush3.bf16.msra.mxu0 %v1848_v20  ;;  %1693 = vmatprep.mubr.msk.bf16.mxu0 %vm1907_vm6, %v1906_v14 }
  0x66   : >> { %1697 = vmatprep.subr.bf16.mxu0 %v1906_v14 }
  0x6b   : >> { %1718 = vmatmul.mubr.msk.bf16.vlgmr.msra.gmra.mrb[4].mxu1 %vm238_vm7, %v1147_v23 }
  0x6c   : >> { %1722 = vmatpush3.bf16.msra.mxu1 %v1852_v24  ;;  %1723 = vmatprep.mubr.msk.bf16.mxu1 %vm1907_vm6, %v1906_v14 }
  0x70   : >> { %1694 = vmatmul.mubr.msk.bf16.vlgmr.msra.gmra.mrb[4].mxu0 %vm238_vm7, %v1533_v27 }
  0x71   : >> { %1698 = vmatpush3.bf16.msra.mxu0 %v1851_v28  ;;  %1699 = vmatprep.mubr.msk.bf16.mxu0 %vm1907_vm6, %v1906_v14 }
  0x77   : >> { %1724 = vmatmul.mubr.msk.bf16.vlgmr.msra.gmra.mrb[4].mxu1 %vm238_vm7, %v1205_v31 }
  0x7c   : >> { %1700 = vmatmul.mubr.msk.bf16.vlgmr.msra.gmra.mrb[4].mxu0 %vm238_vm7, %v937_v34 }
 0x11e   : >> { %v718_v35 = vpop.f32.mrb[0].mxu1 }
 0x11f   : >> { %1520 = vst.msk [vmem:[%s2122_s3 + $0x40] sm:$0xff] %vm458_vm8, %v718_v35  ;;  %v728_v36 = vsel %vm458_vm8, %v718_v35, 0.0  ;;  %v736_v14 = vmul.f32 %v718_v35, %v718_v35  ;;  %v1677_v37 = vpop.f32.mrb[1].mxu1 }
 0x120   : >> { %v729_v38 = vrot.slane %v728_v36, 4  ;;  %v721_v39 = vpop.f32.mrb[2].mxu1 }
 0x121   : >> { %v737_v40 = vsel %vm458_vm8, %v736_v14, 0.0  ;;  %v1678_v41 = vpop.f32.mrb[3].mxu1 }
 0x122   : >> { %v730_v42 = vadd.f32 %v729_v38, %v728_v36  ;;  %v738_v43 = vrot.slane %v737_v40, 4 }
 0x123   : >> { %v449_v44 = vpop.f32.mrb[0].mxu0 }
 0x124   : >> { %v739_v45 = vadd.f32 %v738_v43, %v737_v40  ;;  %459 = vst.msk [vmem:[%s2122_s3] sm:$0xff] %vm458_vm8, %v449_v44  ;;  %v460_v46 = vsel %vm458_vm8, %v449_v44, 0.0  ;;  %v468_v47 = vmul.f32 %v449_v44, %v449_v44  ;;  %v1653_v48 = vpop.f32.mrb[1].mxu0  ;;  %v731_v49 = vrot.slane %v730_v42, 2 }
 0x125   : >> { %v461_v50 = vrot.slane %v460_v46, 4  ;;  %v452_v51 = vpop.f32.mrb[2].mxu0 }
 0x126   : >> { %v469_v52 = vsel %vm458_vm8, %v468_v47, 0.0  ;;  %v1654_v53 = vpop.f32.mrb[3].mxu0  ;;  %v740_v54 = vrot.slane %v739_v45, 2  ;;  %v732_v57 = vadd.f32 %v731_v49, %v730_v42 }
 0x127   : >> { %v462_v55 = vadd.f32 %v461_v50, %v460_v46  ;;  %v470_v56 = vrot.slane %v469_v52, 4 }
 0x128   : >> { %v741_v60 = vadd.f32 %v740_v54, %v739_v45  ;;  %v733_v63 = vrot.slane %v732_v57, 1 }
 0x129   : >> { %v463_v58 = vrot.slane %v462_v55, 2  ;;  %v471_v59 = vadd.f32 %v470_v56, %v469_v52 }
 0x12a   : >> { %v742_v2 = vrot.slane %v741_v60, 1  ;;  %v734_v5 = vadd.f32 %v733_v63, %v732_v57 }
 0x12b   : >> { %v464_v61 = vadd.f32 %v463_v58, %v462_v55  ;;  %v472_v62 = vrot.slane %v471_v59, 2 }
 0x12c   : >> { %v743_v8 = vadd.f32 %v742_v2, %v741_v60 }
 0x12d   : >> { %v465_v0 = vrot.slane %v464_v61, 1  ;;  %v473_v1 = vadd.f32 %v472_v62, %v471_v59 }
 0x12f   : >> { %v466_v3 = vadd.f32 %v465_v0, %v464_v61  ;;  %v474_v4 = vrot.slane %v473_v1, 1 }
 0x131   : >> { %v467_v6 = vadd.f32 %v1895_v12, %v466_v3  ;;  %v475_v7 = vadd.f32 %v474_v4, %v473_v1 }
 0x133   : >> { %v476_v9 = vadd.f32 %v1891_v11, %v475_v7  ;;  %v735_v10 = vadd.f32 %v734_v5, %v467_v6 }
 0x135   : >> { %v744_v13 = vadd.f32 %v743_v8, %v476_v9 }
 0x14a   : >> { %v1249_v15 = vpop.f32.mrb[4].mxu1 }
 0x14b   : >> { %1574 = vst.msk [vmem:[%s2122_s3 + $0xc0] sm:$0xff] %vm458_vm8, %v1249_v15  ;;  %v1259_v16 = vsel %vm458_vm8, %v1249_v15, 0.0  ;;  %v1267_v17 = vmul.f32 %v1249_v15, %v1249_v15  ;;  %v1725_v18 = vpop.f32.mrb[5].mxu1 }
 0x14c   : >> { %v1260_v19 = vrot.slane %v1259_v16, 4  ;;  %v1252_v20 = vpop.f32.mrb[6].mxu1 }
 0x14d   : >> { %v1268_v21 = vsel %vm458_vm8, %v1267_v17, 0.0  ;;  %v1726_v22 = vpop.f32.mrb[7].mxu1 }
 0x14e   : >> { %v1261_v12 = vadd.f32 %v1260_v19, %v1259_v16  ;;  %v1269_v23 = vrot.slane %v1268_v21, 4 }
 0x14f   : >> { %v981_v24 = vpop.f32.mrb[4].mxu0 }
 0x150   : >> { %v1270_v25 = vadd.f32 %v1269_v23, %v1268_v21  ;;  %1546 = vst.msk [vmem:[%s2122_s3 + $0x80] sm:$0xff] %vm458_vm8, %v981_v24  ;;  %v991_v11 = vsel %vm458_vm8, %v981_v24, 0.0  ;;  %v999_v26 = vmul.f32 %v981_v24, %v981_v24  ;;  %v1701_v27 = vpop.f32.mrb[5].mxu0  ;;  %v1262_v28 = vrot.slane %v1261_v12, 2 }
 0x151   : >> { %v992_v29 = vrot.slane %v991_v11, 4  ;;  %v984_v30 = vpop.f32.mrb[6].mxu0 }
 0x152   : >> { %v1000_v31 = vsel %vm458_vm8, %v999_v26, 0.0  ;;  %v1702_v32 = vpop.f32.mrb[7].mxu0  ;;  %v1271_v33 = vrot.slane %v1270_v25, 2  ;;  %v1263_v36 = vadd.f32 %v1262_v28, %v1261_v12 }
 0x153   : >> { %v993_v34 = vadd.f32 %v992_v29, %v991_v11  ;;  %v1001_v35 = vrot.slane %v1000_v31, 4 }
 0x154   : >> { %v1272_v38 = vadd.f32 %v1271_v33, %v1270_v25  ;;  %v1264_v41 = vrot.slane %v1263_v36, 1 }
 0x155   : >> { %v994_v14 = vrot.slane %v993_v34, 2  ;;  %v1002_v37 = vadd.f32 %v1001_v35, %v1000_v31 }
 0x156   : >> { %v1273_v44 = vrot.slane %v1272_v38, 1  ;;  %v1265_v47 = vadd.f32 %v1264_v41, %v1263_v36 }
 0x157   : >> { %v995_v39 = vadd.f32 %v994_v14, %v993_v34  ;;  %v1003_v40 = vrot.slane %v1002_v37, 2 }
 0x158   : >> { %v1274_v50 = vadd.f32 %v1273_v44, %v1272_v38 }
 0x159   : >> { %v996_v42 = vrot.slane %v995_v39, 1  ;;  %v1004_v43 = vadd.f32 %v1003_v40, %v1002_v37 }
 0x15b   : >> { %v997_v45 = vadd.f32 %v996_v42, %v995_v39  ;;  %v1005_v46 = vrot.slane %v1004_v43, 1 }
 0x15d   : >> { %v998_v48 = vadd.f32 %v997_v45, %v735_v10  ;;  %v1006_v49 = vadd.f32 %v1005_v46, %v1004_v43  ;;  %206 = sbr.rel (!%p204_p5) target bundleno = 28 (0x1c), region = 120 }
 0x15f   : >> { %v1007_v51 = vadd.f32 %v1006_v49, %v744_v13  ;;  %v1266_v52 = vadd.f32 %v1265_v47, %v998_v48  }
 0x161   : >> { %v1275_v53 = vadd.f32 %v1274_v50, %v1007_v51   ;;  %v2167_v12 = vmov %v1266_v52  ;;  %v1277_v54 = vmul.f32 (%p204_p5), 0.00390625, %v1266_v52 }
 0x163   : >> { %v2166_v11 = vmov %v1275_v53  ;;  %v1278_v55 = vmul.f32 (%p204_p5), 0.00390625, %v1275_v53  ;;  %v1279_v56 = vmul.f32 (%p204_p5), %v1277_v54, %v1277_v54 }
 0x165   : > { %v1280_v57 = vsub.f32 %v1278_v55, %v1279_v56 }
 0x167   : > { %v1281_v58 = vadd.f32 1e-05, %v1280_v57 }
 0x169   : > { %1855 = vrsqrt.f32 %v1281_v58 }
 0x173   : > { %v1856_v59 = vpop.eup %1855 }
 0x174 LB: >> { %s1575_s10 = sshll.u32 %s1903_s30, 3  ;;  %vm1299_vm9 = vcmask 60416   ;;  %s1908_s12 = smov 8   ;;  %vm1314_vm10 = vcmask 126016   ;;  %s1903_s30 = sphi %s2149_s30, %s1288_s30  }
 0x175   : >> { %s1290_s11 = scalar_lea.vmem [#allocation3], %s1575_s10  ;;  %s1298_s25 = scalar_lea.vmem %s1964_s19, %s1575_s10 }
 0x176   : >> { %v1579_v60 = vld [vmem:[%s1290_s11 + $0x40] sm:$0xff]  ;;  %s1288_s30 = sadd.s32 1, %s1903_s30  }
 0x177   : >> { %v1582_v61 = vld [vmem:[%s1290_s11 + $0x80] sm:$0xff]  ;;  %v1304_v63 = vsub.f32 %v1579_v60, %v1277_v54  ;;  %p1285_p6 = scmp.ge.s32.totalorder %s1288_s30, 8  }
 0x178   : >> { %v1291_v62 = vld [vmem:[%s1290_s11] sm:$0xff]  ;;  %v1319_v0 = vsub.f32 %v1582_v61, %v1277_v54 }
 0x179   : >> { %v1292_v1 = vsub.f32 %v1291_v62, %v1277_v54  ;;  %v1587_v2 = vld [vmem:[%s1290_s11 + $0xc0] sm:$0xff]  ;;  %v1305_v4 = vmul.f32 %v1856_v59, %v1304_v63 }
 0x17a   : >> { %v1330_v3 = vsub.f32 %v1587_v2, %v1277_v54  ;;  %v1320_v5 = vmul.f32 %v1856_v59, %v1319_v0 }
 0x17b   : >> { %v1293_v6 = vmul.f32 %v1856_v59, %v1292_v1  ;;  %v1306_v8 = vmax.f32 %v1305_v4, 0.0 }
 0x17c   : >> { %v1331_v7 = vmul.f32 %v1856_v59, %v1330_v3  ;;  %v1321_v10 = vmax.f32 %v1320_v5, 0.0 }
 0x17d   : >> { %v1294_v9 = vmax.f32 %v1293_v6, 0.0  ;;  %v1596_v15 = vpack.c.bf16 %v1306_v8, %v1306_v8 }
 0x17e   : >> { %v1332_v13 = vmax.f32 %v1331_v7, 0.0  ;;  %v1322_v17 = vpack.c.bf16 %v1321_v10, %v1321_v10 }
 0x17f   : >> { %v1295_v16 = vpack.c.bf16 %v1294_v9, %v1294_v9  ;;  %1311 = vrot.lane.b32.xlu0 %v1596_v15, %s1908_s12 }
 0x180   : >> { %v1598_v18 = vpack.c.bf16 %v1332_v13, %v1332_v13  ;;  %1585 = vst.msk [vmem:[%s1298_s25 + $0x4] sm:$0xf] %vm1299_vm9, %v1322_v17 }
 0x181   : >> { %1300 = vst.msk [vmem:[%s1298_s25] sm:$0xf] %vm1299_vm9, %v1295_v16 }
 0x183   : >> { %1337 = vrot.lane.b32.xlu0 %v1598_v18, %s1908_s12 }
 0x1f0   : > { %1287 = sbr.rel (!%p1285_p6) target bundleno = 372 (0x174), region = 131 }
 0x1f1   : >> { %v1312_v19 = vpop.permute.xlu0 %1311 }
 0x1f2   : >> { %1315 = vst.msk [vmem:[%s1298_s25] sm:$0xf] %vm1314_vm10, %v1312_v19 }
 0x1f5   : >> { %v1338_v20 = vpop.permute.xlu0 %1337 }
 0x1f6   : >> { %1589 = vst.msk [vmem:[%s1298_s25 + $0x4] sm:$0xf] %vm1314_vm10, %v1338_v20 }
 0x1f7 PF: > { %s12_s9 = sadd.s32 1, %s1883_s9  }
 0x1f8   : > { %p9_p7 = scmp.ge.s32.totalorder %s12_s9, 4  }
 0x1fa   :  { %11 = sbr.rel (!%p9_p7) target bundleno = 1 (0x1), region = 142 }

// kernel: dc_decoder_forward.9
= control target key start
LH: loop header
LB: loop body
LE: loop exit
PB: predicated region body
PF: predicated region fallthrough
CT: control target
= control target key end

     0   :  { %s2094_s9 = smov 0   ;;  %s2474_s0 = inlined_call_operand.vmem [shape: bf16[2,16,16,8], index: 0, kind: input, shape index: {}]   ;;  %s2475_s1 = inlined_call_operand.vmem [shape: bf16[4,4,8,4], index: 1, kind: input, shape index: {}]   ;;  %s2476_s2 = inlined_call_operand.vmem [shape: bf16[2,16,2,16,8], index: 2, kind: output, shape index: {}]  }
   0x1 LB: > { %s1628_s10 = sadd.s32 4294967295, %s2053_s9   ;;  %p1632_p0 = scmp.ge.s32.totalorder %s2053_s9, 1  ;;  %s2053_s9 = sphi %s2094_s9, %s12_s9  }
   0x2   : > { %p112_p1 = scmp.lt.s32.totalorder %s2053_s9, 3 }
   0x4   : > { %p113_p2 = pnand %p1632_p0, %p112_p1 }
   0x5   : > { %p2104_p3 = scmp.lt.s32.totalorder (!%p113_p2), %s1628_s10, 1  ;;  %vm145_vm0 = vcmask (!%p113_p2), 60416   ;;  %vm148_vm1 = vcmask (!%p113_p2), 57344   ;;  %v2075_v0 = vmov (!%p113_p2), 0   ;;  %s2176_s20 = smov (!%p113_p2), 0  }
   0x6   : > { %116 = sbr.rel (%p113_p2) target bundleno = 525 (0x20d), region = 28  ;;  %146 = vst.msk [vmem:[#allocation2] sm:$0xf] (!%p113_p2), %vm145_vm0, %v2075_v0  ;;  %147 = vst.msk [vmem:[#allocation2 + $0x4] sm:$0xf] (!%p113_p2), %vm145_vm0, %v2075_v0 }
   0x7   : > { %150 = vst.msk [vmem:[#allocation2 + $0xc] sm:$0xf] (!%p113_p2), %vm145_vm0, %v2075_v0  ;;  %151 = vst.msk [vmem:[#allocation2 + $0x10] sm:$0xf] (!%p113_p2), %vm145_vm0, %v2075_v0 }
   0x8   : > { %153 = vst.msk [vmem:[#allocation2 + $0x18] sm:$0xf] (!%p113_p2), %vm145_vm0, %v2075_v0  ;;  %154 = vst.msk [vmem:[#allocation2 + $0x1c] sm:$0xf] (!%p113_p2), %vm145_vm0, %v2075_v0 }
   0x9   : > { %156 = vst.msk [vmem:[#allocation2 + $0x24] sm:$0xf] (!%p113_p2), %vm145_vm0, %v2075_v0  ;;  %157 = vst.msk [vmem:[#allocation2 + $0x28] sm:$0xf] (!%p113_p2), %vm145_vm0, %v2075_v0 }
   0xa   : > { %159 = vst.msk [vmem:[#allocation2 + $0x30] sm:$0xf] (!%p113_p2), %vm145_vm0, %v2075_v0  ;;  %160 = vst.msk [vmem:[#allocation2 + $0x34] sm:$0xf] (!%p113_p2), %vm145_vm0, %v2075_v0 }
   0xb   : > { %162 = vst.msk [vmem:[#allocation2 + $0x3c] sm:$0xf] (!%p113_p2), %vm145_vm0, %v2075_v0  ;;  %163 = vst.msk [vmem:[#allocation2 + $0x40] sm:$0xf] (!%p113_p2), %vm145_vm0, %v2075_v0 }
   0xc   : > { %165 = vst.msk [vmem:[#allocation2 + $0x48] sm:$0xf] (!%p113_p2), %vm145_vm0, %v2075_v0  ;;  %166 = vst.msk [vmem:[#allocation2 + $0x4c] sm:$0xf] (!%p113_p2), %vm145_vm0, %v2075_v0 }
   0xd   : > { %168 = vst.msk [vmem:[#allocation2 + $0x54] sm:$0xf] %vm145_vm0, %v2075_v0  ;;  %169 = vst.msk [vmem:[#allocation2 + $0x58] sm:$0xf] %vm145_vm0, %v2075_v0  ;;  %s2481_s10 = smov (!%p2104_p3, %s1628_s10), 1 }
   0xe   : > { %171 = vst.msk [vmem:[#allocation2 + $0x60] sm:$0xf] %vm145_vm0, %v2075_v0  ;;  %172 = vst.msk [vmem:[#allocation2 + $0x64] sm:$0xf] %vm145_vm0, %v2075_v0  ;;  %s1761_s12 = sshll.u32 %s2481_s10, 7  ;;  %s1762_s13 = sshll.u32 %s2481_s10, 8 }
   0xf   : > { %174 = vst.msk [vmem:[#allocation2 + $0x6c] sm:$0xf] %vm145_vm0, %v2075_v0  ;;  %175 = vst.msk [vmem:[#allocation2 + $0x70] sm:$0xf] %vm145_vm0, %v2075_v0  ;;  %s2169_s16 = scalar_lea.vmem %s2474_s0, %s1761_s12  ;;  %s2174_s19 = scalar_lea.vmem %s2476_s2, %s1762_s13 }
  0x10   : > { %177 = vst.msk [vmem:[#allocation2 + $0x78] sm:$0xf] %vm145_vm0, %v2075_v0  ;;  %178 = vst.msk [vmem:[#allocation2 + $0x7c] sm:$0xf] %vm145_vm0, %v2075_v0 }
  0x11   : > { %180 = vst.msk [vmem:[#allocation2 + $0x84] sm:$0xf] %vm145_vm0, %v2075_v0  ;;  %181 = vst.msk [vmem:[#allocation2 + $0x88] sm:$0xf] %vm145_vm0, %v2075_v0 }
  0x12   : > { %183 = vst.msk [vmem:[#allocation2 + $0x90] sm:$0xf] %vm145_vm0, %v2075_v0  ;;  %184 = vst.msk [vmem:[#allocation2 + $0x94] sm:$0xf] %vm145_vm0, %v2075_v0 }
  0x13   : > { %186 = vst.msk [vmem:[#allocation2 + $0x9c] sm:$0xf] %vm145_vm0, %v2075_v0  ;;  %187 = vst.msk [vmem:[#allocation2 + $0xa0] sm:$0xf] %vm145_vm0, %v2075_v0 }
  0x14   : > { %189 = vst.msk [vmem:[#allocation2 + $0xa8] sm:$0xf] %vm145_vm0, %v2075_v0  ;;  %190 = vst.msk [vmem:[#allocation2 + $0xac] sm:$0xf] %vm145_vm0, %v2075_v0 }
  0x15   : > { %192 = vst.msk [vmem:[#allocation2 + $0xb4] sm:$0xf] %vm145_vm0, %v2075_v0  ;;  %193 = vst.msk [vmem:[#allocation2 + $0xb8] sm:$0xf] %vm145_vm0, %v2075_v0 }
  0x16   : > { %195 = vst.msk [vmem:[#allocation2 + $0xc0] sm:$0xf] %vm145_vm0, %v2075_v0  ;;  %196 = vst.msk [vmem:[#allocation2 + $0xc4] sm:$0xf] %vm145_vm0, %v2075_v0 }
  0x17   : > { %198 = vst.msk [vmem:[#allocation2 + $0xcc] sm:$0xf] %vm145_vm0, %v2075_v0  ;;  %199 = vst.msk [vmem:[#allocation2 + $0xd0] sm:$0xf] %vm145_vm0, %v2075_v0 }
  0x18   : > { %149 = vst.msk [vmem:[#allocation2 + $0x8] sm:$0x1] %vm148_vm1, %v2075_v0  ;;  %152 = vst.msk [vmem:[#allocation2 + $0x14] sm:$0x1] %vm148_vm1, %v2075_v0 }
  0x19   : > { %155 = vst.msk [vmem:[#allocation2 + $0x20] sm:$0x1] %vm148_vm1, %v2075_v0  ;;  %158 = vst.msk [vmem:[#allocation2 + $0x2c] sm:$0x1] %vm148_vm1, %v2075_v0 }
  0x1a   : > { %161 = vst.msk [vmem:[#allocation2 + $0x38] sm:$0x1] %vm148_vm1, %v2075_v0  ;;  %164 = vst.msk [vmem:[#allocation2 + $0x44] sm:$0x1] %vm148_vm1, %v2075_v0 }
  0x1b   : > { %167 = vst.msk [vmem:[#allocation2 + $0x50] sm:$0x1] %vm148_vm1, %v2075_v0  ;;  %170 = vst.msk [vmem:[#allocation2 + $0x5c] sm:$0x1] %vm148_vm1, %v2075_v0 }
  0x1c   : > { %173 = vst.msk [vmem:[#allocation2 + $0x68] sm:$0x1] %vm148_vm1, %v2075_v0  ;;  %176 = vst.msk [vmem:[#allocation2 + $0x74] sm:$0x1] %vm148_vm1, %v2075_v0 }
  0x1d   : > { %179 = vst.msk [vmem:[#allocation2 + $0x80] sm:$0x1] %vm148_vm1, %v2075_v0  ;;  %182 = vst.msk [vmem:[#allocation2 + $0x8c] sm:$0x1] %vm148_vm1, %v2075_v0 }
  0x1e   : > { %185 = vst.msk [vmem:[#allocation2 + $0x98] sm:$0x1] %vm148_vm1, %v2075_v0  ;;  %188 = vst.msk [vmem:[#allocation2 + $0xa4] sm:$0x1] %vm148_vm1, %v2075_v0 }
  0x1f   : > { %191 = vst.msk [vmem:[#allocation2 + $0xb0] sm:$0x1] %vm148_vm1, %v2075_v0  ;;  %194 = vst.msk [vmem:[#allocation2 + $0xbc] sm:$0x1] %vm148_vm1, %v2075_v0 }
  0x20   : > { %197 = vst.msk [vmem:[#allocation2 + $0xc8] sm:$0x1] %vm148_vm1, %v2075_v0  ;;  %200 = vst.msk [vmem:[#allocation2 + $0xd4] sm:$0x1] %vm148_vm1, %v2075_v0 }
  0x21 LB: >> { %s1763_s21 = sshll.u32 %s2057_s20, 3  ;;  %s1544_s22 = smul.u32 12, %s2057_s20  ;;  %vm240_vm2 = vsmask.f32 7938  ;;  %vm213_vm3 = vsmask.f32 256  ;;  %s2057_s20 = sphi %s2176_s20, %s206_s20  }
  0x22   : >> { %s209_s23 = scalar_lea.vmem %s2169_s16, %s1763_s21  ;;  %vm214_vm4 = vsmask.f32 4368  ;;  %vm241_vm5 = vmand %vm145_vm0, %vm240_vm2  ;;  %s206_s20 = sadd.s32 1, %s2057_s20  }
  0x23   : >> { %v210_v1 = vld [vmem:[%s209_s23] sm:$0xf]  ;;  %v211_v2 = vld [vmem:[%s209_s23 + $0x4] sm:$0xf]  ;;  %vm215_vm6 = vmor %vm213_vm3, %vm214_vm4  ;;  %s1545_s24 = scalar_lea.vmem [#allocation2], %s1544_s22  ;;  %p203_p4 = scmp.ge.s32.totalorder %s206_s20, 16  }
  0x24   : >> { %v217_v3 = vshrl.u32 %v210_v1, 16  ;;  %v220_v4 = vshll.u32 %v210_v1, 16  ;;  %v225_v5 = vshrl.u32 %v211_v2, 16  ;;  %v228_v6 = vshll.u32 %v211_v2, 16  ;;  %vm247_vm7 = vmand %vm148_vm1, %vm213_vm3  ;;  %s2194_s25 = smov (%p203_p4), 0  }
  0x25   : > { %v2190_v18 = vmov (%p203_p4), 0.0   ;;  %v2192_v19 = vmov (%p203_p4), 0.0  }
  0x26   : >> { %v219_v7 = vrot.slane %v217_v3, 7  ;;  %v227_v8 = vrot.slane %v225_v5, 7  ;;  %205 = sbr.rel (!%p203_p4) target bundleno = 33 (0x21), region = 109 }
  0x27   : >> { %v1639_v9 = vld [vmem:[%s1545_s24 + $0xc] sm:$0xf]  ;;  %v1642_v10 = vld [vmem:[%s1545_s24 + $0x14] sm:$0x1] }
  0x28   : >> { %v222_v11 = vor.u32 %v220_v4, %v219_v7  ;;  %v223_v12 = vrot.slane %v219_v7, 4  ;;  %v230_v13 = vor.u32 %v228_v6, %v227_v8  ;;  %v232_v14 = vrot.slane %v227_v8, 4 }
  0x2a   : >> { %v243_v15 = vsel %vm241_vm5, %v222_v11, %v1639_v9  ;;  %v231_v16 = vsel %vm215_vm6, %v223_v12, %v230_v13  ;;  %v249_v17 = vsel %vm247_vm7, %v232_v14, %v1642_v10 }
  0x2b   : >> { %1640 = vst [vmem:[%s1545_s24 + $0xc] sm:$0xf] %v243_v15  ;;  %1641 = vst.msk [vmem:[%s1545_s24 + $0x10] sm:$0xf] %vm145_vm0, %v231_v16 }
  0x2c   : >> { %1643 = vst [vmem:[%s1545_s24 + $0x14] sm:$0x1] %v249_v17 }
  0x2d LB: >> { %vm293_vm8 = vcmask 1043456   ;;  %v1664_v20 = vld [vmem:[%s2475_s1 + $0x14] sm:$0xf]  ;;  %v2076_v21 = vmov 0.0   ;;  %v1645_v23 = vld [vmem:[%s2475_s1 + $0x4] sm:$0xf]  ;;  %s2069_s25 = sphi %s2194_s25, %s256_s25   ;;  %v2065_v19 = vphi %v2192_v19, %v2479_v19   ;;  %v2061_v18 = vphi %v2190_v18, %v2478_v18  }
  0x2e   : >> { %1831 = vmatprep.subr.bf16.mxu1 %v2076_v21  ;;  %v571_v22 = vsel %vm293_vm8, %v1664_v20, 0  ;;  %1807 = vmatprep.subr.bf16.mxu0 %v2076_v21  ;;  %vm2077_vm9 = vmmov 0   ;;  %v295_v24 = vsel %vm293_vm8, %v1645_v23, 0  ;;  %s1764_s30 = smul.u32 12, %s2069_s25  ;;  %v1663_v27 = vld [vmem:[%s2475_s1 + $0x10] sm:$0xf] }
  0x2f   : >> { %1832 = vmatpush3.bf16.msra.mxu1 %v571_v22  ;;  %1833 = vmatprep.mubr.msk.bf16.mxu1 %vm2077_vm9, %v2076_v21  ;;  %vm289_vm10 = vcmask 64512   ;;  %vm563_vm11 = vcmask 1046528   ;;  %v264_v39 = vld [vmem:[%s2475_s1] sm:$0xf]  ;;  %v633_v41 = vsel %vm293_vm8, %v1663_v27, 0  ;;  %s1662_s8 = sshll.u32 %s2069_s25, 4 }
  0x30   : >> { %1808 = vmatpush3.bf16.msra.mxu0 %v295_v24  ;;  %1809 = vmatprep.mubr.msk.bf16.mxu0 %vm2077_vm9, %v2076_v21  ;;  %s2222_s3 = scalar_lea.vmem [#allocation2], %s1764_s30  ;;  %vm276_vm12 = vsmask.f32 7424  ;;  %v341_v45 = vsel %vm293_vm8, %v264_v39, 0  ;;  %v1673_v56 = vld [vmem:[%s2475_s1 + $0x18] sm:$0xf] }
  0x31   : >> { %1813 = vmatprep.subr.bf16.mxu0 %v2076_v21  ;;  %1837 = vmatprep.subr.bf16.mxu1 %v2076_v21  ;;  %v705_v60 = vsel %vm293_vm8, %v1673_v56, 0  ;;  %v1652_v61 = vld [vmem:[%s2475_s1 + $0x8] sm:$0xf]  ;;  %v1678_v9 = vld [vmem:[%s2475_s1 + $0x1c] sm:$0xf]  ;;  %vm522_vm13 = vcmask 31744  }
  0x32   : >> { %v401_v1 = vsel %vm293_vm8, %v1652_v61, 0  ;;  %v1688_v61 = vld [vmem:[%s2475_s1 + $0x24] sm:$0xf]  ;;  %s256_s25 = sadd.s32 1, %s2069_s25  }
  0x33   : >> { %v547_v25 = vld [vmem:[%s2222_s3] sm:$0xf]  ;;  %v548_v26 = vld [vmem:[%s2222_s3 + $0x4] sm:$0xf]  ;;  %v1670_v50 = vld [vmem:[%s2222_s3 + $0xc] sm:$0xf] }
  0x34   : >> { %v552_v28 = vld [vmem:[%s2222_s3] sm:$0xe]  ;;  %v2004_v29 = vld [vmem:[%s2222_s3 + $0x8] ss:$0 sps:$4 sm:$0x11]   ;;  %v1668_v30 = vcombine.low %v547_v25, %v548_v26  ;;  %v2023_v7 = vld [vmem:[%s2222_s3 + $0x18] sm:$0xff]  }
  0x35   : >> { %v2006_v31 = vld [vmem:[%s2222_s3] sm:$0xff]   ;;  %v1665_v32 = vcombine.low %v552_v28, %v548_v26  ;;  %v565_v33 = vrot.slane %v2004_v29, 1  ;;  %v2007_v34 = vld [vmem:[%s2222_s3 + $0x8] ss:$0 sps:$4 sm:$0x11]   ;;  %v625_v49 = vshll.u32 %v2004_v29, 16 }
  0x36   : >> { %v620_v36 = vshll.u32 %v1668_v30, 16  ;;  %v278_v37 = vshrl.u32 %v2006_v31, 16  ;;  %v280_v38 = vshll.u32 %v2006_v31, 16  ;;  %v285_v40 = vshll.u32 %v2007_v34, 16  ;;  %v2245_v51 = vld [vmem:[%s2222_s3 + $0x10] sm:$0xf] }
  0x37   : >> { %v564_v35 = vrot.slane %v1665_v32, 1  ;;  %v618_v47 = vshrl.u32 %v1668_v30, 16  ;;  %v627_v54 = vrot.slane %v625_v49, 1  ;;  %v1674_v55 = vcombine.low %v1670_v50, %v2245_v51  ;;  %v2257_v57 = vld [vmem:[%s2222_s3 + $0x14] ss:$0 sps:$4 sm:$0x11]  }
  0x38   : >> { %v282_v43 = vrot.slane %v280_v38, 1  ;;  %v287_v44 = vrot.slane %v285_v40, 1  ;;  %v622_v48 = vrot.slane %v620_v36, 1  ;;  %v697_v62 = vshll.u32 %v2257_v57, 16  ;;  %v1719_v2 = vld [vmem:[%s2222_s3 + $0x18] sm:$0xf] }
  0x39   : >> { %v566_v42 = vsel %vm563_vm11, %v564_v35, %v565_v33  ;;  %v692_v59 = vshll.u32 %v1674_v55, 16  ;;  %v690_v63 = vshrl.u32 %v1674_v55, 16  ;;  %v1720_v3 = vld [vmem:[%s2222_s3 + $0x1c] sm:$0xf]  ;;  %v2012_v13 = vld [vmem:[%s2222_s3 + $0xc] sm:$0xff]   ;;  %v1030_v16 = vshrl.u32 %v2023_v7, 16 }
  0x3a   : >> { %1834 = vmatmul.mubr.msk.bf16.vlgmr.msra.gmra.mrb[0].mxu1 %vm289_vm10, %v566_v42  ;;  %v283_v46 = vor.u32 %v282_v43, %v278_v37  ;;  %v623_v53 = vor.u32 %v622_v48, %v618_v47  ;;  %v1723_v4 = vcombine.low %v1719_v2, %v1720_v3  ;;  %v2020_v5 = vld [vmem:[%s2222_s3 + $0x20] ss:$0 sps:$4 sm:$0x11]   ;;  %v699_v6 = vrot.slane %v697_v62, 1  ;;  %v1726_v14 = vld [vmem:[%s2222_s3 + $0x18] sm:$0xe] }
  0x3b   : >> { %1838 = vmatpush3.bf16.msra.mxu1 %v633_v41  ;;  %1839 = vmatprep.mubr.msk.bf16.mxu1 %vm2077_vm9, %v2076_v21  ;;  %v694_v0 = vrot.slane %v692_v59, 1  ;;  %v1265_v12 = vshll.u32 %v2020_v5, 16  ;;  %v1325_v15 = vrot.slane %v2020_v5, 1  ;;  %v1728_v22 = vcombine.low %v1726_v14, %v1720_v3  ;;  %v2024_v23 = vld [vmem:[%s2222_s3 + $0x20] ss:$0 sps:$4 sm:$0x11]  }
  0x3c   : >> { %1843 = vmatprep.subr.bf16.mxu1 %v2076_v21  ;;  %v288_v52 = vsel %vm276_vm12, %v283_v46, %v287_v44  ;;  %v628_v58 = vsel %vm276_vm12, %v623_v53, %v627_v54  ;;  %v1258_v10 = vshrl.u32 %v1723_v4, 16  ;;  %v1260_v11 = vshll.u32 %v1723_v4, 16  ;;  %v1677_v29 = vld [vmem:[%s2222_s3 + $0xc] sm:$0xe]  ;;  %v1709_v49 = vld [vmem:[%s2222_s3 + $0x10] sm:$0xf] }
  0x3d   : >> { %1810 = vmatmul.mubr.msk.bf16.vlgmr.msra.gmra.mrb[0].mxu0 %vm289_vm10, %v288_v52  ;;  %v695_v8 = vor.u32 %v694_v0, %v690_v63  ;;  %v1267_v20 = vrot.slane %v1265_v12, 1  ;;  %v1032_v24 = vshll.u32 %v2023_v7, 16  ;;  %v1324_v27 = vrot.slane %v1728_v22, 1  ;;  %v1658_v32 = vld [vmem:[%s2475_s1 + $0xc] sm:$0xf]  ;;  %p253_p5 = scmp.ge.s32.totalorder %s256_s25, 16  }
  0x3e   : >> { %1814 = vmatpush3.bf16.msra.mxu0 %v341_v45  ;;  %1815 = vmatprep.mubr.msk.bf16.mxu0 %vm2077_vm9, %v2076_v21  ;;  %v1262_v17 = vrot.slane %v1260_v11, 1  ;;  %v763_v28 = vsel %vm293_vm8, %v1678_v9, 0  ;;  %v2010_v35 = vld [vmem:[%s2222_s3 + $0xc] sm:$0xff]   ;;  %v2013_v36 = vld [vmem:[%s2222_s3 + $0x14] ss:$0 sps:$4 sm:$0x11]   ;;  %v1679_v40 = vcombine.low %v1677_v29, %v2245_v51 }
  0x3f   : >> { %1819 = vmatprep.subr.bf16.mxu0 %v2076_v21  ;;  %v700_v25 = vsel %vm276_vm12, %v695_v8, %v699_v6  ;;  %v1034_v30 = vrot.slane %v1032_v24, 1  ;;  %v2294_v34 = vsel %vm563_vm11, %v1324_v27, %v1325_v15  ;;  %v462_v37 = vshll.u32 %v2012_v13, 16  ;;  %v2017_v48 = vld [vmem:[%s2222_s3 + $0xc] sm:$0xff]   ;;  %v1713_v51 = vld [vmem:[%s2475_s1 + $0x34] sm:$0xf]  ;;  %s2441_s10 = smov (%p253_p5), 0  }
  0x40   : >> { %v1263_v26 = vor.u32 %v1262_v17, %v1258_v10  ;;  %v475_v41 = vsel %vm293_vm8, %v1658_v32, 0  ;;  %v460_v43 = vshrl.u32 %v2012_v13, 16  ;;  %v467_v45 = vshll.u32 %v2013_v36, 16  ;;  %v1712_v50 = vld [vmem:[%s2222_s3 + $0xc] sm:$0xe] }
  0x41   : >> { %v1035_v38 = vor.u32 %v1034_v30, %v1030_v16  ;;  %v464_v44 = vrot.slane %v462_v37, 1  ;;  %v756_v46 = vrot.slane %v1679_v40, 1  ;;  %v757_v47 = vrot.slane %v2257_v57, 1  ;;  %v2015_v54 = vld [vmem:[%s2222_s3 + $0x14] ss:$0 sps:$4 sm:$0x11]  }
  0x42   : >> { %v2291_v33 = vsel %vm276_vm12, %v1263_v26, %v1267_v20  ;;  %v469_v53 = vrot.slane %v467_v45, 1  ;;  %v1708_v56 = vld [vmem:[%s2222_s3 + $0xc] sm:$0xf]  ;;  %v2018_v57 = vld [vmem:[%s2222_s3 + $0x14] ss:$0 sps:$4 sm:$0x11]  }
  0x43   : >> { %v465_v52 = vor.u32 %v464_v44, %v460_v43  ;;  %v758_v55 = vsel %vm563_vm11, %v756_v46, %v757_v47  ;;  %v852_v59 = vshll.u32 %v2017_v48, 16  ;;  %v1717_v63 = vcombine.low %v1708_v56, %v1709_v49  ;;  %v1711_v6 = vld [vmem:[%s2475_s1 + $0x30] sm:$0xf]  ;;  %v1686_v12 = vld [vmem:[%s2475_s1 + $0x20] sm:$0xf] }
  0x44   : >> { %v850_v0 = vshrl.u32 %v2017_v48, 16  ;;  %v1133_v2 = vrot.slane %v2015_v54, 1  ;;  %v857_v4 = vshll.u32 %v2018_v57, 16  ;;  %v865_v5 = vsel %vm293_vm8, %v1688_v61, 0  ;;  %v1695_v26 = vld [vmem:[%s2475_s1 + $0x28] sm:$0xf] }
  0x45   : >> { %v470_v62 = vsel %vm276_vm12, %v465_v52, %v469_v53  ;;  %v854_v3 = vrot.slane %v852_v59, 1  ;;  %v1188_v10 = vshll.u32 %v1717_v63, 16  ;;  %v1201_v11 = vsel %vm293_vm8, %v1711_v6, 0  ;;  %v1701_v30 = vld [vmem:[%s2475_s1 + $0x2c] sm:$0xf] }
  0x46   : >> { %1840 = vmatmul.mubr.msk.bf16.vlgmr.msra.gmra.mrb[0].mxu1 %vm289_vm10, %v628_v58  ;;  %v1714_v58 = vcombine.low %v1712_v50, %v1709_v49  ;;  %v859_v9 = vrot.slane %v857_v4, 1  ;;  %v1186_v14 = vshrl.u32 %v1717_v63, 16  ;;  %v1193_v16 = vshll.u32 %v2015_v54, 16 }
  0x47   : >> { %1844 = vmatpush3.bf16.msra.mxu1 %v705_v60  ;;  %1845 = vmatprep.mubr.msk.bf16.mxu1 %vm2077_vm9, %v2076_v21  ;;  %v1139_v60 = vsel %vm293_vm8, %v1713_v51, 0  ;;  %v855_v8 = vor.u32 %v854_v3, %v850_v0  ;;  %v1190_v15 = vrot.slane %v1188_v10, 1  ;;  %v911_v17 = vsel %vm293_vm8, %v1686_v12, 0 }
  0x48   : >> { %1849 = vmatprep.subr.bf16.mxu1 %v2076_v21  ;;  %v1195_v22 = vrot.slane %v1193_v16, 1  ;;  %v971_v27 = vsel %vm293_vm8, %v1695_v26, 0  ;;  %v1045_v32 = vsel %vm293_vm8, %v1701_v30, 0 }
  0x49   : >> { %1816 = vmatmul.mubr.msk.bf16.vlgmr.msra.gmra.mrb[0].mxu0 %vm289_vm10, %v2006_v31  ;;  %v1037_v31 = vshll.u32 %v2024_v23, 16  ;;  %v860_v13 = vsel %vm276_vm12, %v855_v8, %v859_v9  ;;  %v1191_v20 = vor.u32 %v1190_v15, %v1186_v14  ;;  %v1722_v23 = vld [vmem:[%s2475_s1 + $0x38] sm:$0xf] }
  0x4a   : >> { %1820 = vmatpush3.bf16.msra.mxu0 %v401_v1  ;;  %1821 = vmatprep.mubr.msk.bf16.mxu0 %vm2077_vm9, %v2076_v21  ;;  %v1132_v1 = vrot.slane %v1714_v58, 1 }
  0x4b   : >> { %1825 = vmatprep.subr.bf16.mxu0 %v2076_v21  ;;  %v1039_v39 = vrot.slane %v1037_v31, 1  ;;  %v1196_v24 = vsel %vm276_vm12, %v1191_v20, %v1195_v22  ;;  %v2021_v31 = vld [vmem:[%s2222_s3 + $0x18] sm:$0xff]   ;;  %s2392_s3 = scalar_lea.vmem [#allocation3], %s1662_s8 }
  0x4c   : >> { %v1134_v7 = vsel %vm563_vm11, %v1132_v1, %v1133_v2 }
  0x4d   : >> { %v2305_v42 = vsel %vm276_vm12, %v1035_v38, %v1039_v39 }
  0x52   : >> { %1846 = vmatmul.mubr.msk.bf16.vlgmr.msra.gmra.mrb[0].mxu1 %vm289_vm10, %v700_v25  ;;  %v1273_v25 = vsel %vm293_vm8, %v1722_v23, 0 }
  0x53   : >> { %1850 = vmatpush3.bf16.msra.mxu1 %v763_v28  ;;  %1851 = vmatprep.mubr.msk.bf16.mxu1 %vm2077_vm9, %v2076_v21  ;;  %v1727_v28 = vld [vmem:[%s2475_s1 + $0x3c] sm:$0xf] }
  0x54   : >> { %1879 = vmatprep.subr.bf16.mxu1 %v2076_v21  ;;  %v1331_v29 = vsel %vm293_vm8, %v1727_v28, 0 }
  0x55   : >> { %1822 = vmatmul.mubr.msk.bf16.vlgmr.msra.gmra.mrb[0].mxu0 %vm289_vm10, %v2010_v35 }
  0x56   : >> { %1826 = vmatpush3.bf16.msra.mxu0 %v475_v41  ;;  %1827 = vmatprep.mubr.msk.bf16.mxu0 %vm2077_vm9, %v2076_v21 }
  0x57   : >> { %1855 = vmatprep.subr.bf16.mxu0 %v2076_v21 }
  0x5e   : >> { %1852 = vmatmul.mubr.msk.bf16.vlgmr.msra.gmra.mrb[0].mxu1 %vm289_vm10, %v758_v55 }
  0x5f   : >> { %1880 = vmatpush3.bf16.msra.mxu1 %v1139_v60  ;;  %1881 = vmatprep.mubr.msk.bf16.mxu1 %vm2077_vm9, %v2076_v21 }
  0x60   : >> { %1885 = vmatprep.subr.bf16.mxu1 %v2076_v21 }
  0x61   : >> { %1828 = vmatmul.mubr.msk.bf16.vlgmr.msra.gmra.mrb[0].mxu0 %vm289_vm10, %v470_v62 }
  0x62   : >> { %1856 = vmatpush3.bf16.msra.mxu0 %v865_v5  ;;  %1857 = vmatprep.mubr.msk.bf16.mxu0 %vm2077_vm9, %v2076_v21 }
  0x63   : >> { %1861 = vmatprep.subr.bf16.mxu0 %v2076_v21 }
  0x66   : >> { %1882 = vmatmul.mubr.msk.bf16.vlgmr.msra.gmra.mrb[4].mxu1 %vm289_vm10, %v1134_v7 }
  0x67   : >> { %1886 = vmatpush3.bf16.msra.mxu1 %v1201_v11  ;;  %1887 = vmatprep.mubr.msk.bf16.mxu1 %vm2077_vm9, %v2076_v21 }
  0x68   : >> { %1891 = vmatprep.subr.bf16.mxu1 %v2076_v21 }
  0x69   : >> { %1858 = vmatmul.mubr.msk.bf16.vlgmr.msra.gmra.mrb[4].mxu0 %vm289_vm10, %v860_v13 }
  0x6a   : >> { %1862 = vmatpush3.bf16.msra.mxu0 %v911_v17  ;;  %1863 = vmatprep.mubr.msk.bf16.mxu0 %vm2077_vm9, %v2076_v21 }
  0x6b   : >> { %1867 = vmatprep.subr.bf16.mxu0 %v2076_v21 }
  0x72   : >> { %1888 = vmatmul.mubr.msk.bf16.vlgmr.msra.gmra.mrb[4].mxu1 %vm289_vm10, %v1196_v24 }
  0x73   : >> { %1892 = vmatpush3.bf16.msra.mxu1 %v1273_v25  ;;  %1893 = vmatprep.mubr.msk.bf16.mxu1 %vm2077_vm9, %v2076_v21 }
  0x74   : >> { %1897 = vmatprep.subr.bf16.mxu1 %v2076_v21 }
  0x75   : >> { %1864 = vmatmul.mubr.msk.bf16.vlgmr.msra.gmra.mrb[4].mxu0 %vm289_vm10, %v2017_v48 }
  0x76   : >> { %1868 = vmatpush3.bf16.msra.mxu0 %v971_v27  ;;  %1869 = vmatprep.mubr.msk.bf16.mxu0 %vm2077_vm9, %v2076_v21 }
  0x77   : >> { %1873 = vmatprep.subr.bf16.mxu0 %v2076_v21 }
  0x7e   : >> { %1894 = vmatmul.mubr.msk.bf16.vlgmr.msra.gmra.mrb[4].mxu1 %vm289_vm10, %v2291_v33 }
  0x7f   : >> { %1898 = vmatpush3.bf16.msra.mxu1 %v1331_v29  ;;  %1899 = vmatprep.mubr.msk.bf16.mxu1 %vm2077_vm9, %v2076_v21 }
  0x81   : >> { %1870 = vmatmul.mubr.msk.bf16.vlgmr.msra.gmra.mrb[4].mxu0 %vm289_vm10, %v2021_v31 }
  0x82   : >> { %1874 = vmatpush3.bf16.msra.mxu0 %v1045_v32  ;;  %1875 = vmatprep.mubr.msk.bf16.mxu0 %vm2077_vm9, %v2076_v21 }
  0x8a   : >> { %1900 = vmatmul.mubr.msk.bf16.vlgmr.msra.gmra.mrb[4].mxu1 %vm289_vm10, %v2294_v34 }
  0x8d   : >> { %1876 = vmatmul.mubr.msk.bf16.vlgmr.msra.gmra.mrb[4].mxu0 %vm289_vm10, %v2305_v42 }
 0x131   : >> { %v799_v33 = vpop.f32.mrb[0].mxu1 }
 0x132   : >> { %1682 = vst.msk [vmem:[%s2392_s3 + $0x100] sm:$0xff] %vm522_vm13, %v799_v33  ;;  %v822_v35 = vmul.f32 %v799_v33, %v799_v33  ;;  %v1853_v36 = vpop.f32.mrb[1].mxu1  ;;  %v812_v21 = vsel %vm522_vm13, %v799_v33, 0.0 }
 0x133   : >> { %v802_v37 = vpop.f32.mrb[2].mxu1 }
 0x134   : >> { %1683 = vst.msk [vmem:[%s2392_s3 + $0x108] sm:$0xff] %vm522_vm13, %v802_v37  ;;  %v813_v34 = vsel %vm522_vm13, %v802_v37, 0.0  ;;  %v823_v38 = vmul.f32 %v802_v37, %v802_v37  ;;  %v1854_v39 = vpop.f32.mrb[3].mxu1  ;;  %v511_v41 = vpop.f32.mrb[0].mxu0  ;;  %v824_v42 = vsel %vm522_vm13, %v822_v35, 0.0 }
 0x135   : >> { %v814_v40 = vadd.f32 %v813_v34, %v812_v21  ;;  %523 = vst.msk [vmem:[%s2392_s3] sm:$0xff] %vm522_vm13, %v511_v41  ;;  %v535_v44 = vmul.f32 %v511_v41, %v511_v41  ;;  %v1829_v45 = vpop.f32.mrb[1].mxu0  ;;  %v525_v49 = vsel %vm522_vm13, %v511_v41, 0.0 }
 0x136   : >> { %v825_v43 = vsel %vm522_vm13, %v823_v38, 0.0  ;;  %v514_v48 = vpop.f32.mrb[2].mxu0 }
 0x137   : >> { %v815_v46 = vrot.slane %v814_v40, 4  ;;  %v826_v47 = vadd.f32 %v825_v43, %v824_v42  ;;  %524 = vst.msk [vmem:[%s2392_s3 + $0x8] sm:$0xff] %vm522_vm13, %v514_v48  ;;  %v526_v50 = vsel %vm522_vm13, %v514_v48, 0.0  ;;  %v536_v51 = vmul.f32 %v514_v48, %v514_v48  ;;  %v1830_v52 = vpop.f32.mrb[3].mxu0 }
 0x138   : >> { %v527_v55 = vadd.f32 %v526_v50, %v525_v49  ;;  %v537_v56 = vsel %vm522_vm13, %v535_v44, 0.0 }
 0x139   : >> { %v816_v53 = vadd.f32 %v815_v46, %v814_v40  ;;  %v827_v54 = vrot.slane %v826_v47, 4  ;;  %v538_v58 = vsel %vm522_vm13, %v536_v51, 0.0 }
 0x13a   : >> { %v528_v60 = vrot.slane %v527_v55, 4  ;;  %v539_v61 = vadd.f32 %v538_v58, %v537_v56 }
 0x13b   : >> { %v817_v57 = vrot.slane %v816_v53, 2  ;;  %v828_v59 = vadd.f32 %v827_v54, %v826_v47 }
 0x13c   : >> { %v529_v63 = vadd.f32 %v528_v60, %v527_v55  ;;  %v540_v0 = vrot.slane %v539_v61, 4 }
 0x13d   : >> { %v829_v62 = vrot.slane %v828_v59, 2  ;;  %v818_v1 = vadd.f32 %v817_v57, %v816_v53 }
 0x13e   : >> { %v530_v2 = vrot.slane %v529_v63, 2  ;;  %v541_v3 = vadd.f32 %v540_v0, %v539_v61 }
 0x13f   : >> { %v830_v4 = vadd.f32 %v829_v62, %v828_v59  ;;  %v819_v7 = vrot.slane %v818_v1, 1 }
 0x140   : >> { %v531_v5 = vadd.f32 %v530_v2, %v529_v63  ;;  %v542_v6 = vrot.slane %v541_v3, 2 }
 0x141   : >> { %v831_v10 = vrot.slane %v830_v4, 1  ;;  %v820_v13 = vadd.f32 %v819_v7, %v818_v1 }
 0x142   : >> { %v532_v8 = vrot.slane %v531_v5, 1  ;;  %v543_v9 = vadd.f32 %v542_v6, %v541_v3 }
 0x143   : >> { %v832_v16 = vadd.f32 %v831_v10, %v830_v4 }
 0x144   : >> { %v533_v11 = vadd.f32 %v532_v8, %v531_v5  ;;  %v544_v12 = vrot.slane %v543_v9, 1 }
 0x146   : >> { %v534_v14 = vadd.f32 %v2065_v19, %v533_v11  ;;  %v545_v15 = vadd.f32 %v544_v12, %v543_v9 }
 0x148   : >> { %v546_v17 = vadd.f32 %v2061_v18, %v545_v15  ;;  %v821_v20 = vadd.f32 %v820_v13, %v534_v14 }
 0x14a   : >> { %v833_v22 = vadd.f32 %v832_v16, %v546_v17 }
 0x15d   : >> { %v1367_v23 = vpop.f32.mrb[4].mxu1 }
 0x15e   : >> { %1731 = vst.msk [vmem:[%s2392_s3 + $0x300] sm:$0xff] %vm522_vm13, %v1367_v23  ;;  %v1390_v24 = vmul.f32 %v1367_v23, %v1367_v23  ;;  %v1901_v25 = vpop.f32.mrb[5].mxu1  ;;  %v1380_v27 = vsel %vm522_vm13, %v1367_v23, 0.0 }
 0x15f   : >> { %v1370_v26 = vpop.f32.mrb[6].mxu1 }
 0x160   : >> { %1732 = vst.msk [vmem:[%s2392_s3 + $0x308] sm:$0xff] %vm522_vm13, %v1370_v26  ;;  %v1381_v19 = vsel %vm522_vm13, %v1370_v26, 0.0  ;;  %v1391_v28 = vmul.f32 %v1370_v26, %v1370_v26  ;;  %v1902_v29 = vpop.f32.mrb[7].mxu1  ;;  %v1081_v18 = vpop.f32.mrb[4].mxu0  ;;  %v1392_v31 = vsel %vm522_vm13, %v1390_v24, 0.0 }
 0x161   : >> { %v1382_v30 = vadd.f32 %v1381_v19, %v1380_v27  ;;  %1706 = vst.msk [vmem:[%s2392_s3 + $0x200] sm:$0xff] %vm522_vm13, %v1081_v18  ;;  %v1104_v33 = vmul.f32 %v1081_v18, %v1081_v18  ;;  %v1877_v35 = vpop.f32.mrb[5].mxu0  ;;  %v1094_v34 = vsel %vm522_vm13, %v1081_v18, 0.0 }
 0x162   : >> { %v1393_v32 = vsel %vm522_vm13, %v1391_v28, 0.0  ;;  %v1084_v21 = vpop.f32.mrb[6].mxu0 }
 0x163   : >> { %v1383_v36 = vrot.slane %v1382_v30, 4  ;;  %v1394_v37 = vadd.f32 %v1393_v32, %v1392_v31  ;;  %1707 = vst.msk [vmem:[%s2392_s3 + $0x208] sm:$0xff] %vm522_vm13, %v1084_v21  ;;  %v1095_v38 = vsel %vm522_vm13, %v1084_v21, 0.0  ;;  %v1105_v39 = vmul.f32 %v1084_v21, %v1084_v21  ;;  %v1878_v40 = vpop.f32.mrb[7].mxu0 }
 0x164   : >> { %v1096_v43 = vadd.f32 %v1095_v38, %v1094_v34  ;;  %v1106_v44 = vsel %vm522_vm13, %v1104_v33, 0.0 }
 0x165   : >> { %v1384_v41 = vadd.f32 %v1383_v36, %v1382_v30  ;;  %v1395_v42 = vrot.slane %v1394_v37, 4  ;;  %v1107_v45 = vsel %vm522_vm13, %v1105_v39, 0.0 }
 0x166   : >> { %v1097_v48 = vrot.slane %v1096_v43, 4  ;;  %v1108_v49 = vadd.f32 %v1107_v45, %v1106_v44 }
 0x167   : >> { %v1385_v46 = vrot.slane %v1384_v41, 2  ;;  %v1396_v47 = vadd.f32 %v1395_v42, %v1394_v37 }
 0x168   : >> { %v1098_v51 = vadd.f32 %v1097_v48, %v1096_v43  ;;  %v1109_v52 = vrot.slane %v1108_v49, 4 }
 0x169   : >> { %v1397_v50 = vrot.slane %v1396_v47, 2  ;;  %v1386_v53 = vadd.f32 %v1385_v46, %v1384_v41 }
 0x16a   : >> { %v1099_v54 = vrot.slane %v1098_v51, 2  ;;  %v1110_v55 = vadd.f32 %v1109_v52, %v1108_v49 }
 0x16b   : >> { %v1398_v56 = vadd.f32 %v1397_v50, %v1396_v47  ;;  %v1387_v59 = vrot.slane %v1386_v53, 1 }
 0x16c   : >> { %v1100_v58 = vadd.f32 %v1099_v54, %v1098_v51  ;;  %v1111_v57 = vrot.slane %v1110_v55, 2 }
 0x16d   : >> { %v1399_v62 = vrot.slane %v1398_v56, 1  ;;  %v1388_v1 = vadd.f32 %v1387_v59, %v1386_v53 }
 0x16e   : >> { %v1101_v60 = vrot.slane %v1100_v58, 1  ;;  %v1112_v61 = vadd.f32 %v1111_v57, %v1110_v55 }
 0x16f   : >> { %v1400_v4 = vadd.f32 %v1399_v62, %v1398_v56 }
 0x170   : >> { %v1102_v63 = vadd.f32 %v1101_v60, %v1100_v58  ;;  %v1113_v0 = vrot.slane %v1112_v61, 1 }
 0x172   : >> { %v1103_v2 = vadd.f32 %v1102_v63, %v821_v20  ;;  %v1114_v3 = vadd.f32 %v1113_v0, %v1112_v61  ;;  %255 = sbr.rel (!%p253_p5) target bundleno = 45 (0x2d), region = 120 }
 0x174   : >> { %v1115_v5 = vadd.f32 %v1114_v3, %v833_v22  ;;  %v1389_v6 = vadd.f32 %v1388_v1, %v1103_v2  }
 0x176   : >> { %v1401_v7 = vadd.f32 %v1400_v4, %v1115_v5   ;;  %v2479_v19 = vmov %v1389_v6  ;;  %v2435_v8 = vmul.f32 (%p253_p5), 0.0009765625, %v1389_v6 }
 0x178   : >> { %v2478_v18 = vmov %v1401_v7  ;;  %v1404_v9 = vmul.f32 (%p253_p5), 0.0009765625, %v1401_v7  ;;  %v1405_v10 = vmul.f32 (%p253_p5), %v2435_v8, %v2435_v8 }
 0x17a   : > { %v1406_v11 = vsub.f32 %v1404_v9, %v1405_v10 }
 0x17c   : > { %v1407_v12 = vadd.f32 1e-05, %v1406_v11 }
 0x17e   : > { %2025 = vrsqrt.f32 %v1407_v12 }
 0x188   : > { %v2439_v13 = vpop.eup %2025 }
 0x189 LB: >> { %s1733_s25 = sshll.u32 %s2073_s10, 4  ;;  %vm1436_vm14 = vcmask 27648   ;;  %s2078_s13 = smov 4   ;;  %vm1461_vm15 = vcmask 60448   ;;  %s2073_s10 = sphi %s2441_s10, %s1414_s10  }
 0x18a   : >> { %s1416_s11 = scalar_lea.vmem [#allocation3], %s1733_s25  ;;  %s1435_s12 = scalar_lea.vmem %s2174_s19, %s1733_s25 }
 0x18b   : >> { %v1753_v14 = vld [vmem:[%s1416_s11 + $0x300] sm:$0xff]  ;;  %v1754_v16 = vld [vmem:[%s1416_s11 + $0x308] sm:$0xff]  ;;  %s1414_s10 = sadd.s32 1, %s2073_s10  }
 0x18c   : >> { %v1739_v15 = vld [vmem:[%s1416_s11 + $0x100] sm:$0xff]  ;;  %v1491_v17 = vsub.f32 %v1753_v14, %v2435_v8  ;;  %v1492_v22 = vsub.f32 %v1754_v16, %v2435_v8  ;;  %v1740_v23 = vld [vmem:[%s1416_s11 + $0x108] sm:$0xff]  ;;  %p1411_p6 = scmp.ge.s32.totalorder %s1414_s10, 16  }
 0x18d   : >> { %v1443_v20 = vsub.f32 %v1739_v15, %v2435_v8  ;;  %v1744_v24 = vld [vmem:[%s1416_s11 + $0x200] sm:$0xff]  ;;  %v1444_v26 = vsub.f32 %v1740_v23, %v2435_v8  ;;  %v1745_v28 = vld [vmem:[%s1416_s11 + $0x208] sm:$0xff] }
 0x18e   : >> { %v1417_v25 = vld [vmem:[%s1416_s11] sm:$0xff]  ;;  %v1468_v27 = vsub.f32 %v1744_v24, %v2435_v8  ;;  %v1418_v29 = vld [vmem:[%s1416_s11 + $0x8] sm:$0xff]  ;;  %v1493_v30 = vmul.f32 %v2439_v13, %v1491_v17  ;;  %v1494_v31 = vmul.f32 %v2439_v13, %v1492_v22  ;;  %v1469_v32 = vsub.f32 %v1745_v28, %v2435_v8 }
 0x18f   : >> { %v1419_v19 = vsub.f32 %v1417_v25, %v2435_v8  ;;  %v1445_v18 = vmul.f32 %v2439_v13, %v1443_v20  ;;  %v1446_v33 = vmul.f32 %v2439_v13, %v1444_v26  ;;  %v1420_v37 = vsub.f32 %v1418_v29, %v2435_v8 }
 0x190   : >> { %v1470_v35 = vmul.f32 %v2439_v13, %v1468_v27  ;;  %v1495_v21 = vmax.f32 %v1493_v30, 0.0  ;;  %v1496_v38 = vmax.f32 %v1494_v31, 0.0  ;;  %v1471_v39 = vmul.f32 %v2439_v13, %v1469_v32 }
 0x191   : >> { %v1421_v36 = vmul.f32 %v2439_v13, %v1419_v19  ;;  %v1447_v34 = vmax.f32 %v1445_v18, 0.0  ;;  %v1448_v40 = vmax.f32 %v1446_v33, 0.0  ;;  %v1422_v43 = vmul.f32 %v2439_v13, %v1420_v37 }
 0x192   : >> { %v1472_v41 = vmax.f32 %v1470_v35, 0.0  ;;  %v1773_v44 = vpack.c.bf16 %v1495_v21, %v1495_v21  ;;  %v1473_v46 = vmax.f32 %v1471_v39, 0.0  ;;  %v1774_v50 = vpack.c.bf16 %v1496_v38, %v1496_v38 }
 0x193   : >> { %v1423_v42 = vmax.f32 %v1421_v36, 0.0  ;;  %v1768_v45 = vpack.c.bf16 %v1447_v34, %v1447_v34  ;;  %v1424_v49 = vmax.f32 %v1422_v43, 0.0  ;;  %v1769_v51 = vpack.c.bf16 %v1448_v40, %v1448_v40 }
 0x194   : >> { %v1770_v47 = vpack.c.bf16 %v1472_v41, %v1472_v41  ;;  %1503 = vrot.lane.b32.xlu1 %v1773_v44, %s2078_s13  ;;  %v1771_v52 = vpack.c.bf16 %v1473_v46, %v1473_v46 }
 0x195   : >> { %v1765_v48 = vpack.c.bf16 %v1423_v42, %v1423_v42  ;;  %1455 = vrot.lane.b32.xlu0 %v1768_v45, %s2078_s13  ;;  %v1766_v53 = vpack.c.bf16 %v1424_v49, %v1424_v49 }
 0x196   : >> { %1750 = vst.msk [vmem:[%s1435_s12 + $0x8] sm:$0xf] %vm1436_vm14, %v1770_v47  ;;  %1751 = vst.msk [vmem:[%s1435_s12 + $0xc] sm:$0xf] %vm1436_vm14, %v1771_v52 }
 0x197   : >> { %1437 = vst.msk [vmem:[%s1435_s12] sm:$0xf] %vm1436_vm14, %v1765_v48  ;;  %1438 = vst.msk [vmem:[%s1435_s12 + $0x4] sm:$0xf] %vm1436_vm14, %v1766_v53 }
 0x198   : >> { %1505 = vrot.lane.b32.xlu1 %v1774_v50, %s2078_s13 }
 0x199   : >> { %1457 = vrot.lane.b32.xlu0 %v1769_v51, %s2078_s13 }
 0x206   : >> { %v1504_v54 = vpop.permute.xlu1 %1503  ;;  %1413 = sbr.rel (!%p1411_p6) target bundleno = 393 (0x189), region = 131 }
 0x207   : >> { %v1456_v55 = vpop.permute.xlu0 %1455  ;;  %1757 = vst.msk [vmem:[%s1435_s12 + $0x8] sm:$0xf] %vm1461_vm15, %v1504_v54 }
 0x208   : >> { %1462 = vst.msk [vmem:[%s1435_s12] sm:$0xf] %vm1461_vm15, %v1456_v55 }
 0x20a   : >> { %v1506_v56 = vpop.permute.xlu1 %1505 }
 0x20b   : >> { %v1458_v58 = vpop.permute.xlu0 %1457  ;;  %1758 = vst.msk [vmem:[%s1435_s12 + $0xc] sm:$0xf] %vm1461_vm15, %v1506_v56 }
 0x20c   : >> { %1463 = vst.msk [vmem:[%s1435_s12 + $0x4] sm:$0xf] %vm1461_vm15, %v1458_v58 }
 0x20d PF: > { %s12_s9 = sadd.s32 1, %s2053_s9  }
 0x20e   : > { %p9_p7 = scmp.ge.s32.totalorder %s12_s9, 4  }
 0x210   :  { %11 = sbr.rel (!%p9_p7) target bundleno = 1 (0x1), region = 142 }

// kernel: dc_decoder_forward.10
= control target key start
LH: loop header
LB: loop body
LE: loop exit
PB: predicated region body
PF: predicated region fallthrough
CT: control target
= control target key end

     0   :  { %s2808_s9 = smov 0   ;;  %s3670_s0 = inlined_call_operand.vmem [shape: bf16[2,32,32,4], index: 0, kind: input, shape index: {}]   ;;  %s3671_s1 = inlined_call_operand.vmem [shape: bf16[4,4,4,2], index: 1, kind: input, shape index: {}]   ;;  %s3672_s2 = inlined_call_operand.vmem [shape: bf16[2,32,2,32,4], index: 2, kind: output, shape index: {}]  }
   0x1 LB: > { %s2228_s10 = sadd.s32 4294967295, %s2769_s9   ;;  %p2232_p0 = scmp.ge.s32.totalorder %s2769_s9, 1  ;;  %s2769_s9 = sphi %s2808_s9, %s12_s9  }
   0x2   : > { %p112_p1 = scmp.lt.s32.totalorder %s2769_s9, 3 }
   0x4   : > { %p113_p2 = pnand %p2232_p0, %p112_p1 }
   0x5   : > { %p2818_p3 = scmp.lt.s32.totalorder (!%p113_p2), %s2228_s10, 1  ;;  %vm145_vm0 = vcmask (!%p113_p2), 27648   ;;  %vm150_vm1 = vcmask (!%p113_p2), 24576   ;;  %v2791_v0 = vmov (!%p113_p2), 0   ;;  %s3176_s20 = smov (!%p113_p2), 0  }
   0x6   : > { %116 = sbr.rel (%p113_p2) target bundleno = 597 (0x255), region = 28  ;;  %146 = vst.msk [vmem:[#allocation2] sm:$0xf] (!%p113_p2), %vm145_vm0, %v2791_v0  ;;  %147 = vst.msk [vmem:[#allocation2 + $0x4] sm:$0xf] (!%p113_p2), %vm145_vm0, %v2791_v0 }
   0x7   : > { %148 = vst.msk [vmem:[#allocation2 + $0x8] sm:$0xf] (!%p113_p2), %vm145_vm0, %v2791_v0  ;;  %149 = vst.msk [vmem:[#allocation2 + $0xc] sm:$0xf] (!%p113_p2), %vm145_vm0, %v2791_v0 }
   0x8   : > { %152 = vst.msk [vmem:[#allocation2 + $0x14] sm:$0xf] (!%p113_p2), %vm145_vm0, %v2791_v0  ;;  %153 = vst.msk [vmem:[#allocation2 + $0x18] sm:$0xf] (!%p113_p2), %vm145_vm0, %v2791_v0 }
   0x9   : > { %154 = vst.msk [vmem:[#allocation2 + $0x1c] sm:$0xf] (!%p113_p2), %vm145_vm0, %v2791_v0  ;;  %155 = vst.msk [vmem:[#allocation2 + $0x20] sm:$0xf] (!%p113_p2), %vm145_vm0, %v2791_v0 }
   0xa   : > { %157 = vst.msk [vmem:[#allocation2 + $0x28] sm:$0xf] (!%p113_p2), %vm145_vm0, %v2791_v0  ;;  %158 = vst.msk [vmem:[#allocation2 + $0x2c] sm:$0xf] (!%p113_p2), %vm145_vm0, %v2791_v0 }
   0xb   : > { %159 = vst.msk [vmem:[#allocation2 + $0x30] sm:$0xf] (!%p113_p2), %vm145_vm0, %v2791_v0  ;;  %160 = vst.msk [vmem:[#allocation2 + $0x34] sm:$0xf] (!%p113_p2), %vm145_vm0, %v2791_v0 }
   0xc   : > { %162 = vst.msk [vmem:[#allocation2 + $0x3c] sm:$0xf] (!%p113_p2), %vm145_vm0, %v2791_v0  ;;  %163 = vst.msk [vmem:[#allocation2 + $0x40] sm:$0xf] (!%p113_p2), %vm145_vm0, %v2791_v0 }
   0xd   : > { %164 = vst.msk [vmem:[#allocation2 + $0x44] sm:$0xf] %vm145_vm0, %v2791_v0  ;;  %165 = vst.msk [vmem:[#allocation2 + $0x48] sm:$0xf] %vm145_vm0, %v2791_v0  ;;  %s3681_s10 = smov (!%p2818_p3, %s2228_s10), 1 }
   0xe   : > { %167 = vst.msk [vmem:[#allocation2 + $0x50] sm:$0xf] %vm145_vm0, %v2791_v0  ;;  %168 = vst.msk [vmem:[#allocation2 + $0x54] sm:$0xf] %vm145_vm0, %v2791_v0  ;;  %s2429_s12 = sshll.u32 %s3681_s10, 9  ;;  %s2430_s13 = sshll.u32 %s3681_s10, 10 }
   0xf   : > { %169 = vst.msk [vmem:[#allocation2 + $0x58] sm:$0xf] %vm145_vm0, %v2791_v0  ;;  %170 = vst.msk [vmem:[#allocation2 + $0x5c] sm:$0xf] %vm145_vm0, %v2791_v0  ;;  %s3169_s16 = scalar_lea.vmem %s3670_s0, %s2429_s12  ;;  %s3174_s19 = scalar_lea.vmem %s3672_s2, %s2430_s13 }
  0x10   : > { %172 = vst.msk [vmem:[#allocation2 + $0x64] sm:$0xf] %vm145_vm0, %v2791_v0  ;;  %173 = vst.msk [vmem:[#allocation2 + $0x68] sm:$0xf] %vm145_vm0, %v2791_v0 }
  0x11   : > { %174 = vst.msk [vmem:[#allocation2 + $0x6c] sm:$0xf] %vm145_vm0, %v2791_v0  ;;  %175 = vst.msk [vmem:[#allocation2 + $0x70] sm:$0xf] %vm145_vm0, %v2791_v0 }
  0x12   : > { %177 = vst.msk [vmem:[#allocation2 + $0x78] sm:$0xf] %vm145_vm0, %v2791_v0  ;;  %178 = vst.msk [vmem:[#allocation2 + $0x7c] sm:$0xf] %vm145_vm0, %v2791_v0 }
  0x13   : > { %179 = vst.msk [vmem:[#allocation2 + $0x80] sm:$0xf] %vm145_vm0, %v2791_v0  ;;  %180 = vst.msk [vmem:[#allocation2 + $0x84] sm:$0xf] %vm145_vm0, %v2791_v0 }
  0x14   : > { %182 = vst.msk [vmem:[#allocation2 + $0x8c] sm:$0xf] %vm145_vm0, %v2791_v0  ;;  %183 = vst.msk [vmem:[#allocation2 + $0x90] sm:$0xf] %vm145_vm0, %v2791_v0 }
  0x15   : > { %184 = vst.msk [vmem:[#allocation2 + $0x94] sm:$0xf] %vm145_vm0, %v2791_v0  ;;  %185 = vst.msk [vmem:[#allocation2 + $0x98] sm:$0xf] %vm145_vm0, %v2791_v0 }
  0x16   : > { %187 = vst.msk [vmem:[#allocation2 + $0xa0] sm:$0xf] %vm145_vm0, %v2791_v0  ;;  %188 = vst.msk [vmem:[#allocation2 + $0xa4] sm:$0xf] %vm145_vm0, %v2791_v0 }
  0x17   : > { %189 = vst.msk [vmem:[#allocation2 + $0xa8] sm:$0xf] %vm145_vm0, %v2791_v0  ;;  %190 = vst.msk [vmem:[#allocation2 + $0xac] sm:$0xf] %vm145_vm0, %v2791_v0 }
  0x18   : > { %192 = vst.msk [vmem:[#allocation2 + $0xb4] sm:$0xf] %vm145_vm0, %v2791_v0  ;;  %193 = vst.msk [vmem:[#allocation2 + $0xb8] sm:$0xf] %vm145_vm0, %v2791_v0 }
  0x19   : > { %194 = vst.msk [vmem:[#allocation2 + $0xbc] sm:$0xf] %vm145_vm0, %v2791_v0  ;;  %195 = vst.msk [vmem:[#allocation2 + $0xc0] sm:$0xf] %vm145_vm0, %v2791_v0 }
  0x1a   : > { %197 = vst.msk [vmem:[#allocation2 + $0xc8] sm:$0xf] %vm145_vm0, %v2791_v0  ;;  %198 = vst.msk [vmem:[#allocation2 + $0xcc] sm:$0xf] %vm145_vm0, %v2791_v0 }
  0x1b   : > { %199 = vst.msk [vmem:[#allocation2 + $0xd0] sm:$0xf] %vm145_vm0, %v2791_v0  ;;  %200 = vst.msk [vmem:[#allocation2 + $0xd4] sm:$0xf] %vm145_vm0, %v2791_v0 }
  0x1c   : > { %202 = vst.msk [vmem:[#allocation2 + $0xdc] sm:$0xf] %vm145_vm0, %v2791_v0  ;;  %203 = vst.msk [vmem:[#allocation2 + $0xe0] sm:$0xf] %vm145_vm0, %v2791_v0 }
  0x1d   : > { %204 = vst.msk [vmem:[#allocation2 + $0xe4] sm:$0xf] %vm145_vm0, %v2791_v0  ;;  %205 = vst.msk [vmem:[#allocation2 + $0xe8] sm:$0xf] %vm145_vm0, %v2791_v0 }
  0x1e   : > { %207 = vst.msk [vmem:[#allocation2 + $0xf0] sm:$0xf] %vm145_vm0, %v2791_v0  ;;  %208 = vst.msk [vmem:[#allocation2 + $0xf4] sm:$0xf] %vm145_vm0, %v2791_v0 }
  0x1f   : > { %209 = vst.msk [vmem:[#allocation2 + $0xf8] sm:$0xf] %vm145_vm0, %v2791_v0  ;;  %210 = vst.msk [vmem:[#allocation2 + $0xfc] sm:$0xf] %vm145_vm0, %v2791_v0 }
  0x20   : > { %212 = vst.msk [vmem:[#allocation2 + $0x104] sm:$0xf] %vm145_vm0, %v2791_v0  ;;  %213 = vst.msk [vmem:[#allocation2 + $0x108] sm:$0xf] %vm145_vm0, %v2791_v0 }
  0x21   : > { %214 = vst.msk [vmem:[#allocation2 + $0x10c] sm:$0xf] %vm145_vm0, %v2791_v0  ;;  %215 = vst.msk [vmem:[#allocation2 + $0x110] sm:$0xf] %vm145_vm0, %v2791_v0 }
  0x22   : > { %217 = vst.msk [vmem:[#allocation2 + $0x118] sm:$0xf] %vm145_vm0, %v2791_v0  ;;  %218 = vst.msk [vmem:[#allocation2 + $0x11c] sm:$0xf] %vm145_vm0, %v2791_v0 }
  0x23   : > { %219 = vst.msk [vmem:[#allocation2 + $0x120] sm:$0xf] %vm145_vm0, %v2791_v0  ;;  %220 = vst.msk [vmem:[#allocation2 + $0x124] sm:$0xf] %vm145_vm0, %v2791_v0 }
  0x24   : > { %222 = vst.msk [vmem:[#allocation2 + $0x12c] sm:$0xf] %vm145_vm0, %v2791_v0  ;;  %223 = vst.msk [vmem:[#allocation2 + $0x130] sm:$0xf] %vm145_vm0, %v2791_v0 }
  0x25   : > { %224 = vst.msk [vmem:[#allocation2 + $0x134] sm:$0xf] %vm145_vm0, %v2791_v0  ;;  %225 = vst.msk [vmem:[#allocation2 + $0x138] sm:$0xf] %vm145_vm0, %v2791_v0 }
  0x26   : > { %227 = vst.msk [vmem:[#allocation2 + $0x140] sm:$0xf] %vm145_vm0, %v2791_v0  ;;  %228 = vst.msk [vmem:[#allocation2 + $0x144] sm:$0xf] %vm145_vm0, %v2791_v0 }
  0x27   : > { %229 = vst.msk [vmem:[#allocation2 + $0x148] sm:$0xf] %vm145_vm0, %v2791_v0  ;;  %230 = vst.msk [vmem:[#allocation2 + $0x14c] sm:$0xf] %vm145_vm0, %v2791_v0 }
  0x28   : > { %232 = vst.msk [vmem:[#allocation2 + $0x154] sm:$0xf] %vm145_vm0, %v2791_v0  ;;  %233 = vst.msk [vmem:[#allocation2 + $0x158] sm:$0xf] %vm145_vm0, %v2791_v0 }
  0x29   : > { %234 = vst.msk [vmem:[#allocation2 + $0x15c] sm:$0xf] %vm145_vm0, %v2791_v0  ;;  %235 = vst.msk [vmem:[#allocation2 + $0x160] sm:$0xf] %vm145_vm0, %v2791_v0 }
  0x2a   : > { %237 = vst.msk [vmem:[#allocation2 + $0x168] sm:$0xf] %vm145_vm0, %v2791_v0  ;;  %238 = vst.msk [vmem:[#allocation2 + $0x16c] sm:$0xf] %vm145_vm0, %v2791_v0 }
  0x2b   : > { %239 = vst.msk [vmem:[#allocation2 + $0x170] sm:$0xf] %vm145_vm0, %v2791_v0  ;;  %240 = vst.msk [vmem:[#allocation2 + $0x174] sm:$0xf] %vm145_vm0, %v2791_v0 }
  0x2c   : > { %242 = vst.msk [vmem:[#allocation2 + $0x17c] sm:$0xf] %vm145_vm0, %v2791_v0  ;;  %243 = vst.msk [vmem:[#allocation2 + $0x180] sm:$0xf] %vm145_vm0, %v2791_v0 }
  0x2d   : > { %244 = vst.msk [vmem:[#allocation2 + $0x184] sm:$0xf] %vm145_vm0, %v2791_v0  ;;  %245 = vst.msk [vmem:[#allocation2 + $0x188] sm:$0xf] %vm145_vm0, %v2791_v0 }
  0x2e   : > { %247 = vst.msk [vmem:[#allocation2 + $0x190] sm:$0xf] %vm145_vm0, %v2791_v0  ;;  %248 = vst.msk [vmem:[#allocation2 + $0x194] sm:$0xf] %vm145_vm0, %v2791_v0 }
  0x2f   : > { %249 = vst.msk [vmem:[#allocation2 + $0x198] sm:$0xf] %vm145_vm0, %v2791_v0  ;;  %250 = vst.msk [vmem:[#allocation2 + $0x19c] sm:$0xf] %vm145_vm0, %v2791_v0 }
  0x30   : > { %252 = vst.msk [vmem:[#allocation2 + $0x1a4] sm:$0xf] %vm145_vm0, %v2791_v0  ;;  %253 = vst.msk [vmem:[#allocation2 + $0x1a8] sm:$0xf] %vm145_vm0, %v2791_v0 }
  0x31   : > { %254 = vst.msk [vmem:[#allocation2 + $0x1ac] sm:$0xf] %vm145_vm0, %v2791_v0  ;;  %255 = vst.msk [vmem:[#allocation2 + $0x1b0] sm:$0xf] %vm145_vm0, %v2791_v0 }
  0x32   : > { %257 = vst.msk [vmem:[#allocation2 + $0x1b8] sm:$0xf] %vm145_vm0, %v2791_v0  ;;  %258 = vst.msk [vmem:[#allocation2 + $0x1bc] sm:$0xf] %vm145_vm0, %v2791_v0 }
  0x33   : > { %259 = vst.msk [vmem:[#allocation2 + $0x1c0] sm:$0xf] %vm145_vm0, %v2791_v0  ;;  %260 = vst.msk [vmem:[#allocation2 + $0x1c4] sm:$0xf] %vm145_vm0, %v2791_v0 }
  0x34   : > { %262 = vst.msk [vmem:[#allocation2 + $0x1cc] sm:$0xf] %vm145_vm0, %v2791_v0  ;;  %263 = vst.msk [vmem:[#allocation2 + $0x1d0] sm:$0xf] %vm145_vm0, %v2791_v0 }
  0x35   : > { %264 = vst.msk [vmem:[#allocation2 + $0x1d4] sm:$0xf] %vm145_vm0, %v2791_v0  ;;  %265 = vst.msk [vmem:[#allocation2 + $0x1d8] sm:$0xf] %vm145_vm0, %v2791_v0 }
  0x36   : > { %267 = vst.msk [vmem:[#allocation2 + $0x1e0] sm:$0xf] %vm145_vm0, %v2791_v0  ;;  %268 = vst.msk [vmem:[#allocation2 + $0x1e4] sm:$0xf] %vm145_vm0, %v2791_v0 }
  0x37   : > { %269 = vst.msk [vmem:[#allocation2 + $0x1e8] sm:$0xf] %vm145_vm0, %v2791_v0  ;;  %270 = vst.msk [vmem:[#allocation2 + $0x1ec] sm:$0xf] %vm145_vm0, %v2791_v0 }
  0x38   : > { %272 = vst.msk [vmem:[#allocation2 + $0x1f4] sm:$0xf] %vm145_vm0, %v2791_v0  ;;  %273 = vst.msk [vmem:[#allocation2 + $0x1f8] sm:$0xf] %vm145_vm0, %v2791_v0 }
  0x39   : > { %274 = vst.msk [vmem:[#allocation2 + $0x1fc] sm:$0xf] %vm145_vm0, %v2791_v0  ;;  %275 = vst.msk [vmem:[#allocation2 + $0x200] sm:$0xf] %vm145_vm0, %v2791_v0 }
  0x3a   : > { %277 = vst.msk [vmem:[#allocation2 + $0x208] sm:$0xf] %vm145_vm0, %v2791_v0  ;;  %278 = vst.msk [vmem:[#allocation2 + $0x20c] sm:$0xf] %vm145_vm0, %v2791_v0 }
  0x3b   : > { %279 = vst.msk [vmem:[#allocation2 + $0x210] sm:$0xf] %vm145_vm0, %v2791_v0  ;;  %280 = vst.msk [vmem:[#allocation2 + $0x214] sm:$0xf] %vm145_vm0, %v2791_v0 }
  0x3c   : > { %282 = vst.msk [vmem:[#allocation2 + $0x21c] sm:$0xf] %vm145_vm0, %v2791_v0  ;;  %283 = vst.msk [vmem:[#allocation2 + $0x220] sm:$0xf] %vm145_vm0, %v2791_v0 }
  0x3d   : > { %284 = vst.msk [vmem:[#allocation2 + $0x224] sm:$0xf] %vm145_vm0, %v2791_v0  ;;  %285 = vst.msk [vmem:[#allocation2 + $0x228] sm:$0xf] %vm145_vm0, %v2791_v0 }
  0x3e   : > { %287 = vst.msk [vmem:[#allocation2 + $0x230] sm:$0xf] %vm145_vm0, %v2791_v0  ;;  %288 = vst.msk [vmem:[#allocation2 + $0x234] sm:$0xf] %vm145_vm0, %v2791_v0 }
  0x3f   : > { %289 = vst.msk [vmem:[#allocation2 + $0x238] sm:$0xf] %vm145_vm0, %v2791_v0  ;;  %290 = vst.msk [vmem:[#allocation2 + $0x23c] sm:$0xf] %vm145_vm0, %v2791_v0 }
  0x40   : > { %292 = vst.msk [vmem:[#allocation2 + $0x244] sm:$0xf] %vm145_vm0, %v2791_v0  ;;  %293 = vst.msk [vmem:[#allocation2 + $0x248] sm:$0xf] %vm145_vm0, %v2791_v0 }
  0x41   : > { %294 = vst.msk [vmem:[#allocation2 + $0x24c] sm:$0xf] %vm145_vm0, %v2791_v0  ;;  %295 = vst.msk [vmem:[#allocation2 + $0x250] sm:$0xf] %vm145_vm0, %v2791_v0 }
  0x42   : > { %297 = vst.msk [vmem:[#allocation2 + $0x258] sm:$0xf] %vm145_vm0, %v2791_v0  ;;  %298 = vst.msk [vmem:[#allocation2 + $0x25c] sm:$0xf] %vm145_vm0, %v2791_v0 }
  0x43   : > { %299 = vst.msk [vmem:[#allocation2 + $0x260] sm:$0xf] %vm145_vm0, %v2791_v0  ;;  %300 = vst.msk [vmem:[#allocation2 + $0x264] sm:$0xf] %vm145_vm0, %v2791_v0 }
  0x44   : > { %302 = vst.msk [vmem:[#allocation2 + $0x26c] sm:$0xf] %vm145_vm0, %v2791_v0  ;;  %303 = vst.msk [vmem:[#allocation2 + $0x270] sm:$0xf] %vm145_vm0, %v2791_v0 }
  0x45   : > { %304 = vst.msk [vmem:[#allocation2 + $0x274] sm:$0xf] %vm145_vm0, %v2791_v0  ;;  %305 = vst.msk [vmem:[#allocation2 + $0x278] sm:$0xf] %vm145_vm0, %v2791_v0 }
  0x46   : > { %307 = vst.msk [vmem:[#allocation2 + $0x280] sm:$0xf] %vm145_vm0, %v2791_v0  ;;  %308 = vst.msk [vmem:[#allocation2 + $0x284] sm:$0xf] %vm145_vm0, %v2791_v0 }
  0x47   : > { %309 = vst.msk [vmem:[#allocation2 + $0x288] sm:$0xf] %vm145_vm0, %v2791_v0  ;;  %310 = vst.msk [vmem:[#allocation2 + $0x28c] sm:$0xf] %vm145_vm0, %v2791_v0 }
  0x48   : > { %312 = vst.msk [vmem:[#allocation2 + $0x294] sm:$0xf] %vm145_vm0, %v2791_v0  ;;  %313 = vst.msk [vmem:[#allocation2 + $0x298] sm:$0xf] %vm145_vm0, %v2791_v0 }
  0x49   : > { %314 = vst.msk [vmem:[#allocation2 + $0x29c] sm:$0xf] %vm145_vm0, %v2791_v0  ;;  %315 = vst.msk [vmem:[#allocation2 + $0x2a0] sm:$0xf] %vm145_vm0, %v2791_v0 }
  0x4a   : > { %151 = vst.msk [vmem:[#allocation2 + $0x10] sm:$0x1] %vm150_vm1, %v2791_v0  ;;  %156 = vst.msk [vmem:[#allocation2 + $0x24] sm:$0x1] %vm150_vm1, %v2791_v0 }
  0x4b   : > { %161 = vst.msk [vmem:[#allocation2 + $0x38] sm:$0x1] %vm150_vm1, %v2791_v0  ;;  %166 = vst.msk [vmem:[#allocation2 + $0x4c] sm:$0x1] %vm150_vm1, %v2791_v0 }
  0x4c   : > { %171 = vst.msk [vmem:[#allocation2 + $0x60] sm:$0x1] %vm150_vm1, %v2791_v0  ;;  %176 = vst.msk [vmem:[#allocation2 + $0x74] sm:$0x1] %vm150_vm1, %v2791_v0 }
  0x4d   : > { %181 = vst.msk [vmem:[#allocation2 + $0x88] sm:$0x1] %vm150_vm1, %v2791_v0  ;;  %186 = vst.msk [vmem:[#allocation2 + $0x9c] sm:$0x1] %vm150_vm1, %v2791_v0 }
  0x4e   : > { %191 = vst.msk [vmem:[#allocation2 + $0xb0] sm:$0x1] %vm150_vm1, %v2791_v0  ;;  %196 = vst.msk [vmem:[#allocation2 + $0xc4] sm:$0x1] %vm150_vm1, %v2791_v0 }
  0x4f   : > { %201 = vst.msk [vmem:[#allocation2 + $0xd8] sm:$0x1] %vm150_vm1, %v2791_v0  ;;  %206 = vst.msk [vmem:[#allocation2 + $0xec] sm:$0x1] %vm150_vm1, %v2791_v0 }
  0x50   : > { %211 = vst.msk [vmem:[#allocation2 + $0x100] sm:$0x1] %vm150_vm1, %v2791_v0  ;;  %216 = vst.msk [vmem:[#allocation2 + $0x114] sm:$0x1] %vm150_vm1, %v2791_v0 }
  0x51   : > { %221 = vst.msk [vmem:[#allocation2 + $0x128] sm:$0x1] %vm150_vm1, %v2791_v0  ;;  %226 = vst.msk [vmem:[#allocation2 + $0x13c] sm:$0x1] %vm150_vm1, %v2791_v0 }
  0x52   : > { %231 = vst.msk [vmem:[#allocation2 + $0x150] sm:$0x1] %vm150_vm1, %v2791_v0  ;;  %236 = vst.msk [vmem:[#allocation2 + $0x164] sm:$0x1] %vm150_vm1, %v2791_v0 }
  0x53   : > { %241 = vst.msk [vmem:[#allocation2 + $0x178] sm:$0x1] %vm150_vm1, %v2791_v0  ;;  %246 = vst.msk [vmem:[#allocation2 + $0x18c] sm:$0x1] %vm150_vm1, %v2791_v0 }
  0x54   : > { %251 = vst.msk [vmem:[#allocation2 + $0x1a0] sm:$0x1] %vm150_vm1, %v2791_v0  ;;  %256 = vst.msk [vmem:[#allocation2 + $0x1b4] sm:$0x1] %vm150_vm1, %v2791_v0 }
  0x55   : > { %261 = vst.msk [vmem:[#allocation2 + $0x1c8] sm:$0x1] %vm150_vm1, %v2791_v0  ;;  %266 = vst.msk [vmem:[#allocation2 + $0x1dc] sm:$0x1] %vm150_vm1, %v2791_v0 }
  0x56   : > { %271 = vst.msk [vmem:[#allocation2 + $0x1f0] sm:$0x1] %vm150_vm1, %v2791_v0  ;;  %276 = vst.msk [vmem:[#allocation2 + $0x204] sm:$0x1] %vm150_vm1, %v2791_v0 }
  0x57   : > { %281 = vst.msk [vmem:[#allocation2 + $0x218] sm:$0x1] %vm150_vm1, %v2791_v0  ;;  %286 = vst.msk [vmem:[#allocation2 + $0x22c] sm:$0x1] %vm150_vm1, %v2791_v0 }
  0x58   : > { %291 = vst.msk [vmem:[#allocation2 + $0x240] sm:$0x1] %vm150_vm1, %v2791_v0  ;;  %296 = vst.msk [vmem:[#allocation2 + $0x254] sm:$0x1] %vm150_vm1, %v2791_v0 }
  0x59   : > { %301 = vst.msk [vmem:[#allocation2 + $0x268] sm:$0x1] %vm150_vm1, %v2791_v0  ;;  %306 = vst.msk [vmem:[#allocation2 + $0x27c] sm:$0x1] %vm150_vm1, %v2791_v0 }
  0x5a   : > { %311 = vst.msk [vmem:[#allocation2 + $0x290] sm:$0x1] %vm150_vm1, %v2791_v0  ;;  %316 = vst.msk [vmem:[#allocation2 + $0x2a4] sm:$0x1] %vm150_vm1, %v2791_v0 }
  0x5b LB: >> { %s2431_s21 = sshll.u32 %s2773_s20, 4  ;;  %s2144_s22 = smul.u32 20, %s2773_s20  ;;  %vm378_vm2 = vsmask.f32 7938  ;;  %vm331_vm3 = vsmask.f32 256  ;;  %s2773_s20 = sphi %s3176_s20, %s322_s20  }
  0x5c   : >> { %s325_s23 = scalar_lea.vmem %s3169_s16, %s2431_s21  ;;  %vm332_vm4 = vsmask.f32 4368  ;;  %vm3185_vm5 = vmand %vm145_vm0, %vm378_vm2  ;;  %s322_s20 = sadd.s32 1, %s2773_s20  }
  0x5d   : >> { %v326_v1 = vld [vmem:[%s325_s23] sm:$0xf]  ;;  %v327_v2 = vld [vmem:[%s325_s23 + $0x4] sm:$0xf]  ;;  %v328_v7 = vld [vmem:[%s325_s23 + $0x8] sm:$0xf] }
  0x5e   : >> { %v335_v3 = vshrl.u32 %v326_v1, 16  ;;  %v338_v4 = vshll.u32 %v326_v1, 16  ;;  %v343_v5 = vshrl.u32 %v327_v2, 16  ;;  %v346_v6 = vshll.u32 %v327_v2, 16  ;;  %v329_v8 = vld [vmem:[%s325_s23 + $0xc] sm:$0xf]  ;;  %vm3190_vm6 = vmor %vm331_vm3, %vm332_vm4 }
  0x5f   : >> { %v352_v12 = vshrl.u32 %v328_v7, 16  ;;  %s2145_s24 = scalar_lea.vmem [#allocation2], %s2144_s22  ;;  %v355_v15 = vshll.u32 %v328_v7, 16  ;;  %v361_v16 = vshrl.u32 %v329_v8, 16  ;;  %v364_v17 = vshll.u32 %v329_v8, 16  ;;  %vm387_vm7 = vmand %vm150_vm1, %vm331_vm3  ;;  %p319_p4 = scmp.ge.s32.totalorder %s322_s20, 32  }
  0x60   : >> { %v337_v9 = vrot.slane %v335_v3, 7  ;;  %v345_v11 = vrot.slane %v343_v5, 7  ;;  %v3210_v34 = vmov (%p319_p4), 0.0   ;;  %v3212_v35 = vmov (%p319_p4), 0.0   ;;  %s3214_s25 = smov (%p319_p4), 0  }
  0x61   : >> { %v2239_v13 = vld [vmem:[%s2145_s24 + $0x14] sm:$0xf]  ;;  %v354_v22 = vrot.slane %v352_v12, 7  ;;  %v363_v23 = vrot.slane %v361_v16, 7  ;;  %v2244_v26 = vld [vmem:[%s2145_s24 + $0x24] sm:$0x1] }
  0x62   : >> { %v340_v18 = vor.u32 %v338_v4, %v337_v9  ;;  %v341_v19 = vrot.slane %v337_v9, 4  ;;  %v348_v20 = vor.u32 %v346_v6, %v345_v11  ;;  %v350_v21 = vrot.slane %v345_v11, 4  ;;  %321 = sbr.rel (!%p319_p4) target bundleno = 91 (0x5b), region = 109 }
  0x63   : >> { %v357_v27 = vor.u32 %v355_v15, %v354_v22  ;;  %v359_v28 = vrot.slane %v354_v22, 4  ;;  %v366_v29 = vor.u32 %v364_v17, %v363_v23  ;;  %v368_v30 = vrot.slane %v363_v23, 4 }
  0x64   : >> { %v381_v24 = vsel %vm3185_vm5, %v340_v18, %v2239_v13  ;;  %v349_v25 = vsel %vm3190_vm6, %v341_v19, %v348_v20 }
  0x65   : >> { %2240 = vst [vmem:[%s2145_s24 + $0x14] sm:$0xf] %v381_v24  ;;  %2241 = vst.msk [vmem:[%s2145_s24 + $0x18] sm:$0xf] %vm145_vm0, %v349_v25  ;;  %v358_v31 = vsel %vm3190_vm6, %v350_v21, %v357_v27  ;;  %v367_v32 = vsel %vm3190_vm6, %v359_v28, %v366_v29  ;;  %v389_v33 = vsel %vm387_vm7, %v368_v30, %v2244_v26 }
  0x66   : >> { %2242 = vst.msk [vmem:[%s2145_s24 + $0x1c] sm:$0xf] %vm145_vm0, %v358_v31  ;;  %2243 = vst.msk [vmem:[%s2145_s24 + $0x20] sm:$0xf] %vm145_vm0, %v367_v32 }
  0x67   : >> { %2245 = vst [vmem:[%s2145_s24 + $0x24] sm:$0x1] %v389_v33 }
  0x69 LB: >> { %vm451_vm8 = vcmask 1041408   ;;  %v2277_v36 = vld [vmem:[%s3671_s1 + $0xa] sm:$0x3]  ;;  %v2247_v37 = vld [vmem:[%s3671_s1 + $0x2] sm:$0x3]  ;;  %s2432_s30 = smul.u32 20, %s2785_s25  ;;  %s2785_s25 = sphi %s3214_s25, %s396_s25   ;;  %v2781_v35 = vphi %v3212_v35, %v3679_v35   ;;  %v2777_v34 = vphi %v3210_v34, %v3678_v34  }
  0x6a   : >> { %2647 = vmatprep.subr.msk.bf16.mxu1 %vm451_vm8, %v2277_v36  ;;  %v819_v38 = vsel %vm451_vm8, %v2277_v36, 0  ;;  %2643 = vmatprep.subr.msk.bf16.mxu0 %vm451_vm8, %v2247_v37  ;;  %v453_v39 = vsel %vm451_vm8, %v2247_v37, 0  ;;  %v406_v40 = vld [vmem:[%s3671_s1] sm:$0x3]  ;;  %v2276_v41 = vld [vmem:[%s3671_s1 + $0x8] sm:$0x3] }
  0x6b   : >> { %2524 = vmatpush3.bf16.msra.mxu1 %v819_v38  ;;  %2500 = vmatpush3.bf16.msra.mxu0 %v453_v39  ;;  %vm444_vm9 = vcmask 31744   ;;  %vm806_vm10 = vcmask 1046528   ;;  %s3244_s7 = scalar_lea.vmem [#allocation2], %s2432_s30  ;;  %vm423_vm11 = vsmask.f32 7424  ;;  %v900_v47 = vsel %vm451_vm8, %v2276_v41, 0 }
  0x6c   : >> { %2644 = vmatprep.subr.msk.bf16.mxu0 %vm451_vm8, %v406_v40  ;;  %2648 = vmatprep.subr.msk.bf16.mxu1 %vm451_vm8, %v2276_v41  ;;  %v2291_v61 = vld [vmem:[%s3671_s1 + $0xc] sm:$0x3]  ;;  %v509_v17 = vsel %vm451_vm8, %v406_v40, 0  ;;  %v2259_v20 = vld [vmem:[%s3671_s1 + $0x4] sm:$0x3]  ;;  %s2275_s8 = sshll.u32 %s2785_s25, 5 }
  0x6d   : >> { %v998_v32 = vsel %vm451_vm8, %v2291_v61, 0  ;;  %v2298_v37 = vld [vmem:[%s3671_s1 + $0xe] sm:$0x3]  ;;  %v587_v41 = vsel %vm451_vm8, %v2259_v20, 0  ;;  %vm746_vm12 = vcmask 15360   ;;  %s396_s25 = sadd.s32 1, %s2785_s25  }
  0x6e   : >> { %v783_v42 = vld [vmem:[%s3244_s7] sm:$0xf]  ;;  %v784_v43 = vld [vmem:[%s3244_s7 + $0x4] sm:$0xf]  ;;  %v2710_v45 = vld [vmem:[%s3244_s7 + $0x8] sm:$0xff]   ;;  %p393_p5 = scmp.ge.s32.totalorder %s396_s25, 32  }
  0x6f   : >> { %v790_v44 = vld [vmem:[%s3244_s7] sm:$0xe]  ;;  %v2283_v46 = vcombine.low %v783_v42, %v784_v43  ;;  %v2712_v49 = vld [vmem:[%s3244_s7 + $0x10] ss:$0 sps:$4 sm:$0x11]   ;;  %v808_v51 = vrot.slane %v2710_v45, 1 }
  0x70   : >> { %v2278_v48 = vcombine.low %v790_v44, %v784_v43  ;;  %v2713_v50 = vld [vmem:[%s3244_s7] sm:$0xff]   ;;  %v3254_v54 = vld [vmem:[%s3244_s7 + $0x8] sm:$0xff]   ;;  %v810_v56 = vrot.slane %v2712_v49, 1  ;;  %v2715_v0 = vld [vmem:[%s3244_s7 + $0x10] ss:$0 sps:$4 sm:$0x11]  }
  0x71   : >> { %v874_v52 = vshrl.u32 %v2283_v46, 16  ;;  %v876_v53 = vshll.u32 %v2283_v46, 16  ;;  %v425_v57 = vshrl.u32 %v2713_v50, 16  ;;  %v427_v58 = vshll.u32 %v2713_v50, 16  ;;  %v2286_v6 = vld [vmem:[%s3244_s7 + $0x14] sm:$0xf] }
  0x72   : >> { %v807_v55 = vrot.slane %v2278_v48, 1  ;;  %v432_v59 = vshll.u32 %v3254_v54, 16  ;;  %v436_v60 = vshrl.u32 %v3254_v54, 16  ;;  %v811_v63 = vsel %vm806_vm10, %v808_v51, %v810_v56  ;;  %v2287_v10 = vld [vmem:[%s3244_s7 + $0x18] sm:$0xf]  ;;  %v3269_v15 = vld [vmem:[%s3244_s7 + $0x1c] sm:$0xff]  }
  0x73   : >> { %v878_v1 = vrot.slane %v876_v53, 1  ;;  %v429_v2 = vrot.slane %v427_v58, 1  ;;  %v881_v4 = vshll.u32 %v2710_v45, 16  ;;  %v885_v5 = vshrl.u32 %v2710_v45, 16  ;;  %v2722_v36 = vld [vmem:[%s3244_s7 + $0x14] sm:$0xff]   ;;  %v3304_v44 = vld [vmem:[%s3244_s7 + $0x1c] sm:$0xff]  }
  0x74   : >> { %v809_v62 = vsel %vm806_vm10, %v807_v55, %v808_v51  ;;  %v434_v3 = vrot.slane %v432_v59, 1  ;;  %v440_v7 = vshll.u32 %v2715_v0, 16  ;;  %v889_v9 = vshll.u32 %v2712_v49, 16  ;;  %v3287_v31 = vld [vmem:[%s3244_s7 + $0x24] ss:$0 sps:$4 sm:$0x11]  }
  0x75   : >> { %2525 = vmatprep.mubr.msk.bf16.mxu1 %vm444_vm9, %v809_v62  ;;  %v879_v8 = vor.u32 %v878_v1, %v874_v52  ;;  %v430_v11 = vor.u32 %v429_v2, %v425_v57  ;;  %v883_v13 = vrot.slane %v881_v4, 1  ;;  %v2292_v14 = vcombine.low %v2286_v6, %v2287_v10  ;;  %v2297_v38 = vld [vmem:[%s3244_s7 + $0x14] sm:$0xe]  ;;  %v2269_v46 = vld [vmem:[%s3671_s1 + $0x6] sm:$0x3]  ;;  %v2720_v6 = vld [vmem:[%s3244_s7 + $0x1c] sm:$0xff]  }
  0x76   : >> { %2526 = vmatmul.mubr.msk.bf16.vlgmr.msra.gmra.mrb[0].mxu1 %vm444_vm9, %v811_v63  ;;  %v438_v12 = vor.u32 %v436_v60, %v434_v3  ;;  %v442_v16 = vrot.slane %v440_v7, 1  ;;  %v979_v24 = vshll.u32 %v3269_v15, 16  ;;  %v891_v26 = vrot.slane %v889_v9, 1  ;;  %v2719_v42 = vld [vmem:[%s3244_s7 + $0x14] sm:$0xff]   ;;  %s3561_s10 = smov (%p393_p5), 0  }
  0x77   : >> { %2530 = vmatpush3.bf16.msra.mxu1 %v900_v47  ;;  %v435_v18 = vsel %vm423_vm11, %v430_v11, %v434_v3  ;;  %v884_v19 = vsel %vm423_vm11, %v879_v8, %v883_v13  ;;  %v972_v22 = vshrl.u32 %v2292_v14, 16  ;;  %v974_v23 = vshll.u32 %v2292_v14, 16  ;;  %v3315_v53 = vld [vmem:[%s3244_s7 + $0x24] ss:$0 sps:$4 sm:$0x11]   ;;  %v3321_v57 = vld [vmem:[%s3244_s7 + $0x14] sm:$0xff]  }
  0x78   : >> { %2649 = vmatprep.subr.msk.bf16.mxu1 %vm451_vm8, %v2291_v61  ;;  %2501 = vmatprep.mubr.msk.bf16.mxu0 %vm444_vm9, %v435_v18  ;;  %v443_v21 = vsel %vm423_vm11, %v438_v12, %v442_v16  ;;  %v887_v25 = vor.u32 %v885_v5, %v883_v13  ;;  %v981_v28 = vrot.slane %v979_v24, 1  ;;  %v983_v39 = vshrl.u32 %v3269_v15, 16  ;;  %v2352_v56 = vld [vmem:[%s3244_s7 + $0x14] sm:$0xe]  ;;  %v2353_v58 = vld [vmem:[%s3671_s1 + $0x1a] sm:$0x3] }
  0x79   : >> { %2531 = vmatprep.mubr.msk.bf16.mxu1 %vm444_vm9, %v884_v19  ;;  %2502 = vmatmul.mubr.msk.bf16.vlgmr.msra.gmra.mrb[0].mxu0 %vm444_vm9, %v443_v21  ;;  %v976_v27 = vrot.slane %v974_v23, 1  ;;  %v987_v40 = vshll.u32 %v3287_v31, 16  ;;  %v2299_v43 = vcombine.low %v2297_v38, %v2287_v10  ;;  %v665_v45 = vshll.u32 %v2722_v36, 16  ;;  %v3327_v59 = vld [vmem:[%s3244_s7 + $0x30] sm:$0xff]   ;;  %v3337_v5 = vld [vmem:[%s3244_s7 + $0x1c] sm:$0xff]  }
  0x7a   : >> { %2506 = vmatpush3.bf16.msra.mxu0 %v509_v17  ;;  %2507 = vmatprep.mubr.msk.bf16.mxu0 %vm444_vm9, %v2713_v50  ;;  %v892_v30 = vsel %vm423_vm11, %v887_v25, %v891_v26  ;;  %v985_v47 = vor.u32 %v983_v39, %v981_v28  ;;  %v1060_v49 = vrot.slane %v3269_v15, 1  ;;  %v663_v51 = vshrl.u32 %v2722_v36, 16  ;;  %v2346_v3 = vld [vmem:[%s3244_s7 + $0x14] sm:$0xf]  ;;  %v3345_v10 = vld [vmem:[%s3244_s7 + $0x1c] sm:$0xff]   ;;  %v2738_v25 = vld [vmem:[%s3244_s7 + $0x28] sm:$0xff]  }
  0x7b   : >> { %2645 = vmatprep.subr.msk.bf16.mxu0 %vm451_vm8, %v2259_v20  ;;  %v977_v29 = vor.u32 %v976_v27, %v972_v22  ;;  %v989_v48 = vrot.slane %v987_v40, 1  ;;  %v1059_v50 = vrot.slane %v2299_v43, 1  ;;  %v670_v52 = vshll.u32 %v3304_v44, 16  ;;  %v2734_v15 = vld [vmem:[%s3244_s7 + $0x38] ss:$0 sps:$4 sm:$0x11]  }
  0x7c   : >> { %v667_v55 = vrot.slane %v665_v45, 1  ;;  %v689_v61 = vsel %vm451_vm8, %v2269_v46, 0  ;;  %v1071_v62 = vsel %vm451_vm8, %v2298_v37, 0  ;;  %v1062_v63 = vrot.slane %v3287_v31, 1  ;;  %v3359_v17 = vld [vmem:[%s3671_s1 + $0x12] sm:$0x3] }
  0x7d   : >> { %v982_v33 = vsel %vm423_vm11, %v977_v29, %v981_v28  ;;  %v990_v60 = vsel %vm423_vm11, %v985_v47, %v989_v48  ;;  %v1061_v0 = vsel %vm806_vm10, %v1059_v50, %v1060_v49  ;;  %v672_v1 = vrot.slane %v670_v52, 1  ;;  %v2739_v26 = vld [vmem:[%s3244_s7 + $0x30] sm:$0xff]   ;;  %v2363_v29 = vld [vmem:[%s3244_s7 + $0x2c] sm:$0xf] }
  0x7e   : >> { %v674_v2 = vshrl.u32 %v3304_v44, 16  ;;  %v668_v7 = vor.u32 %v667_v55, %v663_v51  ;;  %v678_v8 = vshll.u32 %v3315_v53, 16  ;;  %v3342_v9 = vsel %vm451_vm8, %v2353_v58, 0  ;;  %v3383_v39 = vld [vmem:[%s3244_s7 + $0x24] ss:$0 sps:$4 sm:$0x11]  }
  0x7f   : >> { %v1189_v11 = vshll.u32 %v3321_v57, 16  ;;  %v1737_v12 = vshll.u32 %v3327_v59, 16  ;;  %v1741_v13 = vshrl.u32 %v3327_v59, 16  ;;  %v1818_v16 = vrot.slane %v3327_v59, 1 }
  0x80   : >> { %v1566_v19 = vrot.slane %v3337_v5, 1  ;;  %v1187_v20 = vshrl.u32 %v3321_v57, 16  ;;  %v673_v22 = vsel %vm423_vm11, %v668_v7, %v672_v1  ;;  %v1745_v23 = vshll.u32 %v2734_v15, 16  ;;  %v2740_v48 = vld [vmem:[%s3244_s7 + $0x38] ss:$0 sps:$4 sm:$0x11]  }
  0x81   : >> { %v3364_v21 = vrot.slane %v1737_v12, 1  ;;  %v1820_v24 = vrot.slane %v2734_v15, 1  ;;  %v1191_v27 = vrot.slane %v1189_v11, 1  ;;  %v1194_v28 = vshll.u32 %v3345_v10, 16  ;;  %v2311_v15 = vld [vmem:[%s3671_s1 + $0x10] sm:$0x3] }
  0x82   : >> { %2532 = vmatmul.mubr.msk.bf16.vlgmr.msra.gmra.mrb[0].mxu1 %vm444_vm9, %v892_v30  ;;  %v1430_v43 = vshll.u32 %v2739_v26, 16  ;;  %v676_v44 = vor.u32 %v674_v2, %v672_v1  ;;  %v680_v45 = vrot.slane %v678_v8, 1  ;;  %v1434_v47 = vshrl.u32 %v2739_v26, 16  ;;  %v2731_v50 = vld [vmem:[%s3244_s7 + $0x24] ss:$0 sps:$4 sm:$0x11]  }
  0x83   : >> { %2536 = vmatpush3.bf16.msra.mxu1 %v998_v32  ;;  %2537 = vmatprep.mubr.msk.bf16.mxu1 %vm444_vm9, %v982_v33  ;;  %v1743_v30 = vor.u32 %v1741_v13, %v3364_v21  ;;  %v1747_v32 = vrot.slane %v1745_v23, 1  ;;  %v2373_v33 = vld [vmem:[%s3244_s7 + $0x28] sm:$0xe]  ;;  %v3376_v36 = vsel %vm806_vm10, %v1818_v16, %v1820_v24  ;;  %v1192_v59 = vor.u32 %v1191_v27, %v1187_v20  ;;  %v2367_v24 = vld [vmem:[%s3671_s1 + $0x1c] sm:$0x3] }
  0x84   : >> { %2650 = vmatprep.subr.msk.bf16.mxu1 %vm451_vm8, %v2298_v37  ;;  %v1063_v37 = vsel %vm806_vm10, %v1060_v49, %v1062_v63  ;;  %v2375_v38 = vcombine.low %v2373_v33, %v2363_v29  ;;  %v1432_v53 = vrot.slane %v1430_v43, 1  ;;  %v681_v1 = vsel %vm423_vm11, %v676_v44, %v680_v45  ;;  %v2736_v43 = vld [vmem:[%s3244_s7 + $0x30] sm:$0xff]  }
  0x85   : >> { %2508 = vmatmul.mubr.msk.bf16.vlgmr.msra.gmra.mrb[0].mxu0 %vm444_vm9, %v3254_v54  ;;  %v2347_v54 = vld [vmem:[%s3244_s7 + $0x18] sm:$0xf]  ;;  %v3386_v40 = vsel %vm423_vm11, %v1743_v30, %v1747_v32  ;;  %v2325_v30 = vld [vmem:[%s3671_s1 + $0x14] sm:$0x3] }
  0x86   : >> { %2512 = vmatpush3.bf16.msra.mxu0 %v587_v41  ;;  %2513 = vmatprep.mubr.msk.bf16.mxu0 %vm444_vm9, %v2719_v42  ;;  %v2354_v4 = vcombine.low %v2352_v56, %v2347_v54  ;;  %v3352_v14 = vcombine.low %v2346_v3, %v2347_v54  ;;  %v1423_v41 = vshrl.u32 %v2738_v25, 16  ;;  %v1425_v42 = vshll.u32 %v2738_v25, 16 }
  0x87   : >> { %2646 = vmatprep.subr.msk.bf16.mxu0 %vm451_vm8, %v2269_v46  ;;  %v1817_v46 = vrot.slane %v2375_v38, 1  ;;  %v1639_v54 = vshll.u32 %v3337_v5, 16  ;;  %v1568_v3 = vrot.slane %v3383_v39, 1  ;;  %v1647_v25 = vshll.u32 %v3383_v39, 16  ;;  %v2374_v39 = vld [vmem:[%s3671_s1 + $0x1e] sm:$0x3] }
  0x88   : >> { %v1565_v18 = vrot.slane %v2354_v4, 1  ;;  %v1634_v31 = vshll.u32 %v3352_v14, 16  ;;  %v1632_v51 = vshrl.u32 %v3352_v14, 16  ;;  %v1427_v52 = vrot.slane %v1425_v42, 1  ;;  %v2335_v42 = vld [vmem:[%s3671_s1 + $0x16] sm:$0x3] }
  0x89   : >> { %v3396_v56 = vsel %vm806_vm10, %v1817_v46, %v1818_v16  ;;  %v1198_v4 = vshrl.u32 %v3345_v10, 16  ;;  %v1641_v11 = vrot.slane %v1639_v54, 1  ;;  %v1213_v14 = vsel %vm451_vm8, %v3359_v17, 0 }
  0x8a   : >> { %v1567_v49 = vsel %vm806_vm10, %v1565_v18, %v1566_v19  ;;  %v1636_v55 = vrot.slane %v1634_v31, 1  ;;  %v1428_v63 = vor.u32 %v1427_v52, %v1423_v41  ;;  %v1569_v16 = vsel %vm806_vm10, %v1566_v19, %v1568_v3 }
  0x8b   : >> { %v1643_v19 = vshrl.u32 %v3337_v5, 16  ;;  %v1649_v31 = vrot.slane %v1647_v25, 1  ;;  %v1347_v41 = vsel %vm451_vm8, %v2325_v30, 0  ;;  %v1449_v44 = vsel %vm451_vm8, %v2335_v42, 0 }
  0x8c   : >> { %v1433_v7 = vsel %vm423_vm11, %v1428_v63, %v1432_v53  ;;  %v1637_v8 = vor.u32 %v1636_v55, %v1632_v51 }
  0x8d   : >> { %v1645_v5 = vor.u32 %v1643_v19, %v1641_v11 }
  0x8e   : >> { %2538 = vmatmul.mubr.msk.bf16.vlgmr.msra.gmra.mrb[0].mxu1 %vm444_vm9, %v990_v60  ;;  %v1196_v60 = vrot.slane %v1194_v28, 1 }
  0x8f   : >> { %2542 = vmatpush3.bf16.msra.mxu1 %v1071_v62  ;;  %2543 = vmatprep.mubr.msk.bf16.mxu1 %vm444_vm9, %v1061_v0  ;;  %v2362_v62 = vld [vmem:[%s3244_s7 + $0x28] sm:$0xf]  ;;  %v1436_v0 = vor.u32 %v1434_v47, %v1432_v53  ;;  %v1650_v33 = vsel %vm423_vm11, %v1645_v5, %v1649_v31 }
  0x90   : >> { %2655 = vmatprep.subr.msk.bf16.mxu1 %vm451_vm8, %v2353_v58  ;;  %v1438_v58 = vshll.u32 %v2740_v48, 16  ;;  %v2368_v12 = vcombine.low %v2362_v62, %v2363_v29  ;;  %v1200_v20 = vor.u32 %v1198_v4, %v1196_v60  ;;  %v1269_v29 = vsel %vm451_vm8, %v2311_v15, 0 }
  0x91   : >> { %2514 = vmatmul.mubr.msk.bf16.vlgmr.msra.gmra.mrb[0].mxu0 %vm444_vm9, %v2720_v6  ;;  %v1202_v6 = vshll.u32 %v2731_v50, 16 }
  0x92   : >> { %2518 = vmatpush3.bf16.msra.mxu0 %v689_v61  ;;  %2519 = vmatprep.mubr.msk.bf16.mxu0 %vm444_vm9, %v673_v22  ;;  %v2351_v61 = vld [vmem:[%s3671_s1 + $0x18] sm:$0x3]  ;;  %v1440_v2 = vrot.slane %v1438_v58, 1  ;;  %v1732_v23 = vshll.u32 %v2368_v12, 16  ;;  %v1730_v27 = vshrl.u32 %v2368_v12, 16 }
  0x93   : >> { %2651 = vmatprep.subr.msk.bf16.mxu0 %vm451_vm8, %v3359_v17  ;;  %v1658_v18 = vsel %vm451_vm8, %v2351_v61, 0  ;;  %v1204_v22 = vrot.slane %v1202_v6, 1  ;;  %v1642_v17 = vsel %vm423_vm11, %v1637_v8, %v1641_v11 }
  0x94   : >> { %v1441_v13 = vsel %vm423_vm11, %v1436_v0, %v1440_v2  ;;  %v1734_v28 = vrot.slane %v1732_v23, 1 }
  0x95   : >> { %v1205_v26 = vsel %vm423_vm11, %v1200_v20, %v1204_v22 }
  0x96   : >> { %v1735_v32 = vor.u32 %v1734_v28, %v1730_v27 }
  0x98   : >> { %v1740_v38 = vsel %vm423_vm11, %v1735_v32, %v3364_v21  ;;  %v1829_v21 = vsel %vm451_vm8, %v2374_v39, 0 }
  0x9a   : >> { %2544 = vmatmul.mubr.msk.bf16.vlgmr.msra.gmra.mrb[0].mxu1 %vm444_vm9, %v1063_v37  ;;  %v1756_v37 = vsel %vm451_vm8, %v2367_v24, 0 }
  0x9b   : >> { %2572 = vmatpush3.bf16.msra.mxu1 %v3342_v9  ;;  %2573 = vmatprep.mubr.msk.bf16.mxu1 %vm444_vm9, %v1567_v49  ;;  %v1197_v9 = vsel %vm423_vm11, %v1192_v59, %v1196_v60 }
  0x9c   : >> { %2656 = vmatprep.subr.msk.bf16.mxu1 %vm451_vm8, %v2351_v61 }
  0x9d   : >> { %2520 = vmatmul.mubr.msk.bf16.vlgmr.msra.gmra.mrb[0].mxu0 %vm444_vm9, %v681_v1 }
  0x9e   : >> { %2548 = vmatpush3.bf16.msra.mxu0 %v1213_v14  ;;  %2549 = vmatprep.mubr.msk.bf16.mxu0 %vm444_vm9, %v1197_v9 }
  0x9f   : >> { %2652 = vmatprep.subr.msk.bf16.mxu0 %vm451_vm8, %v2311_v15 }
  0xa2   : >> { %2574 = vmatmul.mubr.msk.bf16.vlgmr.msra.gmra.mrb[4].mxu1 %vm444_vm9, %v1569_v16 }
  0xa3   : >> { %2578 = vmatpush3.bf16.msra.mxu1 %v1658_v18  ;;  %2579 = vmatprep.mubr.msk.bf16.mxu1 %vm444_vm9, %v1642_v17 }
  0xa4   : >> { %2657 = vmatprep.subr.msk.bf16.mxu1 %vm451_vm8, %v2367_v24 }
  0xa5   : >> { %2550 = vmatmul.mubr.msk.bf16.vlgmr.msra.gmra.mrb[4].mxu0 %vm444_vm9, %v1205_v26 }
  0xa6   : >> { %2554 = vmatpush3.bf16.msra.mxu0 %v1269_v29  ;;  %2555 = vmatprep.mubr.msk.bf16.mxu0 %vm444_vm9, %v3321_v57  ;;  %v2735_v57 = vld [vmem:[%s3244_s7 + $0x28] sm:$0xff]   ;;  %s3474_s7 = scalar_lea.vmem [#allocation3], %s2275_s8 }
  0xa7   : >> { %2653 = vmatprep.subr.msk.bf16.mxu0 %vm451_vm8, %v2325_v30 }
  0xae   : >> { %2580 = vmatmul.mubr.msk.bf16.vlgmr.msra.gmra.mrb[4].mxu1 %vm444_vm9, %v1650_v33 }
  0xaf   : >> { %2584 = vmatpush3.bf16.msra.mxu1 %v1756_v37  ;;  %2585 = vmatprep.mubr.msk.bf16.mxu1 %vm444_vm9, %v1740_v38 }
  0xb0   : >> { %2658 = vmatprep.subr.msk.bf16.mxu1 %vm451_vm8, %v2374_v39 }
  0xb1   : >> { %2556 = vmatmul.mubr.msk.bf16.vlgmr.msra.gmra.mrb[4].mxu0 %vm444_vm9, %v3345_v10 }
  0xb2   : >> { %2560 = vmatpush3.bf16.msra.mxu0 %v1347_v41  ;;  %2561 = vmatprep.mubr.msk.bf16.mxu0 %vm444_vm9, %v2735_v57 }
  0xb3   : >> { %2654 = vmatprep.subr.msk.bf16.mxu0 %vm451_vm8, %v2335_v42 }
  0xba   : >> { %2586 = vmatmul.mubr.msk.bf16.vlgmr.msra.gmra.mrb[4].mxu1 %vm444_vm9, %v3386_v40 }
  0xbb   : >> { %2590 = vmatpush3.bf16.msra.mxu1 %v1829_v21  ;;  %2591 = vmatprep.mubr.msk.bf16.mxu1 %vm444_vm9, %v3396_v56 }
  0xbd   : >> { %2562 = vmatmul.mubr.msk.bf16.vlgmr.msra.gmra.mrb[4].mxu0 %vm444_vm9, %v2736_v43 }
  0xbe   : >> { %2566 = vmatpush3.bf16.msra.mxu0 %v1449_v44  ;;  %2567 = vmatprep.mubr.msk.bf16.mxu0 %vm444_vm9, %v1433_v7 }
  0xc6   : >> { %2592 = vmatmul.mubr.msk.bf16.vlgmr.msra.gmra.mrb[4].mxu1 %vm444_vm9, %v3376_v36 }
  0xc9   : >> { %2568 = vmatmul.mubr.msk.bf16.vlgmr.msra.gmra.mrb[4].mxu0 %vm444_vm9, %v1441_v13 }
 0x16d   : >> { %v2545_v10 = vpop.f32.mrb[0].mxu1 }
 0x16e   : >> { %2305 = vst.msk [vmem:[%s3474_s7 + $0x410] sm:$0xff] %vm746_vm12, %v2545_v10  ;;  %v1107_v40 = vpop.f32.mrb[1].mxu1  ;;  %v1148_v47 = vmul.f32 %v2545_v10, %v2545_v10  ;;  %v1135_v53 = vsel %vm746_vm12, %v2545_v10, 0.0 }
 0x16f   : >> { %2303 = vst.msk [vmem:[%s3474_s7 + $0x400] sm:$0xff] %vm746_vm12, %v1107_v40  ;;  %v1146_v45 = vmul.f32 %v1107_v40, %v1107_v40  ;;  %v2546_v46 = vpop.f32.mrb[2].mxu1  ;;  %v1132_v48 = vsel %vm746_vm12, %v1107_v40, 0.0 }
 0x170   : >> { %2306 = vst.msk [vmem:[%s3474_s7 + $0x418] sm:$0xff] %vm746_vm12, %v2546_v46  ;;  %v1110_v36 = vpop.f32.mrb[3].mxu1  ;;  %v2521_v52 = vpop.f32.mrb[0].mxu0  ;;  %v1149_v54 = vmul.f32 %v2546_v46, %v2546_v46  ;;  %v1153_v62 = vsel %vm746_vm12, %v1148_v47, 0.0  ;;  %v1137_v63 = vsel %vm746_vm12, %v2546_v46, 0.0 }
 0x171   : >> { %2304 = vst.msk [vmem:[%s3474_s7 + $0x408] sm:$0xff] %vm746_vm12, %v1110_v36  ;;  %v1133_v49 = vsel %vm746_vm12, %v1110_v36, 0.0  ;;  %v1147_v50 = vmul.f32 %v1110_v36, %v1110_v36  ;;  %v1150_v55 = vsel %vm746_vm12, %v1146_v45, 0.0  ;;  %749 = vst.msk [vmem:[%s3474_s7 + $0x10] sm:$0xff] %vm746_vm12, %v2521_v52  ;;  %v725_v58 = vpop.f32.mrb[1].mxu0  ;;  %v767_v8 = vmul.f32 %v2521_v52, %v2521_v52 }
 0x172   : >> { %v1134_v51 = vadd.f32 %v1133_v49, %v1132_v48  ;;  %747 = vst.msk [vmem:[%s3474_s7] sm:$0xff] %vm746_vm12, %v725_v58  ;;  %v2522_v61 = vpop.f32.mrb[2].mxu0  ;;  %v765_v0 = vmul.f32 %v725_v58, %v725_v58  ;;  %v751_v4 = vsel %vm746_vm12, %v725_v58, 0.0  ;;  %v1155_v7 = vsel %vm746_vm12, %v1149_v54, 0.0 }
 0x173   : >> { %v1151_v56 = vsel %vm746_vm12, %v1147_v50, 0.0  ;;  %750 = vst.msk [vmem:[%s3474_s7 + $0x18] sm:$0xff] %vm746_vm12, %v2522_v61  ;;  %v728_v1 = vpop.f32.mrb[3].mxu0  ;;  %v754_v9 = vsel %vm746_vm12, %v2521_v52, 0.0  ;;  %v768_v16 = vmul.f32 %v2522_v61, %v2522_v61  ;;  %v756_v23 = vsel %vm746_vm12, %v2522_v61, 0.0 }
 0x174   : >> { %v1136_v59 = vadd.f32 %v1135_v53, %v1134_v51  ;;  %v1152_v60 = vadd.f32 %v1151_v56, %v1150_v55  ;;  %748 = vst.msk [vmem:[%s3474_s7 + $0x8] sm:$0xff] %vm746_vm12, %v728_v1  ;;  %v752_v6 = vsel %vm746_vm12, %v728_v1, 0.0  ;;  %v766_v12 = vmul.f32 %v728_v1, %v728_v1 }
 0x175   : >> { %v753_v11 = vadd.f32 %v752_v6, %v751_v4  ;;  %v769_v15 = vsel %vm746_vm12, %v765_v0, 0.0  ;;  %v772_v19 = vsel %vm746_vm12, %v767_v8, 0.0  ;;  %v774_v29 = vsel %vm746_vm12, %v768_v16, 0.0 }
 0x176   : >> { %v1138_v2 = vadd.f32 %v1137_v63, %v1136_v59  ;;  %v1154_v3 = vadd.f32 %v1153_v62, %v1152_v60  ;;  %v770_v20 = vsel %vm746_vm12, %v766_v12, 0.0 }
 0x177   : >> { %v755_v18 = vadd.f32 %v754_v9, %v753_v11  ;;  %v771_v24 = vadd.f32 %v770_v20, %v769_v15 }
 0x178   : >> { %v1139_v13 = vrot.slane %v1138_v2, 4  ;;  %v1156_v14 = vadd.f32 %v1155_v7, %v1154_v3 }
 0x179   : >> { %v757_v25 = vadd.f32 %v756_v23, %v755_v18  ;;  %v773_v27 = vadd.f32 %v772_v19, %v771_v24 }
 0x17a   : >> { %v1140_v22 = vadd.f32 %v1139_v13, %v1138_v2  ;;  %v1157_v17 = vrot.slane %v1156_v14, 4 }
 0x17b   : >> { %v758_v30 = vrot.slane %v757_v25, 4  ;;  %v775_v5 = vadd.f32 %v774_v29, %v773_v27 }
 0x17c   : >> { %v1158_v26 = vadd.f32 %v1157_v17, %v1156_v14  ;;  %v1141_v28 = vrot.slane %v1140_v22, 2 }
 0x17d   : >> { %v759_v31 = vadd.f32 %v758_v30, %v757_v25  ;;  %v776_v33 = vrot.slane %v775_v5, 4 }
 0x17e   : >> { %v1159_v32 = vrot.slane %v1158_v26, 2  ;;  %v1142_v37 = vadd.f32 %v1141_v28, %v1140_v22 }
 0x17f   : >> { %v760_v38 = vrot.slane %v759_v31, 2  ;;  %v777_v39 = vadd.f32 %v776_v33, %v775_v5 }
 0x180   : >> { %v1160_v41 = vadd.f32 %v1159_v32, %v1158_v26  ;;  %v1143_v21 = vrot.slane %v1142_v37, 1 }
 0x181   : >> { %v761_v57 = vadd.f32 %v760_v38, %v759_v31  ;;  %v778_v42 = vrot.slane %v777_v39, 2 }
 0x182   : >> { %v1161_v40 = vrot.slane %v1160_v41, 1  ;;  %v1144_v46 = vadd.f32 %v1143_v21, %v1142_v37 }
 0x183   : >> { %v762_v43 = vrot.slane %v761_v57, 1  ;;  %v779_v44 = vadd.f32 %v778_v42, %v777_v39 }
 0x184   : >> { %v1162_v49 = vadd.f32 %v1161_v40, %v1160_v41 }
 0x185   : >> { %v763_v10 = vadd.f32 %v762_v43, %v761_v57  ;;  %v780_v45 = vrot.slane %v779_v44, 1 }
 0x187   : >> { %v764_v36 = vadd.f32 %v2781_v35, %v763_v10  ;;  %v781_v47 = vadd.f32 %v780_v45, %v779_v44 }
 0x189   : >> { %v3509_v48 = vadd.f32 %v1144_v46, %v764_v36  ;;  %v782_v50 = vadd.f32 %v2777_v34, %v781_v47 }
 0x18b   : >> { %v3512_v51 = vadd.f32 %v1162_v49, %v782_v50 }
 0x199   : >> { %v2593_v52 = vpop.f32.mrb[4].mxu1 }
 0x19a   : >> { %2381 = vst.msk [vmem:[%s3474_s7 + $0xc10] sm:$0xff] %vm746_vm12, %v2593_v52  ;;  %v1865_v53 = vpop.f32.mrb[5].mxu1  ;;  %v1906_v56 = vmul.f32 %v2593_v52, %v2593_v52  ;;  %v1893_v62 = vsel %vm746_vm12, %v2593_v52, 0.0 }
 0x19b   : >> { %2379 = vst.msk [vmem:[%s3474_s7 + $0xc00] sm:$0xff] %vm746_vm12, %v1865_v53  ;;  %v1904_v55 = vmul.f32 %v1865_v53, %v1865_v53  ;;  %v2594_v54 = vpop.f32.mrb[6].mxu1  ;;  %v1890_v58 = vsel %vm746_vm12, %v1865_v53, 0.0 }
 0x19c   : >> { %2382 = vst.msk [vmem:[%s3474_s7 + $0xc18] sm:$0xff] %vm746_vm12, %v2594_v54  ;;  %v1868_v35 = vpop.f32.mrb[7].mxu1  ;;  %v2569_v61 = vpop.f32.mrb[4].mxu0  ;;  %v1907_v0 = vmul.f32 %v2594_v54, %v2594_v54  ;;  %v1911_v7 = vsel %vm746_vm12, %v1906_v56, 0.0  ;;  %v1895_v8 = vsel %vm746_vm12, %v2594_v54, 0.0 }
 0x19d   : >> { %2380 = vst.msk [vmem:[%s3474_s7 + $0xc08] sm:$0xff] %vm746_vm12, %v1868_v35  ;;  %v1891_v34 = vsel %vm746_vm12, %v1868_v35, 0.0  ;;  %v1905_v59 = vmul.f32 %v1868_v35, %v1868_v35  ;;  %v1908_v63 = vsel %vm746_vm12, %v1904_v55, 0.0  ;;  %2344 = vst.msk [vmem:[%s3474_s7 + $0x810] sm:$0xff] %vm746_vm12, %v2569_v61  ;;  %v1485_v2 = vpop.f32.mrb[5].mxu0  ;;  %v1526_v18 = vmul.f32 %v2569_v61, %v2569_v61 }
 0x19e   : >> { %v1892_v60 = vadd.f32 %v1891_v34, %v1890_v58  ;;  %2342 = vst.msk [vmem:[%s3474_s7 + $0x800] sm:$0xff] %vm746_vm12, %v1485_v2  ;;  %v2570_v6 = vpop.f32.mrb[6].mxu0  ;;  %v1524_v11 = vmul.f32 %v1485_v2, %v1485_v2  ;;  %v1510_v9 = vsel %vm746_vm12, %v1485_v2, 0.0  ;;  %v1913_v16 = vsel %vm746_vm12, %v1907_v0, 0.0 }
 0x19f   : >> { %v1909_v1 = vsel %vm746_vm12, %v1905_v59, 0.0  ;;  %2345 = vst.msk [vmem:[%s3474_s7 + $0x818] sm:$0xff] %vm746_vm12, %v2570_v6  ;;  %v1488_v12 = vpop.f32.mrb[7].mxu0  ;;  %v1513_v24 = vsel %vm746_vm12, %v2569_v61, 0.0  ;;  %v1527_v25 = vmul.f32 %v2570_v6, %v2570_v6  ;;  %v1515_v30 = vsel %vm746_vm12, %v2570_v6, 0.0 }
 0x1a0   : >> { %v1894_v3 = vadd.f32 %v1893_v62, %v1892_v60  ;;  %v1910_v4 = vadd.f32 %v1909_v1, %v1908_v63  ;;  %2343 = vst.msk [vmem:[%s3474_s7 + $0x808] sm:$0xff] %vm746_vm12, %v1488_v12  ;;  %v1511_v15 = vsel %vm746_vm12, %v1488_v12, 0.0  ;;  %v1525_v22 = vmul.f32 %v1488_v12, %v1488_v12 }
 0x1a1   : >> { %v1512_v20 = vadd.f32 %v1511_v15, %v1510_v9  ;;  %v1528_v19 = vsel %vm746_vm12, %v1524_v11, 0.0  ;;  %v1531_v31 = vsel %vm746_vm12, %v1526_v18, 0.0  ;;  %v1533_v39 = vsel %vm746_vm12, %v1527_v25, 0.0 }
 0x1a2   : >> { %v1896_v13 = vadd.f32 %v1895_v8, %v1894_v3  ;;  %v1912_v14 = vadd.f32 %v1911_v7, %v1910_v4  ;;  %v1529_v27 = vsel %vm746_vm12, %v1525_v22, 0.0 }
 0x1a3   : >> { %v1514_v26 = vadd.f32 %v1513_v24, %v1512_v20  ;;  %v1530_v5 = vadd.f32 %v1529_v27, %v1528_v19 }
 0x1a4   : >> { %v1897_v17 = vrot.slane %v1896_v13, 4  ;;  %v1914_v23 = vadd.f32 %v1913_v16, %v1912_v14 }
 0x1a5   : >> { %v1516_v32 = vadd.f32 %v1515_v30, %v1514_v26  ;;  %v1532_v37 = vadd.f32 %v1531_v31, %v1530_v5 }
 0x1a6   : >> { %v1898_v28 = vadd.f32 %v1897_v17, %v1896_v13  ;;  %v1915_v29 = vrot.slane %v1914_v23, 4 }
 0x1a7   : >> { %v1517_v57 = vrot.slane %v1516_v32, 4  ;;  %v1534_v41 = vadd.f32 %v1533_v39, %v1532_v37 }
 0x1a8   : >> { %v1916_v33 = vadd.f32 %v1915_v29, %v1914_v23  ;;  %v1899_v38 = vrot.slane %v1898_v28, 2 }
 0x1a9   : >> { %v1518_v42 = vadd.f32 %v1517_v57, %v1516_v32  ;;  %v1535_v43 = vrot.slane %v1534_v41, 4 }
 0x1aa   : >> { %v1917_v21 = vrot.slane %v1916_v33, 2  ;;  %v1900_v44 = vadd.f32 %v1899_v38, %v1898_v28 }
 0x1ab   : >> { %v1519_v10 = vrot.slane %v1518_v42, 2  ;;  %v1536_v40 = vadd.f32 %v1535_v43, %v1534_v41 }
 0x1ac   : >> { %v1918_v46 = vadd.f32 %v1917_v21, %v1916_v33  ;;  %v1901_v47 = vrot.slane %v1900_v44, 1 }
 0x1ad   : >> { %v1520_v45 = vadd.f32 %v1519_v10, %v1518_v42  ;;  %v1537_v36 = vrot.slane %v1536_v40, 2 }
 0x1ae   : >> { %v1919_v53 = vrot.slane %v1918_v46, 1  ;;  %v1902_v54 = vadd.f32 %v1901_v47, %v1900_v44 }
 0x1af   : >> { %v1521_v49 = vrot.slane %v1520_v45, 1  ;;  %v1538_v50 = vadd.f32 %v1537_v36, %v1536_v40 }
 0x1b0   : >> { %v1920_v34 = vadd.f32 %v1919_v53, %v1918_v46 }
 0x1b1   : >> { %v1522_v52 = vadd.f32 %v1521_v49, %v1520_v45  ;;  %v1539_v55 = vrot.slane %v1538_v50, 1 }
 0x1b3   : >> { %v1523_v35 = vadd.f32 %v1522_v52, %v3509_v48  ;;  %v1540_v56 = vadd.f32 %v1539_v55, %v1538_v50  ;;  %395 = sbr.rel (!%p393_p5) target bundleno = 105 (0x69), region = 120 }
 0x1b5   : >> { %v1903_v58 = vadd.f32 %v1902_v54, %v1523_v35   ;;  %v1541_v59 = vadd.f32 %v1540_v56, %v3512_v51 }
 0x1b7   : >> { %v1921_v60 = vadd.f32 %v1920_v34, %v1541_v59   ;;  %v3679_v35 = vmov %v1903_v58  ;;  %v3555_v61 = vmul.f32 (%p393_p5), 0.00024414063, %v1903_v58 }
 0x1b9   : >> { %v3678_v34 = vmov %v1921_v60  ;;  %v1924_v62 = vmul.f32 (%p393_p5), 0.00024414063, %v1921_v60  ;;  %v1925_v48 = vmul.f32 (%p393_p5), %v3555_v61, %v3555_v61 }
 0x1bb   : > { %v1926_v63 = vsub.f32 %v1924_v62, %v1925_v48 }
 0x1bd   : > { %v1927_v0 = vadd.f32 1e-05, %v1926_v63 }
 0x1bf   : > { %2741 = vrsqrt.f32 %v1927_v0 }
 0x1c9   : > { %v3559_v51 = vpop.eup %2741 }
 0x1ca LB: >> { %s2383_s25 = sshll.u32 %s2789_s10, 5  ;;  %vm1972_vm13 = vcmask 11264   ;;  %s2792_s12 = smov 2   ;;  %vm2019_vm14 = vcmask 27664   ;;  %s2789_s10 = sphi %s3561_s10, %s1934_s10  }
 0x1cb   : >> { %s3569_s11 = scalar_lea.vmem [#allocation3], %s2383_s25  ;;  %s3625_s13 = scalar_lea.vmem %s3174_s19, %s2383_s25 }
 0x1cc   : >> { %v2393_v1 = vld [vmem:[%s3569_s11 + $0x410] sm:$0xff]  ;;  %v2391_v2 = vld [vmem:[%s3569_s11 + $0x400] sm:$0xff]  ;;  %v2394_v3 = vld [vmem:[%s3569_s11 + $0x418] sm:$0xff]  ;;  %s1934_s10 = sadd.s32 1, %s2789_s10  }
 0x1cd   : >> { %v1985_v4 = vsub.f32 %v2393_v1, %v3555_v61  ;;  %v1983_v6 = vsub.f32 %v2391_v2, %v3555_v61  ;;  %v1986_v7 = vsub.f32 %v2394_v3, %v3555_v61  ;;  %v2392_v8 = vld [vmem:[%s3569_s11 + $0x408] sm:$0xff]  ;;  %v2415_v12 = vld [vmem:[%s3569_s11 + $0xc00] sm:$0xff]  ;;  %v2418_v15 = vld [vmem:[%s3569_s11 + $0xc18] sm:$0xff]  ;;  %p1931_p6 = scmp.ge.s32.totalorder %s1934_s10, 32  }
 0x1ce   : >> { %v2416_v11 = vld [vmem:[%s3569_s11 + $0xc08] sm:$0xff]  ;;  %v1984_v13 = vsub.f32 %v2392_v8, %v3555_v61  ;;  %v2071_v9 = vsub.f32 %v2415_v12, %v3555_v61  ;;  %v2417_v16 = vld [vmem:[%s3569_s11 + $0xc10] sm:$0xff]  ;;  %v2074_v17 = vsub.f32 %v2418_v15, %v3555_v61  ;;  %v1937_v37 = vld [vmem:[%s3569_s11] sm:$0xff] }
 0x1cf   : >> { %v2072_v14 = vsub.f32 %v2416_v11, %v3555_v61  ;;  %v1989_v18 = vmul.f32 %v3559_v51, %v1985_v4  ;;  %v1987_v20 = vmul.f32 %v3559_v51, %v1983_v6  ;;  %v1990_v22 = vmul.f32 %v3559_v51, %v1986_v7  ;;  %v1939_v33 = vld [vmem:[%s3569_s11 + $0x10] sm:$0xff]  ;;  %v1940_v41 = vld [vmem:[%s3569_s11 + $0x18] sm:$0xff]  ;;  %v1938_v42 = vld [vmem:[%s3569_s11 + $0x8] sm:$0xff] }
 0x1d0   : >> { %v1988_v23 = vmul.f32 %v3559_v51, %v1984_v13  ;;  %v2075_v19 = vmul.f32 %v3559_v51, %v2071_v9  ;;  %v2073_v25 = vsub.f32 %v2417_v16, %v3555_v61  ;;  %v2078_v29 = vmul.f32 %v3559_v51, %v2074_v17  ;;  %v2401_v21 = vld [vmem:[%s3569_s11 + $0x808] sm:$0xff]  ;;  %v2400_v40 = vld [vmem:[%s3569_s11 + $0x800] sm:$0xff]  ;;  %v2403_v45 = vld [vmem:[%s3569_s11 + $0x818] sm:$0xff] }
 0x1d1   : >> { %v2076_v24 = vmul.f32 %v3559_v51, %v2072_v14  ;;  %v1993_v26 = vmax.f32 %v1989_v18, 0.0  ;;  %v1991_v27 = vmax.f32 %v1987_v20, 0.0  ;;  %v1994_v28 = vmax.f32 %v1990_v22, 0.0  ;;  %v2402_v50 = vld [vmem:[%s3569_s11 + $0x810] sm:$0xff] }
 0x1d2   : >> { %v1992_v30 = vmax.f32 %v1988_v23, 0.0  ;;  %v2079_v31 = vmax.f32 %v2075_v19, 0.0  ;;  %v2077_v32 = vmul.f32 %v3559_v51, %v2073_v25  ;;  %v2082_v57 = vmax.f32 %v2078_v29, 0.0 }
 0x1d3   : >> { %v2080_v5 = vmax.f32 %v2076_v24, 0.0  ;;  %v2440_v38 = vpack.c.bf16 %v1993_v26, %v1993_v26  ;;  %v2438_v39 = vpack.c.bf16 %v1991_v27, %v1991_v27  ;;  %v2441_v43 = vpack.c.bf16 %v1994_v28, %v1994_v28 }
 0x1d4   : >> { %v2439_v44 = vpack.c.bf16 %v1992_v30, %v1992_v30  ;;  %v2447_v46 = vpack.c.bf16 %v2079_v31, %v2079_v31  ;;  %v2081_v36 = vmax.f32 %v2077_v32, 0.0  ;;  %v1943_v47 = vsub.f32 %v1939_v33, %v3555_v61 }
 0x1d5   : >> { %v2448_v10 = vpack.c.bf16 %v2080_v5, %v2080_v5  ;;  %2011 = vrot.lane.b32.xlu1 %v2440_v38, %s2792_s12  ;;  %2007 = vrot.lane.b32.xlu0 %v2438_v39, %s2792_s12  ;;  %v1941_v49 = vsub.f32 %v1937_v37, %v3555_v61  ;;  %v2450_v52 = vpack.c.bf16 %v2082_v57, %v2082_v57 }
 0x1d6   : >> { %v1944_v53 = vsub.f32 %v1940_v41, %v3555_v61  ;;  %v1942_v55 = vsub.f32 %v1938_v42, %v3555_v61  ;;  %v2031_v54 = vsub.f32 %v2401_v21, %v3555_v61  ;;  %v1947_v35 = vmul.f32 %v3559_v51, %v1943_v47 }
 0x1d7   : >> { %v1945_v56 = vmul.f32 %v3559_v51, %v1941_v49  ;;  %v2030_v58 = vsub.f32 %v2400_v40, %v3555_v61  ;;  %v2033_v34 = vsub.f32 %v2403_v45, %v3555_v61  ;;  %v2032_v48 = vsub.f32 %v2402_v50, %v3555_v61 }
 0x1d8   : >> { %v1948_v59 = vmul.f32 %v3559_v51, %v1944_v53  ;;  %v1946_v60 = vmul.f32 %v3559_v51, %v1942_v55  ;;  %v2035_v62 = vmul.f32 %v3559_v51, %v2031_v54  ;;  %v1951_v63 = vmax.f32 %v1947_v35, 0.0 }
 0x1d9   : >> { %2013 = vrot.lane.b32.xlu1 %v2441_v43, %s2792_s12  ;;  %2009 = vrot.lane.b32.xlu0 %v2439_v44, %s2792_s12  ;;  %v1949_v0 = vmax.f32 %v1945_v56, 0.0  ;;  %v2034_v1 = vmul.f32 %v3559_v51, %v2030_v58  ;;  %v2037_v2 = vmul.f32 %v3559_v51, %v2033_v34  ;;  %v2036_v7 = vmul.f32 %v3559_v51, %v2032_v48 }
 0x1da   : >> { %v1952_v3 = vmax.f32 %v1948_v59, 0.0  ;;  %v1950_v4 = vmax.f32 %v1946_v60, 0.0  ;;  %v2039_v6 = vmax.f32 %v2035_v62, 0.0  ;;  %v2435_v8 = vpack.c.bf16 %v1951_v63, %v1951_v63 }
 0x1db   : >> { %v2433_v11 = vpack.c.bf16 %v1949_v0, %v1949_v0  ;;  %v2038_v12 = vmax.f32 %v2034_v1, 0.0  ;;  %v2041_v13 = vmax.f32 %v2037_v2, 0.0  ;;  %v2040_v16 = vmax.f32 %v2036_v7, 0.0 }
 0x1dc   : >> { %v2436_v14 = vpack.c.bf16 %v1952_v3, %v1952_v3  ;;  %v2434_v9 = vpack.c.bf16 %v1950_v4, %v1950_v4  ;;  %v2443_v15 = vpack.c.bf16 %v2039_v6, %v2039_v6  ;;  %v2449_v18 = vpack.c.bf16 %v2081_v36, %v2081_v36  ;;  %1975 = vst.msk [vmem:[%s3625_s13 + $0x8] sm:$0xf] %vm1972_vm13, %v2435_v8 }
 0x1dd   : >> { %2097 = vrot.lane.b32.xlu1 %v2448_v10, %s2792_s12  ;;  %2095 = vrot.lane.b32.xlu0 %v2447_v46, %s2792_s12  ;;  %1973 = vst.msk [vmem:[%s3625_s13] sm:$0xf] %vm1972_vm13, %v2433_v11  ;;  %v2442_v20 = vpack.c.bf16 %v2038_v12, %v2038_v12  ;;  %v2445_v22 = vpack.c.bf16 %v2041_v13, %v2041_v13 }
 0x1de   : >> { %1976 = vst.msk [vmem:[%s3625_s13 + $0xc] sm:$0xf] %vm1972_vm13, %v2436_v14  ;;  %1974 = vst.msk [vmem:[%s3625_s13 + $0x4] sm:$0xf] %vm1972_vm13, %v2434_v9  ;;  %v2444_v17 = vpack.c.bf16 %v2040_v16, %v2040_v16 }
 0x1df   : >> { %2411 = vst.msk [vmem:[%s3625_s13 + $0x14] sm:$0xf] %vm1972_vm13, %v2443_v15  ;;  %2410 = vst.msk [vmem:[%s3625_s13 + $0x10] sm:$0xf] %vm1972_vm13, %v2442_v20 }
 0x1e0   : >> { %2413 = vst.msk [vmem:[%s3625_s13 + $0x1c] sm:$0xf] %vm1972_vm13, %v2445_v22  ;;  %2412 = vst.msk [vmem:[%s3625_s13 + $0x18] sm:$0xf] %vm1972_vm13, %v2444_v17 }
 0x1e1   : >> { %2101 = vrot.lane.b32.xlu1 %v2450_v52, %s2792_s12  ;;  %2099 = vrot.lane.b32.xlu0 %v2449_v18, %s2792_s12 }
 0x247   : >> { %v2012_v23 = vpop.permute.xlu1 %2011  ;;  %v2008_v24 = vpop.permute.xlu0 %2007 }
 0x248   : >> { %2022 = vst.msk [vmem:[%s3625_s13 + $0x8] sm:$0xf] %vm2019_vm14, %v2012_v23  ;;  %2020 = vst.msk [vmem:[%s3625_s13] sm:$0xf] %vm2019_vm14, %v2008_v24 }
 0x24b   : >> { %v2014_v19 = vpop.permute.xlu1 %2013  ;;  %v2010_v25 = vpop.permute.xlu0 %2009 }
 0x24c   : >> { %2023 = vst.msk [vmem:[%s3625_s13 + $0xc] sm:$0xf] %vm2019_vm14, %v2014_v19  ;;  %2021 = vst.msk [vmem:[%s3625_s13 + $0x4] sm:$0xf] %vm2019_vm14, %v2010_v25 }
 0x24e   : > { %1933 = sbr.rel (!%p1931_p6) target bundleno = 458 (0x1ca), region = 131 }
 0x24f   : >> { %v2098_v26 = vpop.permute.xlu1 %2097  ;;  %v2096_v27 = vpop.permute.xlu0 %2095 }
 0x250   : >> { %2424 = vst.msk [vmem:[%s3625_s13 + $0x14] sm:$0xf] %vm2019_vm14, %v2098_v26  ;;  %2423 = vst.msk [vmem:[%s3625_s13 + $0x10] sm:$0xf] %vm2019_vm14, %v2096_v27 }
 0x253   : >> { %v2102_v28 = vpop.permute.xlu1 %2101  ;;  %v2100_v29 = vpop.permute.xlu0 %2099 }
 0x254   : >> { %2426 = vst.msk [vmem:[%s3625_s13 + $0x1c] sm:$0xf] %vm2019_vm14, %v2102_v28  ;;  %2425 = vst.msk [vmem:[%s3625_s13 + $0x18] sm:$0xf] %vm2019_vm14, %v2100_v29 }
 0x255 PF: > { %s12_s9 = sadd.s32 1, %s2769_s9  }
 0x256   : > { %p9_p7 = scmp.ge.s32.totalorder %s12_s9, 4  }
 0x258   :  { %11 = sbr.rel (!%p9_p7) target bundleno = 1 (0x1), region = 142 }

// kernel: dc_decoder_forward.11
= control target key start
LH: loop header
LB: loop body
LE: loop exit
PB: predicated region body
PF: predicated region fallthrough
CT: control target
= control target key end

     0   :  { %s3906_s9 = smov 0   ;;  %s5645_s0 = inlined_call_operand.vmem [shape: bf16[2,64,64,2], index: 0, kind: input, shape index: {}]   ;;  %s5646_s1 = inlined_call_operand.vmem [shape: bf16[4,4,2,1], index: 1, kind: input, shape index: {}]   ;;  %s5647_s2 = inlined_call_operand.vmem [shape: f32[2,64,2,64,2], index: 2, kind: output, shape index: {}]  }
   0x1 LB: > { %s3120_s10 = sadd.s32 4294967295, %s3879_s9   ;;  %p3124_p0 = scmp.ge.s32.totalorder %s3879_s9, 1  ;;  %s3879_s9 = sphi %s3906_s9, %s12_s9  }
   0x2   : > { %p112_p1 = scmp.lt.s32.totalorder %s3879_s9, 3 }
   0x4   : > { %p113_p2 = pnand %p3124_p0, %p112_p1 }
   0x5   : > { %p3916_p3 = scmp.lt.s32.totalorder (!%p113_p2), %s3120_s10, 1  ;;  %vm145_vm0 = vcmask (!%p113_p2), 11264   ;;  %vm154_vm1 = vcmask (!%p113_p2), 8192   ;;  %v3889_v0 = vmov (!%p113_p2), 0   ;;  %s5122_s20 = smov (!%p113_p2), 0  }
   0x6   : > { %116 = sbr.rel (%p113_p2) target bundleno = 803 (0x323), region = 28  ;;  %146 = vst.msk [vmem:[#allocation2] sm:$0xf] (!%p113_p2), %vm145_vm0, %v3889_v0  ;;  %147 = vst.msk [vmem:[#allocation2 + $0x4] sm:$0xf] (!%p113_p2), %vm145_vm0, %v3889_v0 }
   0x7   : > { %148 = vst.msk [vmem:[#allocation2 + $0x8] sm:$0xf] (!%p113_p2), %vm145_vm0, %v3889_v0  ;;  %149 = vst.msk [vmem:[#allocation2 + $0xc] sm:$0xf] (!%p113_p2), %vm145_vm0, %v3889_v0 }
   0x8   : > { %150 = vst.msk [vmem:[#allocation2 + $0x10] sm:$0xf] (!%p113_p2), %vm145_vm0, %v3889_v0  ;;  %151 = vst.msk [vmem:[#allocation2 + $0x14] sm:$0xf] (!%p113_p2), %vm145_vm0, %v3889_v0 }
   0x9   : > { %152 = vst.msk [vmem:[#allocation2 + $0x18] sm:$0xf] (!%p113_p2), %vm145_vm0, %v3889_v0  ;;  %153 = vst.msk [vmem:[#allocation2 + $0x1c] sm:$0xf] (!%p113_p2), %vm145_vm0, %v3889_v0 }
   0xa   : > { %156 = vst.msk [vmem:[#allocation2 + $0x24] sm:$0xf] (!%p113_p2), %vm145_vm0, %v3889_v0  ;;  %157 = vst.msk [vmem:[#allocation2 + $0x28] sm:$0xf] (!%p113_p2), %vm145_vm0, %v3889_v0 }
   0xb   : > { %158 = vst.msk [vmem:[#allocation2 + $0x2c] sm:$0xf] (!%p113_p2), %vm145_vm0, %v3889_v0  ;;  %159 = vst.msk [vmem:[#allocation2 + $0x30] sm:$0xf] (!%p113_p2), %vm145_vm0, %v3889_v0 }
   0xc   : > { %160 = vst.msk [vmem:[#allocation2 + $0x34] sm:$0xf] (!%p113_p2), %vm145_vm0, %v3889_v0  ;;  %161 = vst.msk [vmem:[#allocation2 + $0x38] sm:$0xf] (!%p113_p2), %vm145_vm0, %v3889_v0 }
   0xd   : > { %162 = vst.msk [vmem:[#allocation2 + $0x3c] sm:$0xf] %vm145_vm0, %v3889_v0  ;;  %163 = vst.msk [vmem:[#allocation2 + $0x40] sm:$0xf] %vm145_vm0, %v3889_v0  ;;  %s5654_s10 = smov (!%p3916_p3, %s3120_s10), 1 }
   0xe   : > { %165 = vst.msk [vmem:[#allocation2 + $0x48] sm:$0xf] %vm145_vm0, %v3889_v0  ;;  %166 = vst.msk [vmem:[#allocation2 + $0x4c] sm:$0xf] %vm145_vm0, %v3889_v0  ;;  %s3367_s12 = sshll.u32 %s5654_s10, 11  ;;  %s3368_s13 = sshll.u32 %s5654_s10, 13 }
   0xf   : > { %167 = vst.msk [vmem:[#allocation2 + $0x50] sm:$0xf] %vm145_vm0, %v3889_v0  ;;  %168 = vst.msk [vmem:[#allocation2 + $0x54] sm:$0xf] %vm145_vm0, %v3889_v0  ;;  %s5115_s16 = scalar_lea.vmem %s5645_s0, %s3367_s12  ;;  %s5120_s19 = scalar_lea.vmem %s5647_s2, %s3368_s13 }
  0x10   : > { %169 = vst.msk [vmem:[#allocation2 + $0x58] sm:$0xf] %vm145_vm0, %v3889_v0  ;;  %170 = vst.msk [vmem:[#allocation2 + $0x5c] sm:$0xf] %vm145_vm0, %v3889_v0 }
  0x11   : > { %171 = vst.msk [vmem:[#allocation2 + $0x60] sm:$0xf] %vm145_vm0, %v3889_v0  ;;  %172 = vst.msk [vmem:[#allocation2 + $0x64] sm:$0xf] %vm145_vm0, %v3889_v0 }
  0x12   : > { %174 = vst.msk [vmem:[#allocation2 + $0x6c] sm:$0xf] %vm145_vm0, %v3889_v0  ;;  %175 = vst.msk [vmem:[#allocation2 + $0x70] sm:$0xf] %vm145_vm0, %v3889_v0 }
  0x13   : > { %176 = vst.msk [vmem:[#allocation2 + $0x74] sm:$0xf] %vm145_vm0, %v3889_v0  ;;  %177 = vst.msk [vmem:[#allocation2 + $0x78] sm:$0xf] %vm145_vm0, %v3889_v0 }
  0x14   : > { %178 = vst.msk [vmem:[#allocation2 + $0x7c] sm:$0xf] %vm145_vm0, %v3889_v0  ;;  %179 = vst.msk [vmem:[#allocation2 + $0x80] sm:$0xf] %vm145_vm0, %v3889_v0 }
  0x15   : > { %180 = vst.msk [vmem:[#allocation2 + $0x84] sm:$0xf] %vm145_vm0, %v3889_v0  ;;  %181 = vst.msk [vmem:[#allocation2 + $0x88] sm:$0xf] %vm145_vm0, %v3889_v0 }
  0x16   : > { %183 = vst.msk [vmem:[#allocation2 + $0x90] sm:$0xf] %vm145_vm0, %v3889_v0  ;;  %184 = vst.msk [vmem:[#allocation2 + $0x94] sm:$0xf] %vm145_vm0, %v3889_v0 }
  0x17   : > { %185 = vst.msk [vmem:[#allocation2 + $0x98] sm:$0xf] %vm145_vm0, %v3889_v0  ;;  %186 = vst.msk [vmem:[#allocation2 + $0x9c] sm:$0xf] %vm145_vm0, %v3889_v0 }
  0x18   : > { %187 = vst.msk [vmem:[#allocation2 + $0xa0] sm:$0xf] %vm145_vm0, %v3889_v0  ;;  %188 = vst.msk [vmem:[#allocation2 + $0xa4] sm:$0xf] %vm145_vm0, %v3889_v0 }
  0x19   : > { %189 = vst.msk [vmem:[#allocation2 + $0xa8] sm:$0xf] %vm145_vm0, %v3889_v0  ;;  %190 = vst.msk [vmem:[#allocation2 + $0xac] sm:$0xf] %vm145_vm0, %v3889_v0 }
  0x1a   : > { %192 = vst.msk [vmem:[#allocation2 + $0xb4] sm:$0xf] %vm145_vm0, %v3889_v0  ;;  %193 = vst.msk [vmem:[#allocation2 + $0xb8] sm:$0xf] %vm145_vm0, %v3889_v0 }
  0x1b   : > { %194 = vst.msk [vmem:[#allocation2 + $0xbc] sm:$0xf] %vm145_vm0, %v3889_v0  ;;  %195 = vst.msk [vmem:[#allocation2 + $0xc0] sm:$0xf] %vm145_vm0, %v3889_v0 }
  0x1c   : > { %196 = vst.msk [vmem:[#allocation2 + $0xc4] sm:$0xf] %vm145_vm0, %v3889_v0  ;;  %197 = vst.msk [vmem:[#allocation2 + $0xc8] sm:$0xf] %vm145_vm0, %v3889_v0 }
  0x1d   : > { %198 = vst.msk [vmem:[#allocation2 + $0xcc] sm:$0xf] %vm145_vm0, %v3889_v0  ;;  %199 = vst.msk [vmem:[#allocation2 + $0xd0] sm:$0xf] %vm145_vm0, %v3889_v0 }
  0x1e   : > { %201 = vst.msk [vmem:[#allocation2 + $0xd8] sm:$0xf] %vm145_vm0, %v3889_v0  ;;  %202 = vst.msk [vmem:[#allocation2 + $0xdc] sm:$0xf] %vm145_vm0, %v3889_v0 }
  0x1f   : > { %203 = vst.msk [vmem:[#allocation2 + $0xe0] sm:$0xf] %vm145_vm0, %v3889_v0  ;;  %204 = vst.msk [vmem:[#allocation2 + $0xe4] sm:$0xf] %vm145_vm0, %v3889_v0 }
  0x20   : > { %205 = vst.msk [vmem:[#allocation2 + $0xe8] sm:$0xf] %vm145_vm0, %v3889_v0  ;;  %206 = vst.msk [vmem:[#allocation2 + $0xec] sm:$0xf] %vm145_vm0, %v3889_v0 }
  0x21   : > { %207 = vst.msk [vmem:[#allocation2 + $0xf0] sm:$0xf] %vm145_vm0, %v3889_v0  ;;  %208 = vst.msk [vmem:[#allocation2 + $0xf4] sm:$0xf] %vm145_vm0, %v3889_v0 }
  0x22   : > { %210 = vst.msk [vmem:[#allocation2 + $0xfc] sm:$0xf] %vm145_vm0, %v3889_v0  ;;  %211 = vst.msk [vmem:[#allocation2 + $0x100] sm:$0xf] %vm145_vm0, %v3889_v0 }
  0x23   : > { %212 = vst.msk [vmem:[#allocation2 + $0x104] sm:$0xf] %vm145_vm0, %v3889_v0  ;;  %213 = vst.msk [vmem:[#allocation2 + $0x108] sm:$0xf] %vm145_vm0, %v3889_v0 }
  0x24   : > { %214 = vst.msk [vmem:[#allocation2 + $0x10c] sm:$0xf] %vm145_vm0, %v3889_v0  ;;  %215 = vst.msk [vmem:[#allocation2 + $0x110] sm:$0xf] %vm145_vm0, %v3889_v0 }
  0x25   : > { %216 = vst.msk [vmem:[#allocation2 + $0x114] sm:$0xf] %vm145_vm0, %v3889_v0  ;;  %217 = vst.msk [vmem:[#allocation2 + $0x118] sm:$0xf] %vm145_vm0, %v3889_v0 }
  0x26   : > { %219 = vst.msk [vmem:[#allocation2 + $0x120] sm:$0xf] %vm145_vm0, %v3889_v0  ;;  %220 = vst.msk [vmem:[#allocation2 + $0x124] sm:$0xf] %vm145_vm0, %v3889_v0 }
  0x27   : > { %221 = vst.msk [vmem:[#allocation2 + $0x128] sm:$0xf] %vm145_vm0, %v3889_v0  ;;  %222 = vst.msk [vmem:[#allocation2 + $0x12c] sm:$0xf] %vm145_vm0, %v3889_v0 }
  0x28   : > { %223 = vst.msk [vmem:[#allocation2 + $0x130] sm:$0xf] %vm145_vm0, %v3889_v0  ;;  %224 = vst.msk [vmem:[#allocation2 + $0x134] sm:$0xf] %vm145_vm0, %v3889_v0 }
  0x29   : > { %225 = vst.msk [vmem:[#allocation2 + $0x138] sm:$0xf] %vm145_vm0, %v3889_v0  ;;  %226 = vst.msk [vmem:[#allocation2 + $0x13c] sm:$0xf] %vm145_vm0, %v3889_v0 }
  0x2a   : > { %228 = vst.msk [vmem:[#allocation2 + $0x144] sm:$0xf] %vm145_vm0, %v3889_v0  ;;  %229 = vst.msk [vmem:[#allocation2 + $0x148] sm:$0xf] %vm145_vm0, %v3889_v0 }
  0x2b   : > { %230 = vst.msk [vmem:[#allocation2 + $0x14c] sm:$0xf] %vm145_vm0, %v3889_v0  ;;  %231 = vst.msk [vmem:[#allocation2 + $0x150] sm:$0xf] %vm145_vm0, %v3889_v0 }
  0x2c   : > { %232 = vst.msk [vmem:[#allocation2 + $0x154] sm:$0xf] %vm145_vm0, %v3889_v0  ;;  %233 = vst.msk [vmem:[#allocation2 + $0x158] sm:$0xf] %vm145_vm0, %v3889_v0 }
  0x2d   : > { %234 = vst.msk [vmem:[#allocation2 + $0x15c] sm:$0xf] %vm145_vm0, %v3889_v0  ;;  %235 = vst.msk [vmem:[#allocation2 + $0x160] sm:$0xf] %vm145_vm0, %v3889_v0 }
  0x2e   : > { %237 = vst.msk [vmem:[#allocation2 + $0x168] sm:$0xf] %vm145_vm0, %v3889_v0  ;;  %238 = vst.msk [vmem:[#allocation2 + $0x16c] sm:$0xf] %vm145_vm0, %v3889_v0 }
  0x2f   : > { %239 = vst.msk [vmem:[#allocation2 + $0x170] sm:$0xf] %vm145_vm0, %v3889_v0  ;;  %240 = vst.msk [vmem:[#allocation2 + $0x174] sm:$0xf] %vm145_vm0, %v3889_v0 }
  0x30   : > { %241 = vst.msk [vmem:[#allocation2 + $0x178] sm:$0xf] %vm145_vm0, %v3889_v0  ;;  %242 = vst.msk [vmem:[#allocation2 + $0x17c] sm:$0xf] %vm145_vm0, %v3889_v0 }
  0x31   : > { %243 = vst.msk [vmem:[#allocation2 + $0x180] sm:$0xf] %vm145_vm0, %v3889_v0  ;;  %244 = vst.msk [vmem:[#allocation2 + $0x184] sm:$0xf] %vm145_vm0, %v3889_v0 }
  0x32   : > { %246 = vst.msk [vmem:[#allocation2 + $0x18c] sm:$0xf] %vm145_vm0, %v3889_v0  ;;  %247 = vst.msk [vmem:[#allocation2 + $0x190] sm:$0xf] %vm145_vm0, %v3889_v0 }
  0x33   : > { %248 = vst.msk [vmem:[#allocation2 + $0x194] sm:$0xf] %vm145_vm0, %v3889_v0  ;;  %249 = vst.msk [vmem:[#allocation2 + $0x198] sm:$0xf] %vm145_vm0, %v3889_v0 }
  0x34   : > { %250 = vst.msk [vmem:[#allocation2 + $0x19c] sm:$0xf] %vm145_vm0, %v3889_v0  ;;  %251 = vst.msk [vmem:[#allocation2 + $0x1a0] sm:$0xf] %vm145_vm0, %v3889_v0 }
  0x35   : > { %252 = vst.msk [vmem:[#allocation2 + $0x1a4] sm:$0xf] %vm145_vm0, %v3889_v0  ;;  %253 = vst.msk [vmem:[#allocation2 + $0x1a8] sm:$0xf] %vm145_vm0, %v3889_v0 }
  0x36   : > { %255 = vst.msk [vmem:[#allocation2 + $0x1b0] sm:$0xf] %vm145_vm0, %v3889_v0  ;;  %256 = vst.msk [vmem:[#allocation2 + $0x1b4] sm:$0xf] %vm145_vm0, %v3889_v0 }
  0x37   : > { %257 = vst.msk [vmem:[#allocation2 + $0x1b8] sm:$0xf] %vm145_vm0, %v3889_v0  ;;  %258 = vst.msk [vmem:[#allocation2 + $0x1bc] sm:$0xf] %vm145_vm0, %v3889_v0 }
  0x38   : > { %259 = vst.msk [vmem:[#allocation2 + $0x1c0] sm:$0xf] %vm145_vm0, %v3889_v0  ;;  %260 = vst.msk [vmem:[#allocation2 + $0x1c4] sm:$0xf] %vm145_vm0, %v3889_v0 }
  0x39   : > { %261 = vst.msk [vmem:[#allocation2 + $0x1c8] sm:$0xf] %vm145_vm0, %v3889_v0  ;;  %262 = vst.msk [vmem:[#allocation2 + $0x1cc] sm:$0xf] %vm145_vm0, %v3889_v0 }
  0x3a   : > { %264 = vst.msk [vmem:[#allocation2 + $0x1d4] sm:$0xf] %vm145_vm0, %v3889_v0  ;;  %265 = vst.msk [vmem:[#allocation2 + $0x1d8] sm:$0xf] %vm145_vm0, %v3889_v0 }
  0x3b   : > { %266 = vst.msk [vmem:[#allocation2 + $0x1dc] sm:$0xf] %vm145_vm0, %v3889_v0  ;;  %267 = vst.msk [vmem:[#allocation2 + $0x1e0] sm:$0xf] %vm145_vm0, %v3889_v0 }
  0x3c   : > { %268 = vst.msk [vmem:[#allocation2 + $0x1e4] sm:$0xf] %vm145_vm0, %v3889_v0  ;;  %269 = vst.msk [vmem:[#allocation2 + $0x1e8] sm:$0xf] %vm145_vm0, %v3889_v0 }
  0x3d   : > { %270 = vst.msk [vmem:[#allocation2 + $0x1ec] sm:$0xf] %vm145_vm0, %v3889_v0  ;;  %271 = vst.msk [vmem:[#allocation2 + $0x1f0] sm:$0xf] %vm145_vm0, %v3889_v0 }
  0x3e   : > { %273 = vst.msk [vmem:[#allocation2 + $0x1f8] sm:$0xf] %vm145_vm0, %v3889_v0  ;;  %274 = vst.msk [vmem:[#allocation2 + $0x1fc] sm:$0xf] %vm145_vm0, %v3889_v0 }
  0x3f   : > { %275 = vst.msk [vmem:[#allocation2 + $0x200] sm:$0xf] %vm145_vm0, %v3889_v0  ;;  %276 = vst.msk [vmem:[#allocation2 + $0x204] sm:$0xf] %vm145_vm0, %v3889_v0 }
  0x40   : > { %277 = vst.msk [vmem:[#allocation2 + $0x208] sm:$0xf] %vm145_vm0, %v3889_v0  ;;  %278 = vst.msk [vmem:[#allocation2 + $0x20c] sm:$0xf] %vm145_vm0, %v3889_v0 }
  0x41   : > { %279 = vst.msk [vmem:[#allocation2 + $0x210] sm:$0xf] %vm145_vm0, %v3889_v0  ;;  %280 = vst.msk [vmem:[#allocation2 + $0x214] sm:$0xf] %vm145_vm0, %v3889_v0 }
  0x42   : > { %282 = vst.msk [vmem:[#allocation2 + $0x21c] sm:$0xf] %vm145_vm0, %v3889_v0  ;;  %283 = vst.msk [vmem:[#allocation2 + $0x220] sm:$0xf] %vm145_vm0, %v3889_v0 }
  0x43   : > { %284 = vst.msk [vmem:[#allocation2 + $0x224] sm:$0xf] %vm145_vm0, %v3889_v0  ;;  %285 = vst.msk [vmem:[#allocation2 + $0x228] sm:$0xf] %vm145_vm0, %v3889_v0 }
  0x44   : > { %286 = vst.msk [vmem:[#allocation2 + $0x22c] sm:$0xf] %vm145_vm0, %v3889_v0  ;;  %287 = vst.msk [vmem:[#allocation2 + $0x230] sm:$0xf] %vm145_vm0, %v3889_v0 }
  0x45   : > { %288 = vst.msk [vmem:[#allocation2 + $0x234] sm:$0xf] %vm145_vm0, %v3889_v0  ;;  %289 = vst.msk [vmem:[#allocation2 + $0x238] sm:$0xf] %vm145_vm0, %v3889_v0 }
  0x46   : > { %291 = vst.msk [vmem:[#allocation2 + $0x240] sm:$0xf] %vm145_vm0, %v3889_v0  ;;  %292 = vst.msk [vmem:[#allocation2 + $0x244] sm:$0xf] %vm145_vm0, %v3889_v0 }
  0x47   : > { %293 = vst.msk [vmem:[#allocation2 + $0x248] sm:$0xf] %vm145_vm0, %v3889_v0  ;;  %294 = vst.msk [vmem:[#allocation2 + $0x24c] sm:$0xf] %vm145_vm0, %v3889_v0 }
  0x48   : > { %295 = vst.msk [vmem:[#allocation2 + $0x250] sm:$0xf] %vm145_vm0, %v3889_v0  ;;  %296 = vst.msk [vmem:[#allocation2 + $0x254] sm:$0xf] %vm145_vm0, %v3889_v0 }
  0x49   : > { %297 = vst.msk [vmem:[#allocation2 + $0x258] sm:$0xf] %vm145_vm0, %v3889_v0  ;;  %298 = vst.msk [vmem:[#allocation2 + $0x25c] sm:$0xf] %vm145_vm0, %v3889_v0 }
  0x4a   : > { %300 = vst.msk [vmem:[#allocation2 + $0x264] sm:$0xf] %vm145_vm0, %v3889_v0  ;;  %301 = vst.msk [vmem:[#allocation2 + $0x268] sm:$0xf] %vm145_vm0, %v3889_v0 }
  0x4b   : > { %302 = vst.msk [vmem:[#allocation2 + $0x26c] sm:$0xf] %vm145_vm0, %v3889_v0  ;;  %303 = vst.msk [vmem:[#allocation2 + $0x270] sm:$0xf] %vm145_vm0, %v3889_v0 }
  0x4c   : > { %304 = vst.msk [vmem:[#allocation2 + $0x274] sm:$0xf] %vm145_vm0, %v3889_v0  ;;  %305 = vst.msk [vmem:[#allocation2 + $0x278] sm:$0xf] %vm145_vm0, %v3889_v0 }
  0x4d   : > { %306 = vst.msk [vmem:[#allocation2 + $0x27c] sm:$0xf] %vm145_vm0, %v3889_v0  ;;  %307 = vst.msk [vmem:[#allocation2 + $0x280] sm:$0xf] %vm145_vm0, %v3889_v0 }
  0x4e   : > { %309 = vst.msk [vmem:[#allocation2 + $0x288] sm:$0xf] %vm145_vm0, %v3889_v0  ;;  %310 = vst.msk [vmem:[#allocation2 + $0x28c] sm:$0xf] %vm145_vm0, %v3889_v0 }
  0x4f   : > { %311 = vst.msk [vmem:[#allocation2 + $0x290] sm:$0xf] %vm145_vm0, %v3889_v0  ;;  %312 = vst.msk [vmem:[#allocation2 + $0x294] sm:$0xf] %vm145_vm0, %v3889_v0 }
  0x50   : > { %313 = vst.msk [vmem:[#allocation2 + $0x298] sm:$0xf] %vm145_vm0, %v3889_v0  ;;  %314 = vst.msk [vmem:[#allocation2 + $0x29c] sm:$0xf] %vm145_vm0, %v3889_v0 }
  0x51   : > { %315 = vst.msk [vmem:[#allocation2 + $0x2a0] sm:$0xf] %vm145_vm0, %v3889_v0  ;;  %316 = vst.msk [vmem:[#allocation2 + $0x2a4] sm:$0xf] %vm145_vm0, %v3889_v0 }
  0x52   : > { %318 = vst.msk [vmem:[#allocation2 + $0x2ac] sm:$0xf] %vm145_vm0, %v3889_v0  ;;  %319 = vst.msk [vmem:[#allocation2 + $0x2b0] sm:$0xf] %vm145_vm0, %v3889_v0 }
  0x53   : > { %320 = vst.msk [vmem:[#allocation2 + $0x2b4] sm:$0xf] %vm145_vm0, %v3889_v0  ;;  %321 = vst.msk [vmem:[#allocation2 + $0x2b8] sm:$0xf] %vm145_vm0, %v3889_v0 }
  0x54   : > { %322 = vst.msk [vmem:[#allocation2 + $0x2bc] sm:$0xf] %vm145_vm0, %v3889_v0  ;;  %323 = vst.msk [vmem:[#allocation2 + $0x2c0] sm:$0xf] %vm145_vm0, %v3889_v0 }
  0x55   : > { %324 = vst.msk [vmem:[#allocation2 + $0x2c4] sm:$0xf] %vm145_vm0, %v3889_v0  ;;  %325 = vst.msk [vmem:[#allocation2 + $0x2c8] sm:$0xf] %vm145_vm0, %v3889_v0 }
  0x56   : > { %327 = vst.msk [vmem:[#allocation2 + $0x2d0] sm:$0xf] %vm145_vm0, %v3889_v0  ;;  %328 = vst.msk [vmem:[#allocation2 + $0x2d4] sm:$0xf] %vm145_vm0, %v3889_v0 }
  0x57   : > { %329 = vst.msk [vmem:[#allocation2 + $0x2d8] sm:$0xf] %vm145_vm0, %v3889_v0  ;;  %330 = vst.msk [vmem:[#allocation2 + $0x2dc] sm:$0xf] %vm145_vm0, %v3889_v0 }
  0x58   : > { %331 = vst.msk [vmem:[#allocation2 + $0x2e0] sm:$0xf] %vm145_vm0, %v3889_v0  ;;  %332 = vst.msk [vmem:[#allocation2 + $0x2e4] sm:$0xf] %vm145_vm0, %v3889_v0 }
  0x59   : > { %333 = vst.msk [vmem:[#allocation2 + $0x2e8] sm:$0xf] %vm145_vm0, %v3889_v0  ;;  %334 = vst.msk [vmem:[#allocation2 + $0x2ec] sm:$0xf] %vm145_vm0, %v3889_v0 }
  0x5a   : > { %336 = vst.msk [vmem:[#allocation2 + $0x2f4] sm:$0xf] %vm145_vm0, %v3889_v0  ;;  %337 = vst.msk [vmem:[#allocation2 + $0x2f8] sm:$0xf] %vm145_vm0, %v3889_v0 }
  0x5b   : > { %338 = vst.msk [vmem:[#allocation2 + $0x2fc] sm:$0xf] %vm145_vm0, %v3889_v0  ;;  %339 = vst.msk [vmem:[#allocation2 + $0x300] sm:$0xf] %vm145_vm0, %v3889_v0 }
  0x5c   : > { %340 = vst.msk [vmem:[#allocation2 + $0x304] sm:$0xf] %vm145_vm0, %v3889_v0  ;;  %341 = vst.msk [vmem:[#allocation2 + $0x308] sm:$0xf] %vm145_vm0, %v3889_v0 }
  0x5d   : > { %342 = vst.msk [vmem:[#allocation2 + $0x30c] sm:$0xf] %vm145_vm0, %v3889_v0  ;;  %343 = vst.msk [vmem:[#allocation2 + $0x310] sm:$0xf] %vm145_vm0, %v3889_v0 }
  0x5e   : > { %345 = vst.msk [vmem:[#allocation2 + $0x318] sm:$0xf] %vm145_vm0, %v3889_v0  ;;  %346 = vst.msk [vmem:[#allocation2 + $0x31c] sm:$0xf] %vm145_vm0, %v3889_v0 }
  0x5f   : > { %347 = vst.msk [vmem:[#allocation2 + $0x320] sm:$0xf] %vm145_vm0, %v3889_v0  ;;  %348 = vst.msk [vmem:[#allocation2 + $0x324] sm:$0xf] %vm145_vm0, %v3889_v0 }
  0x60   : > { %349 = vst.msk [vmem:[#allocation2 + $0x328] sm:$0xf] %vm145_vm0, %v3889_v0  ;;  %350 = vst.msk [vmem:[#allocation2 + $0x32c] sm:$0xf] %vm145_vm0, %v3889_v0 }
  0x61   : > { %351 = vst.msk [vmem:[#allocation2 + $0x330] sm:$0xf] %vm145_vm0, %v3889_v0  ;;  %352 = vst.msk [vmem:[#allocation2 + $0x334] sm:$0xf] %vm145_vm0, %v3889_v0 }
  0x62   : > { %354 = vst.msk [vmem:[#allocation2 + $0x33c] sm:$0xf] %vm145_vm0, %v3889_v0  ;;  %355 = vst.msk [vmem:[#allocation2 + $0x340] sm:$0xf] %vm145_vm0, %v3889_v0 }
  0x63   : > { %356 = vst.msk [vmem:[#allocation2 + $0x344] sm:$0xf] %vm145_vm0, %v3889_v0  ;;  %357 = vst.msk [vmem:[#allocation2 + $0x348] sm:$0xf] %vm145_vm0, %v3889_v0 }
  0x64   : > { %358 = vst.msk [vmem:[#allocation2 + $0x34c] sm:$0xf] %vm145_vm0, %v3889_v0  ;;  %359 = vst.msk [vmem:[#allocation2 + $0x350] sm:$0xf] %vm145_vm0, %v3889_v0 }
  0x65   : > { %360 = vst.msk [vmem:[#allocation2 + $0x354] sm:$0xf] %vm145_vm0, %v3889_v0  ;;  %361 = vst.msk [vmem:[#allocation2 + $0x358] sm:$0xf] %vm145_vm0, %v3889_v0 }
  0x66   : > { %363 = vst.msk [vmem:[#allocation2 + $0x360] sm:$0xf] %vm145_vm0, %v3889_v0  ;;  %364 = vst.msk [vmem:[#allocation2 + $0x364] sm:$0xf] %vm145_vm0, %v3889_v0 }
  0x67   : > { %365 = vst.msk [vmem:[#allocation2 + $0x368] sm:$0xf] %vm145_vm0, %v3889_v0  ;;  %366 = vst.msk [vmem:[#allocation2 + $0x36c] sm:$0xf] %vm145_vm0, %v3889_v0 }
  0x68   : > { %367 = vst.msk [vmem:[#allocation2 + $0x370] sm:$0xf] %vm145_vm0, %v3889_v0  ;;  %368 = vst.msk [vmem:[#allocation2 + $0x374] sm:$0xf] %vm145_vm0, %v3889_v0 }
  0x69   : > { %369 = vst.msk [vmem:[#allocation2 + $0x378] sm:$0xf] %vm145_vm0, %v3889_v0  ;;  %370 = vst.msk [vmem:[#allocation2 + $0x37c] sm:$0xf] %vm145_vm0, %v3889_v0 }
  0x6a   : > { %372 = vst.msk [vmem:[#allocation2 + $0x384] sm:$0xf] %vm145_vm0, %v3889_v0  ;;  %373 = vst.msk [vmem:[#allocation2 + $0x388] sm:$0xf] %vm145_vm0, %v3889_v0 }
  0x6b   : > { %374 = vst.msk [vmem:[#allocation2 + $0x38c] sm:$0xf] %vm145_vm0, %v3889_v0  ;;  %375 = vst.msk [vmem:[#allocation2 + $0x390] sm:$0xf] %vm145_vm0, %v3889_v0 }
  0x6c   : > { %376 = vst.msk [vmem:[#allocation2 + $0x394] sm:$0xf] %vm145_vm0, %v3889_v0  ;;  %377 = vst.msk [vmem:[#allocation2 + $0x398] sm:$0xf] %vm145_vm0, %v3889_v0 }
  0x6d   : > { %378 = vst.msk [vmem:[#allocation2 + $0x39c] sm:$0xf] %vm145_vm0, %v3889_v0  ;;  %379 = vst.msk [vmem:[#allocation2 + $0x3a0] sm:$0xf] %vm145_vm0, %v3889_v0 }
  0x6e   : > { %381 = vst.msk [vmem:[#allocation2 + $0x3a8] sm:$0xf] %vm145_vm0, %v3889_v0  ;;  %382 = vst.msk [vmem:[#allocation2 + $0x3ac] sm:$0xf] %vm145_vm0, %v3889_v0 }
  0x6f   : > { %383 = vst.msk [vmem:[#allocation2 + $0x3b0] sm:$0xf] %vm145_vm0, %v3889_v0  ;;  %384 = vst.msk [vmem:[#allocation2 + $0x3b4] sm:$0xf] %vm145_vm0, %v3889_v0 }
  0x70   : > { %385 = vst.msk [vmem:[#allocation2 + $0x3b8] sm:$0xf] %vm145_vm0, %v3889_v0  ;;  %386 = vst.msk [vmem:[#allocation2 + $0x3bc] sm:$0xf] %vm145_vm0, %v3889_v0 }
  0x71   : > { %387 = vst.msk [vmem:[#allocation2 + $0x3c0] sm:$0xf] %vm145_vm0, %v3889_v0  ;;  %388 = vst.msk [vmem:[#allocation2 + $0x3c4] sm:$0xf] %vm145_vm0, %v3889_v0 }
  0x72   : > { %390 = vst.msk [vmem:[#allocation2 + $0x3cc] sm:$0xf] %vm145_vm0, %v3889_v0  ;;  %391 = vst.msk [vmem:[#allocation2 + $0x3d0] sm:$0xf] %vm145_vm0, %v3889_v0 }
  0x73   : > { %392 = vst.msk [vmem:[#allocation2 + $0x3d4] sm:$0xf] %vm145_vm0, %v3889_v0  ;;  %393 = vst.msk [vmem:[#allocation2 + $0x3d8] sm:$0xf] %vm145_vm0, %v3889_v0 }
  0x74   : > { %394 = vst.msk [vmem:[#allocation2 + $0x3dc] sm:$0xf] %vm145_vm0, %v3889_v0  ;;  %395 = vst.msk [vmem:[#allocation2 + $0x3e0] sm:$0xf] %vm145_vm0, %v3889_v0 }
  0x75   : > { %396 = vst.msk [vmem:[#allocation2 + $0x3e4] sm:$0xf] %vm145_vm0, %v3889_v0  ;;  %397 = vst.msk [vmem:[#allocation2 + $0x3e8] sm:$0xf] %vm145_vm0, %v3889_v0 }
  0x76   : > { %399 = vst.msk [vmem:[#allocation2 + $0x3f0] sm:$0xf] %vm145_vm0, %v3889_v0  ;;  %400 = vst.msk [vmem:[#allocation2 + $0x3f4] sm:$0xf] %vm145_vm0, %v3889_v0 }
  0x77   : > { %401 = vst.msk [vmem:[#allocation2 + $0x3f8] sm:$0xf] %vm145_vm0, %v3889_v0  ;;  %402 = vst.msk [vmem:[#allocation2 + $0x3fc] sm:$0xf] %vm145_vm0, %v3889_v0 }
  0x78   : > { %403 = vst.msk [vmem:[#allocation2 + $0x400] sm:$0xf] %vm145_vm0, %v3889_v0  ;;  %404 = vst.msk [vmem:[#allocation2 + $0x404] sm:$0xf] %vm145_vm0, %v3889_v0 }
  0x79   : > { %405 = vst.msk [vmem:[#allocation2 + $0x408] sm:$0xf] %vm145_vm0, %v3889_v0  ;;  %406 = vst.msk [vmem:[#allocation2 + $0x40c] sm:$0xf] %vm145_vm0, %v3889_v0 }
  0x7a   : > { %408 = vst.msk [vmem:[#allocation2 + $0x414] sm:$0xf] %vm145_vm0, %v3889_v0  ;;  %409 = vst.msk [vmem:[#allocation2 + $0x418] sm:$0xf] %vm145_vm0, %v3889_v0 }
  0x7b   : > { %410 = vst.msk [vmem:[#allocation2 + $0x41c] sm:$0xf] %vm145_vm0, %v3889_v0  ;;  %411 = vst.msk [vmem:[#allocation2 + $0x420] sm:$0xf] %vm145_vm0, %v3889_v0 }
  0x7c   : > { %412 = vst.msk [vmem:[#allocation2 + $0x424] sm:$0xf] %vm145_vm0, %v3889_v0  ;;  %413 = vst.msk [vmem:[#allocation2 + $0x428] sm:$0xf] %vm145_vm0, %v3889_v0 }
  0x7d   : > { %414 = vst.msk [vmem:[#allocation2 + $0x42c] sm:$0xf] %vm145_vm0, %v3889_v0  ;;  %415 = vst.msk [vmem:[#allocation2 + $0x430] sm:$0xf] %vm145_vm0, %v3889_v0 }
  0x7e   : > { %417 = vst.msk [vmem:[#allocation2 + $0x438] sm:$0xf] %vm145_vm0, %v3889_v0  ;;  %418 = vst.msk [vmem:[#allocation2 + $0x43c] sm:$0xf] %vm145_vm0, %v3889_v0 }
  0x7f   : > { %419 = vst.msk [vmem:[#allocation2 + $0x440] sm:$0xf] %vm145_vm0, %v3889_v0  ;;  %420 = vst.msk [vmem:[#allocation2 + $0x444] sm:$0xf] %vm145_vm0, %v3889_v0 }
  0x80   : > { %421 = vst.msk [vmem:[#allocation2 + $0x448] sm:$0xf] %vm145_vm0, %v3889_v0  ;;  %422 = vst.msk [vmem:[#allocation2 + $0x44c] sm:$0xf] %vm145_vm0, %v3889_v0 }
  0x81   : > { %423 = vst.msk [vmem:[#allocation2 + $0x450] sm:$0xf] %vm145_vm0, %v3889_v0  ;;  %424 = vst.msk [vmem:[#allocation2 + $0x454] sm:$0xf] %vm145_vm0, %v3889_v0 }
  0x82   : > { %426 = vst.msk [vmem:[#allocation2 + $0x45c] sm:$0xf] %vm145_vm0, %v3889_v0  ;;  %427 = vst.msk [vmem:[#allocation2 + $0x460] sm:$0xf] %vm145_vm0, %v3889_v0 }
  0x83   : > { %428 = vst.msk [vmem:[#allocation2 + $0x464] sm:$0xf] %vm145_vm0, %v3889_v0  ;;  %429 = vst.msk [vmem:[#allocation2 + $0x468] sm:$0xf] %vm145_vm0, %v3889_v0 }
  0x84   : > { %430 = vst.msk [vmem:[#allocation2 + $0x46c] sm:$0xf] %vm145_vm0, %v3889_v0  ;;  %431 = vst.msk [vmem:[#allocation2 + $0x470] sm:$0xf] %vm145_vm0, %v3889_v0 }
  0x85   : > { %432 = vst.msk [vmem:[#allocation2 + $0x474] sm:$0xf] %vm145_vm0, %v3889_v0  ;;  %433 = vst.msk [vmem:[#allocation2 + $0x478] sm:$0xf] %vm145_vm0, %v3889_v0 }
  0x86   : > { %435 = vst.msk [vmem:[#allocation2 + $0x480] sm:$0xf] %vm145_vm0, %v3889_v0  ;;  %436 = vst.msk [vmem:[#allocation2 + $0x484] sm:$0xf] %vm145_vm0, %v3889_v0 }
  0x87   : > { %437 = vst.msk [vmem:[#allocation2 + $0x488] sm:$0xf] %vm145_vm0, %v3889_v0  ;;  %438 = vst.msk [vmem:[#allocation2 + $0x48c] sm:$0xf] %vm145_vm0, %v3889_v0 }
  0x88   : > { %439 = vst.msk [vmem:[#allocation2 + $0x490] sm:$0xf] %vm145_vm0, %v3889_v0  ;;  %440 = vst.msk [vmem:[#allocation2 + $0x494] sm:$0xf] %vm145_vm0, %v3889_v0 }
  0x89   : > { %441 = vst.msk [vmem:[#allocation2 + $0x498] sm:$0xf] %vm145_vm0, %v3889_v0  ;;  %442 = vst.msk [vmem:[#allocation2 + $0x49c] sm:$0xf] %vm145_vm0, %v3889_v0 }
  0x8a   : > { %444 = vst.msk [vmem:[#allocation2 + $0x4a4] sm:$0xf] %vm145_vm0, %v3889_v0  ;;  %445 = vst.msk [vmem:[#allocation2 + $0x4a8] sm:$0xf] %vm145_vm0, %v3889_v0 }
  0x8b   : > { %446 = vst.msk [vmem:[#allocation2 + $0x4ac] sm:$0xf] %vm145_vm0, %v3889_v0  ;;  %447 = vst.msk [vmem:[#allocation2 + $0x4b0] sm:$0xf] %vm145_vm0, %v3889_v0 }
  0x8c   : > { %448 = vst.msk [vmem:[#allocation2 + $0x4b4] sm:$0xf] %vm145_vm0, %v3889_v0  ;;  %449 = vst.msk [vmem:[#allocation2 + $0x4b8] sm:$0xf] %vm145_vm0, %v3889_v0 }
  0x8d   : > { %450 = vst.msk [vmem:[#allocation2 + $0x4bc] sm:$0xf] %vm145_vm0, %v3889_v0  ;;  %451 = vst.msk [vmem:[#allocation2 + $0x4c0] sm:$0xf] %vm145_vm0, %v3889_v0 }
  0x8e   : > { %453 = vst.msk [vmem:[#allocation2 + $0x4c8] sm:$0xf] %vm145_vm0, %v3889_v0  ;;  %454 = vst.msk [vmem:[#allocation2 + $0x4cc] sm:$0xf] %vm145_vm0, %v3889_v0 }
  0x8f   : > { %455 = vst.msk [vmem:[#allocation2 + $0x4d0] sm:$0xf] %vm145_vm0, %v3889_v0  ;;  %456 = vst.msk [vmem:[#allocation2 + $0x4d4] sm:$0xf] %vm145_vm0, %v3889_v0 }
  0x90   : > { %457 = vst.msk [vmem:[#allocation2 + $0x4d8] sm:$0xf] %vm145_vm0, %v3889_v0  ;;  %458 = vst.msk [vmem:[#allocation2 + $0x4dc] sm:$0xf] %vm145_vm0, %v3889_v0 }
  0x91   : > { %459 = vst.msk [vmem:[#allocation2 + $0x4e0] sm:$0xf] %vm145_vm0, %v3889_v0  ;;  %460 = vst.msk [vmem:[#allocation2 + $0x4e4] sm:$0xf] %vm145_vm0, %v3889_v0 }
  0x92   : > { %462 = vst.msk [vmem:[#allocation2 + $0x4ec] sm:$0xf] %vm145_vm0, %v3889_v0  ;;  %463 = vst.msk [vmem:[#allocation2 + $0x4f0] sm:$0xf] %vm145_vm0, %v3889_v0 }
  0x93   : > { %464 = vst.msk [vmem:[#allocation2 + $0x4f4] sm:$0xf] %vm145_vm0, %v3889_v0  ;;  %465 = vst.msk [vmem:[#allocation2 + $0x4f8] sm:$0xf] %vm145_vm0, %v3889_v0 }
  0x94   : > { %466 = vst.msk [vmem:[#allocation2 + $0x4fc] sm:$0xf] %vm145_vm0, %v3889_v0  ;;  %467 = vst.msk [vmem:[#allocation2 + $0x500] sm:$0xf] %vm145_vm0, %v3889_v0 }
  0x95   : > { %468 = vst.msk [vmem:[#allocation2 + $0x504] sm:$0xf] %vm145_vm0, %v3889_v0  ;;  %469 = vst.msk [vmem:[#allocation2 + $0x508] sm:$0xf] %vm145_vm0, %v3889_v0 }
  0x96   : > { %471 = vst.msk [vmem:[#allocation2 + $0x510] sm:$0xf] %vm145_vm0, %v3889_v0  ;;  %472 = vst.msk [vmem:[#allocation2 + $0x514] sm:$0xf] %vm145_vm0, %v3889_v0 }
  0x97   : > { %473 = vst.msk [vmem:[#allocation2 + $0x518] sm:$0xf] %vm145_vm0, %v3889_v0  ;;  %474 = vst.msk [vmem:[#allocation2 + $0x51c] sm:$0xf] %vm145_vm0, %v3889_v0 }
  0x98   : > { %475 = vst.msk [vmem:[#allocation2 + $0x520] sm:$0xf] %vm145_vm0, %v3889_v0  ;;  %476 = vst.msk [vmem:[#allocation2 + $0x524] sm:$0xf] %vm145_vm0, %v3889_v0 }
  0x99   : > { %477 = vst.msk [vmem:[#allocation2 + $0x528] sm:$0xf] %vm145_vm0, %v3889_v0  ;;  %478 = vst.msk [vmem:[#allocation2 + $0x52c] sm:$0xf] %vm145_vm0, %v3889_v0 }
  0x9a   : > { %480 = vst.msk [vmem:[#allocation2 + $0x534] sm:$0xf] %vm145_vm0, %v3889_v0  ;;  %481 = vst.msk [vmem:[#allocation2 + $0x538] sm:$0xf] %vm145_vm0, %v3889_v0 }
  0x9b   : > { %482 = vst.msk [vmem:[#allocation2 + $0x53c] sm:$0xf] %vm145_vm0, %v3889_v0  ;;  %483 = vst.msk [vmem:[#allocation2 + $0x540] sm:$0xf] %vm145_vm0, %v3889_v0 }
  0x9c   : > { %484 = vst.msk [vmem:[#allocation2 + $0x544] sm:$0xf] %vm145_vm0, %v3889_v0  ;;  %485 = vst.msk [vmem:[#allocation2 + $0x548] sm:$0xf] %vm145_vm0, %v3889_v0 }
  0x9d   : > { %486 = vst.msk [vmem:[#allocation2 + $0x54c] sm:$0xf] %vm145_vm0, %v3889_v0  ;;  %487 = vst.msk [vmem:[#allocation2 + $0x550] sm:$0xf] %vm145_vm0, %v3889_v0 }
  0x9e   : > { %489 = vst.msk [vmem:[#allocation2 + $0x558] sm:$0xf] %vm145_vm0, %v3889_v0  ;;  %490 = vst.msk [vmem:[#allocation2 + $0x55c] sm:$0xf] %vm145_vm0, %v3889_v0 }
  0x9f   : > { %491 = vst.msk [vmem:[#allocation2 + $0x560] sm:$0xf] %vm145_vm0, %v3889_v0  ;;  %492 = vst.msk [vmem:[#allocation2 + $0x564] sm:$0xf] %vm145_vm0, %v3889_v0 }
  0xa0   : > { %493 = vst.msk [vmem:[#allocation2 + $0x568] sm:$0xf] %vm145_vm0, %v3889_v0  ;;  %494 = vst.msk [vmem:[#allocation2 + $0x56c] sm:$0xf] %vm145_vm0, %v3889_v0 }
  0xa1   : > { %495 = vst.msk [vmem:[#allocation2 + $0x570] sm:$0xf] %vm145_vm0, %v3889_v0  ;;  %496 = vst.msk [vmem:[#allocation2 + $0x574] sm:$0xf] %vm145_vm0, %v3889_v0 }
  0xa2   : > { %498 = vst.msk [vmem:[#allocation2 + $0x57c] sm:$0xf] %vm145_vm0, %v3889_v0  ;;  %499 = vst.msk [vmem:[#allocation2 + $0x580] sm:$0xf] %vm145_vm0, %v3889_v0 }
  0xa3   : > { %500 = vst.msk [vmem:[#allocation2 + $0x584] sm:$0xf] %vm145_vm0, %v3889_v0  ;;  %501 = vst.msk [vmem:[#allocation2 + $0x588] sm:$0xf] %vm145_vm0, %v3889_v0 }
  0xa4   : > { %502 = vst.msk [vmem:[#allocation2 + $0x58c] sm:$0xf] %vm145_vm0, %v3889_v0  ;;  %503 = vst.msk [vmem:[#allocation2 + $0x590] sm:$0xf] %vm145_vm0, %v3889_v0 }
  0xa5   : > { %504 = vst.msk [vmem:[#allocation2 + $0x594] sm:$0xf] %vm145_vm0, %v3889_v0  ;;  %505 = vst.msk [vmem:[#allocation2 + $0x598] sm:$0xf] %vm145_vm0, %v3889_v0 }
  0xa6   : > { %507 = vst.msk [vmem:[#allocation2 + $0x5a0] sm:$0xf] %vm145_vm0, %v3889_v0  ;;  %508 = vst.msk [vmem:[#allocation2 + $0x5a4] sm:$0xf] %vm145_vm0, %v3889_v0 }
  0xa7   : > { %509 = vst.msk [vmem:[#allocation2 + $0x5a8] sm:$0xf] %vm145_vm0, %v3889_v0  ;;  %510 = vst.msk [vmem:[#allocation2 + $0x5ac] sm:$0xf] %vm145_vm0, %v3889_v0 }
  0xa8   : > { %511 = vst.msk [vmem:[#allocation2 + $0x5b0] sm:$0xf] %vm145_vm0, %v3889_v0  ;;  %512 = vst.msk [vmem:[#allocation2 + $0x5b4] sm:$0xf] %vm145_vm0, %v3889_v0 }
  0xa9   : > { %513 = vst.msk [vmem:[#allocation2 + $0x5b8] sm:$0xf] %vm145_vm0, %v3889_v0  ;;  %514 = vst.msk [vmem:[#allocation2 + $0x5bc] sm:$0xf] %vm145_vm0, %v3889_v0 }
  0xaa   : > { %516 = vst.msk [vmem:[#allocation2 + $0x5c4] sm:$0xf] %vm145_vm0, %v3889_v0  ;;  %517 = vst.msk [vmem:[#allocation2 + $0x5c8] sm:$0xf] %vm145_vm0, %v3889_v0 }
  0xab   : > { %518 = vst.msk [vmem:[#allocation2 + $0x5cc] sm:$0xf] %vm145_vm0, %v3889_v0  ;;  %519 = vst.msk [vmem:[#allocation2 + $0x5d0] sm:$0xf] %vm145_vm0, %v3889_v0 }
  0xac   : > { %520 = vst.msk [vmem:[#allocation2 + $0x5d4] sm:$0xf] %vm145_vm0, %v3889_v0  ;;  %521 = vst.msk [vmem:[#allocation2 + $0x5d8] sm:$0xf] %vm145_vm0, %v3889_v0 }
  0xad   : > { %522 = vst.msk [vmem:[#allocation2 + $0x5dc] sm:$0xf] %vm145_vm0, %v3889_v0  ;;  %523 = vst.msk [vmem:[#allocation2 + $0x5e0] sm:$0xf] %vm145_vm0, %v3889_v0 }
  0xae   : > { %525 = vst.msk [vmem:[#allocation2 + $0x5e8] sm:$0xf] %vm145_vm0, %v3889_v0  ;;  %526 = vst.msk [vmem:[#allocation2 + $0x5ec] sm:$0xf] %vm145_vm0, %v3889_v0 }
  0xaf   : > { %527 = vst.msk [vmem:[#allocation2 + $0x5f0] sm:$0xf] %vm145_vm0, %v3889_v0  ;;  %528 = vst.msk [vmem:[#allocation2 + $0x5f4] sm:$0xf] %vm145_vm0, %v3889_v0 }
  0xb0   : > { %529 = vst.msk [vmem:[#allocation2 + $0x5f8] sm:$0xf] %vm145_vm0, %v3889_v0  ;;  %530 = vst.msk [vmem:[#allocation2 + $0x5fc] sm:$0xf] %vm145_vm0, %v3889_v0 }
  0xb1   : > { %531 = vst.msk [vmem:[#allocation2 + $0x600] sm:$0xf] %vm145_vm0, %v3889_v0  ;;  %532 = vst.msk [vmem:[#allocation2 + $0x604] sm:$0xf] %vm145_vm0, %v3889_v0 }
  0xb2   : > { %534 = vst.msk [vmem:[#allocation2 + $0x60c] sm:$0xf] %vm145_vm0, %v3889_v0  ;;  %535 = vst.msk [vmem:[#allocation2 + $0x610] sm:$0xf] %vm145_vm0, %v3889_v0 }
  0xb3   : > { %536 = vst.msk [vmem:[#allocation2 + $0x614] sm:$0xf] %vm145_vm0, %v3889_v0  ;;  %537 = vst.msk [vmem:[#allocation2 + $0x618] sm:$0xf] %vm145_vm0, %v3889_v0 }
  0xb4   : > { %538 = vst.msk [vmem:[#allocation2 + $0x61c] sm:$0xf] %vm145_vm0, %v3889_v0  ;;  %539 = vst.msk [vmem:[#allocation2 + $0x620] sm:$0xf] %vm145_vm0, %v3889_v0 }
  0xb5   : > { %540 = vst.msk [vmem:[#allocation2 + $0x624] sm:$0xf] %vm145_vm0, %v3889_v0  ;;  %541 = vst.msk [vmem:[#allocation2 + $0x628] sm:$0xf] %vm145_vm0, %v3889_v0 }
  0xb6   : > { %543 = vst.msk [vmem:[#allocation2 + $0x630] sm:$0xf] %vm145_vm0, %v3889_v0  ;;  %544 = vst.msk [vmem:[#allocation2 + $0x634] sm:$0xf] %vm145_vm0, %v3889_v0 }
  0xb7   : > { %545 = vst.msk [vmem:[#allocation2 + $0x638] sm:$0xf] %vm145_vm0, %v3889_v0  ;;  %546 = vst.msk [vmem:[#allocation2 + $0x63c] sm:$0xf] %vm145_vm0, %v3889_v0 }
  0xb8   : > { %547 = vst.msk [vmem:[#allocation2 + $0x640] sm:$0xf] %vm145_vm0, %v3889_v0  ;;  %548 = vst.msk [vmem:[#allocation2 + $0x644] sm:$0xf] %vm145_vm0, %v3889_v0 }
  0xb9   : > { %549 = vst.msk [vmem:[#allocation2 + $0x648] sm:$0xf] %vm145_vm0, %v3889_v0  ;;  %550 = vst.msk [vmem:[#allocation2 + $0x64c] sm:$0xf] %vm145_vm0, %v3889_v0 }
  0xba   : > { %552 = vst.msk [vmem:[#allocation2 + $0x654] sm:$0xf] %vm145_vm0, %v3889_v0  ;;  %553 = vst.msk [vmem:[#allocation2 + $0x658] sm:$0xf] %vm145_vm0, %v3889_v0 }
  0xbb   : > { %554 = vst.msk [vmem:[#allocation2 + $0x65c] sm:$0xf] %vm145_vm0, %v3889_v0  ;;  %555 = vst.msk [vmem:[#allocation2 + $0x660] sm:$0xf] %vm145_vm0, %v3889_v0 }
  0xbc   : > { %556 = vst.msk [vmem:[#allocation2 + $0x664] sm:$0xf] %vm145_vm0, %v3889_v0  ;;  %557 = vst.msk [vmem:[#allocation2 + $0x668] sm:$0xf] %vm145_vm0, %v3889_v0 }
  0xbd   : > { %558 = vst.msk [vmem:[#allocation2 + $0x66c] sm:$0xf] %vm145_vm0, %v3889_v0  ;;  %559 = vst.msk [vmem:[#allocation2 + $0x670] sm:$0xf] %vm145_vm0, %v3889_v0 }
  0xbe   : > { %561 = vst.msk [vmem:[#allocation2 + $0x678] sm:$0xf] %vm145_vm0, %v3889_v0  ;;  %562 = vst.msk [vmem:[#allocation2 + $0x67c] sm:$0xf] %vm145_vm0, %v3889_v0 }
  0xbf   : > { %563 = vst.msk [vmem:[#allocation2 + $0x680] sm:$0xf] %vm145_vm0, %v3889_v0  ;;  %564 = vst.msk [vmem:[#allocation2 + $0x684] sm:$0xf] %vm145_vm0, %v3889_v0 }
  0xc0   : > { %565 = vst.msk [vmem:[#allocation2 + $0x688] sm:$0xf] %vm145_vm0, %v3889_v0  ;;  %566 = vst.msk [vmem:[#allocation2 + $0x68c] sm:$0xf] %vm145_vm0, %v3889_v0 }
  0xc1   : > { %567 = vst.msk [vmem:[#allocation2 + $0x690] sm:$0xf] %vm145_vm0, %v3889_v0  ;;  %568 = vst.msk [vmem:[#allocation2 + $0x694] sm:$0xf] %vm145_vm0, %v3889_v0 }
  0xc2   : > { %570 = vst.msk [vmem:[#allocation2 + $0x69c] sm:$0xf] %vm145_vm0, %v3889_v0  ;;  %571 = vst.msk [vmem:[#allocation2 + $0x6a0] sm:$0xf] %vm145_vm0, %v3889_v0 }
  0xc3   : > { %572 = vst.msk [vmem:[#allocation2 + $0x6a4] sm:$0xf] %vm145_vm0, %v3889_v0  ;;  %573 = vst.msk [vmem:[#allocation2 + $0x6a8] sm:$0xf] %vm145_vm0, %v3889_v0 }
  0xc4   : > { %574 = vst.msk [vmem:[#allocation2 + $0x6ac] sm:$0xf] %vm145_vm0, %v3889_v0  ;;  %575 = vst.msk [vmem:[#allocation2 + $0x6b0] sm:$0xf] %vm145_vm0, %v3889_v0 }
  0xc5   : > { %576 = vst.msk [vmem:[#allocation2 + $0x6b4] sm:$0xf] %vm145_vm0, %v3889_v0  ;;  %577 = vst.msk [vmem:[#allocation2 + $0x6b8] sm:$0xf] %vm145_vm0, %v3889_v0 }
  0xc6   : > { %579 = vst.msk [vmem:[#allocation2 + $0x6c0] sm:$0xf] %vm145_vm0, %v3889_v0  ;;  %580 = vst.msk [vmem:[#allocation2 + $0x6c4] sm:$0xf] %vm145_vm0, %v3889_v0 }
  0xc7   : > { %581 = vst.msk [vmem:[#allocation2 + $0x6c8] sm:$0xf] %vm145_vm0, %v3889_v0  ;;  %582 = vst.msk [vmem:[#allocation2 + $0x6cc] sm:$0xf] %vm145_vm0, %v3889_v0 }
  0xc8   : > { %583 = vst.msk [vmem:[#allocation2 + $0x6d0] sm:$0xf] %vm145_vm0, %v3889_v0  ;;  %584 = vst.msk [vmem:[#allocation2 + $0x6d4] sm:$0xf] %vm145_vm0, %v3889_v0 }
  0xc9   : > { %585 = vst.msk [vmem:[#allocation2 + $0x6d8] sm:$0xf] %vm145_vm0, %v3889_v0  ;;  %586 = vst.msk [vmem:[#allocation2 + $0x6dc] sm:$0xf] %vm145_vm0, %v3889_v0 }
  0xca   : > { %588 = vst.msk [vmem:[#allocation2 + $0x6e4] sm:$0xf] %vm145_vm0, %v3889_v0  ;;  %589 = vst.msk [vmem:[#allocation2 + $0x6e8] sm:$0xf] %vm145_vm0, %v3889_v0 }
  0xcb   : > { %590 = vst.msk [vmem:[#allocation2 + $0x6ec] sm:$0xf] %vm145_vm0, %v3889_v0  ;;  %591 = vst.msk [vmem:[#allocation2 + $0x6f0] sm:$0xf] %vm145_vm0, %v3889_v0 }
  0xcc   : > { %592 = vst.msk [vmem:[#allocation2 + $0x6f4] sm:$0xf] %vm145_vm0, %v3889_v0  ;;  %593 = vst.msk [vmem:[#allocation2 + $0x6f8] sm:$0xf] %vm145_vm0, %v3889_v0 }
  0xcd   : > { %594 = vst.msk [vmem:[#allocation2 + $0x6fc] sm:$0xf] %vm145_vm0, %v3889_v0  ;;  %595 = vst.msk [vmem:[#allocation2 + $0x700] sm:$0xf] %vm145_vm0, %v3889_v0 }
  0xce   : > { %597 = vst.msk [vmem:[#allocation2 + $0x708] sm:$0xf] %vm145_vm0, %v3889_v0  ;;  %598 = vst.msk [vmem:[#allocation2 + $0x70c] sm:$0xf] %vm145_vm0, %v3889_v0 }
  0xcf   : > { %599 = vst.msk [vmem:[#allocation2 + $0x710] sm:$0xf] %vm145_vm0, %v3889_v0  ;;  %600 = vst.msk [vmem:[#allocation2 + $0x714] sm:$0xf] %vm145_vm0, %v3889_v0 }
  0xd0   : > { %601 = vst.msk [vmem:[#allocation2 + $0x718] sm:$0xf] %vm145_vm0, %v3889_v0  ;;  %602 = vst.msk [vmem:[#allocation2 + $0x71c] sm:$0xf] %vm145_vm0, %v3889_v0 }
  0xd1   : > { %603 = vst.msk [vmem:[#allocation2 + $0x720] sm:$0xf] %vm145_vm0, %v3889_v0  ;;  %604 = vst.msk [vmem:[#allocation2 + $0x724] sm:$0xf] %vm145_vm0, %v3889_v0 }
  0xd2   : > { %606 = vst.msk [vmem:[#allocation2 + $0x72c] sm:$0xf] %vm145_vm0, %v3889_v0  ;;  %607 = vst.msk [vmem:[#allocation2 + $0x730] sm:$0xf] %vm145_vm0, %v3889_v0 }
  0xd3   : > { %608 = vst.msk [vmem:[#allocation2 + $0x734] sm:$0xf] %vm145_vm0, %v3889_v0  ;;  %609 = vst.msk [vmem:[#allocation2 + $0x738] sm:$0xf] %vm145_vm0, %v3889_v0 }
  0xd4   : > { %610 = vst.msk [vmem:[#allocation2 + $0x73c] sm:$0xf] %vm145_vm0, %v3889_v0  ;;  %611 = vst.msk [vmem:[#allocation2 + $0x740] sm:$0xf] %vm145_vm0, %v3889_v0 }
  0xd5   : > { %612 = vst.msk [vmem:[#allocation2 + $0x744] sm:$0xf] %vm145_vm0, %v3889_v0  ;;  %613 = vst.msk [vmem:[#allocation2 + $0x748] sm:$0xf] %vm145_vm0, %v3889_v0 }
  0xd6   : > { %615 = vst.msk [vmem:[#allocation2 + $0x750] sm:$0xf] %vm145_vm0, %v3889_v0  ;;  %616 = vst.msk [vmem:[#allocation2 + $0x754] sm:$0xf] %vm145_vm0, %v3889_v0 }
  0xd7   : > { %617 = vst.msk [vmem:[#allocation2 + $0x758] sm:$0xf] %vm145_vm0, %v3889_v0  ;;  %618 = vst.msk [vmem:[#allocation2 + $0x75c] sm:$0xf] %vm145_vm0, %v3889_v0 }
  0xd8   : > { %619 = vst.msk [vmem:[#allocation2 + $0x760] sm:$0xf] %vm145_vm0, %v3889_v0  ;;  %620 = vst.msk [vmem:[#allocation2 + $0x764] sm:$0xf] %vm145_vm0, %v3889_v0 }
  0xd9   : > { %621 = vst.msk [vmem:[#allocation2 + $0x768] sm:$0xf] %vm145_vm0, %v3889_v0  ;;  %622 = vst.msk [vmem:[#allocation2 + $0x76c] sm:$0xf] %vm145_vm0, %v3889_v0 }
  0xda   : > { %624 = vst.msk [vmem:[#allocation2 + $0x774] sm:$0xf] %vm145_vm0, %v3889_v0  ;;  %625 = vst.msk [vmem:[#allocation2 + $0x778] sm:$0xf] %vm145_vm0, %v3889_v0 }
  0xdb   : > { %626 = vst.msk [vmem:[#allocation2 + $0x77c] sm:$0xf] %vm145_vm0, %v3889_v0  ;;  %627 = vst.msk [vmem:[#allocation2 + $0x780] sm:$0xf] %vm145_vm0, %v3889_v0 }
  0xdc   : > { %628 = vst.msk [vmem:[#allocation2 + $0x784] sm:$0xf] %vm145_vm0, %v3889_v0  ;;  %629 = vst.msk [vmem:[#allocation2 + $0x788] sm:$0xf] %vm145_vm0, %v3889_v0 }
  0xdd   : > { %630 = vst.msk [vmem:[#allocation2 + $0x78c] sm:$0xf] %vm145_vm0, %v3889_v0  ;;  %631 = vst.msk [vmem:[#allocation2 + $0x790] sm:$0xf] %vm145_vm0, %v3889_v0 }
  0xde   : > { %633 = vst.msk [vmem:[#allocation2 + $0x798] sm:$0xf] %vm145_vm0, %v3889_v0  ;;  %634 = vst.msk [vmem:[#allocation2 + $0x79c] sm:$0xf] %vm145_vm0, %v3889_v0 }
  0xdf   : > { %635 = vst.msk [vmem:[#allocation2 + $0x7a0] sm:$0xf] %vm145_vm0, %v3889_v0  ;;  %636 = vst.msk [vmem:[#allocation2 + $0x7a4] sm:$0xf] %vm145_vm0, %v3889_v0 }
  0xe0   : > { %637 = vst.msk [vmem:[#allocation2 + $0x7a8] sm:$0xf] %vm145_vm0, %v3889_v0  ;;  %638 = vst.msk [vmem:[#allocation2 + $0x7ac] sm:$0xf] %vm145_vm0, %v3889_v0 }
  0xe1   : > { %639 = vst.msk [vmem:[#allocation2 + $0x7b0] sm:$0xf] %vm145_vm0, %v3889_v0  ;;  %640 = vst.msk [vmem:[#allocation2 + $0x7b4] sm:$0xf] %vm145_vm0, %v3889_v0 }
  0xe2   : > { %642 = vst.msk [vmem:[#allocation2 + $0x7bc] sm:$0xf] %vm145_vm0, %v3889_v0  ;;  %643 = vst.msk [vmem:[#allocation2 + $0x7c0] sm:$0xf] %vm145_vm0, %v3889_v0 }
  0xe3   : > { %644 = vst.msk [vmem:[#allocation2 + $0x7c4] sm:$0xf] %vm145_vm0, %v3889_v0  ;;  %645 = vst.msk [vmem:[#allocation2 + $0x7c8] sm:$0xf] %vm145_vm0, %v3889_v0 }
  0xe4   : > { %646 = vst.msk [vmem:[#allocation2 + $0x7cc] sm:$0xf] %vm145_vm0, %v3889_v0  ;;  %647 = vst.msk [vmem:[#allocation2 + $0x7d0] sm:$0xf] %vm145_vm0, %v3889_v0 }
  0xe5   : > { %648 = vst.msk [vmem:[#allocation2 + $0x7d4] sm:$0xf] %vm145_vm0, %v3889_v0  ;;  %649 = vst.msk [vmem:[#allocation2 + $0x7d8] sm:$0xf] %vm145_vm0, %v3889_v0 }
  0xe6   : > { %651 = vst.msk [vmem:[#allocation2 + $0x7e0] sm:$0xf] %vm145_vm0, %v3889_v0  ;;  %652 = vst.msk [vmem:[#allocation2 + $0x7e4] sm:$0xf] %vm145_vm0, %v3889_v0 }
  0xe7   : > { %653 = vst.msk [vmem:[#allocation2 + $0x7e8] sm:$0xf] %vm145_vm0, %v3889_v0  ;;  %654 = vst.msk [vmem:[#allocation2 + $0x7ec] sm:$0xf] %vm145_vm0, %v3889_v0 }
  0xe8   : > { %655 = vst.msk [vmem:[#allocation2 + $0x7f0] sm:$0xf] %vm145_vm0, %v3889_v0  ;;  %656 = vst.msk [vmem:[#allocation2 + $0x7f4] sm:$0xf] %vm145_vm0, %v3889_v0 }
  0xe9   : > { %657 = vst.msk [vmem:[#allocation2 + $0x7f8] sm:$0xf] %vm145_vm0, %v3889_v0  ;;  %658 = vst.msk [vmem:[#allocation2 + $0x7fc] sm:$0xf] %vm145_vm0, %v3889_v0 }
  0xea   : > { %660 = vst.msk [vmem:[#allocation2 + $0x804] sm:$0xf] %vm145_vm0, %v3889_v0  ;;  %661 = vst.msk [vmem:[#allocation2 + $0x808] sm:$0xf] %vm145_vm0, %v3889_v0 }
  0xeb   : > { %662 = vst.msk [vmem:[#allocation2 + $0x80c] sm:$0xf] %vm145_vm0, %v3889_v0  ;;  %663 = vst.msk [vmem:[#allocation2 + $0x810] sm:$0xf] %vm145_vm0, %v3889_v0 }
  0xec   : > { %664 = vst.msk [vmem:[#allocation2 + $0x814] sm:$0xf] %vm145_vm0, %v3889_v0  ;;  %665 = vst.msk [vmem:[#allocation2 + $0x818] sm:$0xf] %vm145_vm0, %v3889_v0 }
  0xed   : > { %666 = vst.msk [vmem:[#allocation2 + $0x81c] sm:$0xf] %vm145_vm0, %v3889_v0  ;;  %667 = vst.msk [vmem:[#allocation2 + $0x820] sm:$0xf] %vm145_vm0, %v3889_v0 }
  0xee   : > { %669 = vst.msk [vmem:[#allocation2 + $0x828] sm:$0xf] %vm145_vm0, %v3889_v0  ;;  %670 = vst.msk [vmem:[#allocation2 + $0x82c] sm:$0xf] %vm145_vm0, %v3889_v0 }
  0xef   : > { %671 = vst.msk [vmem:[#allocation2 + $0x830] sm:$0xf] %vm145_vm0, %v3889_v0  ;;  %672 = vst.msk [vmem:[#allocation2 + $0x834] sm:$0xf] %vm145_vm0, %v3889_v0 }
  0xf0   : > { %673 = vst.msk [vmem:[#allocation2 + $0x838] sm:$0xf] %vm145_vm0, %v3889_v0  ;;  %674 = vst.msk [vmem:[#allocation2 + $0x83c] sm:$0xf] %vm145_vm0, %v3889_v0 }
  0xf1   : > { %675 = vst.msk [vmem:[#allocation2 + $0x840] sm:$0xf] %vm145_vm0, %v3889_v0  ;;  %676 = vst.msk [vmem:[#allocation2 + $0x844] sm:$0xf] %vm145_vm0, %v3889_v0 }
  0xf2   : > { %678 = vst.msk [vmem:[#allocation2 + $0x84c] sm:$0xf] %vm145_vm0, %v3889_v0  ;;  %679 = vst.msk [vmem:[#allocation2 + $0x850] sm:$0xf] %vm145_vm0, %v3889_v0 }
  0xf3   : > { %680 = vst.msk [vmem:[#allocation2 + $0x854] sm:$0xf] %vm145_vm0, %v3889_v0  ;;  %681 = vst.msk [vmem:[#allocation2 + $0x858] sm:$0xf] %vm145_vm0, %v3889_v0 }
  0xf4   : > { %682 = vst.msk [vmem:[#allocation2 + $0x85c] sm:$0xf] %vm145_vm0, %v3889_v0  ;;  %683 = vst.msk [vmem:[#allocation2 + $0x860] sm:$0xf] %vm145_vm0, %v3889_v0 }
  0xf5   : > { %684 = vst.msk [vmem:[#allocation2 + $0x864] sm:$0xf] %vm145_vm0, %v3889_v0  ;;  %685 = vst.msk [vmem:[#allocation2 + $0x868] sm:$0xf] %vm145_vm0, %v3889_v0 }
  0xf6   : > { %687 = vst.msk [vmem:[#allocation2 + $0x870] sm:$0xf] %vm145_vm0, %v3889_v0  ;;  %688 = vst.msk [vmem:[#allocation2 + $0x874] sm:$0xf] %vm145_vm0, %v3889_v0 }
  0xf7   : > { %689 = vst.msk [vmem:[#allocation2 + $0x878] sm:$0xf] %vm145_vm0, %v3889_v0  ;;  %690 = vst.msk [vmem:[#allocation2 + $0x87c] sm:$0xf] %vm145_vm0, %v3889_v0 }
  0xf8   : > { %691 = vst.msk [vmem:[#allocation2 + $0x880] sm:$0xf] %vm145_vm0, %v3889_v0  ;;  %692 = vst.msk [vmem:[#allocation2 + $0x884] sm:$0xf] %vm145_vm0, %v3889_v0 }
  0xf9   : > { %693 = vst.msk [vmem:[#allocation2 + $0x888] sm:$0xf] %vm145_vm0, %v3889_v0  ;;  %694 = vst.msk [vmem:[#allocation2 + $0x88c] sm:$0xf] %vm145_vm0, %v3889_v0 }
  0xfa   : > { %696 = vst.msk [vmem:[#allocation2 + $0x894] sm:$0xf] %vm145_vm0, %v3889_v0  ;;  %697 = vst.msk [vmem:[#allocation2 + $0x898] sm:$0xf] %vm145_vm0, %v3889_v0 }
  0xfb   : > { %698 = vst.msk [vmem:[#allocation2 + $0x89c] sm:$0xf] %vm145_vm0, %v3889_v0  ;;  %699 = vst.msk [vmem:[#allocation2 + $0x8a0] sm:$0xf] %vm145_vm0, %v3889_v0 }
  0xfc   : > { %700 = vst.msk [vmem:[#allocation2 + $0x8a4] sm:$0xf] %vm145_vm0, %v3889_v0  ;;  %701 = vst.msk [vmem:[#allocation2 + $0x8a8] sm:$0xf] %vm145_vm0, %v3889_v0 }
  0xfd   : > { %702 = vst.msk [vmem:[#allocation2 + $0x8ac] sm:$0xf] %vm145_vm0, %v3889_v0  ;;  %703 = vst.msk [vmem:[#allocation2 + $0x8b0] sm:$0xf] %vm145_vm0, %v3889_v0 }
  0xfe   : > { %705 = vst.msk [vmem:[#allocation2 + $0x8b8] sm:$0xf] %vm145_vm0, %v3889_v0  ;;  %706 = vst.msk [vmem:[#allocation2 + $0x8bc] sm:$0xf] %vm145_vm0, %v3889_v0 }
  0xff   : > { %707 = vst.msk [vmem:[#allocation2 + $0x8c0] sm:$0xf] %vm145_vm0, %v3889_v0  ;;  %708 = vst.msk [vmem:[#allocation2 + $0x8c4] sm:$0xf] %vm145_vm0, %v3889_v0 }
 0x100   : > { %709 = vst.msk [vmem:[#allocation2 + $0x8c8] sm:$0xf] %vm145_vm0, %v3889_v0  ;;  %710 = vst.msk [vmem:[#allocation2 + $0x8cc] sm:$0xf] %vm145_vm0, %v3889_v0 }
 0x101   : > { %711 = vst.msk [vmem:[#allocation2 + $0x8d0] sm:$0xf] %vm145_vm0, %v3889_v0  ;;  %712 = vst.msk [vmem:[#allocation2 + $0x8d4] sm:$0xf] %vm145_vm0, %v3889_v0 }
 0x102   : > { %714 = vst.msk [vmem:[#allocation2 + $0x8dc] sm:$0xf] %vm145_vm0, %v3889_v0  ;;  %715 = vst.msk [vmem:[#allocation2 + $0x8e0] sm:$0xf] %vm145_vm0, %v3889_v0 }
 0x103   : > { %716 = vst.msk [vmem:[#allocation2 + $0x8e4] sm:$0xf] %vm145_vm0, %v3889_v0  ;;  %717 = vst.msk [vmem:[#allocation2 + $0x8e8] sm:$0xf] %vm145_vm0, %v3889_v0 }
 0x104   : > { %718 = vst.msk [vmem:[#allocation2 + $0x8ec] sm:$0xf] %vm145_vm0, %v3889_v0  ;;  %719 = vst.msk [vmem:[#allocation2 + $0x8f0] sm:$0xf] %vm145_vm0, %v3889_v0 }
 0x105   : > { %720 = vst.msk [vmem:[#allocation2 + $0x8f4] sm:$0xf] %vm145_vm0, %v3889_v0  ;;  %721 = vst.msk [vmem:[#allocation2 + $0x8f8] sm:$0xf] %vm145_vm0, %v3889_v0 }
 0x106   : > { %723 = vst.msk [vmem:[#allocation2 + $0x900] sm:$0xf] %vm145_vm0, %v3889_v0  ;;  %724 = vst.msk [vmem:[#allocation2 + $0x904] sm:$0xf] %vm145_vm0, %v3889_v0 }
 0x107   : > { %725 = vst.msk [vmem:[#allocation2 + $0x908] sm:$0xf] %vm145_vm0, %v3889_v0  ;;  %726 = vst.msk [vmem:[#allocation2 + $0x90c] sm:$0xf] %vm145_vm0, %v3889_v0 }
 0x108   : > { %727 = vst.msk [vmem:[#allocation2 + $0x910] sm:$0xf] %vm145_vm0, %v3889_v0  ;;  %728 = vst.msk [vmem:[#allocation2 + $0x914] sm:$0xf] %vm145_vm0, %v3889_v0 }
 0x109   : > { %729 = vst.msk [vmem:[#allocation2 + $0x918] sm:$0xf] %vm145_vm0, %v3889_v0  ;;  %730 = vst.msk [vmem:[#allocation2 + $0x91c] sm:$0xf] %vm145_vm0, %v3889_v0 }
 0x10a   : > { %732 = vst.msk [vmem:[#allocation2 + $0x924] sm:$0xf] %vm145_vm0, %v3889_v0  ;;  %733 = vst.msk [vmem:[#allocation2 + $0x928] sm:$0xf] %vm145_vm0, %v3889_v0 }
 0x10b   : > { %734 = vst.msk [vmem:[#allocation2 + $0x92c] sm:$0xf] %vm145_vm0, %v3889_v0  ;;  %735 = vst.msk [vmem:[#allocation2 + $0x930] sm:$0xf] %vm145_vm0, %v3889_v0 }
 0x10c   : > { %736 = vst.msk [vmem:[#allocation2 + $0x934] sm:$0xf] %vm145_vm0, %v3889_v0  ;;  %737 = vst.msk [vmem:[#allocation2 + $0x938] sm:$0xf] %vm145_vm0, %v3889_v0 }
 0x10d   : > { %738 = vst.msk [vmem:[#allocation2 + $0x93c] sm:$0xf] %vm145_vm0, %v3889_v0  ;;  %739 = vst.msk [vmem:[#allocation2 + $0x940] sm:$0xf] %vm145_vm0, %v3889_v0 }
 0x10e   : > { %155 = vst.msk [vmem:[#allocation2 + $0x20] sm:$0x1] %vm154_vm1, %v3889_v0  ;;  %164 = vst.msk [vmem:[#allocation2 + $0x44] sm:$0x1] %vm154_vm1, %v3889_v0 }
 0x10f   : > { %173 = vst.msk [vmem:[#allocation2 + $0x68] sm:$0x1] %vm154_vm1, %v3889_v0  ;;  %182 = vst.msk [vmem:[#allocation2 + $0x8c] sm:$0x1] %vm154_vm1, %v3889_v0 }
 0x110   : > { %191 = vst.msk [vmem:[#allocation2 + $0xb0] sm:$0x1] %vm154_vm1, %v3889_v0  ;;  %200 = vst.msk [vmem:[#allocation2 + $0xd4] sm:$0x1] %vm154_vm1, %v3889_v0 }
 0x111   : > { %209 = vst.msk [vmem:[#allocation2 + $0xf8] sm:$0x1] %vm154_vm1, %v3889_v0  ;;  %218 = vst.msk [vmem:[#allocation2 + $0x11c] sm:$0x1] %vm154_vm1, %v3889_v0 }
 0x112   : > { %227 = vst.msk [vmem:[#allocation2 + $0x140] sm:$0x1] %vm154_vm1, %v3889_v0  ;;  %236 = vst.msk [vmem:[#allocation2 + $0x164] sm:$0x1] %vm154_vm1, %v3889_v0 }
 0x113   : > { %245 = vst.msk [vmem:[#allocation2 + $0x188] sm:$0x1] %vm154_vm1, %v3889_v0  ;;  %254 = vst.msk [vmem:[#allocation2 + $0x1ac] sm:$0x1] %vm154_vm1, %v3889_v0 }
 0x114   : > { %263 = vst.msk [vmem:[#allocation2 + $0x1d0] sm:$0x1] %vm154_vm1, %v3889_v0  ;;  %272 = vst.msk [vmem:[#allocation2 + $0x1f4] sm:$0x1] %vm154_vm1, %v3889_v0 }
 0x115   : > { %281 = vst.msk [vmem:[#allocation2 + $0x218] sm:$0x1] %vm154_vm1, %v3889_v0  ;;  %290 = vst.msk [vmem:[#allocation2 + $0x23c] sm:$0x1] %vm154_vm1, %v3889_v0 }
 0x116   : > { %299 = vst.msk [vmem:[#allocation2 + $0x260] sm:$0x1] %vm154_vm1, %v3889_v0  ;;  %308 = vst.msk [vmem:[#allocation2 + $0x284] sm:$0x1] %vm154_vm1, %v3889_v0 }
 0x117   : > { %317 = vst.msk [vmem:[#allocation2 + $0x2a8] sm:$0x1] %vm154_vm1, %v3889_v0  ;;  %326 = vst.msk [vmem:[#allocation2 + $0x2cc] sm:$0x1] %vm154_vm1, %v3889_v0 }
 0x118   : > { %335 = vst.msk [vmem:[#allocation2 + $0x2f0] sm:$0x1] %vm154_vm1, %v3889_v0  ;;  %344 = vst.msk [vmem:[#allocation2 + $0x314] sm:$0x1] %vm154_vm1, %v3889_v0 }
 0x119   : > { %353 = vst.msk [vmem:[#allocation2 + $0x338] sm:$0x1] %vm154_vm1, %v3889_v0  ;;  %362 = vst.msk [vmem:[#allocation2 + $0x35c] sm:$0x1] %vm154_vm1, %v3889_v0 }
 0x11a   : > { %371 = vst.msk [vmem:[#allocation2 + $0x380] sm:$0x1] %vm154_vm1, %v3889_v0  ;;  %380 = vst.msk [vmem:[#allocation2 + $0x3a4] sm:$0x1] %vm154_vm1, %v3889_v0 }
 0x11b   : > { %389 = vst.msk [vmem:[#allocation2 + $0x3c8] sm:$0x1] %vm154_vm1, %v3889_v0  ;;  %398 = vst.msk [vmem:[#allocation2 + $0x3ec] sm:$0x1] %vm154_vm1, %v3889_v0 }
 0x11c   : > { %407 = vst.msk [vmem:[#allocation2 + $0x410] sm:$0x1] %vm154_vm1, %v3889_v0  ;;  %416 = vst.msk [vmem:[#allocation2 + $0x434] sm:$0x1] %vm154_vm1, %v3889_v0 }
 0x11d   : > { %425 = vst.msk [vmem:[#allocation2 + $0x458] sm:$0x1] %vm154_vm1, %v3889_v0  ;;  %434 = vst.msk [vmem:[#allocation2 + $0x47c] sm:$0x1] %vm154_vm1, %v3889_v0 }
 0x11e   : > { %443 = vst.msk [vmem:[#allocation2 + $0x4a0] sm:$0x1] %vm154_vm1, %v3889_v0  ;;  %452 = vst.msk [vmem:[#allocation2 + $0x4c4] sm:$0x1] %vm154_vm1, %v3889_v0 }
 0x11f   : > { %461 = vst.msk [vmem:[#allocation2 + $0x4e8] sm:$0x1] %vm154_vm1, %v3889_v0  ;;  %470 = vst.msk [vmem:[#allocation2 + $0x50c] sm:$0x1] %vm154_vm1, %v3889_v0 }
 0x120   : > { %479 = vst.msk [vmem:[#allocation2 + $0x530] sm:$0x1] %vm154_vm1, %v3889_v0  ;;  %488 = vst.msk [vmem:[#allocation2 + $0x554] sm:$0x1] %vm154_vm1, %v3889_v0 }
 0x121   : > { %497 = vst.msk [vmem:[#allocation2 + $0x578] sm:$0x1] %vm154_vm1, %v3889_v0  ;;  %506 = vst.msk [vmem:[#allocation2 + $0x59c] sm:$0x1] %vm154_vm1, %v3889_v0 }
 0x122   : > { %515 = vst.msk [vmem:[#allocation2 + $0x5c0] sm:$0x1] %vm154_vm1, %v3889_v0  ;;  %524 = vst.msk [vmem:[#allocation2 + $0x5e4] sm:$0x1] %vm154_vm1, %v3889_v0 }
 0x123   : > { %533 = vst.msk [vmem:[#allocation2 + $0x608] sm:$0x1] %vm154_vm1, %v3889_v0  ;;  %542 = vst.msk [vmem:[#allocation2 + $0x62c] sm:$0x1] %vm154_vm1, %v3889_v0 }
 0x124   : > { %551 = vst.msk [vmem:[#allocation2 + $0x650] sm:$0x1] %vm154_vm1, %v3889_v0  ;;  %560 = vst.msk [vmem:[#allocation2 + $0x674] sm:$0x1] %vm154_vm1, %v3889_v0 }
 0x125   : > { %569 = vst.msk [vmem:[#allocation2 + $0x698] sm:$0x1] %vm154_vm1, %v3889_v0  ;;  %578 = vst.msk [vmem:[#allocation2 + $0x6bc] sm:$0x1] %vm154_vm1, %v3889_v0 }
 0x126   : > { %587 = vst.msk [vmem:[#allocation2 + $0x6e0] sm:$0x1] %vm154_vm1, %v3889_v0  ;;  %596 = vst.msk [vmem:[#allocation2 + $0x704] sm:$0x1] %vm154_vm1, %v3889_v0 }
 0x127   : > { %605 = vst.msk [vmem:[#allocation2 + $0x728] sm:$0x1] %vm154_vm1, %v3889_v0  ;;  %614 = vst.msk [vmem:[#allocation2 + $0x74c] sm:$0x1] %vm154_vm1, %v3889_v0 }
 0x128   : > { %623 = vst.msk [vmem:[#allocation2 + $0x770] sm:$0x1] %vm154_vm1, %v3889_v0  ;;  %632 = vst.msk [vmem:[#allocation2 + $0x794] sm:$0x1] %vm154_vm1, %v3889_v0 }
 0x129   : > { %641 = vst.msk [vmem:[#allocation2 + $0x7b8] sm:$0x1] %vm154_vm1, %v3889_v0  ;;  %650 = vst.msk [vmem:[#allocation2 + $0x7dc] sm:$0x1] %vm154_vm1, %v3889_v0 }
 0x12a   : > { %659 = vst.msk [vmem:[#allocation2 + $0x800] sm:$0x1] %vm154_vm1, %v3889_v0  ;;  %668 = vst.msk [vmem:[#allocation2 + $0x824] sm:$0x1] %vm154_vm1, %v3889_v0 }
 0x12b   : > { %677 = vst.msk [vmem:[#allocation2 + $0x848] sm:$0x1] %vm154_vm1, %v3889_v0  ;;  %686 = vst.msk [vmem:[#allocation2 + $0x86c] sm:$0x1] %vm154_vm1, %v3889_v0 }
 0x12c   : > { %695 = vst.msk [vmem:[#allocation2 + $0x890] sm:$0x1] %vm154_vm1, %v3889_v0  ;;  %704 = vst.msk [vmem:[#allocation2 + $0x8b4] sm:$0x1] %vm154_vm1, %v3889_v0 }
 0x12d   : > { %713 = vst.msk [vmem:[#allocation2 + $0x8d8] sm:$0x1] %vm154_vm1, %v3889_v0  ;;  %722 = vst.msk [vmem:[#allocation2 + $0x8fc] sm:$0x1] %vm154_vm1, %v3889_v0 }
 0x12e   : > { %731 = vst.msk [vmem:[#allocation2 + $0x920] sm:$0x1] %vm154_vm1, %v3889_v0  ;;  %740 = vst.msk [vmem:[#allocation2 + $0x944] sm:$0x1] %vm154_vm1, %v3889_v0 }
 0x12f LB: >> { %s3369_s21 = sshll.u32 %s3883_s20, 5  ;;  %s3070_s22 = smul.u32 36, %s3883_s20  ;;  %vm846_vm2 = vsmask.f32 7938  ;;  %vm759_vm3 = vsmask.f32 256  ;;  %s3883_s20 = sphi %s5122_s20, %s746_s20  }
 0x130   : >> { %s5130_s23 = scalar_lea.vmem %s5115_s16, %s3369_s21  ;;  %vm760_vm4 = vsmask.f32 4368  ;;  %vm5142_vm5 = vmand %vm145_vm0, %vm846_vm2  ;;  %s746_s20 = sadd.s32 1, %s3883_s20  }
 0x131   : >> { %v750_v1 = vld [vmem:[%s5130_s23] sm:$0xf]  ;;  %v751_v2 = vld [vmem:[%s5130_s23 + $0x4] sm:$0xf]  ;;  %s5134_s24 = scalar_lea.vmem [#allocation2], %s3070_s22  ;;  %vm5149_vm6 = vmor %vm759_vm3, %vm760_vm4  ;;  %p743_p4 = scmp.ge.s32.totalorder %s746_s20, 64  }
 0x132   : >> { %v763_v3 = vshrl.u32 %v750_v1, 16  ;;  %v766_v4 = vshll.u32 %v750_v1, 16  ;;  %v771_v5 = vshrl.u32 %v751_v2, 16  ;;  %v774_v6 = vshll.u32 %v751_v2, 16  ;;  %v752_v8 = vld [vmem:[%s5130_s23 + $0x8] sm:$0xf]  ;;  %vm859_vm7 = vmand %vm154_vm1, %vm759_vm3 }
 0x133   : >> { %v753_v9 = vld [vmem:[%s5130_s23 + $0xc] sm:$0xf]  ;;  %v754_v10 = vld [vmem:[%s5130_s23 + $0x10] sm:$0xf]  ;;  %v780_v14 = vshrl.u32 %v752_v8, 16  ;;  %v783_v15 = vshll.u32 %v752_v8, 16 }
 0x134   : >> { %v765_v11 = vrot.slane %v763_v3, 7  ;;  %v773_v13 = vrot.slane %v771_v5, 7  ;;  %v755_v16 = vld [vmem:[%s5130_s23 + $0x14] sm:$0xf]  ;;  %v789_v18 = vshrl.u32 %v753_v9, 16  ;;  %v792_v19 = vshll.u32 %v753_v9, 16 }
 0x135   : >> { %v3131_v7 = vld [vmem:[%s5134_s24 + $0x24] sm:$0xf]  ;;  %v798_v20 = vshrl.u32 %v754_v10, 16  ;;  %v801_v21 = vshll.u32 %v754_v10, 16  ;;  %v756_v22 = vld [vmem:[%s5130_s23 + $0x18] sm:$0xf] }
 0x136   : >> { %v768_v23 = vor.u32 %v766_v4, %v765_v11  ;;  %v769_v24 = vrot.slane %v765_v11, 4  ;;  %v776_v25 = vor.u32 %v774_v6, %v773_v13  ;;  %v778_v26 = vrot.slane %v773_v13, 4  ;;  %v757_v35 = vld [vmem:[%s5130_s23 + $0x1c] sm:$0xf]  ;;  %v3140_v56 = vld [vmem:[%s5134_s24 + $0x44] sm:$0x1] }
 0x137   : >> { %v782_v27 = vrot.slane %v780_v14, 7  ;;  %v791_v28 = vrot.slane %v789_v18, 7  ;;  %v800_v29 = vrot.slane %v798_v20, 7  ;;  %v807_v30 = vshrl.u32 %v755_v16, 16  ;;  %s5193_s25 = smov (%p743_p4), 0  }
 0x138   : >> { %v849_v31 = vsel %vm5142_vm5, %v768_v23, %v3131_v7  ;;  %v777_v32 = vsel %vm5149_vm6, %v769_v24, %v776_v25  ;;  %v810_v33 = vshll.u32 %v755_v16, 16  ;;  %v816_v34 = vshrl.u32 %v756_v22, 16 }
 0x139   : >> { %3132 = vst [vmem:[%s5134_s24 + $0x24] sm:$0xf] %v849_v31  ;;  %3133 = vst.msk [vmem:[%s5134_s24 + $0x28] sm:$0xf] %vm145_vm0, %v777_v32  ;;  %v785_v36 = vor.u32 %v783_v15, %v782_v27  ;;  %v787_v37 = vrot.slane %v782_v27, 4  ;;  %v794_v38 = vor.u32 %v792_v19, %v791_v28  ;;  %v796_v39 = vrot.slane %v791_v28, 4 }
 0x13a   : >> { %v803_v40 = vor.u32 %v801_v21, %v800_v29  ;;  %v805_v41 = vrot.slane %v800_v29, 4  ;;  %v809_v42 = vrot.slane %v807_v30, 7  ;;  %v818_v43 = vrot.slane %v816_v34, 7 }
 0x13b   : >> { %v786_v44 = vsel %vm5149_vm6, %v778_v26, %v785_v36  ;;  %v795_v45 = vsel %vm5149_vm6, %v787_v37, %v794_v38  ;;  %v819_v46 = vshll.u32 %v756_v22, 16  ;;  %v825_v47 = vshrl.u32 %v757_v35, 16 }
 0x13c   : >> { %3134 = vst.msk [vmem:[%s5134_s24 + $0x2c] sm:$0xf] %vm145_vm0, %v786_v44  ;;  %3135 = vst.msk [vmem:[%s5134_s24 + $0x30] sm:$0xf] %vm145_vm0, %v795_v45  ;;  %v804_v48 = vsel %vm5149_vm6, %v796_v39, %v803_v40  ;;  %v812_v49 = vor.u32 %v810_v33, %v809_v42  ;;  %v814_v50 = vrot.slane %v809_v42, 4  ;;  %v823_v52 = vrot.slane %v818_v43, 4 }
 0x13d   : >> { %3136 = vst.msk [vmem:[%s5134_s24 + $0x34] sm:$0xf] %vm145_vm0, %v804_v48  ;;  %v821_v51 = vor.u32 %v819_v46, %v818_v43  ;;  %v827_v53 = vrot.slane %v825_v47, 7  ;;  %v828_v54 = vshll.u32 %v757_v35, 16  ;;  %745 = sbr.rel (!%p743_p4) target bundleno = 303 (0x12f), region = 94 }
 0x13e   : >> { %v813_v55 = vsel %vm5149_vm6, %v805_v41, %v812_v49 }
 0x13f   : >> { %3137 = vst.msk [vmem:[%s5134_s24 + $0x38] sm:$0xf] %vm145_vm0, %v813_v55  ;;  %v822_v57 = vsel %vm5149_vm6, %v814_v50, %v821_v51  ;;  %v830_v58 = vor.u32 %v828_v54, %v827_v53  ;;  %v832_v59 = vrot.slane %v827_v53, 4 }
 0x140   : >> { %3138 = vst.msk [vmem:[%s5134_s24 + $0x3c] sm:$0xf] %vm145_vm0, %v822_v57 }
 0x141   : >> { %v831_v60 = vsel %vm5149_vm6, %v823_v52, %v830_v58  ;;  %v861_v61 = vsel %vm859_vm7, %v832_v59, %v3140_v56 }
 0x142   : >> { %3139 = vst.msk [vmem:[%s5134_s24 + $0x40] sm:$0xf] %vm145_vm0, %v831_v60  ;;  %3141 = vst [vmem:[%s5134_s24 + $0x44] sm:$0x1] %v861_v61 }
 0x144 LB: >> { %vm957_vm8 = vcmask 1040384   ;;  %v3195_v62 = vld [vmem:[%s5646_s1 + $0x5] sm:$0x1]  ;;  %v3194_v0 = vld [vmem:[%s5646_s1 + $0x4] sm:$0x1]  ;;  %s3370_s30 = smul.u32 36, %s3887_s25  ;;  %s3887_s25 = sphi %s5193_s25, %s868_s25  }
 0x145   : >> { %3711 = vmatprep.subr.msk.bf16.mxu1 %vm957_vm8, %v3195_v62  ;;  %v1461_v63 = vsel %vm957_vm8, %v3195_v62, 0  ;;  %v3143_v1 = vld [vmem:[%s5646_s1 + $0x1] sm:$0x1]  ;;  %vm944_vm9 = vcmask 15360   ;;  %vm1438_vm10 = vcmask 1046528   ;;  %v1580_v16 = vsel %vm957_vm8, %v3194_v0, 0 }
 0x146   : >> { %3492 = vmatpush3.bf16.msra.mxu1 %v1461_v63  ;;  %3707 = vmatprep.subr.msk.bf16.mxu0 %vm957_vm8, %v3143_v1  ;;  %v959_v2 = vsel %vm957_vm8, %v3143_v1, 0  ;;  %s5213_s5 = scalar_lea.vmem [#allocation2], %s3370_s30  ;;  %v3219_v24 = vld [vmem:[%s5646_s1 + $0x6] sm:$0x1]  ;;  %vm907_vm11 = vsmask.f32 7424 }
 0x147   : >> { %3712 = vmatprep.subr.msk.bf16.mxu1 %vm957_vm8, %v3194_v0  ;;  %3452 = vmatpush3.bf16.msra.mxu0 %v959_v2  ;;  %v1730_v41 = vsel %vm957_vm8, %v3219_v24, 0  ;;  %v3230_v60 = vld [vmem:[%s5646_s1 + $0x7] sm:$0x1]  ;;  %s3193_s8 = sshll.u32 %s3887_s25, 7  ;;  %vm1392_vm12 = vcmask 7168   ;;  %vm1948_vm13 = vcmask 15368  }
 0x148   : >> { %s5565_s10 = scalar_lea.vmem %s5120_s19, %s3193_s8  ;;  %s868_s25 = sadd.s32 1, %s3887_s25  }
 0x149   : >> { %v1401_v3 = vld [vmem:[%s5213_s5] sm:$0xf]  ;;  %v1402_v4 = vld [vmem:[%s5213_s5 + $0x4] sm:$0xf]  ;;  %v3750_v6 = vld [vmem:[%s5213_s5 + $0x8] sm:$0xff]   ;;  %p865_p5 = scmp.ge.s32.totalorder %s868_s25, 64  }
 0x14a   : >> { %v1412_v5 = vld [vmem:[%s5213_s5] sm:$0xe]  ;;  %v3205_v7 = vcombine.low %v1401_v3, %v1402_v4  ;;  %v3752_v9 = vld [vmem:[%s5213_s5 + $0x10] sm:$0xff]   ;;  %v1440_v10 = vrot.slane %v3750_v6, 1  ;;  %v5221_v12 = vld [vmem:[%s5213_s5 + $0x18] sm:$0xff]   ;;  %v1539_v22 = vshll.u32 %v3750_v6, 16 }
 0x14b   : >> { %v3196_v8 = vcombine.low %v1412_v5, %v1402_v4  ;;  %v1442_v14 = vrot.slane %v3752_v9, 1  ;;  %v1444_v17 = vrot.slane %v5221_v12, 1  ;;  %v3754_v18 = vld [vmem:[%s5213_s5 + $0x20] ss:$0 sps:$4 sm:$0x11]   ;;  %v1547_v30 = vshll.u32 %v3752_v9, 16 }
 0x14c   : >> { %v1534_v11 = vshll.u32 %v3205_v7, 16  ;;  %v1532_v15 = vshrl.u32 %v3205_v7, 16  ;;  %v3210_v25 = vld [vmem:[%s5213_s5 + $0x24] sm:$0xf]  ;;  %v5236_v26 = vld [vmem:[%s5213_s5 + $0x28] sm:$0xf] }
 0x14d   : >> { %v1439_v13 = vrot.slane %v3196_v8, 1  ;;  %v1443_v20 = vsel %vm1438_vm10, %v1440_v10, %v1442_v14  ;;  %v1445_v23 = vsel %vm1438_vm10, %v1442_v14, %v1444_v17  ;;  %v1446_v27 = vrot.slane %v3754_v18, 1  ;;  %v5245_v37 = vld [vmem:[%s5213_s5 + $0x2c] sm:$0xff]   ;;  %v5252_v43 = vld [vmem:[%s5213_s5] sm:$0xff]   ;;  %v5266_v56 = vld [vmem:[%s5213_s5 + $0x18] sm:$0xff]  }
 0x14e   : >> { %v1536_v21 = vrot.slane %v1534_v11, 1  ;;  %v1541_v29 = vrot.slane %v1539_v22, 1  ;;  %v3220_v31 = vcombine.low %v3210_v25, %v5236_v26  ;;  %v1543_v33 = vshrl.u32 %v3750_v6, 16  ;;  %v5255_v44 = vld [vmem:[%s5213_s5 + $0x8] sm:$0xff]   ;;  %v5258_v47 = vld [vmem:[%s5213_s5 + $0x10] sm:$0xff]   ;;  %v5280_v3 = vld [vmem:[%s5213_s5 + $0x3c] sm:$0xff]  }
 0x14f   : >> { %v1441_v19 = vsel %vm1438_vm10, %v1439_v13, %v1440_v10  ;;  %v1447_v32 = vsel %vm1438_vm10, %v1444_v17, %v1446_v27  ;;  %v1551_v35 = vshrl.u32 %v3752_v9, 16  ;;  %v1555_v36 = vshll.u32 %v5221_v12, 16  ;;  %v5276_v0 = vld [vmem:[%s5213_s5 + $0x34] sm:$0xff]   ;;  %v3771_v10 = vld [vmem:[%s5213_s5 + $0x20] ss:$0 sps:$4 sm:$0x11]  }
 0x150   : >> { %3493 = vmatprep.mubr.msk.bf16.mxu1 %vm944_vm9, %v1441_v19  ;;  %v1537_v28 = vor.u32 %v1536_v21, %v1532_v15  ;;  %v1549_v38 = vrot.slane %v1547_v30, 1  ;;  %v1684_v39 = vshll.u32 %v3220_v31, 16  ;;  %v1545_v40 = vor.u32 %v1543_v33, %v1541_v29  ;;  %v880_v15 = vld [vmem:[%s5646_s1] sm:$0x1] }
 0x151   : >> { %3494 = vmatmul.mubr.msk.bf16.vlgmr.msra.gmra.mrb[0].mxu1 %vm944_vm9, %v1443_v20  ;;  %v1559_v42 = vshrl.u32 %v5221_v12, 16  ;;  %v1557_v46 = vrot.slane %v1555_v36, 1  ;;  %v1563_v48 = vshll.u32 %v3754_v18, 16  ;;  %v1689_v49 = vshll.u32 %v5245_v37, 16  ;;  %3708 = vmatprep.subr.msk.bf16.mxu0 %vm957_vm8, %v880_v15  ;;  %v3165_v20 = vld [vmem:[%s5646_s1 + $0x2] sm:$0x1] }
 0x152   : >> { %3502 = vmatpush3.bf16.msra.mxu1 %v1580_v16  ;;  %3497 = vmatprep.mubr.msk.bf16.mxu1 %vm944_vm9, %v1445_v23  ;;  %v1542_v34 = vsel %vm907_vm11, %v1537_v28, %v1541_v29  ;;  %v1553_v45 = vor.u32 %v1551_v35, %v1549_v38  ;;  %v1682_v50 = vshrl.u32 %v3220_v31, 16  ;;  %v1686_v51 = vrot.slane %v1684_v39, 1  ;;  %v5310_v31 = vld [vmem:[%s5213_s5 + $0x44] ss:$0 sps:$4 sm:$0x11]  }
 0x153   : >> { %3713 = vmatprep.subr.msk.bf16.mxu1 %vm957_vm8, %v3219_v24  ;;  %v1550_v52 = vsel %vm907_vm11, %v1545_v40, %v1549_v38  ;;  %v909_v53 = vshrl.u32 %v5252_v43, 16  ;;  %v911_v54 = vshll.u32 %v5252_v43, 16  ;;  %v916_v55 = vshll.u32 %v5255_v44, 16  ;;  %v3229_v36 = vld [vmem:[%s5213_s5 + $0x24] sm:$0xe] }
 0x154   : >> { %v1558_v57 = vsel %vm907_vm11, %v1553_v45, %v1557_v46  ;;  %v920_v58 = vshrl.u32 %v5255_v44, 16  ;;  %v924_v59 = vshll.u32 %v5258_v47, 16  ;;  %v1565_v63 = vrot.slane %v1563_v48, 1 }
 0x155   : >> { %v913_v61 = vrot.slane %v911_v54, 1  ;;  %v918_v62 = vrot.slane %v916_v55, 1  ;;  %v1561_v2 = vor.u32 %v1559_v42, %v1557_v46  ;;  %v928_v6 = vshrl.u32 %v5258_v47, 16  ;;  %v3316_v46 = vld [vmem:[%s5646_s1 + $0xd] sm:$0x1] }
 0x156   : >> { %v926_v1 = vrot.slane %v924_v59, 1  ;;  %v1687_v7 = vor.u32 %v1686_v51, %v1682_v50  ;;  %v1691_v8 = vrot.slane %v1689_v49, 1  ;;  %v932_v9 = vshll.u32 %v5266_v56, 16  ;;  %v3315_v55 = vld [vmem:[%s5213_s5 + $0x24] sm:$0xe]  ;;  %v5351_v59 = vld [vmem:[%s5213_s5 + $0x2c] sm:$0xff]  }
 0x157   : >> { %v914_v4 = vor.u32 %v913_v61, %v909_v53  ;;  %v922_v5 = vor.u32 %v920_v58, %v918_v62  ;;  %v936_v11 = vshrl.u32 %v5266_v56, 16  ;;  %v1693_v16 = vshrl.u32 %v5245_v37, 16  ;;  %v3782_v58 = vld [vmem:[%s5213_s5 + $0x24] sm:$0xff]  }
 0x158   : >> { %v930_v14 = vor.u32 %v928_v6, %v926_v1  ;;  %v1697_v17 = vshll.u32 %v5276_v0, 16  ;;  %v934_v18 = vrot.slane %v932_v9, 1  ;;  %v940_v19 = vshll.u32 %v3771_v10, 16  ;;  %v3779_v6 = vld [vmem:[%s5213_s5 + $0x34] sm:$0xff]  }
 0x159   : >> { %3498 = vmatmul.mubr.msk.bf16.gmra.mrb[4].mxu1 %vm944_vm9, %v1447_v32  ;;  %v919_v12 = vsel %vm907_vm11, %v914_v4, %v918_v62  ;;  %v927_v13 = vsel %vm907_vm11, %v922_v5, %v926_v1  ;;  %v1566_v21 = vsel %vm907_vm11, %v1561_v2, %v1565_v63  ;;  %v1701_v22 = vshrl.u32 %v5276_v0, 16  ;;  %v3305_v63 = vld [vmem:[%s5213_s5 + $0x24] sm:$0xf]  ;;  %v3783_v1 = vld [vmem:[%s5213_s5 + $0x2c] sm:$0xff]  }
 0x15a   : >> { %3503 = vmatprep.mubr.msk.bf16.mxu1 %vm944_vm9, %v1542_v34  ;;  %3453 = vmatprep.mubr.msk.bf16.mxu0 %vm944_vm9, %v919_v12  ;;  %v1705_v23 = vshll.u32 %v5280_v3, 16  ;;  %v1035_v24 = vsel %vm957_vm8, %v880_v15, 0  ;;  %v1692_v25 = vsel %vm907_vm11, %v1687_v7, %v1691_v8  ;;  %v935_v27 = vsel %vm907_vm11, %v930_v14, %v934_v18  ;;  %v3776_v4 = vld [vmem:[%s5213_s5 + $0x2c] sm:$0xff]   ;;  %v5373_v12 = vld [vmem:[%s5213_s5 + $0x34] sm:$0xff]  }
 0x15b   : >> { %3454 = vmatmul.mubr.msk.bf16.vlgmr.msra.gmra.mrb[0].mxu0 %vm944_vm9, %v927_v13  ;;  %v938_v28 = vor.u32 %v936_v11, %v934_v18  ;;  %v942_v29 = vrot.slane %v940_v19, 1  ;;  %v1699_v30 = vrot.slane %v1697_v17, 1  ;;  %v1695_v32 = vor.u32 %v1693_v16, %v1691_v8  ;;  %v3246_v13 = vld [vmem:[%s5646_s1 + $0x9] sm:$0x1]  ;;  %v3784_v15 = vld [vmem:[%s5213_s5 + $0x34] sm:$0xff]   ;;  %v5383_v17 = vld [vmem:[%s5213_s5 + $0x3c] sm:$0xff]  }
 0x15c   : >> { %3462 = vmatpush3.bf16.msra.mxu0 %v1035_v24  ;;  %3457 = vmatprep.mubr.msk.bf16.mxu0 %vm944_vm9, %v935_v27  ;;  %v1707_v34 = vrot.slane %v1705_v23, 1  ;;  %v1709_v39 = vshrl.u32 %v5280_v3, 16  ;;  %v1713_v40 = vshll.u32 %v5310_v31, 16  ;;  %v3231_v45 = vcombine.low %v3229_v36, %v5236_v26  ;;  %v3780_v23 = vld [vmem:[%s5213_s5 + $0x3c] sm:$0xff]  }
 0x15d   : >> { %3709 = vmatprep.subr.msk.bf16.mxu0 %vm957_vm8, %v3165_v20  ;;  %v1703_v33 = vor.u32 %v1701_v22, %v1699_v30  ;;  %v943_v35 = vsel %vm907_vm11, %v938_v28, %v942_v29  ;;  %v1700_v38 = vsel %vm907_vm11, %v1695_v32, %v1699_v30  ;;  %v1812_v51 = vrot.slane %v5245_v37, 1  ;;  %v3306_v37 = vld [vmem:[%s5213_s5 + $0x28] sm:$0xf] }
 0x15e   : >> { %v1711_v48 = vor.u32 %v1709_v39, %v1707_v34  ;;  %v1715_v49 = vrot.slane %v1713_v40, 1  ;;  %v1811_v50 = vrot.slane %v3231_v45, 1  ;;  %v1149_v26 = vsel %vm957_vm8, %v3165_v20, 0  ;;  %v3785_v20 = vld [vmem:[%s5213_s5 + $0x3c] sm:$0xff]   ;;  %v3340_v45 = vld [vmem:[%s5646_s1 + $0xe] sm:$0x1] }
 0x15f   : >> { %v1708_v42 = vsel %vm907_vm11, %v1703_v33, %v1707_v34  ;;  %v1814_v54 = vrot.slane %v5276_v0, 1  ;;  %v2542_v61 = vsel %vm957_vm8, %v3316_v46, 0  ;;  %v3314_v0 = vld [vmem:[%s5646_s1 + $0xc] sm:$0x1]  ;;  %v1261_v2 = vshll.u32 %v3782_v58, 16 }
 0x160   : >> { %v1813_v53 = vsel %vm1438_vm10, %v1811_v50, %v1812_v51  ;;  %v1259_v8 = vshrl.u32 %v3782_v58, 16  ;;  %v1266_v10 = vshll.u32 %v3783_v1, 16  ;;  %v3326_v11 = vcombine.low %v3305_v63, %v3306_v37  ;;  %v5399_v33 = vld [vmem:[%s5213_s5 + $0x44] ss:$0 sps:$4 sm:$0x11]  }
 0x161   : >> { %3504 = vmatmul.mubr.msk.bf16.vlgmr.msra.gmra.mrb[0].mxu1 %vm944_vm9, %v1550_v52  ;;  %v1716_v52 = vsel %vm907_vm11, %v1711_v48, %v1715_v49  ;;  %v1263_v9 = vrot.slane %v1261_v2, 1  ;;  %v1274_v24 = vshll.u32 %v3784_v15, 16  ;;  %v1270_v27 = vshrl.u32 %v3783_v1, 16  ;;  %v5411_v49 = vld [vmem:[%s5213_s5 + $0x2c] sm:$0xff]  }
 0x162   : >> { %3512 = vmatpush3.bf16.msra.mxu1 %v1730_v41  ;;  %3507 = vmatprep.mubr.msk.bf16.mxu1 %vm944_vm9, %v1558_v57  ;;  %v1833_v41 = vsel %vm957_vm8, %v3230_v60, 0  ;;  %v3775_v57 = vld [vmem:[%s5213_s5 + $0x24] sm:$0xff]   ;;  %v1268_v19 = vrot.slane %v1266_v10, 1  ;;  %v2615_v22 = vshll.u32 %v3326_v11, 16  ;;  %v1278_v29 = vshrl.u32 %v3784_v15, 16 }
 0x163   : >> { %3714 = vmatprep.subr.msk.bf16.mxu1 %vm957_vm8, %v3230_v60  ;;  %3458 = vmatmul.mubr.msk.bf16.gmra.mrb[4].mxu0 %vm944_vm9, %v943_v35  ;;  %v3317_v60 = vcombine.low %v3315_v55, %v3306_v37  ;;  %v1264_v18 = vor.u32 %v1263_v9, %v1259_v8  ;;  %v1282_v30 = vshll.u32 %v3785_v20, 16  ;;  %v2613_v34 = vshrl.u32 %v3326_v11, 16  ;;  %v5443_v9 = vld [vmem:[%s5213_s5 + $0x3c] sm:$0xff]  }
 0x164   : >> { %3463 = vmatprep.mubr.msk.bf16.mxu0 %vm944_vm9, %v5252_v43  ;;  %v3183_v43 = vld [vmem:[%s5646_s1 + $0x3] sm:$0x1]  ;;  %v2617_v35 = vrot.slane %v2615_v22, 1  ;;  %v2620_v36 = vshll.u32 %v5351_v59, 16  ;;  %v2661_v39 = vsel %vm957_vm8, %v3314_v0, 0  ;;  %v2632_v1 = vshrl.u32 %v5373_v12, 16 }
 0x165   : >> { %v2520_v5 = vrot.slane %v3317_v60, 1  ;;  %v1307_v7 = vsel %vm957_vm8, %v3183_v43, 0  ;;  %v1269_v28 = vsel %vm907_vm11, %v1264_v18, %v1268_v19  ;;  %v1284_v48 = vrot.slane %v1282_v30, 1 }
 0x166   : >> { %v2636_v2 = vshll.u32 %v5383_v17, 16  ;;  %v2005_v18 = vshrl.u32 %v5411_v49, 16  ;;  %v2811_v22 = vsel %vm957_vm8, %v3340_v45, 0 }
 0x169   : >> { %3508 = vmatmul.mubr.msk.bf16.gmra.mrb[4].mxu1 %vm944_vm9, %v1566_v21  ;;  %v2523_v21 = vrot.slane %v5373_v12, 1 }
 0x16a   : >> { %3513 = vmatprep.mubr.msk.bf16.mxu1 %vm944_vm9, %v1692_v25  ;;  %v2525_v25 = vrot.slane %v5383_v17, 1 }
 0x16b   : >> { %3464 = vmatmul.mubr.msk.bf16.vlgmr.msra.gmra.mrb[0].mxu0 %vm944_vm9, %v5255_v44  ;;  %v1816_v44 = vrot.slane %v5280_v3, 1  ;;  %v1818_v3 = vrot.slane %v5310_v31, 1  ;;  %v5395_v31 = vld [vmem:[%s5213_s5 + $0x24] sm:$0xff]  }
 0x16c   : >> { %3467 = vmatprep.mubr.msk.bf16.mxu0 %vm944_vm9, %v5258_v47  ;;  %3472 = vmatpush3.bf16.msra.mxu0 %v1149_v26  ;;  %v1815_v47 = vsel %vm1438_vm10, %v1812_v51, %v1814_v54  ;;  %v2526_v40 = vsel %vm1438_vm10, %v2523_v21, %v2525_v25  ;;  %v1996_v50 = vshll.u32 %v5395_v31, 16  ;;  %v2527_v51 = vrot.slane %v5399_v33, 1 }
 0x16d   : >> { %3710 = vmatprep.subr.msk.bf16.mxu0 %vm957_vm8, %v3183_v43  ;;  %v1817_v62 = vsel %vm1438_vm10, %v1814_v54, %v1816_v44  ;;  %v1819_v14 = vsel %vm1438_vm10, %v1816_v44, %v1818_v3  ;;  %v2618_v26 = vor.u32 %v2617_v35, %v2613_v34  ;;  %v2622_v43 = vrot.slane %v2620_v36, 1  ;;  %v5437_v3 = vld [vmem:[%s5213_s5 + $0x34] sm:$0xff]   ;;  %v3791_v35 = vld [vmem:[%s5213_s5 + $0x44] ss:$0 sps:$4 sm:$0x11]  }
 0x16e   : >> { %v1286_v54 = vshrl.u32 %v3785_v20, 16  ;;  %v1994_v44 = vshrl.u32 %v5395_v31, 16  ;;  %v1998_v60 = vrot.slane %v1996_v50, 1  ;;  %v2528_v63 = vsel %vm1438_vm10, %v2525_v25, %v2527_v51 }
 0x16f   : >> { %v2013_v20 = vshrl.u32 %v5437_v3, 16  ;;  %v2644_v25 = vshll.u32 %v5399_v33, 16  ;;  %v2025_v50 = vshll.u32 %v3791_v35, 16  ;;  %v3799_v35 = vld [vmem:[%s5213_s5 + $0x60] sm:$0xff]  }
 0x171   : >> { %3514 = vmatmul.mubr.msk.bf16.vlgmr.msra.gmra.mrb[0].mxu1 %vm944_vm9, %v1700_v38  ;;  %v1276_v38 = vrot.slane %v1274_v24, 1 }
 0x172   : >> { %3522 = vmatpush3.bf16.msra.mxu1 %v1833_v41  ;;  %3517 = vmatprep.mubr.msk.bf16.mxu1 %vm944_vm9, %v1708_v42  ;;  %v1272_v41 = vor.u32 %v1270_v27, %v1268_v19  ;;  %v3786_v42 = vld [vmem:[%s5213_s5 + $0x44] ss:$0 sps:$4 sm:$0x11]  }
 0x173   : >> { %3719 = vmatprep.subr.msk.bf16.mxu1 %vm957_vm8, %v3316_v46  ;;  %3468 = vmatmul.mubr.msk.bf16.gmra.mrb[4].mxu0 %vm944_vm9, %v5266_v56  ;;  %v2521_v56 = vrot.slane %v5351_v59, 1  ;;  %v1280_v46 = vor.u32 %v1278_v29, %v1276_v38  ;;  %v1290_v55 = vshll.u32 %v3786_v42, 16 }
 0x174   : >> { %3473 = vmatprep.mubr.msk.bf16.mxu0 %vm944_vm9, %v3775_v57  ;;  %v1277_v37 = vsel %vm907_vm11, %v1272_v41, %v1276_v38  ;;  %v5423_v57 = vld [vmem:[%s5213_s5 + $0x4c] sm:$0xf]  ;;  %v5471_v38 = vld [vmem:[%s5213_s5 + $0x58] sm:$0xff]  }
 0x175   : >> { %v2522_v16 = vsel %vm1438_vm10, %v2520_v5, %v2521_v56  ;;  %v2524_v32 = vsel %vm1438_vm10, %v2521_v56, %v2523_v21  ;;  %v1285_v58 = vsel %vm907_vm11, %v1280_v46, %v1284_v48  ;;  %v2623_v56 = vsel %vm907_vm11, %v2618_v26, %v2622_v43 }
 0x176   : >> { %v1288_v5 = vor.u32 %v1286_v54, %v1284_v48  ;;  %v2017_v21 = vshll.u32 %v5443_v9, 16  ;;  %v2021_v48 = vshrl.u32 %v5443_v9, 16  ;;  %v2782_v54 = vshrl.u32 %v5471_v38, 16 }
 0x178   : >> { %v2019_v33 = vrot.slane %v2017_v21, 1 }
 0x179   : >> { %3518 = vmatmul.mubr.msk.bf16.gmra.mrb[4].mxu1 %vm944_vm9, %v1716_v52  ;;  %v2628_v52 = vshll.u32 %v5373_v12, 16  ;;  %v5449_v12 = vld [vmem:[%s5213_s5 + $0x50] sm:$0xff]  }
 0x17a   : >> { %3523 = vmatprep.mubr.msk.bf16.mxu1 %vm944_vm9, %v1813_v53  ;;  %v3331_v53 = vld [vmem:[%s5213_s5 + $0x48] sm:$0xf]  ;;  %v2770_v27 = vshll.u32 %v5449_v12, 16 }
 0x17b   : >> { %3474 = vmatmul.mubr.msk.bf16.vlgmr.msra.gmra.mrb[0].mxu0 %vm944_vm9, %v3776_v4  ;;  %v3341_v4 = vcombine.low %v3331_v53, %v5423_v57 }
 0x17c   : >> { %3477 = vmatprep.mubr.msk.bf16.mxu0 %vm944_vm9, %v3779_v6  ;;  %3482 = vmatpush3.bf16.msra.mxu0 %v1307_v7  ;;  %v1292_v6 = vrot.slane %v1290_v55, 1  ;;  %v2630_v7 = vrot.slane %v2628_v52, 1  ;;  %v2772_v41 = vrot.slane %v2770_v27, 1  ;;  %v3268_v52 = vld [vmem:[%s5646_s1 + $0xa] sm:$0x1] }
 0x17d   : >> { %3715 = vmatprep.subr.msk.bf16.mxu0 %vm957_vm8, %v3246_v13  ;;  %v2765_v15 = vshll.u32 %v3341_v4, 16  ;;  %v2763_v30 = vshrl.u32 %v3341_v4, 16 }
 0x17e   : >> { %v2634_v11 = vor.u32 %v2632_v1, %v2630_v7 }
 0x181   : >> { %3524 = vmatmul.mubr.msk.bf16.vlgmr.msra.gmra.mrb[0].mxu1 %vm944_vm9, %v1815_v47  ;;  %v2042_v47 = vsel %vm957_vm8, %v3246_v13, 0  ;;  %v2009_v13 = vshll.u32 %v5437_v3, 16 }
 0x182   : >> { %3572 = vmatpush3.bf16.msra.mxu1 %v2542_v61  ;;  %3527 = vmatprep.mubr.msk.bf16.mxu1 %vm944_vm9, %v1817_v62  ;;  %v2001_v61 = vshll.u32 %v5411_v49, 16  ;;  %v3244_v62 = vld [vmem:[%s5646_s1 + $0x8] sm:$0x1] }
 0x183   : >> { %3720 = vmatprep.subr.msk.bf16.mxu1 %vm957_vm8, %v3314_v0  ;;  %3478 = vmatmul.mubr.msk.bf16.gmra.mrb[4].mxu0 %vm944_vm9, %v3780_v23  ;;  %v2624_v0 = vshrl.u32 %v5351_v59, 16  ;;  %v1999_v59 = vor.u32 %v1998_v60, %v1994_v44  ;;  %v2640_v23 = vshrl.u32 %v5383_v17, 16  ;;  %v3351_v17 = vld [vmem:[%s5646_s1 + $0xf] sm:$0x1]  ;;  %v2118_v26 = vsel %vm957_vm8, %v3244_v62, 0 }
 0x184   : >> { %3483 = vmatprep.mubr.msk.bf16.mxu0 %vm944_vm9, %v1269_v28  ;;  %v2003_v8 = vrot.slane %v2001_v61, 1  ;;  %v2011_v28 = vrot.slane %v2009_v13, 1  ;;  %v2893_v13 = vrot.slane %v5449_v12, 1 }
 0x185   : >> { %v2626_v10 = vor.u32 %v2624_v0, %v2622_v43  ;;  %v2778_v43 = vshll.u32 %v5471_v38, 16 }
 0x186   : >> { %v2004_v19 = vsel %vm907_vm11, %v1999_v59, %v2003_v8  ;;  %v2007_v34 = vor.u32 %v2005_v18, %v2003_v8  ;;  %v2015_v36 = vor.u32 %v2013_v20, %v2011_v28  ;;  %v3792_v18 = vld [vmem:[%s5213_s5 + $0x48] sm:$0xff]   ;;  %v3797_v20 = vld [vmem:[%s5213_s5 + $0x50] sm:$0xff]  }
 0x187   : >> { %v2631_v24 = vsel %vm907_vm11, %v2626_v10, %v2630_v7  ;;  %v2780_v60 = vrot.slane %v2778_v43, 1 }
 0x188   : >> { %v2012_v46 = vsel %vm907_vm11, %v2007_v34, %v2011_v28  ;;  %v2020_v51 = vsel %vm907_vm11, %v2015_v36, %v2019_v33  ;;  %v2349_v28 = vshll.u32 %v3797_v20, 16 }
 0x189   : >> { %3528 = vmatmul.mubr.msk.bf16.gmra.mrb[4].mxu1 %vm944_vm9, %v1819_v14  ;;  %v2638_v14 = vrot.slane %v2636_v2, 1  ;;  %v3350_v2 = vld [vmem:[%s5213_s5 + $0x48] sm:$0xe] }
 0x18a   : >> { %3573 = vmatprep.mubr.msk.bf16.mxu1 %vm944_vm9, %v2522_v16  ;;  %v1293_v16 = vsel %vm907_vm11, %v1288_v5, %v1292_v6  ;;  %v2914_v6 = vsel %vm957_vm8, %v3351_v17, 0  ;;  %v3352_v59 = vcombine.low %v3350_v2, %v5423_v57  ;;  %v3286_v57 = vld [vmem:[%s5646_s1 + $0xb] sm:$0x1]  ;;  %v2351_v34 = vrot.slane %v2349_v28, 1 }
 0x18b   : >> { %3484 = vmatmul.mubr.msk.bf16.vlgmr.msra.gmra.mrb[0].mxu0 %vm944_vm9, %v1277_v37  ;;  %v2639_v29 = vsel %vm907_vm11, %v2634_v11, %v2638_v14  ;;  %v2774_v37 = vshrl.u32 %v5449_v12, 16  ;;  %v2895_v12 = vrot.slane %v5471_v38, 1 }
 0x18c   : >> { %3487 = vmatprep.mubr.msk.bf16.mxu0 %vm944_vm9, %v1285_v58  ;;  %3532 = vmatpush3.bf16.msra.mxu0 %v2042_v47  ;;  %v2023_v58 = vor.u32 %v2021_v48, %v2019_v33  ;;  %v2027_v47 = vrot.slane %v2025_v50, 1  ;;  %v2892_v11 = vrot.slane %v3352_v59, 1  ;;  %v2353_v33 = vshrl.u32 %v3797_v20, 16 }
 0x18d   : >> { %3716 = vmatprep.subr.msk.bf16.mxu0 %vm957_vm8, %v3244_v62  ;;  %v2776_v61 = vor.u32 %v2774_v37, %v2772_v41  ;;  %v3778_v62 = vld [vmem:[%s5213_s5 + $0x68] ss:$0 sps:$4 sm:$0x11]  }
 0x18e   : >> { %v2028_v1 = vsel %vm907_vm11, %v2023_v58, %v2027_v47  ;;  %v2794_v5 = vshll.u32 %v3778_v62, 16 }
 0x190   : >> { %v2796_v10 = vrot.slane %v2794_v5, 1 }
 0x191   : >> { %3574 = vmatmul.mubr.msk.bf16.vlgmr.msra.gmra.mrb[8].mxu1 %vm944_vm9, %v2524_v32  ;;  %v2767_v32 = vrot.slane %v2765_v15, 1  ;;  %v2894_v15 = vsel %vm1438_vm10, %v2892_v11, %v2893_v13 }
 0x192   : >> { %3582 = vmatpush3.bf16.msra.mxu1 %v2661_v39  ;;  %3577 = vmatprep.mubr.msk.bf16.mxu1 %vm944_vm9, %v2526_v40  ;;  %v2642_v39 = vor.u32 %v2640_v23, %v2638_v14  ;;  %v2646_v40 = vrot.slane %v2644_v25, 1  ;;  %v2232_v14 = vsel %vm957_vm8, %v3268_v52, 0  ;;  %v3793_v23 = vld [vmem:[%s5213_s5 + $0x50] sm:$0xff]   ;;  %v2390_v25 = vsel %vm957_vm8, %v3286_v57, 0 }
 0x193   : >> { %3721 = vmatprep.subr.msk.bf16.mxu1 %vm957_vm8, %v3340_v45  ;;  %3488 = vmatmul.mubr.msk.bf16.gmra.mrb[4].mxu0 %vm944_vm9, %v1293_v16  ;;  %v2768_v42 = vor.u32 %v2767_v32, %v2763_v30  ;;  %v5476_v45 = vld [vmem:[%s5213_s5 + $0x60] sm:$0xff]   ;;  %v3798_v30 = vld [vmem:[%s5213_s5 + $0x58] sm:$0xff]  }
 0x194   : >> { %3533 = vmatprep.mubr.msk.bf16.mxu0 %vm944_vm9, %v2004_v19  ;;  %v2647_v53 = vsel %vm907_vm11, %v2642_v39, %v2646_v40  ;;  %v2786_v44 = vshll.u32 %v5476_v45, 16  ;;  %v2790_v4 = vshrl.u32 %v5476_v45, 16  ;;  %v2897_v16 = vrot.slane %v5476_v45, 1  ;;  %v3800_v45 = vld [vmem:[%s5213_s5 + $0x68] ss:$0 sps:$4 sm:$0x11]  }
 0x195   : >> { %v2773_v55 = vsel %vm907_vm11, %v2768_v42, %v2772_v41  ;;  %v2896_v19 = vsel %vm1438_vm10, %v2893_v13, %v2895_v12  ;;  %v2357_v36 = vshll.u32 %v3798_v30, 16  ;;  %v2361_v39 = vshrl.u32 %v3798_v30, 16 }
 0x196   : >> { %v2788_v0 = vrot.slane %v2786_v44, 1  ;;  %v2365_v40 = vshll.u32 %v3799_v35, 16  ;;  %v2355_v42 = vor.u32 %v2353_v33, %v2351_v34 }
 0x197   : >> { %v2359_v41 = vrot.slane %v2357_v36, 1 }
 0x198   : >> { %v2792_v8 = vor.u32 %v2790_v4, %v2788_v0  ;;  %v2367_v48 = vrot.slane %v2365_v40, 1 }
 0x199   : >> { %3578 = vmatmul.mubr.msk.bf16.gmra.mrb[12].mxu1 %vm944_vm9, %v2528_v63  ;;  %v2784_v63 = vor.u32 %v2782_v54, %v2780_v60  ;;  %v2360_v50 = vsel %vm907_vm11, %v2355_v42, %v2359_v41 }
 0x19a   : >> { %3583 = vmatprep.mubr.msk.bf16.mxu1 %vm944_vm9, %v2623_v56  ;;  %v2781_v56 = vsel %vm907_vm11, %v2776_v61, %v2780_v60 }
 0x19b   : >> { %3534 = vmatmul.mubr.msk.bf16.vlgmr.msra.gmra.mrb[8].mxu0 %vm944_vm9, %v2012_v46  ;;  %v2789_v7 = vsel %vm907_vm11, %v2784_v63, %v2788_v0  ;;  %v2363_v46 = vor.u32 %v2361_v39, %v2359_v41 }
 0x19c   : >> { %3537 = vmatprep.mubr.msk.bf16.mxu0 %vm944_vm9, %v2020_v51  ;;  %3542 = vmatpush3.bf16.msra.mxu0 %v2118_v26  ;;  %v2369_v51 = vshrl.u32 %v3799_v35, 16  ;;  %v2373_v26 = vshll.u32 %v3800_v45, 16 }
 0x19d   : >> { %3717 = vmatprep.subr.msk.bf16.mxu0 %vm957_vm8, %v3268_v52  ;;  %v2368_v43 = vsel %vm907_vm11, %v2363_v46, %v2367_v48 }
 0x19e   : >> { %v2371_v52 = vor.u32 %v2369_v51, %v2367_v48 }
 0x1a1   : >> { %3584 = vmatmul.mubr.msk.bf16.vlgmr.msra.gmra.mrb[8].mxu1 %vm944_vm9, %v2631_v24  ;;  %v3794_v24 = vld [vmem:[%s5213_s5 + $0x58] sm:$0xff]  }
 0x1a2   : >> { %3592 = vmatpush3.bf16.msra.mxu1 %v2811_v22  ;;  %3587 = vmatprep.mubr.msk.bf16.mxu1 %vm944_vm9, %v2639_v29  ;;  %v2899_v22 = vrot.slane %v3778_v62, 1 }
 0x1a3   : >> { %3722 = vmatprep.subr.msk.bf16.mxu1 %vm957_vm8, %v3351_v17  ;;  %3538 = vmatmul.mubr.msk.bf16.gmra.mrb[12].mxu0 %vm944_vm9, %v2028_v1  ;;  %v3795_v17 = vld [vmem:[%s5213_s5 + $0x60] sm:$0xff]  }
 0x1a4   : >> { %3543 = vmatprep.mubr.msk.bf16.mxu0 %vm944_vm9, %v5395_v31  ;;  %v2797_v31 = vsel %vm907_vm11, %v2792_v8, %v2796_v10  ;;  %v2900_v29 = vsel %vm1438_vm10, %v2897_v16, %v2899_v22 }
 0x1a9   : >> { %3588 = vmatmul.mubr.msk.bf16.gmra.mrb[12].mxu1 %vm944_vm9, %v2647_v53  ;;  %v2375_v53 = vrot.slane %v2373_v26, 1 }
 0x1aa   : >> { %3593 = vmatprep.mubr.msk.bf16.mxu1 %vm944_vm9, %v2773_v55 }
 0x1ab   : >> { %3544 = vmatmul.mubr.msk.bf16.vlgmr.msra.gmra.mrb[8].mxu0 %vm944_vm9, %v5411_v49  ;;  %v3796_v49 = vld [vmem:[%s5213_s5 + $0x48] sm:$0xff]   ;;  %v2376_v37 = vsel %vm907_vm11, %v2371_v52, %v2375_v53  ;;  %s3890_s5 = smov 1  }
 0x1ac   : >> { %3547 = vmatprep.mubr.msk.bf16.mxu0 %vm944_vm9, %v5437_v3  ;;  %3552 = vmatpush3.bf16.msra.mxu0 %v2232_v14  ;;  %v2898_v3 = vsel %vm1438_vm10, %v2895_v12, %v2897_v16  ;;  %v2344_v21 = vshll.u32 %v3796_v49, 16  ;;  %v2342_v27 = vshrl.u32 %v3796_v49, 16 }
 0x1ad   : >> { %3718 = vmatprep.subr.msk.bf16.mxu0 %vm957_vm8, %v3286_v57 }
 0x1b1   : >> { %3594 = vmatmul.mubr.msk.bf16.vlgmr.msra.gmra.mrb[8].mxu1 %vm944_vm9, %v2781_v56 }
 0x1b2   : >> { %3602 = vmatpush3.bf16.msra.mxu1 %v2914_v6  ;;  %3597 = vmatprep.mubr.msk.bf16.mxu1 %vm944_vm9, %v2789_v7 }
 0x1b3   : >> { %3548 = vmatmul.mubr.msk.bf16.gmra.mrb[12].mxu0 %vm944_vm9, %v5443_v9  ;;  %v2346_v9 = vrot.slane %v2344_v21, 1 }
 0x1b4   : >> { %3553 = vmatprep.mubr.msk.bf16.mxu0 %vm944_vm9, %v3792_v18 }
 0x1b5   : >> { %v2347_v32 = vor.u32 %v2346_v9, %v2342_v27 }
 0x1b7   : >> { %v2352_v38 = vsel %vm907_vm11, %v2347_v32, %v2351_v34 }
 0x1b9   : >> { %3598 = vmatmul.mubr.msk.bf16.gmra.mrb[12].mxu1 %vm944_vm9, %v2797_v31 }
 0x1ba   : >> { %3603 = vmatprep.mubr.msk.bf16.mxu1 %vm944_vm9, %v2894_v15 }
 0x1bb   : >> { %3554 = vmatmul.mubr.msk.bf16.vlgmr.msra.gmra.mrb[8].mxu0 %vm944_vm9, %v3793_v23 }
 0x1bc   : >> { %3557 = vmatprep.mubr.msk.bf16.mxu0 %vm944_vm9, %v3794_v24  ;;  %3562 = vmatpush3.bf16.msra.mxu0 %v2390_v25 }
 0x1c1   : >> { %3604 = vmatmul.mubr.msk.bf16.vlgmr.msra.gmra.mrb[8].mxu1 %vm944_vm9, %v2896_v19 }
 0x1c2   : >> { %3607 = vmatprep.mubr.msk.bf16.mxu1 %vm944_vm9, %v2898_v3 }
 0x1c3   : >> { %3558 = vmatmul.mubr.msk.bf16.gmra.mrb[12].mxu0 %vm944_vm9, %v3795_v17 }
 0x1c4   : >> { %3563 = vmatprep.mubr.msk.bf16.mxu0 %vm944_vm9, %v2352_v38 }
 0x1c9   : >> { %3608 = vmatmul.mubr.msk.bf16.gmra.mrb[12].mxu1 %vm944_vm9, %v2900_v29 }
 0x1cb   : >> { %3564 = vmatmul.mubr.msk.bf16.vlgmr.msra.gmra.mrb[8].mxu0 %vm944_vm9, %v2360_v50 }
 0x1cc   : >> { %3567 = vmatprep.mubr.msk.bf16.mxu0 %vm944_vm9, %v2368_v43 }
 0x1d3   : >> { %3568 = vmatmul.mubr.msk.bf16.gmra.mrb[12].mxu0 %vm944_vm9, %v2376_v37 }
 0x254   : >> { %v3525_v54 = vpop.f32.mrb[0].mxu1 }
 0x255   : >> { %3801 = vtanh.f32 %v3525_v54  ;;  %v1869_v55 = vpop.f32.mrb[1].mxu1 }
 0x256   : >> { %3803 = vtanh.f32 %v1869_v55  ;;  %v3526_v44 = vpop.f32.mrb[2].mxu1 }
 0x257   : >> { %v1872_v58 = vpop.f32.mrb[3].mxu1  ;;  %3805 = vtanh.f32 %v3526_v44 }
 0x258   : >> { %3807 = vtanh.f32 %v1872_v58 }
 0x25c   : >> { %v3529_v47 = vpop.f32.mrb[4].mxu1 }
 0x25d   : >> { %3809 = vtanh.f32 %v3529_v47  ;;  %v1885_v60 = vpop.f32.mrb[5].mxu1 }
 0x25e   : >> { %v3530_v61 = vpop.f32.mrb[6].mxu1  ;;  %v3485_v5 = vpop.f32.mrb[0].mxu0 }
 0x25f   : >> { %v3802_v62 = vpop.eup %3801  ;;  %3811 = vtanh.f32 %v3530_v61  ;;  %v1888_v63 = vpop.f32.mrb[7].mxu1 }
 0x260   : >> { %v3804_v0 = vpop.eup %3803  ;;  %1928 = vrot.lane.b32.xlu1 %v3802_v62, %s3890_s5  ;;  %3813 = vtanh.f32 %v1885_v60  ;;  %v1343_v6 = vpop.f32.mrb[1].mxu0 }
 0x261   : >> { %1924 = vrot.lane.b32.xlu0 %v3804_v0, %s3890_s5  ;;  %v3806_v1 = vpop.eup %3805  ;;  %3815 = vtanh.f32 %v1888_v63  ;;  %v3486_v7 = vpop.f32.mrb[2].mxu0 }
 0x262   : >> { %v3808_v2 = vpop.eup %3807  ;;  %3817 = vtanh.f32 %v3485_v5  ;;  %v1346_v8 = vpop.f32.mrb[3].mxu0 }
 0x263   : >> { %3819 = vtanh.f32 %v1343_v6 }
 0x264   : >> { %1930 = vrot.lane.b32.xlu1 %v3806_v1, %s3890_s5  ;;  %3821 = vtanh.f32 %v3486_v7 }
 0x265   : >> { %1926 = vrot.lane.b32.xlu0 %v3808_v2, %s3890_s5  ;;  %3823 = vtanh.f32 %v1346_v8 }
 0x266   : >> { %v3489_v11 = vpop.f32.mrb[4].mxu0 }
 0x267   : >> { %v3810_v56 = vpop.eup %3809  ;;  %3825 = vtanh.f32 %v3489_v11  ;;  %v1359_v13 = vpop.f32.mrb[5].mxu0 }
 0x268   : >> { %3827 = vtanh.f32 %v1359_v13  ;;  %v3490_v14 = vpop.f32.mrb[6].mxu0 }
 0x269   : >> { %v3812_v4 = vpop.eup %3811  ;;  %1936 = vrot.lane.b32.xlu0 %v3810_v56, %s3890_s5  ;;  %3829 = vtanh.f32 %v3490_v14  ;;  %v1362_v31 = vpop.f32.mrb[7].mxu0 }
 0x26a   : >> { %1938 = vrot.lane.b32.xlu1 %v3812_v4, %s3890_s5  ;;  %v3814_v59 = vpop.eup %3813  ;;  %3831 = vtanh.f32 %v1362_v31 }
 0x26b   : >> { %v3816_v10 = vpop.eup %3815 }
 0x26c   : >> { %v3818_v57 = vpop.eup %3817 }
 0x26d   : >> { %1932 = vrot.lane.b32.xlu0 %v3814_v59, %s3890_s5  ;;  %v3820_v15 = vpop.eup %3819  ;;  %1395 = vst.msk [vmem:[%s5565_s10 + $0x10] sm:$0xff] %vm1392_vm12, %v3818_v57 }
 0x26e   : >> { %1934 = vrot.lane.b32.xlu1 %v3816_v10, %s3890_s5  ;;  %v3822_v12 = vpop.eup %3821  ;;  %1393 = vst.msk [vmem:[%s5565_s10] sm:$0xff] %vm1392_vm12, %v3820_v15 }
 0x26f   : >> { %v3824_v16 = vpop.eup %3823  ;;  %1396 = vst.msk [vmem:[%s5565_s10 + $0x18] sm:$0xff] %vm1392_vm12, %v3822_v12 }
 0x270   : >> { %1394 = vst.msk [vmem:[%s5565_s10 + $0x8] sm:$0xff] %vm1392_vm12, %v3824_v16 }
 0x271   : >> { %v3826_v18 = vpop.eup %3825 }
 0x272   : >> { %v3828_v49 = vpop.eup %3827  ;;  %1399 = vst.msk [vmem:[%s5565_s10 + $0x30] sm:$0xff] %vm1392_vm12, %v3826_v18 }
 0x273   : >> { %v3830_v19 = vpop.eup %3829  ;;  %1397 = vst.msk [vmem:[%s5565_s10 + $0x20] sm:$0xff] %vm1392_vm12, %v3828_v49 }
 0x274   : >> { %v3832_v3 = vpop.eup %3831  ;;  %1400 = vst.msk [vmem:[%s5565_s10 + $0x38] sm:$0xff] %vm1392_vm12, %v3830_v19 }
 0x275   : >> { %1398 = vst.msk [vmem:[%s5565_s10 + $0x28] sm:$0xff] %vm1392_vm12, %v3832_v3 }
 0x294   : >> { %v3605_v20 = vpop.f32.mrb[8].mxu1 }
 0x295   : >> { %3833 = vtanh.f32 %v3605_v20  ;;  %v2950_v21 = vpop.f32.mrb[9].mxu1 }
 0x296   : >> { %v3606_v22 = vpop.f32.mrb[10].mxu1 }
 0x297   : >> { %3835 = vtanh.f32 %v3606_v22  ;;  %v2953_v23 = vpop.f32.mrb[11].mxu1 }
 0x298   : >> { %3837 = vtanh.f32 %v2950_v21 }
 0x299   : >> { %3839 = vtanh.f32 %v2953_v23 }
 0x29c   : >> { %v3609_v24 = vpop.f32.mrb[12].mxu1 }
 0x29d   : >> { %v2966_v25 = vpop.f32.mrb[13].mxu1 }
 0x29e   : >> { %3841 = vtanh.f32 %v2966_v25  ;;  %v3610_v27 = vpop.f32.mrb[14].mxu1  ;;  %v3565_v35 = vpop.f32.mrb[8].mxu0 }
 0x29f   : >> { %v3834_v9 = vpop.eup %3833  ;;  %v2969_v28 = vpop.f32.mrb[15].mxu1 }
 0x2a0   : >> { %3843 = vtanh.f32 %v2969_v28  ;;  %3009 = vrot.lane.b32.xlu0 %v3834_v9, %s3890_s5  ;;  %v2426_v36 = vpop.f32.mrb[9].mxu0 }
 0x2a1   : >> { %v3836_v29 = vpop.eup %3835  ;;  %3845 = vtanh.f32 %v3609_v24  ;;  %v3566_v33 = vpop.f32.mrb[10].mxu0 }
 0x2a2   : >> { %3011 = vrot.lane.b32.xlu1 %v3836_v29, %s3890_s5  ;;  %v3838_v30 = vpop.eup %3837  ;;  %3847 = vtanh.f32 %v3610_v27  ;;  %v2429_v39 = vpop.f32.mrb[11].mxu0 }
 0x2a3   : >> { %v3840_v32 = vpop.eup %3839  ;;  %3849 = vtanh.f32 %v3565_v35 }
 0x2a4   : >> { %3005 = vrot.lane.b32.xlu0 %v3838_v30, %s3890_s5  ;;  %3851 = vtanh.f32 %v2426_v36 }
 0x2a5   : >> { %3853 = vtanh.f32 %v3566_v33 }
 0x2a6   : >> { %3007 = vrot.lane.b32.xlu1 %v3840_v32, %s3890_s5  ;;  %3855 = vtanh.f32 %v2429_v39  ;;  %v3569_v41 = vpop.f32.mrb[12].mxu0 }
 0x2a7   : >> { %3857 = vtanh.f32 %v3569_v41  ;;  %v2442_v42 = vpop.f32.mrb[13].mxu0 }
 0x2a8   : >> { %v3842_v34 = vpop.eup %3841  ;;  %3859 = vtanh.f32 %v2442_v42  ;;  %v3570_v45 = vpop.f32.mrb[14].mxu0 }
 0x2a9   : >> { %3013 = vrot.lane.b32.xlu0 %v3842_v34, %s3890_s5  ;;  %3861 = vtanh.f32 %v3570_v45  ;;  %v2445_v48 = vpop.f32.mrb[15].mxu0 }
 0x2aa   : >> { %v3844_v17 = vpop.eup %3843  ;;  %3863 = vtanh.f32 %v2445_v48 }
 0x2ab   : >> { %3015 = vrot.lane.b32.xlu1 %v3844_v17, %s3890_s5  ;;  %v3846_v38 = vpop.eup %3845 }
 0x2ac   : >> { %v3848_v40 = vpop.eup %3847 }
 0x2ad   : >> { %3017 = vrot.lane.b32.xlu0 %v3846_v38, %s3890_s5  ;;  %v3850_v46 = vpop.eup %3849 }
 0x2ae   : >> { %v3852_v50 = vpop.eup %3851  ;;  %3299 = vst.msk [vmem:[%s5565_s10 + $0x50] sm:$0xff] %vm1392_vm12, %v3850_v46 }
 0x2af   : >> { %3019 = vrot.lane.b32.xlu1 %v3848_v40, %s3890_s5  ;;  %v3854_v51 = vpop.eup %3853  ;;  %3297 = vst.msk [vmem:[%s5565_s10 + $0x40] sm:$0xff] %vm1392_vm12, %v3852_v50 }
 0x2b0   : >> { %v3856_v26 = vpop.eup %3855  ;;  %3300 = vst.msk [vmem:[%s5565_s10 + $0x58] sm:$0xff] %vm1392_vm12, %v3854_v51 }
 0x2b1   : >> { %3298 = vst.msk [vmem:[%s5565_s10 + $0x48] sm:$0xff] %vm1392_vm12, %v3856_v26  ;;  %v3858_v43 = vpop.eup %3857 }
 0x2b2   : >> { %v3860_v52 = vpop.eup %3859  ;;  %3303 = vst.msk [vmem:[%s5565_s10 + $0x70] sm:$0xff] %vm1392_vm12, %v3858_v43 }
 0x2b3   : >> { %v3862_v53 = vpop.eup %3861  ;;  %3301 = vst.msk [vmem:[%s5565_s10 + $0x60] sm:$0xff] %vm1392_vm12, %v3860_v52 }
 0x2b4   : >> { %v3864_v37 = vpop.eup %3863  ;;  %3304 = vst.msk [vmem:[%s5565_s10 + $0x78] sm:$0xff] %vm1392_vm12, %v3862_v53 }
 0x2b5   : >> { %3302 = vst.msk [vmem:[%s5565_s10 + $0x68] sm:$0xff] %vm1392_vm12, %v3864_v37 }
 0x2d2   : >> { %v1929_v54 = vpop.permute.xlu1 %1928 }
 0x2d3   : >> { %1951 = vst.msk [vmem:[%s5565_s10 + $0x10] sm:$0xff] %vm1948_vm13, %v1929_v54  ;;  %v1925_v55 = vpop.permute.xlu0 %1924 }
 0x2d4   : >> { %1949 = vst.msk [vmem:[%s5565_s10] sm:$0xff] %vm1948_vm13, %v1925_v55 }
 0x2d6   : >> { %v1931_v44 = vpop.permute.xlu1 %1930 }
 0x2d7   : >> { %1952 = vst.msk [vmem:[%s5565_s10 + $0x18] sm:$0xff] %vm1948_vm13, %v1931_v44  ;;  %v1927_v58 = vpop.permute.xlu0 %1926 }
 0x2d8   : >> { %1950 = vst.msk [vmem:[%s5565_s10 + $0x8] sm:$0xff] %vm1948_vm13, %v1927_v58 }
 0x2db   : >> { %v1937_v47 = vpop.permute.xlu0 %1936 }
 0x2dc   : >> { %1955 = vst.msk [vmem:[%s5565_s10 + $0x30] sm:$0xff] %vm1948_vm13, %v1937_v47  ;;  %v1939_v60 = vpop.permute.xlu1 %1938 }
 0x2dd   : >> { %1956 = vst.msk [vmem:[%s5565_s10 + $0x38] sm:$0xff] %vm1948_vm13, %v1939_v60 }
 0x2df   : >> { %v1933_v61 = vpop.permute.xlu0 %1932 }
 0x2e0   : >> { %1953 = vst.msk [vmem:[%s5565_s10 + $0x20] sm:$0xff] %vm1948_vm13, %v1933_v61  ;;  %v1935_v62 = vpop.permute.xlu1 %1934 }
 0x2e1   : >> { %1954 = vst.msk [vmem:[%s5565_s10 + $0x28] sm:$0xff] %vm1948_vm13, %v1935_v62 }
 0x312   : >> { %v3010_v63 = vpop.permute.xlu0 %3009 }
 0x313   : >> { %3359 = vst.msk [vmem:[%s5565_s10 + $0x50] sm:$0xff] %vm1948_vm13, %v3010_v63 }
 0x314   : >> { %v3012_v0 = vpop.permute.xlu1 %3011 }
 0x315   : >> { %3360 = vst.msk [vmem:[%s5565_s10 + $0x58] sm:$0xff] %vm1948_vm13, %v3012_v0 }
 0x316   : >> { %v3006_v1 = vpop.permute.xlu0 %3005 }
 0x317   : >> { %3357 = vst.msk [vmem:[%s5565_s10 + $0x40] sm:$0xff] %vm1948_vm13, %v3006_v1 }
 0x318   : >> { %v3008_v2 = vpop.permute.xlu1 %3007 }
 0x319   : >> { %3358 = vst.msk [vmem:[%s5565_s10 + $0x48] sm:$0xff] %vm1948_vm13, %v3008_v2 }
 0x31b   : >> { %v3014_v56 = vpop.permute.xlu0 %3013 }
 0x31c   : >> { %3361 = vst.msk [vmem:[%s5565_s10 + $0x60] sm:$0xff] %vm1948_vm13, %v3014_v56  ;;  %867 = sbr.rel (!%p865_p5) target bundleno = 324 (0x144), region = 105 }
 0x31d   : >> { %v3016_v4 = vpop.permute.xlu1 %3015 }
 0x31e   : >> { %3362 = vst.msk [vmem:[%s5565_s10 + $0x68] sm:$0xff] %vm1948_vm13, %v3016_v4 }
 0x31f   : >> { %v3018_v5 = vpop.permute.xlu0 %3017 }
 0x320   : >> { %3363 = vst.msk [vmem:[%s5565_s10 + $0x70] sm:$0xff] %vm1948_vm13, %v3018_v5 }
 0x321   : >> { %v3020_v6 = vpop.permute.xlu1 %3019 }
 0x322   : >> { %3364 = vst.msk [vmem:[%s5565_s10 + $0x78] sm:$0xff] %vm1948_vm13, %v3020_v6 }
 0x323 PF: > { %s12_s9 = sadd.s32 1, %s3879_s9  }
 0x324   : > { %p9_p6 = scmp.ge.s32.totalorder %s12_s9, 4  }
 0x326   :  { %11 = sbr.rel (!%p9_p6) target bundleno = 1 (0x1), region = 116 }

</bundles_post_ra>
